<compile_context>
chip_gen: v6e
topology: v6e:2x2x1
jax: 0.10.0
libtpu: 0.0.40
codegen_flags: <defaults>
</compile_context>

<pallas_src>
import numpy as np
import jax
import jax.numpy as jnp
from jax.experimental import pallas as pl
from jax.experimental.pallas import tpu as pltpu

WIN_SIZE = 11
KERNEL_SIGMA = 1.5
K1 = 0.01
K2 = 0.03
DATA_RANGE = 1.0


def _gaussian_1d(size, sigma):
    dist = np.arange((1 - size) / 2.0, (1 + size) / 2.0, 1.0, dtype=np.float64)
    g = np.exp(-((dist / sigma) ** 2) / 2.0)
    return g / g.sum()


def _make_ssim_kernel(C, D, H, W):
    """Kernel for one batch sample: block = (C*D, H*W) logits/targets -> (8,128) SSIM-map sum."""
    Dout = D - WIN_SIZE + 1
    Hout = H - WIN_SIZE + 1
    Wout = W - WIN_SIZE + 1
    HW = H * W
    HoW = Hout * W
    L = HoW - WIN_SIZE + 1          # flattened lane width after the W blur
    g = tuple(float(v) for v in _gaussian_1d(WIN_SIZE, KERNEL_SIGMA))
    c1 = float((K1 * DATA_RANGE) ** 2)
    c2 = float((K2 * DATA_RANGE) ** 2)

    def kernel(pred_ref, targ_ref, out_ref):
        x = jax.nn.sigmoid(pred_ref[...].astype(jnp.float32))   # (C*D, H*W) sigmoid on logits
        y = targ_ref[...].astype(jnp.float32)                   # (C*D, H*W)

        # Stack the five blur operands along the sublane axis -> one pass of each blur.
        v = jnp.concatenate([x, y, x * x, y * y, x * y], axis=0)   # (5*C*D, H*W)
        v = v.reshape(5 * C, D, HW)                                # free leading-dim split

        # ---- separable 11-tap "valid" Gaussian blur, all VPU shifted-adds ----
        # D blur (sublane axis of the (D, H*W) trailing tile)
        vd = g[0] * v[:, 0:Dout, :]
        for i in range(1, WIN_SIZE):
            vd = vd + g[i] * v[:, i:i + Dout, :]                   # (5C, Dout, H*W)

        # H blur (lane axis; H-shift == lane shift by i*W in the flattened H*W)
        vh = g[0] * vd[:, :, 0:HoW]
        for i in range(1, WIN_SIZE):
            vh = vh + g[i] * vd[:, :, i * W:i * W + HoW]           # (5C, Dout, Hout*W)

        # W blur (lane axis, unit shifts; only columns with (col % W) < Wout are valid)
        vw = g[0] * vh[:, :, 0:L]
        for i in range(1, WIN_SIZE):
            vw = vw + g[i] * vh[:, :, i:i + L]                     # (5C, Dout, L)

        mu_x = vw[0 * C:1 * C]                                     # (C, Dout, L)
        mu_y = vw[1 * C:2 * C]
        mu_xx = vw[2 * C:3 * C]
        mu_yy = vw[3 * C:4 * C]
        mu_xy = vw[4 * C:5 * C]

        sig_x = mu_xx - mu_x * mu_x
        sig_y = mu_yy - mu_y * mu_y
        sig_xy = mu_xy - mu_x * mu_y
        num = (2.0 * mu_x * mu_y + c1) * (2.0 * sig_xy + c2)
        den = (mu_x * mu_x + mu_y * mu_y + c1) * (sig_x + sig_y + c2)
        ssim = num / den                                           # (C, Dout, L)

        # Sum only the valid columns (col = j*W + w_out, w_out < Wout); garbage columns are
        # finite (den >= c1*c2 > 0) and simply excluded.
        acc = ssim[:, :, 0:Wout]
        for j in range(1, Hout):
            acc = acc + ssim[:, :, j * W:j * W + Wout]             # (C, Dout, Wout)
        plane = jnp.sum(acc, axis=0)                               # (Dout, Wout) - VPU adds
        s11 = jnp.sum(plane, keepdims=True)                        # (1, 1) - single small XLU reduce
        out_ref[...] = jnp.broadcast_to(s11, out_ref.shape).astype(out_ref.dtype)

    return kernel


@jax.jit
def ssim_loss(predicted, target):
    """predicted, target: (N, C, D, H, W). Returns scalar mean SSIM loss."""
    N, C, D, H, W = predicted.shape
    assert min(D, H, W) >= WIN_SIZE, "spatial dims must be >= win_size (11)"
    Dout, Hout, Wout = D - WIN_SIZE + 1, H - WIN_SIZE + 1, W - WIN_SIZE + 1
    HW = H * W

    # Free host-side reshapes (contiguous) -> lane-dense (C*D, H*W) blocks; cast in-kernel.
    p = predicted.reshape(N, C * D, HW)
    t = target.reshape(N, C * D, HW)

    kernel = _make_ssim_kernel(C, D, H, W)

    L = Hout * W - WIN_SIZE + 1
    blur_flops = 2 * WIN_SIZE * 5 * C * (Dout * HW + Dout * Hout * W + Dout * L)
    cost = pl.CostEstimate(
        flops=int(N * (3 * C * D * HW + blur_flops + 20 * C * Dout * L)),
        transcendentals=int(N * C * D * HW),                       # sigmoid exp
        bytes_accessed=int(2 * N * C * D * HW * predicted.dtype.itemsize + N * 8 * 128 * 4),
    )

    partial = pl.pallas_call(
        kernel,
        out_shape=jax.ShapeDtypeStruct((N, 8, 128), jnp.float32),
        grid_spec=pltpu.PrefetchScalarGridSpec(
            num_scalar_prefetch=0,
            grid=(N,),
            in_specs=[
                pl.BlockSpec((None, C * D, HW), lambda n: (n, 0, 0)),
                pl.BlockSpec((None, C * D, HW), lambda n: (n, 0, 0)),
            ],
            out_specs=pl.BlockSpec((None, 8, 128), lambda n: (n, 0, 0)),
        ),
        compiler_params=pltpu.CompilerParams(
            dimension_semantics=("parallel",),
            vmem_limit_bytes=32 * 1024 * 1024,
        ),
        cost_estimate=cost,
    )(p, t)

    n_valid = jnp.float32(C * Dout * Hout * Wout)
    ssim_per_item = partial[:, 0, 0] / n_valid                     # mean SSIM per batch element
    return jnp.mean(1.0 - ssim_per_item)


def ssim_loss_ref(predicted, target):
    """Independent float64 numpy reference mirroring MONAI SSIMLoss(spatial_dims=3)."""
    p = np.asarray(predicted, dtype=np.float64)
    t = np.asarray(target, dtype=np.float64)
    x = 1.0 / (1.0 + np.exp(-p))        # module applies sigmoid to predicted
    y = t
    g = _gaussian_1d(WIN_SIZE, KERNEL_SIGMA)

    def blur(v):
        out = v
        for axis in (2, 3, 4):
            k = g.shape[0]
            lout = out.shape[axis] - k + 1
            acc = np.zeros(out.shape[:axis] + (lout,) + out.shape[axis + 1:], dtype=np.float64)
            for i in range(k):
                sl = [slice(None)] * out.ndim
                sl[axis] = slice(i, i + lout)
                acc += g[i] * out[tuple(sl)]
            out = acc
        return out

    mu_x, mu_y = blur(x), blur(y)
    mu_xx, mu_yy, mu_xy = blur(x * x), blur(y * y), blur(x * y)
    c1 = (K1 * DATA_RANGE) ** 2
    c2 = (K2 * DATA_RANGE) ** 2
    sx = mu_xx - mu_x * mu_x
    sy = mu_yy - mu_y * mu_y
    sxy = mu_xy - mu_x * mu_y
    ssim = ((2 * mu_x * mu_y + c1) * (2 * sxy + c2)) / ((mu_x ** 2 + mu_y ** 2 + c1) * (sx + sy + c2))
    n = ssim.shape[0]
    ssim_per_batch = ssim.reshape(n, -1).mean(axis=1)
    return float(np.mean(1.0 - ssim_per_batch))


if __name__ == "__main__":
    key = jax.random.PRNGKey(0)
    k_pred, k_targ = jax.random.split(key)

    N, C, D, H, W = 2, 4, 16, 16, 16
    predicted = jax.random.normal(k_pred, (N, C, D, H, W), dtype=jnp.float32)      # logits
    target = jax.random.uniform(k_targ, (N, C, D, H, W), dtype=jnp.float32)        # in [0, 1]

    loss = jax.block_until_ready(ssim_loss(predicted, target))
    ref = ssim_loss_ref(np.asarray(predicted), np.asarray(target))
    assert abs(float(loss) - ref) < 2e-4, (float(loss), ref)

    print("KERNEL_OK")
</pallas_src>

<mosaic_0001>
module attributes {stable_mosaic.version = 11 : i64} {
  func.func @kernel(%arg0: i32, %arg1: memref<1x64x256xf32, #tpu.memory_space<vmem>>, %arg2: memref<1x64x256xf32, #tpu.memory_space<vmem>>, %arg3: memref<1x8x128xf32, #tpu.memory_space<vmem>>) attributes {dimension_semantics = [#tpu.dimension_semantics<parallel>], iteration_bounds = array<i64: 2>, scalar_prefetch = 0 : i64, scratch_operands = 0 : i64, tpu.core_type = #tpu.core_type<tc>, window_params = [{transform_indices = @transform_0, window_bounds = array<i64: 1, 64, 256>}, {transform_indices = @transform_1, window_bounds = array<i64: 1, 64, 256>}, {transform_indices = @transform_2, window_bounds = array<i64: 1, 8, 128>}]} {
    %c0 = arith.constant 0 : index
    %c0_0 = arith.constant 0 : index
    %c0_1 = arith.constant 0 : index
    %0 = vector.load %arg1[%c0, %c0_0, %c0_1] : memref<1x64x256xf32, #tpu.memory_space<vmem>>, vector<1x64x256xf32>
    %1 = vector.shape_cast %0 : vector<1x64x256xf32> to vector<64x256xf32>
    %2 = arith.negf %1 : vector<64x256xf32>
    %3 = math.exp %2 : vector<64x256xf32>
    %cst = arith.constant 1.000000e+00 : f32
    %4 = vector.broadcast %cst : f32 to vector<64x256xf32>
    %5 = arith.addf %4, %3 : vector<64x256xf32>
    %6 = arith.divf %4, %5 : vector<64x256xf32>
    %c0_2 = arith.constant 0 : index
    %c0_3 = arith.constant 0 : index
    %c0_4 = arith.constant 0 : index
    %7 = vector.load %arg2[%c0_2, %c0_3, %c0_4] : memref<1x64x256xf32, #tpu.memory_space<vmem>>, vector<1x64x256xf32>
    %8 = vector.shape_cast %7 : vector<1x64x256xf32> to vector<64x256xf32>
    %9 = arith.mulf %6, %6 : vector<64x256xf32>
    %10 = arith.mulf %8, %8 : vector<64x256xf32>
    %11 = arith.mulf %6, %8 : vector<64x256xf32>
    %12 = tpu.concatenate %6, %8, %9, %10, %11 in 0 : vector<64x256xf32>, vector<64x256xf32>, vector<64x256xf32>, vector<64x256xf32>, vector<64x256xf32> -> vector<320x256xf32>
    %13 = vector.shape_cast %12 : vector<320x256xf32> to vector<20x16x256xf32>
    %14 = vector.extract_strided_slice %13 {offsets = [0, 0, 0], sizes = [20, 6, 256], strides = [1, 1, 1]} : vector<20x16x256xf32> to vector<20x6x256xf32>
    %cst_5 = arith.constant 0.00102838012 : f32
    %15 = vector.broadcast %cst_5 : f32 to vector<20x6x256xf32>
    %16 = arith.mulf %15, %14 : vector<20x6x256xf32>
    %17 = vector.extract_strided_slice %13 {offsets = [0, 1, 0], sizes = [20, 6, 256], strides = [1, 1, 1]} : vector<20x16x256xf32> to vector<20x6x256xf32>
    %cst_6 = arith.constant 0.00759875821 : f32
    %18 = vector.broadcast %cst_6 : f32 to vector<20x6x256xf32>
    %19 = arith.mulf %18, %17 : vector<20x6x256xf32>
    %20 = arith.addf %16, %19 : vector<20x6x256xf32>
    %21 = vector.extract_strided_slice %13 {offsets = [0, 2, 0], sizes = [20, 6, 256], strides = [1, 1, 1]} : vector<20x16x256xf32> to vector<20x6x256xf32>
    %cst_7 = arith.constant 0.0360007733 : f32
    %22 = vector.broadcast %cst_7 : f32 to vector<20x6x256xf32>
    %23 = arith.mulf %22, %21 : vector<20x6x256xf32>
    %24 = arith.addf %20, %23 : vector<20x6x256xf32>
    %25 = vector.extract_strided_slice %13 {offsets = [0, 3, 0], sizes = [20, 6, 256], strides = [1, 1, 1]} : vector<20x16x256xf32> to vector<20x6x256xf32>
    %cst_8 = arith.constant 0.109360687 : f32
    %26 = vector.broadcast %cst_8 : f32 to vector<20x6x256xf32>
    %27 = arith.mulf %26, %25 : vector<20x6x256xf32>
    %28 = arith.addf %24, %27 : vector<20x6x256xf32>
    %29 = vector.extract_strided_slice %13 {offsets = [0, 4, 0], sizes = [20, 6, 256], strides = [1, 1, 1]} : vector<20x16x256xf32> to vector<20x6x256xf32>
    %cst_9 = arith.constant 0.213005543 : f32
    %30 = vector.broadcast %cst_9 : f32 to vector<20x6x256xf32>
    %31 = arith.mulf %30, %29 : vector<20x6x256xf32>
    %32 = arith.addf %28, %31 : vector<20x6x256xf32>
    %33 = vector.extract_strided_slice %13 {offsets = [0, 5, 0], sizes = [20, 6, 256], strides = [1, 1, 1]} : vector<20x16x256xf32> to vector<20x6x256xf32>
    %cst_10 = arith.constant 0.266011715 : f32
    %34 = vector.broadcast %cst_10 : f32 to vector<20x6x256xf32>
    %35 = arith.mulf %34, %33 : vector<20x6x256xf32>
    %36 = arith.addf %32, %35 : vector<20x6x256xf32>
    %37 = vector.extract_strided_slice %13 {offsets = [0, 6, 0], sizes = [20, 6, 256], strides = [1, 1, 1]} : vector<20x16x256xf32> to vector<20x6x256xf32>
    %cst_11 = arith.constant 0.213005543 : f32
    %38 = vector.broadcast %cst_11 : f32 to vector<20x6x256xf32>
    %39 = arith.mulf %38, %37 : vector<20x6x256xf32>
    %40 = arith.addf %36, %39 : vector<20x6x256xf32>
    %41 = vector.extract_strided_slice %13 {offsets = [0, 7, 0], sizes = [20, 6, 256], strides = [1, 1, 1]} : vector<20x16x256xf32> to vector<20x6x256xf32>
    %cst_12 = arith.constant 0.109360687 : f32
    %42 = vector.broadcast %cst_12 : f32 to vector<20x6x256xf32>
    %43 = arith.mulf %42, %41 : vector<20x6x256xf32>
    %44 = arith.addf %40, %43 : vector<20x6x256xf32>
    %45 = vector.extract_strided_slice %13 {offsets = [0, 8, 0], sizes = [20, 6, 256], strides = [1, 1, 1]} : vector<20x16x256xf32> to vector<20x6x256xf32>
    %cst_13 = arith.constant 0.0360007733 : f32
    %46 = vector.broadcast %cst_13 : f32 to vector<20x6x256xf32>
    %47 = arith.mulf %46, %45 : vector<20x6x256xf32>
    %48 = arith.addf %44, %47 : vector<20x6x256xf32>
    %49 = vector.extract_strided_slice %13 {offsets = [0, 9, 0], sizes = [20, 6, 256], strides = [1, 1, 1]} : vector<20x16x256xf32> to vector<20x6x256xf32>
    %cst_14 = arith.constant 0.00759875821 : f32
    %50 = vector.broadcast %cst_14 : f32 to vector<20x6x256xf32>
    %51 = arith.mulf %50, %49 : vector<20x6x256xf32>
    %52 = arith.addf %48, %51 : vector<20x6x256xf32>
    %53 = vector.extract_strided_slice %13 {offsets = [0, 10, 0], sizes = [20, 6, 256], strides = [1, 1, 1]} : vector<20x16x256xf32> to vector<20x6x256xf32>
    %cst_15 = arith.constant 0.00102838012 : f32
    %54 = vector.broadcast %cst_15 : f32 to vector<20x6x256xf32>
    %55 = arith.mulf %54, %53 : vector<20x6x256xf32>
    %56 = arith.addf %52, %55 : vector<20x6x256xf32>
    %57 = vector.extract_strided_slice %56 {offsets = [0, 0, 0], sizes = [20, 6, 96], strides = [1, 1, 1]} : vector<20x6x256xf32> to vector<20x6x96xf32>
    %cst_16 = arith.constant 0.00102838012 : f32
    %58 = vector.broadcast %cst_16 : f32 to vector<20x6x96xf32>
    %59 = arith.mulf %58, %57 : vector<20x6x96xf32>
    %60 = vector.extract_strided_slice %56 {offsets = [0, 0, 16], sizes = [20, 6, 96], strides = [1, 1, 1]} : vector<20x6x256xf32> to vector<20x6x96xf32>
    %cst_17 = arith.constant 0.00759875821 : f32
    %61 = vector.broadcast %cst_17 : f32 to vector<20x6x96xf32>
    %62 = arith.mulf %61, %60 : vector<20x6x96xf32>
    %63 = arith.addf %59, %62 : vector<20x6x96xf32>
    %64 = vector.extract_strided_slice %56 {offsets = [0, 0, 32], sizes = [20, 6, 96], strides = [1, 1, 1]} : vector<20x6x256xf32> to vector<20x6x96xf32>
    %cst_18 = arith.constant 0.0360007733 : f32
    %65 = vector.broadcast %cst_18 : f32 to vector<20x6x96xf32>
    %66 = arith.mulf %65, %64 : vector<20x6x96xf32>
    %67 = arith.addf %63, %66 : vector<20x6x96xf32>
    %68 = vector.extract_strided_slice %56 {offsets = [0, 0, 48], sizes = [20, 6, 96], strides = [1, 1, 1]} : vector<20x6x256xf32> to vector<20x6x96xf32>
    %cst_19 = arith.constant 0.109360687 : f32
    %69 = vector.broadcast %cst_19 : f32 to vector<20x6x96xf32>
    %70 = arith.mulf %69, %68 : vector<20x6x96xf32>
    %71 = arith.addf %67, %70 : vector<20x6x96xf32>
    %72 = vector.extract_strided_slice %56 {offsets = [0, 0, 64], sizes = [20, 6, 96], strides = [1, 1, 1]} : vector<20x6x256xf32> to vector<20x6x96xf32>
    %cst_20 = arith.constant 0.213005543 : f32
    %73 = vector.broadcast %cst_20 : f32 to vector<20x6x96xf32>
    %74 = arith.mulf %73, %72 : vector<20x6x96xf32>
    %75 = arith.addf %71, %74 : vector<20x6x96xf32>
    %76 = vector.extract_strided_slice %56 {offsets = [0, 0, 80], sizes = [20, 6, 96], strides = [1, 1, 1]} : vector<20x6x256xf32> to vector<20x6x96xf32>
    %cst_21 = arith.constant 0.266011715 : f32
    %77 = vector.broadcast %cst_21 : f32 to vector<20x6x96xf32>
    %78 = arith.mulf %77, %76 : vector<20x6x96xf32>
    %79 = arith.addf %75, %78 : vector<20x6x96xf32>
    %80 = vector.extract_strided_slice %56 {offsets = [0, 0, 96], sizes = [20, 6, 96], strides = [1, 1, 1]} : vector<20x6x256xf32> to vector<20x6x96xf32>
    %cst_22 = arith.constant 0.213005543 : f32
    %81 = vector.broadcast %cst_22 : f32 to vector<20x6x96xf32>
    %82 = arith.mulf %81, %80 : vector<20x6x96xf32>
    %83 = arith.addf %79, %82 : vector<20x6x96xf32>
    %84 = vector.extract_strided_slice %56 {offsets = [0, 0, 112], sizes = [20, 6, 96], strides = [1, 1, 1]} : vector<20x6x256xf32> to vector<20x6x96xf32>
    %cst_23 = arith.constant 0.109360687 : f32
    %85 = vector.broadcast %cst_23 : f32 to vector<20x6x96xf32>
    %86 = arith.mulf %85, %84 : vector<20x6x96xf32>
    %87 = arith.addf %83, %86 : vector<20x6x96xf32>
    %88 = vector.extract_strided_slice %56 {offsets = [0, 0, 128], sizes = [20, 6, 96], strides = [1, 1, 1]} : vector<20x6x256xf32> to vector<20x6x96xf32>
    %cst_24 = arith.constant 0.0360007733 : f32
    %89 = vector.broadcast %cst_24 : f32 to vector<20x6x96xf32>
    %90 = arith.mulf %89, %88 : vector<20x6x96xf32>
    %91 = arith.addf %87, %90 : vector<20x6x96xf32>
    %92 = vector.extract_strided_slice %56 {offsets = [0, 0, 144], sizes = [20, 6, 96], strides = [1, 1, 1]} : vector<20x6x256xf32> to vector<20x6x96xf32>
    %cst_25 = arith.constant 0.00759875821 : f32
    %93 = vector.broadcast %cst_25 : f32 to vector<20x6x96xf32>
    %94 = arith.mulf %93, %92 : vector<20x6x96xf32>
    %95 = arith.addf %91, %94 : vector<20x6x96xf32>
    %96 = vector.extract_strided_slice %56 {offsets = [0, 0, 160], sizes = [20, 6, 96], strides = [1, 1, 1]} : vector<20x6x256xf32> to vector<20x6x96xf32>
    %cst_26 = arith.constant 0.00102838012 : f32
    %97 = vector.broadcast %cst_26 : f32 to vector<20x6x96xf32>
    %98 = arith.mulf %97, %96 : vector<20x6x96xf32>
    %99 = arith.addf %95, %98 : vector<20x6x96xf32>
    %100 = vector.extract_strided_slice %99 {offsets = [0, 0, 0], sizes = [20, 6, 86], strides = [1, 1, 1]} : vector<20x6x96xf32> to vector<20x6x86xf32>
    %cst_27 = arith.constant 0.00102838012 : f32
    %101 = vector.broadcast %cst_27 : f32 to vector<20x6x86xf32>
    %102 = arith.mulf %101, %100 : vector<20x6x86xf32>
    %103 = vector.extract_strided_slice %99 {offsets = [0, 0, 1], sizes = [20, 6, 86], strides = [1, 1, 1]} : vector<20x6x96xf32> to vector<20x6x86xf32>
    %cst_28 = arith.constant 0.00759875821 : f32
    %104 = vector.broadcast %cst_28 : f32 to vector<20x6x86xf32>
    %105 = arith.mulf %104, %103 : vector<20x6x86xf32>
    %106 = arith.addf %102, %105 : vector<20x6x86xf32>
    %107 = vector.extract_strided_slice %99 {offsets = [0, 0, 2], sizes = [20, 6, 86], strides = [1, 1, 1]} : vector<20x6x96xf32> to vector<20x6x86xf32>
    %cst_29 = arith.constant 0.0360007733 : f32
    %108 = vector.broadcast %cst_29 : f32 to vector<20x6x86xf32>
    %109 = arith.mulf %108, %107 : vector<20x6x86xf32>
    %110 = arith.addf %106, %109 : vector<20x6x86xf32>
    %111 = vector.extract_strided_slice %99 {offsets = [0, 0, 3], sizes = [20, 6, 86], strides = [1, 1, 1]} : vector<20x6x96xf32> to vector<20x6x86xf32>
    %cst_30 = arith.constant 0.109360687 : f32
    %112 = vector.broadcast %cst_30 : f32 to vector<20x6x86xf32>
    %113 = arith.mulf %112, %111 : vector<20x6x86xf32>
    %114 = arith.addf %110, %113 : vector<20x6x86xf32>
    %115 = vector.extract_strided_slice %99 {offsets = [0, 0, 4], sizes = [20, 6, 86], strides = [1, 1, 1]} : vector<20x6x96xf32> to vector<20x6x86xf32>
    %cst_31 = arith.constant 0.213005543 : f32
    %116 = vector.broadcast %cst_31 : f32 to vector<20x6x86xf32>
    %117 = arith.mulf %116, %115 : vector<20x6x86xf32>
    %118 = arith.addf %114, %117 : vector<20x6x86xf32>
    %119 = vector.extract_strided_slice %99 {offsets = [0, 0, 5], sizes = [20, 6, 86], strides = [1, 1, 1]} : vector<20x6x96xf32> to vector<20x6x86xf32>
    %cst_32 = arith.constant 0.266011715 : f32
    %120 = vector.broadcast %cst_32 : f32 to vector<20x6x86xf32>
    %121 = arith.mulf %120, %119 : vector<20x6x86xf32>
    %122 = arith.addf %118, %121 : vector<20x6x86xf32>
    %123 = vector.extract_strided_slice %99 {offsets = [0, 0, 6], sizes = [20, 6, 86], strides = [1, 1, 1]} : vector<20x6x96xf32> to vector<20x6x86xf32>
    %cst_33 = arith.constant 0.213005543 : f32
    %124 = vector.broadcast %cst_33 : f32 to vector<20x6x86xf32>
    %125 = arith.mulf %124, %123 : vector<20x6x86xf32>
    %126 = arith.addf %122, %125 : vector<20x6x86xf32>
    %127 = vector.extract_strided_slice %99 {offsets = [0, 0, 7], sizes = [20, 6, 86], strides = [1, 1, 1]} : vector<20x6x96xf32> to vector<20x6x86xf32>
    %cst_34 = arith.constant 0.109360687 : f32
    %128 = vector.broadcast %cst_34 : f32 to vector<20x6x86xf32>
    %129 = arith.mulf %128, %127 : vector<20x6x86xf32>
    %130 = arith.addf %126, %129 : vector<20x6x86xf32>
    %131 = vector.extract_strided_slice %99 {offsets = [0, 0, 8], sizes = [20, 6, 86], strides = [1, 1, 1]} : vector<20x6x96xf32> to vector<20x6x86xf32>
    %cst_35 = arith.constant 0.0360007733 : f32
    %132 = vector.broadcast %cst_35 : f32 to vector<20x6x86xf32>
    %133 = arith.mulf %132, %131 : vector<20x6x86xf32>
    %134 = arith.addf %130, %133 : vector<20x6x86xf32>
    %135 = vector.extract_strided_slice %99 {offsets = [0, 0, 9], sizes = [20, 6, 86], strides = [1, 1, 1]} : vector<20x6x96xf32> to vector<20x6x86xf32>
    %cst_36 = arith.constant 0.00759875821 : f32
    %136 = vector.broadcast %cst_36 : f32 to vector<20x6x86xf32>
    %137 = arith.mulf %136, %135 : vector<20x6x86xf32>
    %138 = arith.addf %134, %137 : vector<20x6x86xf32>
    %139 = vector.extract_strided_slice %99 {offsets = [0, 0, 10], sizes = [20, 6, 86], strides = [1, 1, 1]} : vector<20x6x96xf32> to vector<20x6x86xf32>
    %cst_37 = arith.constant 0.00102838012 : f32
    %140 = vector.broadcast %cst_37 : f32 to vector<20x6x86xf32>
    %141 = arith.mulf %140, %139 : vector<20x6x86xf32>
    %142 = arith.addf %138, %141 : vector<20x6x86xf32>
    %143 = vector.extract_strided_slice %142 {offsets = [0, 0, 0], sizes = [4, 6, 86], strides = [1, 1, 1]} : vector<20x6x86xf32> to vector<4x6x86xf32>
    %144 = vector.extract_strided_slice %142 {offsets = [4, 0, 0], sizes = [4, 6, 86], strides = [1, 1, 1]} : vector<20x6x86xf32> to vector<4x6x86xf32>
    %145 = vector.extract_strided_slice %142 {offsets = [8, 0, 0], sizes = [4, 6, 86], strides = [1, 1, 1]} : vector<20x6x86xf32> to vector<4x6x86xf32>
    %146 = vector.extract_strided_slice %142 {offsets = [12, 0, 0], sizes = [4, 6, 86], strides = [1, 1, 1]} : vector<20x6x86xf32> to vector<4x6x86xf32>
    %147 = vector.extract_strided_slice %142 {offsets = [16, 0, 0], sizes = [4, 6, 86], strides = [1, 1, 1]} : vector<20x6x86xf32> to vector<4x6x86xf32>
    %148 = arith.mulf %143, %143 : vector<4x6x86xf32>
    %149 = arith.subf %145, %148 : vector<4x6x86xf32>
    %150 = arith.mulf %144, %144 : vector<4x6x86xf32>
    %151 = arith.subf %146, %150 : vector<4x6x86xf32>
    %152 = arith.mulf %143, %144 : vector<4x6x86xf32>
    %153 = arith.subf %147, %152 : vector<4x6x86xf32>
    %cst_38 = arith.constant 2.000000e+00 : f32
    %154 = vector.broadcast %cst_38 : f32 to vector<4x6x86xf32>
    %155 = arith.mulf %154, %143 : vector<4x6x86xf32>
    %156 = arith.mulf %155, %144 : vector<4x6x86xf32>
    %cst_39 = arith.constant 9.99999974E-5 : f32
    %157 = vector.broadcast %cst_39 : f32 to vector<4x6x86xf32>
    %158 = arith.addf %156, %157 : vector<4x6x86xf32>
    %cst_40 = arith.constant 2.000000e+00 : f32
    %159 = vector.broadcast %cst_40 : f32 to vector<4x6x86xf32>
    %160 = arith.mulf %159, %153 : vector<4x6x86xf32>
    %cst_41 = arith.constant 8.99999984E-4 : f32
    %161 = vector.broadcast %cst_41 : f32 to vector<4x6x86xf32>
    %162 = arith.addf %160, %161 : vector<4x6x86xf32>
    %163 = arith.mulf %158, %162 : vector<4x6x86xf32>
    %164 = arith.mulf %143, %143 : vector<4x6x86xf32>
    %165 = arith.mulf %144, %144 : vector<4x6x86xf32>
    %166 = arith.addf %164, %165 : vector<4x6x86xf32>
    %cst_42 = arith.constant 9.99999974E-5 : f32
    %167 = vector.broadcast %cst_42 : f32 to vector<4x6x86xf32>
    %168 = arith.addf %166, %167 : vector<4x6x86xf32>
    %169 = arith.addf %149, %151 : vector<4x6x86xf32>
    %cst_43 = arith.constant 8.99999984E-4 : f32
    %170 = vector.broadcast %cst_43 : f32 to vector<4x6x86xf32>
    %171 = arith.addf %169, %170 : vector<4x6x86xf32>
    %172 = arith.mulf %168, %171 : vector<4x6x86xf32>
    %173 = arith.divf %163, %172 : vector<4x6x86xf32>
    %174 = vector.extract_strided_slice %173 {offsets = [0, 0, 0], sizes = [4, 6, 6], strides = [1, 1, 1]} : vector<4x6x86xf32> to vector<4x6x6xf32>
    %175 = vector.extract_strided_slice %173 {offsets = [0, 0, 16], sizes = [4, 6, 6], strides = [1, 1, 1]} : vector<4x6x86xf32> to vector<4x6x6xf32>
    %176 = arith.addf %174, %175 : vector<4x6x6xf32>
    %177 = vector.extract_strided_slice %173 {offsets = [0, 0, 32], sizes = [4, 6, 6], strides = [1, 1, 1]} : vector<4x6x86xf32> to vector<4x6x6xf32>
    %178 = arith.addf %176, %177 : vector<4x6x6xf32>
    %179 = vector.extract_strided_slice %173 {offsets = [0, 0, 48], sizes = [4, 6, 6], strides = [1, 1, 1]} : vector<4x6x86xf32> to vector<4x6x6xf32>
    %180 = arith.addf %178, %179 : vector<4x6x6xf32>
    %181 = vector.extract_strided_slice %173 {offsets = [0, 0, 64], sizes = [4, 6, 6], strides = [1, 1, 1]} : vector<4x6x86xf32> to vector<4x6x6xf32>
    %182 = arith.addf %180, %181 : vector<4x6x6xf32>
    %183 = vector.extract_strided_slice %173 {offsets = [0, 0, 80], sizes = [4, 6, 6], strides = [1, 1, 1]} : vector<4x6x86xf32> to vector<4x6x6xf32>
    %184 = arith.addf %182, %183 : vector<4x6x6xf32>
    %cst_44 = arith.constant dense<0.000000e+00> : vector<6x6xf32>
    %185 = vector.multi_reduction <add>, %184, %cst_44 [0] : vector<4x6x6xf32> to vector<6x6xf32>
    %186 = vector.shape_cast %185 : vector<6x6xf32> to vector<1x6x6xf32>
    %cst_45 = arith.constant dense<0.000000e+00> : vector<1xf32>
    %187 = vector.multi_reduction <add>, %186, %cst_45 [1, 2] : vector<1x6x6xf32> to vector<1xf32>
    %188 = vector.shape_cast %187 : vector<1xf32> to vector<1x1x1xf32>
    %189 = vector.extract %188[0, 0, 0] : f32 from vector<1x1x1xf32>
    %190 = vector.broadcast %189 : f32 to vector<1x1xf32>
    %191 = vector.shape_cast %190 : vector<1x1xf32> to vector<1x1xf32>
    %192 = vector.broadcast %191 : vector<1x1xf32> to vector<8x128xf32>
    %c0_46 = arith.constant 0 : index
    %c0_47 = arith.constant 0 : index
    %c0_48 = arith.constant 0 : index
    %193 = vector.load %arg3[%c0_46, %c0_47, %c0_48] : memref<1x8x128xf32, #tpu.memory_space<vmem>>, vector<1x8x128xf32>
    %194 = vector.shape_cast %193 : vector<1x8x128xf32> to vector<8x128xf32>
    %195 = vector.shape_cast %192 : vector<8x128xf32> to vector<1x8x128xf32>
    tpu.vector_store %arg3[%c0_46, %c0_47, %c0_48], %195 {strides = array<i32>} : memref<1x8x128xf32, #tpu.memory_space<vmem>>, vector<1x8x128xf32>,
    return
  }
  func.func @transform_0(%arg0: i32) -> (i32, i32, i32) {
    %c0_i32 = arith.constant 0 : i32
    %c0_i32_0 = arith.constant 0 : i32
    %c0_i32_1 = arith.constant 0 : i32
    return %arg0, %c0_i32, %c0_i32_0 : i32, i32, i32
  }
  func.func @transform_1(%arg0: i32) -> (i32, i32, i32) {
    %c0_i32 = arith.constant 0 : i32
    %c0_i32_0 = arith.constant 0 : i32
    %c0_i32_1 = arith.constant 0 : i32
    return %arg0, %c0_i32, %c0_i32_0 : i32, i32, i32
  }
  func.func @transform_2(%arg0: i32) -> (i32, i32, i32) {
    %c0_i32 = arith.constant 0 : i32
    %c0_i32_0 = arith.constant 0 : i32
    %c0_i32_1 = arith.constant 0 : i32
    return %arg0, %c0_i32, %c0_i32_0 : i32, i32, i32
  }
}

</mosaic_0001>

<bundles_post_ra>
// kernel: ssim_loss.1
= control target key start
LH: loop header
LB: loop body
LE: loop exit
PB: predicated region body
PF: predicated region fallthrough
CT: control target
= control target key end

     0   :  { %s5698_s9 = smov 0   ;;  %s9596_s0 = inlined_call_operand.vmem [shape: f32[2,64,256], index: 0, kind: input, shape index: {}]   ;;  %s9597_s1 = inlined_call_operand.vmem [shape: f32[2,64,256], index: 1, kind: input, shape index: {}]   ;;  %s9598_s2 = inlined_call_operand.vmem [shape: f32[2,8,128], index: 2, kind: output, shape index: {}]  }
   0x1 LB: > { %s5513_s10 = sadd.s32 4294967295, %s5664_s9   ;;  %p5517_p0 = scmp.ge.s32.totalorder %s5664_s9, 1  ;;  %s5664_s9 = sphi %s5698_s9, %s12_s9  }
   0x2   : > { %p122_p1 = scmp.lt.s32.totalorder %s5664_s9, 3 }
   0x4   : > { %p123_p2 = pnand %p5517_p0, %p122_p1 }
   0x6   : > { %126 = sbr.rel (%p123_p2) target bundleno = 1856 (0x740), region = 28 }
   0xb   : > { %p148_p3 = scmp.lt.s32.totalorder %s5513_s10, 1  ;;  %vm938_vm0 = vcmask 1044480   ;;  %vm1299_vm1 = vcmask 1043456   ;;  %vm1660_vm2 = vcmask 1042432   ;;  %vm1861_vm3 = vcmask 1041408   ;;  %s5666_s18 = smov 112  }
   0xc   : > { %vm2062_vm4 = vcmask 1040384   ;;  %s5667_s19 = smov 96   ;;  %s5668_s20 = smov 80   ;;  %vm3163_vm5 = vcmask 654336   ;;  %vm3384_vm6 = vcmask 523264   ;;  %vm3605_vm7 = vcmask 392192  }
   0xd   : > { %s10673_s10 = smov (!%p148_p3, %s5513_s10), 1  ;;  %s5669_s21 = smov 64   ;;  %vm3746_vm8 = vcmask 261120   ;;  %vm3887_vm9 = vcmask 130048   ;;  %vm5428_vm10 = vcmask 46080  }
   0xe   : > { %s5541_s11 = sshll.u32 %s10673_s10, 7  ;;  %s5670_s22 = smov 48  }
   0xf   : > { %s5712_s14 = scalar_lea.vmem %s9597_s1, %s5541_s11  ;;  %s5731_s17 = scalar_lea.vmem %s9596_s0, %s5541_s11 }
  0x10   : > { %v5715_v0 = vld [vmem:[%s5712_s14] sm:$0xff]  ;;  %v5718_v1 = vld [vmem:[%s5712_s14 + $0x10] sm:$0xff]  ;;  %v163_v25 = vld [vmem:[%s5731_s17 + $0x8] sm:$0xff]  ;;  %s5671_s23 = smov 32   ;;  %s5672_s24 = smov 16  }
  0x11   : > { %v346_v2 = vmul.f32 0.0010283801, %v5715_v0  ;;  %v386_v3 = vmul.f32 0.007598758, %v5715_v0  ;;  %v586_v4 = vmul.f32 0.036000773, %v5715_v0 }
  0x12   : > { %v794_v5 = vmul.f32 0.10936069, %v5715_v0  ;;  %v796_v6 = vmul.f32 0.10936069, %v5718_v1  ;;  %v1155_v7 = vmul.f32 0.21300554, %v5715_v0 }
  0x13   : > { %v466_v8 = vrot.slane %v386_v3, 1  ;;  %v666_v9 = vrot.slane %v586_v4, 2  ;;  %v1157_v10 = vmul.f32 0.21300554, %v5718_v1  ;;  %v1516_v11 = vmul.f32 0.26601171, %v5715_v0 }
  0x14   : > { %v963_v12 = vrot.slane %v794_v5, 3  ;;  %v964_v13 = vrot.slane %v796_v6, 3  ;;  %v1324_v14 = vrot.slane %v1155_v7, 4  ;;  %v1518_v15 = vmul.f32 0.26601171, %v5718_v1  ;;  %v162_v23 = vld [vmem:[%s5731_s17] sm:$0xff] }
  0x15   : > { %v546_v16 = vadd.f32 %v466_v8, %v346_v2  ;;  %v1325_v17 = vrot.slane %v1157_v10, 4  ;;  %v1685_v18 = vrot.slane %v1516_v11, 5  ;;  %v1886_v21 = vrot.slane %v1155_v7, 6  ;;  %v164_v26 = vld [vmem:[%s5731_s17 + $0x10] sm:$0xff]  ;;  %v165_v30 = vld [vmem:[%s5731_s17 + $0x18] sm:$0xff]  ;;  %v166_v31 = vld [vmem:[%s5731_s17 + $0x20] sm:$0xff] }
  0x16   : > { %v965_v19 = vsel %vm938_vm0, %v963_v12, %v964_v13  ;;  %v1686_v20 = vrot.slane %v1518_v15, 5  ;;  %v1887_v22 = vrot.slane %v1157_v10, 6  ;;  %v2087_v28 = vrot.slane %v794_v5, 7  ;;  %v167_v32 = vld [vmem:[%s5731_s17 + $0x28] sm:$0xff]  ;;  %v168_v39 = vld [vmem:[%s5731_s17 + $0x30] sm:$0xff]  ;;  %v169_v40 = vld [vmem:[%s5731_s17 + $0x38] sm:$0xff] }
  0x17   : > { %v746_v24 = vadd.f32 %v666_v9, %v546_v16  ;;  %v1326_v27 = vsel %vm1299_vm1, %v1324_v14, %v1325_v17  ;;  %v2088_v29 = vrot.slane %v796_v6, 7  ;;  %v2271_v34 = vmul.f32 0.036000773, %v5718_v1  ;;  %v170_v44 = vld [vmem:[%s5731_s17 + $0x40] sm:$0xff]  ;;  %v171_v45 = vld [vmem:[%s5731_s17 + $0x48] sm:$0xff]  ;;  %v172_v50 = vld [vmem:[%s5731_s17 + $0x50] sm:$0xff] }
  0x18   : > { %v2351_v35 = vmul.f32 0.007598758, %v5718_v1  ;;  %v5523_v36 = vmul.f32 -1.442695, %v162_v23  ;;  %v1687_v37 = vsel %vm1660_vm2, %v1685_v18, %v1686_v20  ;;  %v1888_v38 = vsel %vm1861_vm3, %v1886_v21, %v1887_v22  ;;  %v173_v51 = vld [vmem:[%s5731_s17 + $0x58] sm:$0xff]  ;;  %v174_v55 = vld [vmem:[%s5731_s17 + $0x60] sm:$0xff] }
  0x19   : > { %v1107_v33 = vadd.f32 %v965_v19, %v746_v24  ;;  %v5524_v41 = vmul.f32 -1.442695, %v163_v25  ;;  %v5525_v42 = vmul.f32 -1.442695, %v164_v26  ;;  %v5526_v46 = vmul.f32 -1.442695, %v165_v30 }
  0x1a   : > { %5570 = vpow2.f32 %v5523_v36  ;;  %v5527_v47 = vmul.f32 -1.442695, %v166_v31  ;;  %v2089_v48 = vsel %vm2062_vm4, %v2087_v28, %v2088_v29  ;;  %v2551_v49 = vmul.f32 0.0010283801, %v5718_v1  ;;  %v5756_v57 = vld [vmem:[%s5712_s14 + $0x20] sm:$0xff]  ;;  %v5759_v2 = vld [vmem:[%s5712_s14 + $0x30] sm:$0xff] }
  0x1b   : > { %v1468_v43 = vadd.f32 %v1326_v27, %v1107_v33  ;;  %5572 = vpow2.f32 %v5524_v41  ;;  %v5528_v52 = vmul.f32 -1.442695, %v167_v32  ;;  %v2431_v54 = vrot.slane %v2351_v35, 1  ;;  %v176_v7 = vld [vmem:[%s5731_s17 + $0x70] sm:$0xff]  ;;  %v175_v24 = vld [vmem:[%s5731_s17 + $0x68] sm:$0xff]  ;;  %v177_v29 = vld [vmem:[%s5731_s17 + $0x78] sm:$0xff] }
  0x1c   : > { %5574 = vpow2.f32 %v5525_v42  ;;  %v5529_v56 = vmul.f32 -1.442695, %v168_v39  ;;  %v5530_v58 = vmul.f32 -1.442695, %v169_v40  ;;  %v5531_v59 = vmul.f32 -1.442695, %v170_v44 }
  0x1d   : > { %v1829_v53 = vadd.f32 %v1687_v37, %v1468_v43  ;;  %5576 = vpow2.f32 %v5526_v46  ;;  %v5532_v60 = vmul.f32 -1.442695, %v171_v45  ;;  %v5533_v62 = vmul.f32 -1.442695, %v172_v50  ;;  %s5673_s25 = smov 127   ;;  %s5674_s26 = smov 126  }
  0x1e   : > { %5578 = vpow2.f32 %v5527_v47  ;;  %v5534_v63 = vmul.f32 -1.442695, %v173_v51  ;;  %v5535_v3 = vmul.f32 -1.442695, %v174_v55  ;;  %v348_v4 = vmul.f32 0.0010283801, %v5756_v57 }
  0x1f   : > { %v2030_v61 = vadd.f32 %v1888_v38, %v1829_v53  ;;  %5580 = vpow2.f32 %v5528_v52  ;;  %v388_v5 = vmul.f32 0.007598758, %v5756_v57  ;;  %v588_v8 = vmul.f32 0.036000773, %v5756_v57  ;;  %s5675_s27 = smov 125   ;;  %s5676_s28 = smov 124  }
  0x20   : > { %5582 = vpow2.f32 %v5529_v56  ;;  %v5766_v9 = vmul.f32 0.10936069, %v5756_v57  ;;  %v2631_v10 = vrot.slane %v2551_v49, 2  ;;  %v5769_v12 = vmul.f32 0.10936069, %v5759_v2  ;;  %s5677_s29 = smov 123  }
  0x21   : > { %v2231_v6 = vadd.f32 %v2089_v48, %v2030_v61  ;;  %v468_v11 = vrot.slane %v388_v5, 1  ;;  %v1159_v13 = vmul.f32 0.21300554, %v5756_v57  ;;  %5584 = vpow2.f32 %v5531_v59  ;;  %s5678_s30 = smov 122   ;;  %s5679_s3 = smov 121  }
  0x22   : > { %v668_v15 = vrot.slane %v588_v8, 2  ;;  %v969_v16 = vrot.slane %v5766_v9, 3  ;;  %v5537_v17 = vmul.f32 -1.442695, %v176_v7  ;;  %v970_v19 = vrot.slane %v5769_v12, 3  ;;  %s5680_s4 = smov 120  }
  0x23   : > { %v2311_v14 = vadd.f32 %v2271_v34, %v2231_v6  ;;  %v548_v18 = vadd.f32 %v468_v11, %v348_v4  ;;  %v1161_v20 = vmul.f32 0.21300554, %v5759_v2  ;;  %5586 = vpow2.f32 %v5533_v62  ;;  %s5681_s5 = smov 119   ;;  %s5682_s6 = smov 118  }
  0x24   : > { %v1330_v22 = vrot.slane %v1159_v13, 4  ;;  %v1520_v23 = vmul.f32 0.26601171, %v5756_v57  ;;  %5588 = vpow2.f32 %v5530_v58  ;;  %v971_v26 = vsel %vm938_vm0, %v969_v16, %v970_v19  ;;  %s5522_s7 = sshll.u32 %s10673_s10, 3 }
  0x25   : > { %v2511_v21 = vadd.f32 %v2431_v54, %v2311_v14  ;;  %v748_v25 = vadd.f32 %v668_v15, %v548_v18  ;;  %v1331_v27 = vrot.slane %v1161_v20, 4  ;;  %5590 = vpow2.f32 %v5535_v3  ;;  %v5798_v3 = vld [vmem:[%s5712_s14 + $0x40] sm:$0xff]  ;;  %s161_s12 = scalar_lea.vmem %s9598_s2, %s5522_s7 }
  0x26   : > { %v1522_v30 = vmul.f32 0.26601171, %v5759_v2  ;;  %v1691_v31 = vrot.slane %v1520_v23, 5  ;;  %5592 = vpow2.f32 %v5532_v60  ;;  %v1892_v35 = vrot.slane %v1159_v13, 6  ;;  %v5805_v13 = vld [vmem:[%s5712_s14 + $0x50] sm:$0xff] }
  0x27   : > { %v5778_v28 = vadd.f32 %v2631_v10, %v2511_v21  ;;  %v5571_v32 = vpop.eup %5570  ;;  %v1109_v33 = vadd.f32 %v971_v26, %v748_v25  ;;  %v1332_v34 = vsel %vm1299_vm1, %v1330_v22, %v1331_v27  ;;  %v5536_v38 = vmul.f32 -1.442695, %v175_v24 }
  0x28   : > { %v5573_v36 = vpop.eup %5572  ;;  %5594 = vpow2.f32 %v5537_v17  ;;  %v1692_v39 = vrot.slane %v1522_v30, 5  ;;  %v5538_v41 = vmul.f32 -1.442695, %v177_v29  ;;  %v1893_v43 = vrot.slane %v1161_v20, 6 }
  0x29   : > { %9756 = vst [vmem:[#allocation2_spill] sm:$0xff] %v5778_v28  ;;  %v2767_v37 = vmul.f32 0.007598758, %v5778_v28  ;;  %v5575_v40 = vpop.eup %5574  ;;  %v1470_v42 = vadd.f32 %v1332_v34, %v1109_v33  ;;  %v226_v45 = vadd.f32 1.0, %v5571_v32  ;;  %v2093_v47 = vrot.slane %v5766_v9, 7 }
  0x2a   : > { %v5577_v44 = vpop.eup %5576  ;;  %v1693_v46 = vsel %vm1660_vm2, %v1691_v31, %v1692_v39  ;;  %5596 = vpow2.f32 %v5534_v63  ;;  %v227_v49 = vadd.f32 1.0, %v5573_v36  ;;  %v1894_v51 = vsel %vm1861_vm3, %v1892_v35, %v1893_v43 }
  0x2b   : > { %2811 = vrot.lane.b32.xlu0 %v2767_v37, %s5666_s18  ;;  %v5579_v48 = vpop.eup %5578  ;;  %v1831_v50 = vadd.f32 %v1693_v46, %v1470_v42  ;;  %5598 = vpow2.f32 %v5536_v38  ;;  %v228_v53 = vadd.f32 1.0, %v5575_v40  ;;  %v2094_v54 = vrot.slane %v5769_v12, 7 }
  0x2c   : > { %v5581_v52 = vpop.eup %5580  ;;  %v5791_v55 = vmul.f32 %v5715_v0, %v5715_v0  ;;  %5600 = vpow2.f32 %v5538_v41  ;;  %v2273_v59 = vmul.f32 0.036000773, %v5759_v2  ;;  %v2353_v60 = vmul.f32 0.007598758, %v5759_v2 }
  0x2d   : > { %v5583_v56 = vpop.eup %5582  ;;  %v2032_v58 = vadd.f32 %v1894_v51, %v1831_v50  ;;  %v229_v61 = vadd.f32 1.0, %v5577_v44  ;;  %5602 = vrcp.f32 %v226_v45  ;;  %v2095_v62 = vsel %vm2062_vm4, %v2093_v47, %v2094_v54 }
  0x2e   : > { %v2553_v63 = vmul.f32 0.0010283801, %v5759_v2  ;;  %v5585_v4 = vpop.eup %5584  ;;  %v230_v5 = vadd.f32 1.0, %v5579_v48  ;;  %5604 = vrcp.f32 %v227_v49  ;;  %v2433_v6 = vrot.slane %v2353_v60, 1 }
  0x2f   : > { %v2233_v0 = vadd.f32 %v2095_v62, %v2032_v58  ;;  %v231_v7 = vadd.f32 1.0, %v5581_v52  ;;  %v232_v8 = vadd.f32 1.0, %v5583_v56  ;;  %5606 = vrcp.f32 %v228_v53  ;;  %v5834_v58 = vld [vmem:[%s5712_s14 + $0x60] sm:$0xff] }
  0x30   : > { %v5802_v9 = vmul.f32 %v5718_v1, %v5718_v1  ;;  %v5587_v10 = vpop.eup %5586  ;;  %v2633_v12 = vrot.slane %v2553_v63, 2  ;;  %v350_v14 = vmul.f32 0.0010283801, %v5798_v3  ;;  %v390_v15 = vmul.f32 0.007598758, %v5798_v3 }
  0x31   : > { %v2313_v11 = vadd.f32 %v2273_v59, %v2233_v0  ;;  %v5589_v16 = vpop.eup %5588  ;;  %v234_v17 = vadd.f32 1.0, %v5585_v4  ;;  %5608 = vrcp.f32 %v229_v61  ;;  %v590_v18 = vmul.f32 0.036000773, %v5798_v3 }
  0x32   : > { %v802_v19 = vmul.f32 0.10936069, %v5798_v3  ;;  %v5591_v20 = vpop.eup %5590  ;;  %v236_v21 = vadd.f32 1.0, %v5587_v10  ;;  %5610 = vrcp.f32 %v230_v5  ;;  %v470_v22 = vrot.slane %v390_v15, 1 }
  0x33   : > { %v2513_v1 = vadd.f32 %v2433_v6, %v2313_v11  ;;  %v5593_v23 = vpop.eup %5592  ;;  %v238_v24 = vadd.f32 1.0, %v5591_v20  ;;  %5612 = vrcp.f32 %v231_v7  ;;  %v670_v25 = vrot.slane %v590_v18, 2 }
  0x34   : > { %v804_v26 = vmul.f32 0.10936069, %v5805_v13  ;;  %v5812_v29 = vadd.f32 1.0, %v5589_v16  ;;  %5614 = vrcp.f32 %v232_v8  ;;  %v550_v31 = vadd.f32 %v470_v22, %v350_v14  ;;  %v5848_v8 = vld [vmem:[%s5712_s14 + $0x70] sm:$0xff] }
  0x35   : > { %v5595_v27 = vpop.eup %5594  ;;  %v5814_v30 = vadd.f32 %v2633_v12, %v2513_v1  ;;  %5616 = vrcp.f32 %v234_v17  ;;  %v975_v33 = vrot.slane %v802_v19, 3  ;;  %v5816_v35 = vadd.f32 1.0, %v5593_v23 }
  0x36   : > { %v240_v32 = vadd.f32 1.0, %v5595_v27  ;;  %v976_v34 = vrot.slane %v804_v26, 3  ;;  %5618 = vrcp.f32 %v236_v21  ;;  %v750_v37 = vadd.f32 %v670_v25, %v550_v31 }
  0x37   : > { %9757 = vst [vmem:[#allocation3_spill] sm:$0xff] %v5814_v30  ;;  %v2768_v36 = vmul.f32 0.007598758, %v5814_v30  ;;  %v5819_v38 = vpop.eup %5596  ;;  %5620 = vrcp.f32 %v238_v24  ;;  %v1163_v40 = vmul.f32 0.21300554, %v5798_v3  ;;  %v2099_v54 = vrot.slane %v802_v19, 7 }
  0x38   : > { %v977_v39 = vsel %vm938_vm0, %v975_v33, %v976_v34  ;;  %v1165_v41 = vmul.f32 0.21300554, %v5805_v13  ;;  %v5824_v42 = vpop.eup %5598  ;;  %5622 = vrcp.f32 %v240_v32  ;;  %v1524_v44 = vmul.f32 0.26601171, %v5798_v3 }
  0x39   : > { %2813 = vrot.lane.b32.xlu1 %v2768_v36, %s5666_s18  ;;  %v1111_v43 = vadd.f32 %v977_v39, %v750_v37  ;;  %v1526_v45 = vmul.f32 0.26601171, %v5805_v13  ;;  %v5829_v46 = vpop.eup %5600  ;;  %v1336_v47 = vrot.slane %v1163_v40, 4  ;;  %v1898_v49 = vrot.slane %v1163_v40, 6 }
  0x3a   : > { %v1337_v48 = vrot.slane %v1165_v41, 4  ;;  %v1899_v50 = vrot.slane %v1165_v41, 6  ;;  %v5831_v51 = vpop.eup %5602  ;;  %v1697_v52 = vrot.slane %v1524_v44, 5  ;;  %v2100_v56 = vrot.slane %v804_v26, 7 }
  0x3b   : > { %v1698_v53 = vrot.slane %v1526_v45, 5  ;;  %v5836_v59 = vpop.eup %5604  ;;  %v2275_v62 = vmul.f32 0.036000773, %v5805_v13  ;;  %v2355_v63 = vmul.f32 0.007598758, %v5805_v13  ;;  %v5854_v14 = vmul.f32 %v5756_v57, %v5756_v57 }
  0x3c   : > { %v1338_v60 = vsel %vm1299_vm1, %v1336_v47, %v1337_v48  ;;  %v1900_v61 = vsel %vm1861_vm3, %v1898_v49, %v1899_v50  ;;  %v5842_v4 = vpop.eup %5606  ;;  %v2101_v6 = vsel %vm2062_vm4, %v2099_v54, %v2100_v56  ;;  %v2555_v7 = vmul.f32 0.0010283801, %v5805_v13 }
  0x3d   : > { %v1472_v5 = vadd.f32 %v1338_v60, %v1111_v43  ;;  %v1699_v0 = vsel %vm1660_vm2, %v1697_v52, %v1698_v53  ;;  %v2435_v10 = vrot.slane %v2355_v63, 1  ;;  %v352_v11 = vmul.f32 0.0010283801, %v5834_v58 }
  0x3e   : > { %v392_v12 = vmul.f32 0.007598758, %v5834_v58  ;;  %v5856_v15 = vpop.eup %5608  ;;  %v2635_v17 = vrot.slane %v2555_v7, 2  ;;  %v592_v18 = vmul.f32 0.036000773, %v5834_v58  ;;  %v5866_v23 = vmul.f32 %v5759_v2, %v5759_v2 }
  0x3f   : > { %v1833_v16 = vadd.f32 %v1699_v0, %v1472_v5  ;;  %v806_v19 = vmul.f32 0.10936069, %v5834_v58  ;;  %v5860_v20 = vpop.eup %5610  ;;  %v808_v1 = vmul.f32 0.10936069, %v5848_v8  ;;  %v1167_v22 = vmul.f32 0.21300554, %v5834_v58 }
  0x40   : > { %v472_v21 = vrot.slane %v392_v12, 1  ;;  %v5868_v57 = vpop.eup %5612  ;;  %v672_v25 = vrot.slane %v592_v18, 2  ;;  %v1169_v27 = vmul.f32 0.21300554, %v5848_v8  ;;  %v1528_v36 = vmul.f32 0.26601171, %v5834_v58 }
  0x41   : > { %v2034_v24 = vadd.f32 %v1900_v61, %v1833_v16  ;;  %v981_v26 = vrot.slane %v806_v19, 3  ;;  %v5871_v31 = vpop.eup %5614  ;;  %v982_v33 = vrot.slane %v808_v1, 3  ;;  %v1342_v34 = vrot.slane %v1167_v22, 4 }
  0x42   : > { %v552_v32 = vadd.f32 %v472_v21, %v352_v11  ;;  %v5874_v37 = vpop.eup %5616  ;;  %v1343_v40 = vrot.slane %v1169_v27, 4  ;;  %v1530_v2 = vmul.f32 0.26601171, %v5848_v8  ;;  %v1904_v41 = vrot.slane %v1167_v22, 6 }
  0x43   : > { %v2235_v39 = vadd.f32 %v2101_v6, %v2034_v24  ;;  %v5877_v43 = vpop.eup %5618  ;;  %v983_v45 = vsel %vm938_vm0, %v981_v26, %v982_v33  ;;  %v1703_v47 = vrot.slane %v1528_v36, 5  ;;  %v1905_v48 = vrot.slane %v1169_v27, 6 }
  0x44   : > { %v752_v44 = vadd.f32 %v672_v25, %v552_v32  ;;  %v5880_v49 = vpop.eup %5620  ;;  %v1344_v52 = vsel %vm1299_vm1, %v1342_v34, %v1343_v40  ;;  %v1704_v53 = vrot.slane %v1530_v2, 5  ;;  %v2105_v54 = vrot.slane %v806_v19, 7 }
  0x45   : > { %v2315_v50 = vadd.f32 %v2275_v62, %v2235_v39  ;;  %v5883_v56 = vpop.eup %5622  ;;  %v1906_v61 = vsel %vm1861_vm3, %v1904_v41, %v1905_v48  ;;  %v2106_v63 = vrot.slane %v808_v1, 7  ;;  %v2277_v5 = vmul.f32 0.036000773, %v5848_v8 }
  0x46   : > { %v1113_v60 = vadd.f32 %v983_v45, %v752_v44  ;;  %v1705_v6 = vsel %vm1660_vm2, %v1703_v47, %v1704_v53  ;;  %v2357_v7 = vmul.f32 0.007598758, %v5848_v8  ;;  %v2557_v11 = vmul.f32 0.0010283801, %v5848_v8 }
  0x47   : > { %v2515_v0 = vadd.f32 %v2435_v10, %v2315_v50  ;;  %v2107_v12 = vsel %vm2062_vm4, %v2105_v54, %v2106_v63  ;;  %v2887_v16 = vmul.f32 0.036000773, %v5778_v28  ;;  %v5893_v18 = vmul.f32 0.036000773, %v5814_v30 }
  0x48   : > { %v1474_v62 = vadd.f32 %v1344_v52, %v1113_v60  ;;  %v2437_v21 = vrot.slane %v2357_v7, 1  ;;  %v2637_v1 = vrot.slane %v2557_v11, 2  ;;  %v362_v10 = vmul.f32 0.0010283801, %v5791_v55 }
  0x49   : > { %v5895_v19 = vadd.f32 %v2635_v17, %v2515_v0  ;;  %v402_v24 = vmul.f32 0.007598758, %v5791_v55  ;;  %v602_v25 = vmul.f32 0.036000773, %v5791_v55  ;;  %v826_v26 = vmul.f32 0.10936069, %v5791_v55 }
  0x4a   : > { %v1835_v22 = vadd.f32 %v1705_v6, %v1474_v62  ;;  %v828_v33 = vmul.f32 0.10936069, %v5802_v9  ;;  %v5906_v17 = vmul.f32 %v5798_v3, %v5798_v3  ;;  %v1187_v41 = vmul.f32 0.21300554, %v5791_v55 }
  0x4b   : > { %9758 = vst [vmem:[#allocation4_spill] sm:$0xff] %v5895_v19  ;;  %v2769_v27 = vmul.f32 0.007598758, %v5895_v19  ;;  %v2889_v32 = vmul.f32 0.036000773, %v5895_v19  ;;  %v482_v36 = vrot.slane %v402_v24, 1  ;;  %5624 = vrcp.f32 %v5812_v29 }
  0x4c   : > { %v2036_v34 = vadd.f32 %v1906_v61, %v1835_v22  ;;  %v682_v39 = vrot.slane %v602_v25, 2  ;;  %v1011_v40 = vrot.slane %v826_v26, 3  ;;  %v1012_v2 = vrot.slane %v828_v33, 3 }
  0x4d   : > { %2815 = vrot.lane.b32.xlu0 %v2769_v27, %s5666_s18  ;;  %v1189_v44 = vmul.f32 0.21300554, %v5802_v9  ;;  %v2135_v45 = vrot.slane %v826_v26, 7  ;;  %v562_v48 = vadd.f32 %v482_v36, %v362_v10  ;;  %v1548_v50 = vmul.f32 0.26601171, %v5791_v55 }
  0x4e   : > { %v2237_v47 = vadd.f32 %v2107_v12, %v2036_v34  ;;  %v1550_v52 = vmul.f32 0.26601171, %v5802_v9  ;;  %v1013_v3 = vsel %vm938_vm0, %v1011_v40, %v1012_v2  ;;  %v1372_v53 = vrot.slane %v1187_v41, 4 }
  0x4f   : > { %v1373_v54 = vrot.slane %v1189_v44, 4  ;;  %v1934_v60 = vrot.slane %v1187_v41, 6  ;;  %v762_v63 = vadd.f32 %v682_v39, %v562_v48  ;;  %v1733_v0 = vrot.slane %v1548_v50, 5 }
  0x50   : > { %v2317_v61 = vadd.f32 %v2277_v5, %v2237_v47  ;;  %v1734_v6 = vrot.slane %v1550_v52, 5  ;;  %v1935_v11 = vrot.slane %v1189_v44, 6  ;;  %v2136_v62 = vrot.slane %v828_v33, 7 }
  0x51   : > { %2931 = vrot.lane.b32.xlu0 %v2887_v16, %s5667_s19  ;;  %v1374_v7 = vsel %vm1299_vm1, %v1372_v53, %v1373_v54  ;;  %v2287_v55 = vmul.f32 0.036000773, %v5802_v9  ;;  %v1123_v10 = vadd.f32 %v1013_v3, %v762_v63  ;;  %v2367_v24 = vmul.f32 0.007598758, %v5802_v9 }
  0x52   : > { %v2517_v12 = vadd.f32 %v2437_v21, %v2317_v61  ;;  %v1735_v22 = vsel %vm1660_vm2, %v1733_v0, %v1734_v6  ;;  %v1936_v5 = vsel %vm1861_vm3, %v1934_v60, %v1935_v11  ;;  %v2137_v25 = vsel %vm2062_vm4, %v2135_v45, %v2136_v62 }
  0x53   : > { %v2567_v26 = vmul.f32 0.0010283801, %v5802_v9  ;;  %v364_v16 = vmul.f32 0.0010283801, %v5854_v14  ;;  %v1484_v34 = vadd.f32 %v1374_v7, %v1123_v10  ;;  %v2447_v33 = vrot.slane %v2367_v24, 1 }
  0x54   : > { %v5923_v27 = vadd.f32 %v2637_v1, %v2517_v12  ;;  %v404_v36 = vmul.f32 0.007598758, %v5854_v14  ;;  %v604_v39 = vmul.f32 0.036000773, %v5854_v14  ;;  %v830_v40 = vmul.f32 0.10936069, %v5854_v14 }
  0x55   : > { %2935 = vrot.lane.b32.xlu0 %v2889_v32, %s5667_s19  ;;  %v2647_v21 = vrot.slane %v2567_v26, 2  ;;  %v5931_v2 = vmul.f32 %v5805_v13, %v5805_v13  ;;  %v1845_v41 = vadd.f32 %v1735_v22, %v1484_v34  ;;  %v832_v47 = vmul.f32 0.10936069, %v5866_v23 }
  0x56   : > { %9759 = vst [vmem:[#allocation5_spill] sm:$0xff] %v5923_v27  ;;  %v2770_v9 = vmul.f32 0.007598758, %v5923_v27  ;;  %v2890_v1 = vmul.f32 0.036000773, %v5923_v27  ;;  %v484_v44 = vrot.slane %v404_v36, 1  ;;  %5626 = vrcp.f32 %v5816_v35 }
  0x57   : > { %v684_v45 = vrot.slane %v604_v39, 2  ;;  %v1017_v48 = vrot.slane %v830_v40, 3  ;;  %v1191_v32 = vmul.f32 0.21300554, %v5854_v14  ;;  %v2046_v50 = vadd.f32 %v1936_v5, %v1845_v41 }
  0x58   : > { %2817 = vrot.lane.b32.xlu1 %v2770_v9, %s5666_s18  ;;  %v564_v52 = vadd.f32 %v484_v44, %v364_v16  ;;  %v1193_v3 = vmul.f32 0.21300554, %v5866_v23  ;;  %v1552_v13 = vmul.f32 0.26601171, %v5854_v14  ;;  %v1018_v53 = vrot.slane %v832_v47, 3 }
  0x59   : > { %v1378_v54 = vrot.slane %v1191_v32, 4  ;;  %v1554_v60 = vmul.f32 0.26601171, %v5866_v23  ;;  %v1940_v61 = vrot.slane %v1191_v32, 6  ;;  %v2247_v63 = vadd.f32 %v2137_v25, %v2046_v50 }
  0x5a   : > { %v764_v0 = vadd.f32 %v684_v45, %v564_v52  ;;  %v1379_v6 = vrot.slane %v1193_v3, 4  ;;  %v1739_v7 = vrot.slane %v1552_v13, 5  ;;  %v1019_v11 = vsel %vm938_vm0, %v1017_v48, %v1018_v53 }
  0x5b   : > { %v1740_v62 = vrot.slane %v1554_v60, 5  ;;  %v1941_v12 = vrot.slane %v1193_v3, 6  ;;  %v2141_v10 = vrot.slane %v830_v40, 7  ;;  %v2327_v22 = vadd.f32 %v2287_v55, %v2247_v63 }
  0x5c   : > { %2933 = vrot.lane.b32.xlu1 %v5893_v18, %s5667_s19  ;;  %v1125_v24 = vadd.f32 %v1019_v11, %v764_v0  ;;  %v1380_v14 = vsel %vm1299_vm1, %v1378_v54, %v1379_v6  ;;  %v2142_v5 = vrot.slane %v832_v47, 7  ;;  %v2289_v16 = vmul.f32 0.036000773, %v5866_v23 }
  0x5d   : > { %v1741_v26 = vsel %vm1660_vm2, %v1739_v7, %v1740_v62  ;;  %v1942_v25 = vsel %vm1861_vm3, %v1940_v61, %v1941_v12  ;;  %v2369_v34 = vmul.f32 0.007598758, %v5866_v23  ;;  %v2527_v36 = vadd.f32 %v2447_v33, %v2327_v22 }
  0x5e   : > { %v1486_v39 = vadd.f32 %v1380_v14, %v1125_v24  ;;  %v2143_v40 = vsel %vm2062_vm4, %v2141_v10, %v2142_v5  ;;  %v2569_v9 = vmul.f32 0.0010283801, %v5866_v23  ;;  %v366_v55 = vmul.f32 0.0010283801, %v5906_v17 }
  0x5f   : > { %v2449_v18 = vrot.slane %v2369_v34, 1  ;;  %v406_v41 = vmul.f32 0.007598758, %v5906_v17  ;;  %v318_v44 = vmul.f32 %v5834_v58, %v5834_v58  ;;  %v5956_v45 = vadd.f32 %v2647_v21, %v2527_v36 }
  0x60   : > { %2937 = vrot.lane.b32.xlu1 %v2890_v1, %s5667_s19  ;;  %v1847_v47 = vadd.f32 %v1741_v26, %v1486_v39  ;;  %v2649_v48 = vrot.slane %v2569_v9, 2  ;;  %v606_v33 = vmul.f32 0.036000773, %v5906_v17  ;;  %v834_v50 = vmul.f32 0.10936069, %v5906_v17 }
  0x61   : > { %v486_v32 = vrot.slane %v406_v41, 1  ;;  %v836_v23 = vmul.f32 0.10936069, %v5931_v2  ;;  %v5963_v52 = vmul.f32 %v5848_v8, %v5848_v8  ;;  %v2775_v3 = vmul.f32 0.007598758, %v5956_v45 }
  0x62   : > { %v2048_v58 = vadd.f32 %v1942_v25, %v1847_v47  ;;  %v686_v13 = vrot.slane %v606_v33, 2  ;;  %v1195_v21 = vmul.f32 0.21300554, %v5906_v17  ;;  %v1023_v53 = vrot.slane %v834_v50, 3 }
  0x63   : > { %v566_v1 = vadd.f32 %v486_v32, %v366_v55  ;;  %v1024_v54 = vrot.slane %v836_v23, 3  ;;  %v1197_v60 = vmul.f32 0.21300554, %v5931_v2  ;;  %2827 = vrot.lane.b32.xlu0 %v2775_v3, %s5666_s18  ;;  %v1556_v0 = vmul.f32 0.26601171, %v5906_v17 }
  0x64   : > { %v2249_v61 = vadd.f32 %v2143_v40, %v2048_v58  ;;  %v1384_v63 = vrot.slane %v1195_v21, 4  ;;  %v1558_v8 = vmul.f32 0.26601171, %v5931_v2  ;;  %v1946_v62 = vrot.slane %v1195_v21, 6 }
  0x65   : > { %v766_v6 = vadd.f32 %v686_v13, %v566_v1  ;;  %v1025_v7 = vsel %vm938_vm0, %v1023_v53, %v1024_v54  ;;  %v1385_v11 = vrot.slane %v1197_v60, 4  ;;  %v1745_v10 = vrot.slane %v1556_v0, 5 }
  0x66   : > { %v2329_v12 = vadd.f32 %v2289_v16, %v2249_v61  ;;  %v1746_v22 = vrot.slane %v1558_v8, 5  ;;  %v1947_v24 = vrot.slane %v1197_v60, 6  ;;  %v2147_v26 = vrot.slane %v834_v50, 7 }
  0x67   : > { %v1127_v14 = vadd.f32 %v1025_v7, %v766_v6  ;;  %v1386_v5 = vsel %vm1299_vm1, %v1384_v63, %v1385_v11  ;;  %v2148_v25 = vrot.slane %v836_v23, 7  ;;  %v2291_v39 = vmul.f32 0.036000773, %v5931_v2 }
  0x68   : > { %v2529_v34 = vadd.f32 %v2449_v18, %v2329_v12  ;;  %v1747_v36 = vsel %vm1660_vm2, %v1745_v10, %v1746_v22  ;;  %v1948_v17 = vsel %vm1861_vm3, %v1946_v62, %v1947_v24  ;;  %v2371_v16 = vmul.f32 0.007598758, %v5931_v2 }
  0x69   : > { %v1488_v40 = vadd.f32 %v1386_v5, %v1127_v14  ;;  %v2149_v9 = vsel %vm2062_vm4, %v2147_v26, %v2148_v25  ;;  %v2571_v55 = vmul.f32 0.0010283801, %v5931_v2  ;;  %v368_v47 = vmul.f32 0.0010283801, %v318_v44 }
  0x6a   : > { %v5979_v41 = vadd.f32 %v2649_v48, %v2529_v34  ;;  %v408_v33 = vmul.f32 0.007598758, %v318_v44  ;;  %v608_v32 = vmul.f32 0.036000773, %v318_v44  ;;  %v2451_v18 = vrot.slane %v2371_v16, 1 }
  0x6b   : > { %v1849_v50 = vadd.f32 %v1747_v36, %v1488_v40  ;;  %v2651_v23 = vrot.slane %v2571_v55, 2  ;;  %v838_v3 = vmul.f32 0.10936069, %v318_v44  ;;  %v840_v1 = vmul.f32 0.10936069, %v5963_v52 }
  0x6c   : > { %v2776_v58 = vmul.f32 0.007598758, %v5979_v41  ;;  %v488_v13 = vrot.slane %v408_v33, 1  ;;  %v688_v21 = vrot.slane %v608_v32, 2  ;;  %v1199_v60 = vmul.f32 0.21300554, %v318_v44 }
  0x6d   : > { %v2050_v53 = vadd.f32 %v1948_v17, %v1849_v50  ;;  %v1029_v54 = vrot.slane %v838_v3, 3  ;;  %v1201_v2 = vmul.f32 0.21300554, %v5963_v52  ;;  %v1030_v61 = vrot.slane %v840_v1, 3 }
  0x6e   : > { %2829 = vrot.lane.b32.xlu1 %v2776_v58, %s5666_s18  ;;  %v568_v48 = vadd.f32 %v488_v13, %v368_v47  ;;  %v1560_v63 = vmul.f32 0.26601171, %v318_v44  ;;  %v1562_v0 = vmul.f32 0.26601171, %v5963_v52  ;;  %v1390_v6 = vrot.slane %v1199_v60, 4 }
  0x6f   : > { %v2251_v8 = vadd.f32 %v2149_v9, %v2050_v53  ;;  %v1391_v7 = vrot.slane %v1201_v2, 4  ;;  %v1952_v11 = vrot.slane %v1199_v60, 6  ;;  %v1031_v12 = vsel %vm938_vm0, %v1029_v54, %v1030_v61 }
  0x70   : > { %v768_v62 = vadd.f32 %v688_v21, %v568_v48  ;;  %v1751_v10 = vrot.slane %v1560_v63, 5  ;;  %v1752_v22 = vrot.slane %v1562_v0, 5  ;;  %v1953_v5 = vrot.slane %v1201_v2, 6 }
  0x71   : > { %v2331_v24 = vadd.f32 %v2291_v39, %v2251_v8  ;;  %v1392_v14 = vsel %vm1299_vm1, %v1390_v6, %v1391_v7  ;;  %v2153_v26 = vrot.slane %v838_v3, 7  ;;  %v2154_v44 = vrot.slane %v840_v1, 7 }
  0x72   : > { %v1129_v25 = vadd.f32 %v1031_v12, %v768_v62  ;;  %v1753_v34 = vsel %vm1660_vm2, %v1751_v10, %v1752_v22  ;;  %v2293_v36 = vmul.f32 0.036000773, %v5963_v52  ;;  %v1954_v40 = vsel %vm1861_vm3, %v1952_v11, %v1953_v5 }
  0x73   : > { %v2531_v17 = vadd.f32 %v2451_v18, %v2331_v24  ;;  %v2373_v9 = vmul.f32 0.007598758, %v5963_v52  ;;  %v2573_v16 = vmul.f32 0.0010283801, %v5963_v52  ;;  %v2155_v39 = vsel %vm2062_vm4, %v2153_v26, %v2154_v44 }
  0x74   : > { %v1490_v55 = vadd.f32 %v1392_v14, %v1129_v25  ;;  %v2895_v47 = vmul.f32 0.036000773, %v5956_v45  ;;  %v5996_v33 = vmul.f32 0.036000773, %v5979_v41  ;;  %v342_v18 = vmul.f32 0.0010283801, %v5874_v37 }
  0x75   : > { %v5998_v32 = vadd.f32 %v2651_v23, %v2531_v17  ;;  %v2453_v50 = vrot.slane %v2373_v9, 1  ;;  %v2653_v3 = vrot.slane %v2573_v16, 2  ;;  %v382_v13 = vmul.f32 0.007598758, %v5874_v37 }
  0x76   : > { %v1851_v58 = vadd.f32 %v1753_v34, %v1490_v55  ;;  %v582_v21 = vmul.f32 0.036000773, %v5874_v37  ;;  %v786_v52 = vmul.f32 0.10936069, %v5874_v37  ;;  %v788_v53 = vmul.f32 0.10936069, %v5877_v43 }
  0x77   : > { %v2777_v1 = vmul.f32 0.007598758, %v5998_v32  ;;  %v1147_v54 = vmul.f32 0.21300554, %v5874_v37  ;;  %v6009_v23 = vmul.f32 %v5860_v20, %v5860_v20  ;;  %v462_v2 = vrot.slane %v382_v13, 1 }
  0x78   : > { %v2052_v60 = vadd.f32 %v1954_v40, %v1851_v58  ;;  %v662_v48 = vrot.slane %v582_v21, 2  ;;  %v951_v61 = vrot.slane %v786_v52, 3  ;;  %v952_v63 = vrot.slane %v788_v53, 3 }
  0x79   : > { %2831 = vrot.lane.b32.xlu0 %v2777_v1, %s5666_s18  ;;  %v1149_v0 = vmul.f32 0.21300554, %v5877_v43  ;;  %v1312_v8 = vrot.slane %v1147_v54, 4  ;;  %v1508_v6 = vmul.f32 0.26601171, %v5874_v37  ;;  %v542_v11 = vadd.f32 %v462_v2, %v342_v18 }
  0x7a   : > { %v2253_v7 = vadd.f32 %v2155_v39, %v2052_v60  ;;  %v1510_v62 = vmul.f32 0.26601171, %v5877_v43  ;;  %v1874_v12 = vrot.slane %v1147_v54, 6  ;;  %v953_v10 = vsel %vm938_vm0, %v951_v61, %v952_v63 }
  0x7b   : > { %v1313_v22 = vrot.slane %v1149_v0, 4  ;;  %v1673_v24 = vrot.slane %v1508_v6, 5  ;;  %v1875_v14 = vrot.slane %v1149_v0, 6  ;;  %v742_v26 = vadd.f32 %v662_v48, %v542_v11 }
  0x7c   : > { %v2333_v5 = vadd.f32 %v2293_v36, %v2253_v7  ;;  %v1674_v25 = vrot.slane %v1510_v62, 5  ;;  %v2075_v34 = vrot.slane %v786_v52, 7  ;;  %v2076_v40 = vrot.slane %v788_v53, 7 }
  0x7d   : > { %2947 = vrot.lane.b32.xlu0 %v2895_v47, %s5667_s19  ;;  %v1314_v44 = vsel %vm1299_vm1, %v1312_v8, %v1313_v22  ;;  %v1876_v17 = vsel %vm1861_vm3, %v1874_v12, %v1875_v14  ;;  %v2267_v9 = vmul.f32 0.036000773, %v5877_v43  ;;  %v1103_v55 = vadd.f32 %v953_v10, %v742_v26 }
  0x7e   : > { %v2533_v16 = vadd.f32 %v2453_v50, %v2333_v5  ;;  %v1675_v39 = vsel %vm1660_vm2, %v1673_v24, %v1674_v25  ;;  %v2347_v18 = vmul.f32 0.007598758, %v5877_v43  ;;  %v2077_v36 = vsel %vm2062_vm4, %v2075_v34, %v2076_v40 }
  0x7f   : > { %v2547_v58 = vmul.f32 0.0010283801, %v5877_v43  ;;  %v338_v13 = vmul.f32 0.0010283801, %v5831_v51  ;;  %v378_v47 = vmul.f32 0.007598758, %v5831_v51  ;;  %v1464_v52 = vadd.f32 %v1314_v44, %v1103_v55 }
  0x80   : > { %v6026_v21 = vadd.f32 %v2653_v3, %v2533_v16  ;;  %v2427_v1 = vrot.slane %v2347_v18, 1  ;;  %v578_v53 = vmul.f32 0.036000773, %v5831_v51  ;;  %v778_v60 = vmul.f32 0.10936069, %v5831_v51 }
  0x81   : > { %v2627_v50 = vrot.slane %v2547_v58, 2  ;;  %v458_v54 = vrot.slane %v378_v47, 1  ;;  %v780_v2 = vmul.f32 0.10936069, %v5842_v4  ;;  %v1825_v61 = vadd.f32 %v1675_v39, %v1464_v52 }
  0x82   : > { %v2778_v48 = vmul.f32 0.007598758, %v6026_v21  ;;  %v658_v63 = vrot.slane %v578_v53, 2  ;;  %v1139_v0 = vmul.f32 0.21300554, %v5831_v51  ;;  %v939_v6 = vrot.slane %v778_v60, 3 }
  0x83   : > { %v538_v8 = vadd.f32 %v458_v54, %v338_v13  ;;  %v940_v3 = vrot.slane %v780_v2, 3  ;;  %v1141_v7 = vmul.f32 0.21300554, %v5842_v4  ;;  %v2026_v11 = vadd.f32 %v1876_v17, %v1825_v61 }
  0x84   : > { %2833 = vrot.lane.b32.xlu1 %v2778_v48, %s5666_s18  ;;  %v1300_v62 = vrot.slane %v1139_v0, 4  ;;  %v1500_v12 = vmul.f32 0.26601171, %v5831_v51  ;;  %v1502_v10 = vmul.f32 0.26601171, %v5842_v4  ;;  %v1862_v5 = vrot.slane %v1139_v0, 6 }
  0x85   : > { %v738_v22 = vadd.f32 %v658_v63, %v538_v8  ;;  %v941_v24 = vsel %vm938_vm0, %v939_v6, %v940_v3  ;;  %v1301_v14 = vrot.slane %v1141_v7, 4  ;;  %v2227_v26 = vadd.f32 %v2077_v36, %v2026_v11 }
  0x86   : > { %v1661_v25 = vrot.slane %v1500_v12, 5  ;;  %v1662_v34 = vrot.slane %v1502_v10, 5  ;;  %v1863_v44 = vrot.slane %v1141_v7, 6  ;;  %v2063_v55 = vrot.slane %v778_v60, 7 }
  0x87   : > { %v1099_v40 = vadd.f32 %v941_v24, %v738_v22  ;;  %v1302_v16 = vsel %vm1299_vm1, %v1300_v62, %v1301_v14  ;;  %v2064_v39 = vrot.slane %v780_v2, 7  ;;  %v2307_v17 = vadd.f32 %v2267_v9, %v2227_v26 }
  0x88   : > { %2949 = vrot.lane.b32.xlu1 %v5996_v33, %s5667_s19  ;;  %v1663_v18 = vsel %vm1660_vm2, %v1661_v25, %v1662_v34  ;;  %v1864_v58 = vsel %vm1861_vm3, %v1862_v5, %v1863_v44  ;;  %v2263_v13 = vmul.f32 0.036000773, %v5842_v4  ;;  %v2343_v52 = vmul.f32 0.007598758, %v5842_v4 }
  0x89   : > { %v1460_v47 = vadd.f32 %v1302_v16, %v1099_v40  ;;  %v2065_v36 = vsel %vm2062_vm4, %v2063_v55, %v2064_v39  ;;  %v2543_v53 = vmul.f32 0.0010283801, %v5842_v4  ;;  %v2507_v54 = vadd.f32 %v2427_v1, %v2307_v17 }
  0x8a   : > { %v344_v60 = vmul.f32 0.0010283801, %v5880_v49  ;;  %v384_v2 = vmul.f32 0.007598758, %v5880_v49  ;;  %v584_v33 = vmul.f32 0.036000773, %v5880_v49 }
  0x8b   : > { %v1821_v9 = vadd.f32 %v1663_v18, %v1460_v47  ;;  %v2423_v48 = vrot.slane %v2343_v52, 1  ;;  %v2623_v61 = vrot.slane %v2543_v53, 2  ;;  %v790_v63 = vmul.f32 0.10936069, %v5880_v49 }
  0x8c   : > { %v6051_v0 = vadd.f32 %v2627_v50, %v2507_v54  ;;  %v464_v8 = vrot.slane %v384_v2, 1  ;;  %v664_v6 = vrot.slane %v584_v33, 2  ;;  %v792_v3 = vmul.f32 0.10936069, %v5883_v56 }
  0x8d   : > { %v2022_v7 = vadd.f32 %v1864_v58, %v1821_v9  ;;  %v957_v11 = vrot.slane %v790_v63, 3  ;;  %v1151_v1 = vmul.f32 0.21300554, %v5880_v49  ;;  %v1153_v62 = vmul.f32 0.21300554, %v5883_v56 }
  0x8e   : > { %9760 = vst [vmem:[#allocation6_spill] sm:$0xff] %v6051_v0  ;;  %v2765_v12 = vmul.f32 0.007598758, %v6051_v0  ;;  %v544_v10 = vadd.f32 %v464_v8, %v344_v60  ;;  %v958_v22 = vrot.slane %v792_v3, 3  ;;  %v1512_v24 = vmul.f32 0.26601171, %v5880_v49 }
  0x8f   : > { %v2223_v14 = vadd.f32 %v2065_v36, %v2022_v7  ;;  %v1318_v5 = vrot.slane %v1151_v1, 4  ;;  %v1319_v50 = vrot.slane %v1153_v62, 4  ;;  %v1514_v26 = vmul.f32 0.26601171, %v5883_v56 }
  0x90   : > { %2807 = vrot.lane.b32.xlu1 %v2765_v12, %s5666_s18  ;;  %v744_v25 = vadd.f32 %v664_v6, %v544_v10  ;;  %v959_v34 = vsel %vm938_vm0, %v957_v11, %v958_v22  ;;  %v1679_v44 = vrot.slane %v1512_v24, 5  ;;  %v1880_v40 = vrot.slane %v1151_v1, 6 }
  0x91   : > { %v2303_v16 = vadd.f32 %v2263_v13, %v2223_v14  ;;  %v1320_v55 = vsel %vm1299_vm1, %v1318_v5, %v1319_v50  ;;  %v1680_v39 = vrot.slane %v1514_v26, 5  ;;  %v1881_v17 = vrot.slane %v1153_v62, 6 }
  0x92   : > { %v1105_v18 = vadd.f32 %v959_v34, %v744_v25  ;;  %v2081_v58 = vrot.slane %v790_v63, 7  ;;  %v2082_v47 = vrot.slane %v792_v3, 7  ;;  %v2269_v36 = vmul.f32 0.036000773, %v5883_v56 }
  0x93   : > { %v2503_v52 = vadd.f32 %v2423_v48, %v2303_v16  ;;  %v1681_v53 = vsel %vm1660_vm2, %v1679_v44, %v1680_v39  ;;  %v1882_v54 = vsel %vm1861_vm3, %v1880_v40, %v1881_v17  ;;  %v2349_v60 = vmul.f32 0.007598758, %v5883_v56 }
  0x94   : > { %v1466_v2 = vadd.f32 %v1320_v55, %v1105_v18  ;;  %v2083_v33 = vsel %vm2062_vm4, %v2081_v58, %v2082_v47  ;;  %v2549_v13 = vmul.f32 0.0010283801, %v5883_v56  ;;  %v340_v9 = vmul.f32 0.0010283801, %v5860_v20 }
  0x95   : > { %v6069_v8 = vadd.f32 %v2623_v61, %v2503_v52  ;;  %v2429_v63 = vrot.slane %v2349_v60, 1  ;;  %v380_v6 = vmul.f32 0.007598758, %v5860_v20  ;;  %v580_v48 = vmul.f32 0.036000773, %v5860_v20 }
  0x96   : > { %v1827_v3 = vadd.f32 %v1681_v53, %v1466_v2  ;;  %v2629_v7 = vrot.slane %v2549_v13, 2  ;;  %v782_v11 = vmul.f32 0.10936069, %v5860_v20  ;;  %v784_v1 = vmul.f32 0.10936069, %v5871_v31 }
  0x97   : > { %9761 = vst [vmem:[#allocation7_spill] sm:$0xff] %v6069_v8  ;;  %v2763_v62 = vmul.f32 0.007598758, %v6069_v8  ;;  %v460_v12 = vrot.slane %v380_v6, 1  ;;  %v660_v10 = vrot.slane %v580_v48, 2 }
  0x98   : > { %v1143_v22 = vmul.f32 0.21300554, %v5860_v20  ;;  %v2028_v24 = vadd.f32 %v1882_v54, %v1827_v3  ;;  %v945_v61 = vrot.slane %v782_v11, 3  ;;  %v946_v14 = vrot.slane %v784_v1, 3 }
  0x99   : > { %v1145_v5 = vmul.f32 0.21300554, %v5871_v31  ;;  %2803 = vrot.lane.b32.xlu0 %v2763_v62, %s5666_s18  ;;  %v540_v50 = vadd.f32 %v460_v12, %v340_v9  ;;  %v1504_v25 = vmul.f32 0.26601171, %v5860_v20  ;;  %v1506_v34 = vmul.f32 0.26601171, %v5871_v31 }
  0x9a   : > { %v1306_v26 = vrot.slane %v1143_v22, 4  ;;  %v2229_v44 = vadd.f32 %v2083_v33, %v2028_v24  ;;  %v947_v40 = vsel %vm938_vm0, %v945_v61, %v946_v14  ;;  %v1868_v55 = vrot.slane %v1143_v22, 6 }
  0x9b   : > { %v1307_v16 = vrot.slane %v1145_v5, 4  ;;  %v740_v39 = vadd.f32 %v660_v10, %v540_v50  ;;  %v1667_v17 = vrot.slane %v1504_v25, 5  ;;  %v1668_v18 = vrot.slane %v1506_v34, 5 }
  0x9c   : > { %v1869_v58 = vrot.slane %v1145_v5, 6  ;;  %v2309_v47 = vadd.f32 %v2269_v36, %v2229_v44  ;;  %v2069_v53 = vrot.slane %v782_v11, 7  ;;  %v2070_v54 = vrot.slane %v784_v1, 7 }
  0x9d   : > { %v1308_v52 = vsel %vm1299_vm1, %v1306_v26, %v1307_v16  ;;  %v1101_v60 = vadd.f32 %v947_v40, %v740_v39  ;;  %v1669_v2 = vsel %vm1660_vm2, %v1667_v17, %v1668_v18  ;;  %v2265_v33 = vmul.f32 0.036000773, %v5871_v31 }
  0x9e   : > { %v1870_v13 = vsel %vm1861_vm3, %v1868_v55, %v1869_v58  ;;  %v2509_v9 = vadd.f32 %v2429_v63, %v2309_v47  ;;  %v2071_v6 = vsel %vm2062_vm4, %v2069_v53, %v2070_v54  ;;  %v2345_v48 = vmul.f32 0.007598758, %v5871_v31 }
  0x9f   : > { %v2545_v3 = vmul.f32 0.0010283801, %v5871_v31  ;;  %v1462_v62 = vadd.f32 %v1308_v52, %v1101_v60  ;;  %v6090_v36 = vmul.f32 0.036000773, %v6069_v8  ;;  %v6093_v11 = vmul.f32 0.036000773, %v6051_v0 }
  0xa0   : > { %v296_v1 = vmul.f32 %v5871_v31, %v5871_v31  ;;  %v6097_v12 = vadd.f32 %v2629_v7, %v2509_v9  ;;  %v2425_v10 = vrot.slane %v2345_v48, 1  ;;  %v356_v22 = vmul.f32 0.0010283801, %v6009_v23 }
  0xa1   : > { %v2625_v63 = vrot.slane %v2545_v3, 2  ;;  %v1823_v24 = vadd.f32 %v1669_v2, %v1462_v62  ;;  %v396_v61 = vmul.f32 0.007598758, %v6009_v23  ;;  %v596_v14 = vmul.f32 0.036000773, %v6009_v23 }
  0xa2   : > { %9762 = vst [vmem:[#allocation8_spill] sm:$0xff] %v6097_v12  ;;  %v814_v5 = vmul.f32 0.10936069, %v6009_v23  ;;  %v2766_v50 = vmul.f32 0.007598758, %v6097_v12  ;;  %v290_v7 = vmul.f32 %v5831_v51, %v5831_v51 }
  0xa3   : > { %v6105_v26 = vmul.f32 0.036000773, %v6097_v12  ;;  %v816_v25 = vmul.f32 0.10936069, %v296_v1  ;;  %v2024_v34 = vadd.f32 %v1870_v13, %v1823_v24  ;;  %v476_v44 = vrot.slane %v396_v61, 1 }
  0xa4   : > { %v676_v40 = vrot.slane %v596_v14, 2  ;;  %v993_v16 = vrot.slane %v814_v5, 3  ;;  %2809 = vrot.lane.b32.xlu1 %v2766_v50, %s5666_s18  ;;  %v1175_v39 = vmul.f32 0.21300554, %v6009_v23  ;;  %v1177_v17 = vmul.f32 0.21300554, %v296_v1 }
  0xa5   : > { %v994_v55 = vrot.slane %v816_v25, 3  ;;  %v2117_v18 = vrot.slane %v814_v5, 7  ;;  %v2225_v58 = vadd.f32 %v2071_v6, %v2024_v34  ;;  %v556_v47 = vadd.f32 %v476_v44, %v356_v22 }
  0xa6   : > { %v1536_v52 = vmul.f32 0.26601171, %v6009_v23  ;;  %v1538_v53 = vmul.f32 0.26601171, %v296_v1  ;;  %v1354_v60 = vrot.slane %v1175_v39, 4  ;;  %v1355_v2 = vrot.slane %v1177_v17, 4 }
  0xa7   : > { %v995_v54 = vsel %vm938_vm0, %v993_v16, %v994_v55  ;;  %v1916_v13 = vrot.slane %v1175_v39, 6  ;;  %v2305_v9 = vadd.f32 %v2265_v33, %v2225_v58  ;;  %v756_v48 = vadd.f32 %v676_v40, %v556_v47 }
  0xa8   : > { %v1715_v3 = vrot.slane %v1536_v52, 5  ;;  %v1716_v62 = vrot.slane %v1538_v53, 5  ;;  %v1356_v24 = vsel %vm1299_vm1, %v1354_v60, %v1355_v2  ;;  %v1917_v61 = vrot.slane %v1177_v17, 6 }
  0xa9   : > { %v2118_v14 = vrot.slane %v816_v25, 7  ;;  %v2281_v50 = vmul.f32 0.036000773, %v296_v1  ;;  %v2505_v5 = vadd.f32 %v2425_v10, %v2305_v9  ;;  %v1117_v6 = vadd.f32 %v995_v54, %v756_v48 }
  0xaa   : > { %v1717_v22 = vsel %vm1660_vm2, %v1715_v3, %v1716_v62  ;;  %v2361_v23 = vmul.f32 0.007598758, %v296_v1  ;;  %v1918_v34 = vsel %vm1861_vm3, %v1916_v13, %v1917_v61  ;;  %v2561_v16 = vmul.f32 0.0010283801, %v296_v1 }
  0xab   : > { %v2119_v44 = vsel %vm2062_vm4, %v2117_v18, %v2118_v14  ;;  %v292_v33 = vmul.f32 %v5842_v4, %v5842_v4  ;;  %v6119_v40 = vadd.f32 %v2625_v63, %v2505_v5  ;;  %v1478_v55 = vadd.f32 %v1356_v24, %v1117_v6 }
  0xac   : > { %v2441_v39 = vrot.slane %v2361_v23, 1  ;;  %v354_v17 = vmul.f32 0.0010283801, %v290_v7  ;;  %v2641_v25 = vrot.slane %v2561_v16, 2  ;;  %v394_v58 = vmul.f32 0.007598758, %v290_v7 }
  0xad   : > { %9763 = vst [vmem:[#allocation9_spill] sm:$0xff] %v6119_v40  ;;  %v594_v10 = vmul.f32 0.036000773, %v290_v7  ;;  %v6123_v47 = vmul.f32 %v5880_v49, %v5880_v49  ;;  %v2764_v52 = vmul.f32 0.007598758, %v6119_v40  ;;  %v1839_v1 = vadd.f32 %v1717_v22, %v1478_v55 }
  0xae   : > { %v2884_v18 = vmul.f32 0.036000773, %v6119_v40  ;;  %v810_v53 = vmul.f32 0.10936069, %v290_v7  ;;  %v474_v54 = vrot.slane %v394_v58, 1 }
  0xaf   : > { %v674_v60 = vrot.slane %v594_v10, 2  ;;  %v812_v63 = vmul.f32 0.10936069, %v292_v33  ;;  %v1171_v2 = vmul.f32 0.21300554, %v290_v7  ;;  %2805 = vrot.lane.b32.xlu0 %v2764_v52, %s5666_s18  ;;  %v2040_v13 = vadd.f32 %v1918_v34, %v1839_v1 }
  0xb0   : > { %2925 = vrot.lane.b32.xlu1 %v2884_v18, %s5667_s19  ;;  %v987_v9 = vrot.slane %v810_v53, 3  ;;  %v1173_v48 = vmul.f32 0.21300554, %v292_v33  ;;  %v1532_v3 = vmul.f32 0.26601171, %v290_v7  ;;  %v554_v62 = vadd.f32 %v474_v54, %v354_v17 }
  0xb1   : > { %v988_v24 = vrot.slane %v812_v63, 3  ;;  %v1348_v61 = vrot.slane %v1171_v2, 4  ;;  %v1534_v14 = vmul.f32 0.26601171, %v292_v33  ;;  %v2241_v5 = vadd.f32 %v2119_v44, %v2040_v13 }
  0xb2   : > { %v1349_v6 = vrot.slane %v1173_v48, 4  ;;  %v1709_v22 = vrot.slane %v1532_v3, 5  ;;  %v1910_v23 = vrot.slane %v1171_v2, 6  ;;  %v754_v16 = vadd.f32 %v674_v60, %v554_v62 }
  0xb3   : > { %v989_v55 = vsel %vm938_vm0, %v987_v9, %v988_v24  ;;  %v1710_v58 = vrot.slane %v1534_v14, 5  ;;  %v1911_v10 = vrot.slane %v1173_v48, 6  ;;  %2923 = vrot.lane.b32.xlu0 %v6090_v36, %s5667_s19  ;;  %v2321_v7 = vadd.f32 %v2281_v50, %v2241_v5 }
  0xb4   : > { %2929 = vrot.lane.b32.xlu1 %v6105_v26, %s5667_s19  ;;  %v1350_v34 = vsel %vm1299_vm1, %v1348_v61, %v1349_v6  ;;  %v2111_v17 = vrot.slane %v810_v53, 7  ;;  %v2112_v52 = vrot.slane %v812_v63, 7  ;;  %v1115_v44 = vadd.f32 %v989_v55, %v754_v16 }
  0xb5   : > { %v1711_v18 = vsel %vm1660_vm2, %v1709_v22, %v1710_v58  ;;  %v1912_v1 = vsel %vm1861_vm3, %v1910_v23, %v1911_v10  ;;  %v2279_v54 = vmul.f32 0.036000773, %v292_v33  ;;  %v2521_v60 = vadd.f32 %v2441_v39, %v2321_v7 }
  0xb6   : > { %v2113_v2 = vsel %vm2062_vm4, %v2111_v17, %v2112_v52  ;;  %v2359_v13 = vmul.f32 0.007598758, %v292_v33  ;;  %v2559_v9 = vmul.f32 0.0010283801, %v292_v33  ;;  %v1476_v36 = vadd.f32 %v1350_v34, %v1115_v44 }
  0xb7   : > { %v304_v26 = vmul.f32 %v5883_v56, %v5883_v56  ;;  %v360_v50 = vmul.f32 0.0010283801, %v6123_v47  ;;  %v400_v53 = vmul.f32 0.007598758, %v6123_v47  ;;  %2927 = vrot.lane.b32.xlu0 %v6093_v11, %s5667_s19  ;;  %v6144_v63 = vadd.f32 %v2641_v25, %v2521_v60 }
  0xb8   : > { %v2439_v48 = vrot.slane %v2359_v13, 1  ;;  %v2639_v3 = vrot.slane %v2559_v9, 2  ;;  %v600_v39 = vmul.f32 0.036000773, %v6123_v47  ;;  %v1837_v62 = vadd.f32 %v1711_v18, %v1476_v36 }
  0xb9   : > { %v480_v24 = vrot.slane %v400_v53, 1  ;;  %v822_v33 = vmul.f32 0.10936069, %v6123_v47  ;;  %v824_v61 = vmul.f32 0.10936069, %v304_v26  ;;  %v298_v22 = vmul.f32 %v5874_v37, %v5874_v37 }
  0xba   : > { %v2772_v14 = vmul.f32 0.007598758, %v6144_v63  ;;  %v680_v5 = vrot.slane %v600_v39, 2  ;;  %v1183_v6 = vmul.f32 0.21300554, %v6123_v47  ;;  %v2038_v11 = vadd.f32 %v1912_v1, %v1837_v62 }
  0xbb   : > { %v560_v25 = vadd.f32 %v480_v24, %v360_v50  ;;  %v1005_v23 = vrot.slane %v822_v33, 3  ;;  %v1006_v16 = vrot.slane %v824_v61, 3  ;;  %v1185_v55 = vmul.f32 0.21300554, %v304_v26 }
  0xbc   : > { %2821 = vrot.lane.b32.xlu1 %v2772_v14, %s5666_s18  ;;  %v1366_v58 = vrot.slane %v1183_v6, 4  ;;  %v1544_v10 = vmul.f32 0.26601171, %v6123_v47  ;;  %v1928_v7 = vrot.slane %v1183_v6, 6  ;;  %v2239_v34 = vadd.f32 %v2113_v2, %v2038_v11 }
  0xbd   : > { %v760_v17 = vadd.f32 %v680_v5, %v560_v25  ;;  %v1007_v52 = vsel %vm938_vm0, %v1005_v23, %v1006_v16  ;;  %v1546_v44 = vmul.f32 0.26601171, %v304_v26  ;;  %v1367_v18 = vrot.slane %v1185_v55, 4 }
  0xbe   : > { %v1727_v60 = vrot.slane %v1544_v10, 5  ;;  %v1929_v13 = vrot.slane %v1185_v55, 6  ;;  %v2129_v9 = vrot.slane %v822_v33, 7  ;;  %v2319_v1 = vadd.f32 %v2279_v54, %v2239_v34 }
  0xbf   : > { %v1121_v36 = vadd.f32 %v1007_v52, %v760_v17  ;;  %v1728_v50 = vrot.slane %v1546_v44, 5  ;;  %v2130_v53 = vrot.slane %v824_v61, 7  ;;  %v1368_v39 = vsel %vm1299_vm1, %v1366_v58, %v1367_v18 }
  0xc0   : > { %v1930_v62 = vsel %vm1861_vm3, %v1928_v7, %v1929_v13  ;;  %v2285_v24 = vmul.f32 0.036000773, %v304_v26  ;;  %v2365_v47 = vmul.f32 0.007598758, %v304_v26  ;;  %v2519_v2 = vadd.f32 %v2439_v48, %v2319_v1  ;;  %v5642_v48 = vld [vmem:[%s5712_s14 + $0x20] sm:$0xff] }
  0xc1   : > { %v1482_v14 = vadd.f32 %v1368_v39, %v1121_v36  ;;  %v1729_v5 = vsel %vm1660_vm2, %v1727_v60, %v1728_v50  ;;  %v2131_v6 = vsel %vm2062_vm4, %v2129_v9, %v2130_v53  ;;  %v2565_v25 = vmul.f32 0.0010283801, %v304_v26 }
  0xc2   : > { %v2445_v11 = vrot.slane %v2365_v47, 1  ;;  %v300_v54 = vmul.f32 %v5877_v43, %v5877_v43  ;;  %v358_v33 = vmul.f32 0.0010283801, %v298_v22  ;;  %v6161_v61 = vadd.f32 %v2639_v3, %v2519_v2 }
  0xc3   : > { %v1843_v23 = vadd.f32 %v1729_v5, %v1482_v14  ;;  %v398_v16 = vmul.f32 0.007598758, %v298_v22  ;;  %v598_v55 = vmul.f32 0.036000773, %v298_v22  ;;  %v2645_v58 = vrot.slane %v2565_v25, 2 }
  0xc4   : > { %9764 = vst [vmem:[#allocation10_spill] sm:$0xff] %v6161_v61  ;;  %v818_v10 = vmul.f32 0.10936069, %v298_v22  ;;  %v820_v7 = vmul.f32 0.10936069, %v300_v54  ;;  %v326_v34 = vmul.f32 %v5642_v48, %v5860_v20 }
  0xc5   : > { %v2771_v17 = vmul.f32 0.007598758, %v6161_v61  ;;  %v2044_v52 = vadd.f32 %v1930_v62, %v1843_v23  ;;  %v478_v44 = vrot.slane %v398_v16, 1  ;;  %v678_v26 = vrot.slane %v598_v55, 2 }
  0xc6   : > { %v999_v18 = vrot.slane %v818_v10, 3  ;;  %v1000_v60 = vrot.slane %v820_v7, 3  ;;  %v1179_v13 = vmul.f32 0.21300554, %v298_v22  ;;  %v1181_v9 = vmul.f32 0.21300554, %v300_v54 }
  0xc7   : > { %2819 = vrot.lane.b32.xlu0 %v2771_v17, %s5666_s18  ;;  %v2245_v3 = vadd.f32 %v2131_v6, %v2044_v52  ;;  %v558_v1 = vadd.f32 %v478_v44, %v358_v33  ;;  %v1540_v36 = vmul.f32 0.26601171, %v298_v22  ;;  %v1542_v50 = vmul.f32 0.26601171, %v300_v54 }
  0xc8   : > { %v1001_v53 = vsel %vm938_vm0, %v999_v18, %v1000_v60  ;;  %v1360_v39 = vrot.slane %v1179_v13, 4  ;;  %v1361_v47 = vrot.slane %v1181_v9, 4  ;;  %v1922_v20 = vrot.slane %v1179_v13, 6  ;;  %v5643_v18 = vld [vmem:[%s5712_s14 + $0x30] sm:$0xff] }
  0xc9   : > { %v2325_v2 = vadd.f32 %v2285_v24, %v2245_v3  ;;  %v758_v14 = vadd.f32 %v678_v26, %v558_v1  ;;  %v1721_v62 = vrot.slane %v1540_v36, 5  ;;  %v1722_v5 = vrot.slane %v1542_v50, 5 }
  0xca   : > { %v1362_v25 = vsel %vm1299_vm1, %v1360_v39, %v1361_v47  ;;  %v1923_v23 = vrot.slane %v1181_v9, 6  ;;  %v2123_v16 = vrot.slane %v818_v10, 7  ;;  %v2124_v55 = vrot.slane %v820_v7, 7 }
  0xcb   : > { %v2525_v6 = vadd.f32 %v2445_v11, %v2325_v2  ;;  %v1119_v22 = vadd.f32 %v1001_v53, %v758_v14  ;;  %v1723_v33 = vsel %vm1660_vm2, %v1721_v62, %v1722_v5  ;;  %v2283_v17 = vmul.f32 0.036000773, %v300_v54 }
  0xcc   : > { %v1924_v48 = vsel %vm1861_vm3, %v1922_v20, %v1923_v23  ;;  %v2363_v52 = vmul.f32 0.007598758, %v300_v54  ;;  %v2563_v24 = vmul.f32 0.0010283801, %v300_v54  ;;  %v328_v60 = vmul.f32 %v5643_v18, %v5871_v31 }
  0xcd   : > { %v6172_v44 = vadd.f32 %v2645_v58, %v2525_v6  ;;  %v1480_v26 = vadd.f32 %v1362_v25, %v1119_v22  ;;  %v372_v13 = vmul.f32 0.0010283801, %v326_v34  ;;  %v2125_v10 = vsel %vm2062_vm4, %v2123_v16, %v2124_v55 }
  0xce   : > { %v2443_v7 = vrot.slane %v2363_v52, 1  ;;  %v412_v29 = vmul.f32 0.007598758, %v326_v34  ;;  %v612_v11 = vmul.f32 0.036000773, %v326_v34 }
  0xcf   : > { %v2774_v9 = vmul.f32 0.007598758, %v6172_v44  ;;  %v1841_v3 = vadd.f32 %v1723_v33, %v1480_v26  ;;  %v846_v1 = vmul.f32 0.10936069, %v326_v34  ;;  %v848_v36 = vmul.f32 0.10936069, %v328_v60 }
  0xd0   : > { %v492_v50 = vrot.slane %v412_v29, 1  ;;  %v692_v53 = vrot.slane %v612_v11, 2  ;;  %v1207_v54 = vmul.f32 0.21300554, %v326_v34  ;;  %v1209_v58 = vmul.f32 0.21300554, %v328_v60 }
  0xd1   : > { %2825 = vrot.lane.b32.xlu1 %v2774_v9, %s5666_s18  ;;  %v2042_v39 = vadd.f32 %v1924_v48, %v1841_v3  ;;  %v1041_v47 = vrot.slane %v846_v1, 3  ;;  %v1042_v31 = vrot.slane %v848_v36, 3  ;;  %v1568_v20 = vmul.f32 0.26601171, %v326_v34 }
  0xd2   : > { %v572_v2 = vadd.f32 %v492_v50, %v372_v13  ;;  %v1402_v14 = vrot.slane %v1207_v54, 4  ;;  %v1403_v62 = vrot.slane %v1209_v58, 4  ;;  %v1570_v5 = vmul.f32 0.26601171, %v328_v60 }
  0xd3   : > { %v2243_v25 = vadd.f32 %v2125_v10, %v2042_v39  ;;  %v1043_v23 = vsel %vm938_vm0, %v1041_v47, %v1042_v31  ;;  %v1763_v16 = vrot.slane %v1568_v20, 5  ;;  %v1964_v55 = vrot.slane %v1207_v54, 6 }
  0xd4   : > { %v772_v6 = vadd.f32 %v692_v53, %v572_v2  ;;  %v1404_v22 = vsel %vm1299_vm1, %v1402_v14, %v1403_v62  ;;  %v1764_v33 = vrot.slane %v1570_v5, 5  ;;  %v1965_v52 = vrot.slane %v1209_v58, 6  ;;  %v5644_v53 = vld [vmem:[%s5712_s14] sm:$0xff]  ;;  %v6186_v58 = vpop.eup %5624 }
  0xd5   : > { %v2323_v26 = vadd.f32 %v2283_v17, %v2243_v25  ;;  %v2643_v48 = vrot.slane %v2563_v24, 2  ;;  %v2165_v18 = vrot.slane %v846_v1, 7  ;;  %v2166_v34 = vrot.slane %v848_v36, 7  ;;  %v5645_v36 = vld [vmem:[%s5712_s14 + $0x10] sm:$0xff]  ;;  %v5646_v2 = vld [vmem:[%s5712_s14 + $0x60] sm:$0xff] }
  0xd6   : > { %v1133_v13 = vadd.f32 %v1043_v23, %v772_v6  ;;  %v1765_v29 = vsel %vm1660_vm2, %v1763_v16, %v1764_v33  ;;  %v1966_v10 = vsel %vm1861_vm3, %v1964_v55, %v1965_v52  ;;  %v2377_v11 = vmul.f32 0.007598758, %v328_v60 }
  0xd7   : > { %v2523_v9 = vadd.f32 %v2443_v7, %v2323_v26  ;;  %v2167_v3 = vsel %vm2062_vm4, %v2165_v18, %v2166_v34  ;;  %v2577_v50 = vmul.f32 0.0010283801, %v328_v60  ;;  %v322_v54 = vmul.f32 %v5644_v53, %v5831_v51 }
  0xd8   : > { %v1494_v17 = vadd.f32 %v1404_v22, %v1133_v13  ;;  %v2297_v24 = vmul.f32 0.036000773, %v328_v60  ;;  %v2457_v1 = vrot.slane %v2377_v11, 1  ;;  %v324_v39 = vmul.f32 %v5645_v36, %v5842_v4 }
  0xd9   : > { %v6190_v47 = vadd.f32 %v2643_v48, %v2523_v9  ;;  %v370_v31 = vmul.f32 0.0010283801, %v322_v54  ;;  %v410_v20 = vmul.f32 0.007598758, %v322_v54  ;;  %v334_v7 = vmul.f32 %v5646_v2, %v5880_v49  ;;  %v5647_v2 = vld [vmem:[%s5712_s14 + $0x70] sm:$0xff] }
  0xda   : > { %v1855_v14 = vadd.f32 %v1765_v29, %v1494_v17  ;;  %v610_v62 = vmul.f32 0.036000773, %v322_v54  ;;  %v842_v5 = vmul.f32 0.10936069, %v322_v54  ;;  %v844_v25 = vmul.f32 0.10936069, %v324_v39 }
  0xdb   : > { %v2773_v51 = vmul.f32 0.007598758, %v6190_v47  ;;  %v2657_v23 = vrot.slane %v2577_v50, 2  ;;  %v490_v16 = vrot.slane %v410_v20, 1  ;;  %v1203_v60 = vmul.f32 0.21300554, %v322_v54 }
  0xdc   : > { %v2056_v55 = vadd.f32 %v1966_v10, %v1855_v14  ;;  %v690_v6 = vrot.slane %v610_v62, 2  ;;  %v1035_v22 = vrot.slane %v842_v5, 3  ;;  %v1036_v4 = vrot.slane %v844_v25, 3 }
  0xdd   : > { %2823 = vrot.lane.b32.xlu0 %v2773_v51, %s5666_s18  ;;  %v570_v33 = vadd.f32 %v490_v16, %v370_v31  ;;  %v1205_v52 = vmul.f32 0.21300554, %v324_v39  ;;  %v1396_v26 = vrot.slane %v1203_v60, 4  ;;  %v1564_v48 = vmul.f32 0.26601171, %v322_v54 }
  0xde   : > { %v2257_v49 = vadd.f32 %v2167_v3, %v2056_v55  ;;  %v1037_v18 = vsel %vm938_vm0, %v1035_v22, %v1036_v4  ;;  %v1566_v34 = vmul.f32 0.26601171, %v324_v39  ;;  %v1958_v13 = vrot.slane %v1203_v60, 6 }
  0xdf   : > { %v770_v29 = vadd.f32 %v690_v6, %v570_v33  ;;  %v1397_v11 = vrot.slane %v1205_v52, 4  ;;  %v1757_v9 = vrot.slane %v1564_v48, 5  ;;  %v1959_v50 = vrot.slane %v1205_v52, 6 }
  0xe0   : > { %v2337_v10 = vadd.f32 %v2297_v24, %v2257_v49  ;;  %v1758_v53 = vrot.slane %v1566_v34, 5  ;;  %v2159_v17 = vrot.slane %v842_v5, 7  ;;  %v2160_v36 = vrot.slane %v844_v25, 7 }
  0xe1   : > { %v6198_v20 = vadd.f32 1.0, %v5819_v38  ;;  %v1131_v31 = vadd.f32 %v1037_v18, %v770_v29  ;;  %v1398_v54 = vsel %vm1299_vm1, %v1396_v26, %v1397_v11  ;;  %v336_v3 = vmul.f32 %v5647_v2, %v5883_v56 }
  0xe2   : > { %v2537_v14 = vadd.f32 %v2457_v1, %v2337_v10  ;;  %v1759_v62 = vsel %vm1660_vm2, %v1757_v9, %v1758_v53  ;;  %v1960_v51 = vsel %vm1861_vm3, %v1958_v13, %v1959_v50  ;;  %v2295_v16 = vmul.f32 0.036000773, %v324_v39 }
  0xe3   : > { %v1492_v60 = vadd.f32 %v1398_v54, %v1131_v31  ;;  %v2161_v24 = vsel %vm2062_vm4, %v2159_v17, %v2160_v36  ;;  %v376_v5 = vmul.f32 0.0010283801, %v334_v7  ;;  %v416_v25 = vmul.f32 0.007598758, %v334_v7 }
  0xe4   : > { %v6206_v55 = vadd.f32 %v2657_v23, %v2537_v14  ;;  %v2375_v38 = vmul.f32 0.007598758, %v324_v39  ;;  %v616_v6 = vmul.f32 0.036000773, %v334_v7  ;;  %v854_v22 = vmul.f32 0.10936069, %v334_v7 }
  0xe5   : > { %v1853_v4 = vadd.f32 %v1759_v62, %v1492_v60  ;;  %v2575_v33 = vmul.f32 0.0010283801, %v324_v39  ;;  %v496_v52 = vrot.slane %v416_v25, 1  ;;  %v856_v56 = vmul.f32 0.10936069, %v336_v3 }
  0xe6   : > { %v2780_v1 = vmul.f32 0.007598758, %v6206_v55  ;;  %v696_v26 = vrot.slane %v616_v6, 2  ;;  %v1053_v48 = vrot.slane %v854_v22, 3  ;;  %v1215_v49 = vmul.f32 0.21300554, %v334_v7 }
  0xe7   : > { %v2054_v18 = vadd.f32 %v1960_v51, %v1853_v4  ;;  %v576_v34 = vadd.f32 %v496_v52, %v376_v5  ;;  %v1054_v13 = vrot.slane %v856_v56, 3  ;;  %v1217_v29 = vmul.f32 0.21300554, %v336_v3 }
  0xe8   : > { %2837 = vrot.lane.b32.xlu1 %v2780_v1, %s5666_s18  ;;  %v2455_v23 = vrot.slane %v2375_v38, 1  ;;  %v1414_v11 = vrot.slane %v1215_v49, 4  ;;  %v1576_v9 = vmul.f32 0.26601171, %v334_v7  ;;  %v1578_v50 = vmul.f32 0.26601171, %v336_v3 }
  0xe9   : > { %v2255_v10 = vadd.f32 %v2161_v24, %v2054_v18  ;;  %v776_v53 = vadd.f32 %v696_v26, %v576_v34  ;;  %v1055_v39 = vsel %vm938_vm0, %v1053_v48, %v1054_v13  ;;  %v1415_v17 = vrot.slane %v1217_v29, 4  ;;  %v5649_v26 = vld [vmem:[%s5712_s14 + $0x50] sm:$0xff] }
  0xea   : > { %v1775_v36 = vrot.slane %v1576_v9, 5  ;;  %v1776_v31 = vrot.slane %v1578_v50, 5  ;;  %v1976_v54 = vrot.slane %v1215_v49, 6  ;;  %v1977_v2 = vrot.slane %v1217_v29, 6 }
  0xeb   : > { %v2335_v14 = vadd.f32 %v2295_v16, %v2255_v10  ;;  %v2655_v62 = vrot.slane %v2575_v33, 2  ;;  %v1137_v51 = vadd.f32 %v1055_v39, %v776_v53  ;;  %v1416_v60 = vsel %vm1299_vm1, %v1414_v11, %v1415_v17  ;;  %v5648_v16 = vld [vmem:[%s5712_s14 + $0x40] sm:$0xff] }
  0xec   : > { %v1777_v5 = vsel %vm1660_vm2, %v1775_v36, %v1776_v31  ;;  %v2177_v7 = vrot.slane %v854_v22, 7  ;;  %v2178_v25 = vrot.slane %v856_v56, 7  ;;  %v2381_v24 = vmul.f32 0.007598758, %v336_v3 }
  0xed   : > { %v239_v38 = vadd.f32 1.0, %v5824_v42  ;;  %v2535_v6 = vadd.f32 %v2455_v23, %v2335_v14  ;;  %v1498_v4 = vadd.f32 %v1416_v60, %v1137_v51  ;;  %v1978_v52 = vsel %vm1861_vm3, %v1976_v54, %v1977_v2 }
  0xee   : > { %v2301_v1 = vmul.f32 0.036000773, %v336_v3  ;;  %v330_v33 = vmul.f32 %v5648_v16, %v5874_v37  ;;  %v332_v48 = vmul.f32 %v5649_v26, %v5877_v43  ;;  %v2461_v56 = vrot.slane %v2381_v24, 1 }
  0xef   : > { %v6220_v49 = vadd.f32 %v2655_v62, %v2535_v6  ;;  %v1859_v22 = vadd.f32 %v1777_v5, %v1498_v4  ;;  %v2581_v18 = vmul.f32 0.0010283801, %v336_v3  ;;  %v2179_v42 = vsel %vm2062_vm4, %v2177_v7, %v2178_v25 }
  0xf0   : > { %v374_v34 = vmul.f32 0.0010283801, %v330_v33  ;;  %v414_v35 = vmul.f32 0.007598758, %v330_v33  ;;  %v614_v13 = vmul.f32 0.036000773, %v330_v33  ;;  %5628 = vrcp.f32 %v6198_v20 }
  0xf1   : > { %v2779_v29 = vmul.f32 0.007598758, %v6220_v49  ;;  %v2060_v23 = vadd.f32 %v1978_v52, %v1859_v22  ;;  %v850_v11 = vmul.f32 0.10936069, %v330_v33  ;;  %v852_v9 = vmul.f32 0.10936069, %v332_v48 }
  0xf2   : > { %v494_v50 = vrot.slane %v414_v35, 1  ;;  %v694_v37 = vrot.slane %v614_v13, 2  ;;  %v1211_v10 = vmul.f32 0.21300554, %v330_v33  ;;  %v1213_v53 = vmul.f32 0.21300554, %v332_v48 }
  0xf3   : > { %2835 = vrot.lane.b32.xlu0 %v2779_v29, %s5666_s18  ;;  %v2261_v43 = vadd.f32 %v2179_v42, %v2060_v23  ;;  %v1047_v39 = vrot.slane %v850_v11, 3  ;;  %v1048_v17 = vrot.slane %v852_v9, 3  ;;  %v1572_v3 = vmul.f32 0.26601171, %v330_v33 }
  0xf4   : > { %v574_v36 = vadd.f32 %v494_v50, %v374_v34  ;;  %v1408_v31 = vrot.slane %v1211_v10, 4  ;;  %v1409_v54 = vrot.slane %v1213_v53, 4  ;;  %v1574_v2 = vmul.f32 0.26601171, %v332_v48 }
  0xf5   : > { %v2341_v14 = vadd.f32 %v2301_v1, %v2261_v43  ;;  %v2661_v62 = vrot.slane %v2581_v18, 2  ;;  %v1049_v51 = vsel %vm938_vm0, %v1047_v39, %v1048_v17  ;;  %v1769_v60 = vrot.slane %v1572_v3, 5 }
  0xf6   : > { %v241_v5 = vadd.f32 1.0, %v5829_v46  ;;  %v774_v7 = vadd.f32 %v694_v37, %v574_v36  ;;  %v1770_v25 = vrot.slane %v1574_v2, 5  ;;  %v1410_v6 = vsel %vm1299_vm1, %v1408_v31, %v1409_v54  ;;  %v6232_v46 = vpop.eup %5626 }
  0xf7   : > { %v2541_v24 = vadd.f32 %v2461_v56, %v2341_v14  ;;  %v1970_v4 = vrot.slane %v1211_v10, 6  ;;  %v1971_v52 = vrot.slane %v1213_v53, 6  ;;  %5630 = vrcp.f32 %v239_v38 }
  0xf8   : > { %v1135_v16 = vadd.f32 %v1049_v51, %v774_v7  ;;  %v2171_v33 = vrot.slane %v850_v11, 7  ;;  %v2379_v26 = vmul.f32 0.007598758, %v332_v48  ;;  %v1771_v22 = vsel %vm1660_vm2, %v1769_v60, %v1770_v25 }
  0xf9   : > { %v6229_v1 = vadd.f32 %v2661_v62, %v2541_v24  ;;  %v2172_v18 = vrot.slane %v852_v9, 7  ;;  %v2579_v42 = vmul.f32 0.0010283801, %v332_v48  ;;  %5632 = vrcp.f32 %v241_v5 }
  0xfa   : > { %v1496_v20 = vadd.f32 %v1410_v6, %v1135_v16  ;;  %v2892_v56 = vmul.f32 0.036000773, %v6144_v63  ;;  %v6236_v34 = vmul.f32 0.036000773, %v6161_v61  ;;  %v1972_v35 = vsel %vm1861_vm3, %v1970_v4, %v1971_v52 }
  0xfb   : > { %v2782_v38 = vmul.f32 0.007598758, %v6229_v1  ;;  %v2299_v13 = vmul.f32 0.036000773, %v332_v48  ;;  %v2894_v29 = vmul.f32 0.036000773, %v6172_v44  ;;  %v2173_v37 = vsel %vm2062_vm4, %v2171_v33, %v2172_v18 }
  0xfc   : > { %v1857_v23 = vadd.f32 %v1771_v22, %v1496_v20  ;;  %v2459_v11 = vrot.slane %v2379_v26, 1  ;;  %v2659_v9 = vrot.slane %v2579_v42, 2  ;;  %v6242_v50 = vmul.f32 0.036000773, %v6190_v47 }
  0xfd   : > { %2841 = vrot.lane.b32.xlu1 %v2782_v38, %s5666_s18  ;;  %v339_v10 = vmul.f32 0.0010283801, %v5836_v59  ;;  %v379_v53 = vmul.f32 0.007598758, %v5836_v59  ;;  %v579_v43 = vmul.f32 0.036000773, %v5836_v59  ;;  %v6257_v33 = vpop.eup %5628 }
  0xfe   : > { %v2058_v39 = vadd.f32 %v1972_v35, %v1857_v23  ;;  %v779_v48 = vmul.f32 0.10936069, %v5836_v59  ;;  %v781_v17 = vmul.f32 0.10936069, %v5856_v15  ;;  %v1140_v3 = vmul.f32 0.21300554, %v5836_v59 }
  0xff   : > { %v459_v36 = vrot.slane %v379_v53, 1  ;;  %v659_v31 = vrot.slane %v579_v43, 2  ;;  %v1142_v54 = vmul.f32 0.21300554, %v5856_v15  ;;  %v1501_v2 = vmul.f32 0.26601171, %v5836_v59 }
 0x100   : > { %v2259_v14 = vadd.f32 %v2173_v37, %v2058_v39  ;;  %v942_v62 = vrot.slane %v779_v48, 3  ;;  %v943_v51 = vrot.slane %v781_v17, 3  ;;  %v1303_v60 = vrot.slane %v1140_v3, 4 }
 0x101   : > { %2941 = vrot.lane.b32.xlu1 %v2892_v56, %s5667_s19  ;;  %v539_v5 = vadd.f32 %v459_v36, %v339_v10  ;;  %v1304_v7 = vrot.slane %v1142_v54, 4  ;;  %v1503_v25 = vmul.f32 0.26601171, %v5856_v15  ;;  %v1664_v24 = vrot.slane %v1501_v2, 5 }
 0x102   : > { %v2339_v6 = vadd.f32 %v2299_v13, %v2259_v14  ;;  %v944_v4 = vsel %vm938_vm0, %v942_v62, %v943_v51  ;;  %v1865_v52 = vrot.slane %v1140_v3, 6  ;;  %v1866_v16 = vrot.slane %v1142_v54, 6 }
 0x103   : > { %v2898_v26 = vmul.f32 0.036000773, %v6026_v21  ;;  %v6261_v22 = vmul.f32 0.036000773, %v5998_v32  ;;  %v739_v18 = vadd.f32 %v659_v31, %v539_v5  ;;  %v1665_v42 = vrot.slane %v1503_v25, 5 }
 0x104   : > { %v2539_v20 = vadd.f32 %v2459_v11, %v2339_v6  ;;  %v1305_v56 = vsel %vm1299_vm1, %v1303_v60, %v1304_v7  ;;  %v2066_v38 = vrot.slane %v779_v48, 7  ;;  %v2067_v35 = vrot.slane %v781_v17, 7  ;;  %v6264_v23 = vpop.eup %5630 }
 0x105   : > { %2945 = vrot.lane.b32.xlu1 %v2894_v29, %s5667_s19  ;;  %v2900_v13 = vmul.f32 0.036000773, %v6206_v55  ;;  %v6269_v37 = vmul.f32 0.036000773, %v6220_v49  ;;  %v2902_v10 = vmul.f32 0.036000773, %v6229_v1  ;;  %v1100_v53 = vadd.f32 %v944_v4, %v739_v18 }
 0x106   : > { %v6272_v43 = vadd.f32 %v2659_v9, %v2539_v20  ;;  %v1666_v11 = vsel %vm1660_vm2, %v1664_v24, %v1665_v42  ;;  %v1867_v39 = vsel %vm1861_vm3, %v1865_v52, %v1866_v16  ;;  %v2344_v48 = vmul.f32 0.007598758, %v5856_v15  ;;  %v6277_v17 = vpop.eup %5632 }
 0x107   : > { %v1461_v3 = vadd.f32 %v1305_v56, %v1100_v53  ;;  %v2264_v29 = vmul.f32 0.036000773, %v5856_v15  ;;  %v341_v36 = vmul.f32 0.0010283801, %v5868_v57  ;;  %v381_v31 = vmul.f32 0.007598758, %v5868_v57 }
 0x108   : > { %v2781_v54 = vmul.f32 0.007598758, %v6272_v43  ;;  %v2068_v9 = vsel %vm2062_vm4, %v2066_v38, %v2067_v35  ;;  %v2544_v2 = vmul.f32 0.0010283801, %v5856_v15  ;;  %v581_v14 = vmul.f32 0.036000773, %v5868_v57 }
 0x109   : > { %2953 = vrot.lane.b32.xlu1 %v2898_v26, %s5667_s19  ;;  %v1822_v62 = vadd.f32 %v1666_v11, %v1461_v3  ;;  %v461_v51 = vrot.slane %v381_v31, 1  ;;  %v783_v60 = vmul.f32 0.10936069, %v5868_v57  ;;  %v785_v5 = vmul.f32 0.10936069, %v6186_v58 }
 0x10a   : > { %2839 = vrot.lane.b32.xlu0 %v2781_v54, %s5666_s18  ;;  %v2424_v7 = vrot.slane %v2344_v48, 1  ;;  %v661_v25 = vrot.slane %v581_v14, 2  ;;  %v1144_v24 = vmul.f32 0.21300554, %v5868_v57  ;;  %v1146_v6 = vmul.f32 0.21300554, %v6186_v58 }
 0x10b   : > { %v2023_v4 = vadd.f32 %v1867_v39, %v1822_v62  ;;  %v541_v52 = vadd.f32 %v461_v51, %v341_v36  ;;  %v948_v16 = vrot.slane %v783_v60, 3  ;;  %v949_v18 = vrot.slane %v785_v5, 3 }
 0x10c   : > { %v1309_v42 = vrot.slane %v1144_v24, 4  ;;  %v1310_v26 = vrot.slane %v1146_v6, 4  ;;  %v1505_v20 = vmul.f32 0.26601171, %v5868_v57  ;;  %v1507_v56 = vmul.f32 0.26601171, %v6186_v58 }
 0x10d   : > { %2957 = vrot.lane.b32.xlu1 %v2900_v13, %s5667_s19  ;;  %v2224_v38 = vadd.f32 %v2068_v9, %v2023_v4  ;;  %v741_v35 = vadd.f32 %v661_v25, %v541_v52  ;;  %v950_v53 = vsel %vm938_vm0, %v948_v16, %v949_v18  ;;  %v1871_v11 = vrot.slane %v1144_v24, 6 }
 0x10e   : > { %2939 = vrot.lane.b32.xlu0 %v6236_v34, %s5667_s19  ;;  %v1311_v39 = vsel %vm1299_vm1, %v1309_v42, %v1310_v26  ;;  %v1670_v48 = vrot.slane %v1505_v20, 5  ;;  %v1671_v3 = vrot.slane %v1507_v56, 5  ;;  %v1872_v36 = vrot.slane %v1146_v6, 6 }
 0x10f   : > { %v2304_v31 = vadd.f32 %v2264_v29, %v2224_v38  ;;  %v2624_v54 = vrot.slane %v2544_v2, 2  ;;  %v6300_v14 = vmul.f32 0.10936069, %v6069_v8  ;;  %v1102_v62 = vadd.f32 %v950_v53, %v741_v35 }
 0x110   : > { %v1672_v13 = vsel %vm1660_vm2, %v1670_v48, %v1671_v3  ;;  %v2072_v9 = vrot.slane %v783_v60, 7  ;;  %v2073_v51 = vrot.slane %v785_v5, 7  ;;  %v2346_v25 = vmul.f32 0.007598758, %v6186_v58 }
 0x111   : > { %9765 = vst [vmem:[#allocation11_spill] sm:$0xff] %v6300_v14  ;;  %2961 = vrot.lane.b32.xlu1 %v2902_v10, %s5667_s19  ;;  %v2901_v34 = vmul.f32 0.036000773, %v6272_v43  ;;  %v2504_v24 = vadd.f32 %v2424_v7, %v2304_v31  ;;  %v1463_v4 = vadd.f32 %v1311_v39, %v1102_v62  ;;  %v2546_v6 = vmul.f32 0.0010283801, %v6186_v58 }
 0x112   : > { %2943 = vrot.lane.b32.xlu0 %v6242_v50, %s5667_s19  ;;  %v1873_v29 = vsel %vm1861_vm3, %v1871_v11, %v1872_v36  ;;  %v2266_v2 = vmul.f32 0.036000773, %v6186_v58  ;;  %v2426_v52 = vrot.slane %v2346_v25, 1  ;;  %v343_v60 = vmul.f32 0.0010283801, %v6232_v46 }
 0x113   : > { %v6312_v5 = vadd.f32 %v2624_v54, %v2504_v24  ;;  %v1824_v16 = vadd.f32 %v1672_v13, %v1463_v4  ;;  %v2626_v10 = vrot.slane %v2546_v6, 2  ;;  %v383_v18 = vmul.f32 0.007598758, %v6232_v46 }
 0x114   : > { %v2074_v7 = vsel %vm2062_vm4, %v2072_v9, %v2073_v51  ;;  %v583_v42 = vmul.f32 0.036000773, %v6232_v46  ;;  %v787_v26 = vmul.f32 0.10936069, %v6232_v46  ;;  %v789_v50 = vmul.f32 0.10936069, %v6257_v33 }
 0x115   : > { %9766 = vst [vmem:[#allocation12_spill] sm:$0xff] %v6312_v5  ;;  %v6320_v20 = vmul.f32 0.10936069, %v6312_v5  ;;  %v2025_v56 = vadd.f32 %v1873_v29, %v1824_v16  ;;  %v463_v38 = vrot.slane %v383_v18, 1  ;;  %v1148_v35 = vmul.f32 0.21300554, %v6232_v46 }
 0x116   : > { %2951 = vrot.lane.b32.xlu0 %v6261_v22, %s5667_s19  ;;  %v663_v53 = vrot.slane %v583_v42, 2  ;;  %v954_v11 = vrot.slane %v787_v26, 3  ;;  %v955_v39 = vrot.slane %v789_v50, 3  ;;  %v1150_v48 = vmul.f32 0.21300554, %v6257_v33 }
 0x117   : > { %9767 = vst [vmem:[#allocation13_spill] sm:$0xff] %v6320_v20  ;;  %3085 = vrot.lane.b32.xlu1 %v6320_v20, %s5668_s20  ;;  %v2226_v3 = vadd.f32 %v2074_v7, %v2025_v56  ;;  %v543_v36 = vadd.f32 %v463_v38, %v343_v60  ;;  %v1315_v31 = vrot.slane %v1148_v35, 4  ;;  %v1509_v54 = vmul.f32 0.26601171, %v6232_v46 }
 0x118   : > { %v956_v62 = vsel %vm938_vm0, %v954_v11, %v955_v39  ;;  %v1316_v13 = vrot.slane %v1150_v48, 4  ;;  %v1511_v9 = vmul.f32 0.26601171, %v6257_v33  ;;  %v1877_v22 = vrot.slane %v1148_v35, 6 }
 0x119   : > { %v2306_v51 = vadd.f32 %v2266_v2, %v2226_v3  ;;  %v743_v25 = vadd.f32 %v663_v53, %v543_v36  ;;  %v1676_v24 = vrot.slane %v1509_v54, 5  ;;  %v1878_v4 = vrot.slane %v1150_v48, 6 }
 0x11a   : > { %2955 = vrot.lane.b32.xlu0 %v6269_v37, %s5667_s19  ;;  %v1317_v6 = vsel %vm1299_vm1, %v1315_v31, %v1316_v13  ;;  %v1677_v29 = vrot.slane %v1511_v9, 5  ;;  %v2078_v60 = vrot.slane %v787_v26, 7  ;;  %v2079_v16 = vrot.slane %v789_v50, 7 }
 0x11b   : > { %v2506_v18 = vadd.f32 %v2426_v52, %v2306_v51  ;;  %v6335_v7 = vmul.f32 0.10936069, %v6119_v40  ;;  %v1104_v42 = vadd.f32 %v956_v62, %v743_v25  ;;  %v1879_v56 = vsel %vm1861_vm3, %v1877_v22, %v1878_v4 }
 0x11c   : > { %v1678_v2 = vsel %vm1660_vm2, %v1676_v24, %v1677_v29  ;;  %v2268_v38 = vmul.f32 0.036000773, %v6257_v33  ;;  %v2348_v35 = vmul.f32 0.007598758, %v6257_v33  ;;  %v2548_v37 = vmul.f32 0.0010283801, %v6257_v33 }
 0x11d   : > { %9768 = vst [vmem:[#allocation14_spill] sm:$0xff] %v6335_v7  ;;  %v6342_v53 = vadd.f32 %v2626_v10, %v2506_v18  ;;  %v1465_v11 = vadd.f32 %v1317_v6, %v1104_v42  ;;  %v6345_v26 = vmul.f32 0.10936069, %v6051_v0  ;;  %v345_v52 = vmul.f32 0.0010283801, %v6264_v23 }
 0x11e   : > { %2959 = vrot.lane.b32.xlu0 %v2901_v34, %s5667_s19  ;;  %v2080_v50 = vsel %vm2062_vm4, %v2078_v60, %v2079_v16  ;;  %v2428_v39 = vrot.slane %v2348_v35, 1  ;;  %v385_v48 = vmul.f32 0.007598758, %v6264_v23  ;;  %v585_v3 = vmul.f32 0.036000773, %v6264_v23 }
 0x11f   : > { %9769 = vst [vmem:[#allocation15_spill] sm:$0xff] %v6342_v53  ;;  %9770 = vst [vmem:[#allocation16_spill] sm:$0xff] %v6345_v26  ;;  %v6353_v36 = vmul.f32 0.10936069, %v6342_v53  ;;  %v1826_v10 = vadd.f32 %v1678_v2, %v1465_v11  ;;  %v791_v31 = vmul.f32 0.10936069, %v6264_v23 }
 0x120   : > { %v793_v54 = vmul.f32 0.10936069, %v6277_v17  ;;  %v465_v62 = vrot.slane %v385_v48, 1  ;;  %v665_v13 = vrot.slane %v585_v3, 2  ;;  %v1152_v9 = vmul.f32 0.21300554, %v6264_v23 }
 0x121   : > { %9771 = vst [vmem:[#allocation17_spill] sm:$0xff] %v6353_v36  ;;  %v1154_v34 = vmul.f32 0.21300554, %v6277_v17  ;;  %3089 = vrot.lane.b32.xlu1 %v6353_v36, %s5668_s20  ;;  %v2027_v22 = vadd.f32 %v1879_v56, %v1826_v10  ;;  %v960_v51 = vrot.slane %v791_v31, 3  ;;  %v1513_v24 = vmul.f32 0.26601171, %v6264_v23 }
 0x122   : > { %v961_v25 = vrot.slane %v793_v54, 3  ;;  %3083 = vrot.lane.b32.xlu0 %v6300_v14, %s5668_s20  ;;  %v545_v4 = vadd.f32 %v465_v62, %v345_v52  ;;  %v1321_v6 = vrot.slane %v1152_v9, 4  ;;  %v1515_v60 = vmul.f32 0.26601171, %v6277_v17  ;;  %v6368_v62 = vld [vmem:[%s5712_s14 + $0x8] sm:$0xff] }
 0x123   : > { %v1322_v29 = vrot.slane %v1154_v34, 4  ;;  %v2228_v16 = vadd.f32 %v2080_v50, %v2027_v22  ;;  %v1682_v42 = vrot.slane %v1513_v24, 5  ;;  %v1883_v2 = vrot.slane %v1152_v9, 6  ;;  %v6477_v53 = vld [vmem:[%s5712_s14 + $0x68] sm:$0xff] }
 0x124   : > { %v962_v18 = vsel %vm938_vm0, %v960_v51, %v961_v25  ;;  %v2628_v35 = vrot.slane %v2548_v37, 2  ;;  %v745_v56 = vadd.f32 %v665_v13, %v545_v4  ;;  %v1683_v11 = vrot.slane %v1515_v60, 5 }
 0x125   : > { %v1884_v48 = vrot.slane %v1154_v34, 6  ;;  %v2308_v3 = vadd.f32 %v2268_v38, %v2228_v16  ;;  %v1323_v10 = vsel %vm1299_vm1, %v1321_v6, %v1322_v29  ;;  %v2084_v36 = vrot.slane %v791_v31, 7 }
 0x126   : > { %v2085_v52 = vrot.slane %v793_v54, 7  ;;  %3087 = vrot.lane.b32.xlu0 %v6335_v7, %s5668_s20  ;;  %v1106_v50 = vadd.f32 %v962_v18, %v745_v56  ;;  %v1684_v22 = vsel %vm1660_vm2, %v1682_v42, %v1683_v11  ;;  %v2270_v9 = vmul.f32 0.036000773, %v6277_v17  ;;  %v6379_v54 = vld [vmem:[%s5712_s14 + $0x18] sm:$0xff] }
 0x127   : > { %v2350_v37 = vmul.f32 0.007598758, %v6277_v17  ;;  %v2508_v13 = vadd.f32 %v2428_v39, %v2308_v3  ;;  %v1885_v34 = vsel %vm1861_vm3, %v1883_v2, %v1884_v48  ;;  %v2550_v31 = vmul.f32 0.0010283801, %v6277_v17 }
 0x128   : > { %v2086_v38 = vsel %vm2062_vm4, %v2084_v36, %v2085_v52  ;;  %v1467_v51 = vadd.f32 %v1323_v10, %v1106_v50  ;;  %v6382_v25 = vmul.f32 0.10936069, %v6097_v12  ;;  %v347_v24 = vmul.f32 0.0010283801, %v6368_v62 }
 0x129   : > { %v387_v4 = vmul.f32 0.007598758, %v6368_v62  ;;  %v6386_v6 = vadd.f32 %v2628_v35, %v2508_v13  ;;  %v2430_v29 = vrot.slane %v2350_v37, 1  ;;  %v587_v39 = vmul.f32 0.036000773, %v6368_v62 }
 0x12a   : > { %9772 = vst [vmem:[#allocation18_spill] sm:$0xff] %v6382_v25  ;;  %v795_v60 = vmul.f32 0.10936069, %v6368_v62  ;;  %3091 = vrot.lane.b32.xlu0 %v6345_v26, %s5668_s20  ;;  %v1828_v36 = vadd.f32 %v1684_v22, %v1467_v51  ;;  %v797_v18 = vmul.f32 0.10936069, %v6379_v54  ;;  %v2630_v26 = vrot.slane %v2550_v31, 2 }
 0x12b   : > { %9773 = vst [vmem:[#allocation19_spill] sm:$0xff] %v6386_v6  ;;  %v467_v16 = vrot.slane %v387_v4, 1  ;;  %v1156_v42 = vmul.f32 0.21300554, %v6368_v62  ;;  %v6395_v2 = vmul.f32 0.10936069, %v6386_v6 }
 0x12c   : > { %v667_v56 = vrot.slane %v587_v39, 2  ;;  %v966_v35 = vrot.slane %v795_v60, 3  ;;  %v1158_v11 = vmul.f32 0.21300554, %v6379_v54  ;;  %v2029_v48 = vadd.f32 %v1885_v34, %v1828_v36  ;;  %v6407_v6 = vld [vmem:[%s5712_s14 + $0x28] sm:$0xff] }
 0x12d   : > { %9774 = vst [vmem:[#allocation20_spill] sm:$0xff] %v6395_v2  ;;  %v547_v3 = vadd.f32 %v467_v16, %v347_v24  ;;  %v967_v10 = vrot.slane %v797_v18, 3  ;;  %v1327_v52 = vrot.slane %v1156_v42, 4  ;;  %3093 = vrot.lane.b32.xlu1 %v6395_v2, %s5668_s20  ;;  %v1517_v22 = vmul.f32 0.26601171, %v6368_v62 }
 0x12e   : > { %v1328_v50 = vrot.slane %v1158_v11, 4  ;;  %v1519_v37 = vmul.f32 0.26601171, %v6379_v54  ;;  %v1889_v13 = vrot.slane %v1156_v42, 6  ;;  %v2230_v51 = vadd.f32 %v2086_v38, %v2029_v48  ;;  %3095 = vrot.lane.b32.xlu0 %v6382_v25, %s5668_s20 }
 0x12f   : > { %v747_v4 = vadd.f32 %v667_v56, %v547_v3  ;;  %v968_v34 = vsel %vm938_vm0, %v966_v35, %v967_v10  ;;  %v1890_v24 = vrot.slane %v1158_v11, 6  ;;  %v1688_v36 = vrot.slane %v1517_v22, 5 }
 0x130   : > { %v1329_v39 = vsel %vm1299_vm1, %v1327_v52, %v1328_v50  ;;  %v1689_v16 = vrot.slane %v1519_v37, 5  ;;  %v2090_v2 = vrot.slane %v795_v60, 7  ;;  %v2310_v20 = vadd.f32 %v2270_v9, %v2230_v51  ;;  %v6418_v9 = vld [vmem:[%s5712_s14 + $0x38] sm:$0xff] }
 0x131   : > { %v1108_v7 = vadd.f32 %v968_v34, %v747_v4  ;;  %v2091_v14 = vrot.slane %v797_v18, 7  ;;  %v1891_v42 = vsel %vm1861_vm3, %v1889_v13, %v1890_v24  ;;  %v2352_v56 = vmul.f32 0.007598758, %v6379_v54 }
 0x132   : > { %v1690_v38 = vsel %vm1660_vm2, %v1688_v36, %v1689_v16  ;;  %v2552_v35 = vmul.f32 0.0010283801, %v6379_v54  ;;  %v2510_v11 = vadd.f32 %v2430_v29, %v2310_v20  ;;  %v2272_v3 = vmul.f32 0.036000773, %v6379_v54 }
 0x133   : > { %v1469_v48 = vadd.f32 %v1329_v39, %v1108_v7  ;;  %v6415_v60 = vmul.f32 0.10936069, %v5778_v28  ;;  %v2092_v31 = vsel %vm2062_vm4, %v2090_v2, %v2091_v14  ;;  %v2432_v18 = vrot.slane %v2352_v56, 1 }
 0x134   : > { %v349_v10 = vmul.f32 0.0010283801, %v6407_v6  ;;  %v389_v52 = vmul.f32 0.007598758, %v6407_v6  ;;  %v6423_v50 = vadd.f32 %v2630_v26, %v2510_v11  ;;  %v589_v20 = vmul.f32 0.036000773, %v6407_v6 }
 0x135   : > { %9775 = vst [vmem:[#allocation21_spill] sm:$0xff] %v6415_v60  ;;  %v1830_v22 = vadd.f32 %v1690_v38, %v1469_v48  ;;  %3099 = vrot.lane.b32.xlu0 %v6415_v60, %s5668_s20  ;;  %v799_v7 = vmul.f32 0.10936069, %v6407_v6  ;;  %v2632_v29 = vrot.slane %v2552_v35, 2  ;;  %v801_v13 = vmul.f32 0.10936069, %v6418_v9 }
 0x136   : > { %9776 = vst [vmem:[#allocation22_spill] sm:$0xff] %v6423_v50  ;;  %v469_v37 = vrot.slane %v389_v52, 1  ;;  %v1160_v14 = vmul.f32 0.21300554, %v6407_v6  ;;  %v6432_v2 = vmul.f32 0.10936069, %v6423_v50 }
 0x137   : > { %v2031_v51 = vadd.f32 %v1891_v42, %v1830_v22  ;;  %v669_v26 = vrot.slane %v589_v20, 2  ;;  %v972_v4 = vrot.slane %v799_v7, 3  ;;  %v973_v24 = vrot.slane %v801_v13, 3 }
 0x138   : > { %9777 = vst [vmem:[#allocation23_spill] sm:$0xff] %v6432_v2  ;;  %v549_v34 = vadd.f32 %v469_v37, %v349_v10  ;;  %v1162_v39 = vmul.f32 0.21300554, %v6418_v9  ;;  %v1333_v36 = vrot.slane %v1160_v14, 4  ;;  %3097 = vrot.lane.b32.xlu1 %v6432_v2, %s5668_s20  ;;  %v1521_v38 = vmul.f32 0.26601171, %v6407_v6 }
 0x139   : > { %v2232_v16 = vadd.f32 %v2092_v31, %v2031_v51  ;;  %v1523_v56 = vmul.f32 0.26601171, %v6418_v9  ;;  %v1895_v35 = vrot.slane %v1160_v14, 6  ;;  %v974_v42 = vsel %vm938_vm0, %v972_v4, %v973_v24  ;;  %v6442_v31 = vld [vmem:[%s5712_s14 + $0x48] sm:$0xff]  ;;  %v6448_v4 = vld [vmem:[%s5712_s14 + $0x58] sm:$0xff] }
 0x13a   : > { %v749_v11 = vadd.f32 %v669_v26, %v549_v34  ;;  %v1334_v48 = vrot.slane %v1162_v39, 4  ;;  %v1896_v10 = vrot.slane %v1162_v39, 6  ;;  %v1694_v22 = vrot.slane %v1521_v38, 5 }
 0x13b   : > { %v2312_v52 = vadd.f32 %v2272_v3, %v2232_v16  ;;  %v1695_v20 = vrot.slane %v1523_v56, 5  ;;  %v2096_v37 = vrot.slane %v799_v7, 7  ;;  %v2097_v25 = vrot.slane %v801_v13, 7 }
 0x13c   : > { %v1110_v60 = vadd.f32 %v974_v42, %v749_v11  ;;  %v1335_v2 = vsel %vm1299_vm1, %v1333_v36, %v1334_v48  ;;  %v1897_v14 = vsel %vm1861_vm3, %v1895_v35, %v1896_v10  ;;  %v2354_v26 = vmul.f32 0.007598758, %v6418_v9 }
 0x13d   : > { %v2512_v51 = vadd.f32 %v2432_v18, %v2312_v52  ;;  %v1696_v50 = vsel %vm1660_vm2, %v1694_v22, %v1695_v20  ;;  %v2274_v3 = vmul.f32 0.036000773, %v6418_v9  ;;  %v2554_v7 = vmul.f32 0.0010283801, %v6418_v9 }
 0x13e   : > { %v1471_v34 = vadd.f32 %v1335_v2, %v1110_v60  ;;  %v6453_v24 = vmul.f32 0.10936069, %v5814_v30  ;;  %v2098_v18 = vsel %vm2062_vm4, %v2096_v37, %v2097_v25  ;;  %v351_v39 = vmul.f32 0.0010283801, %v6442_v31 }
 0x13f   : > { %v6455_v13 = vadd.f32 %v2632_v29, %v2512_v51  ;;  %v391_v36 = vmul.f32 0.007598758, %v6442_v31  ;;  %v2434_v38 = vrot.slane %v2354_v26, 1  ;;  %v591_v60 = vmul.f32 0.036000773, %v6442_v31 }
 0x140   : > { %9778 = vst [vmem:[#allocation24_spill] sm:$0xff] %v6453_v24  ;;  %v1832_v16 = vadd.f32 %v1696_v50, %v1471_v34  ;;  %3103 = vrot.lane.b32.xlu0 %v6453_v24, %s5668_s20  ;;  %v803_v2 = vmul.f32 0.10936069, %v6442_v31  ;;  %v2634_v29 = vrot.slane %v2554_v7, 2  ;;  %v805_v25 = vmul.f32 0.10936069, %v6448_v4 }
 0x141   : > { %9779 = vst [vmem:[#allocation25_spill] sm:$0xff] %v6455_v13  ;;  %v6465_v56 = vmul.f32 0.10936069, %v6455_v13  ;;  %v471_v35 = vrot.slane %v391_v36, 1  ;;  %v671_v42 = vrot.slane %v591_v60, 2 }
 0x142   : > { %v2033_v11 = vadd.f32 %v1897_v14, %v1832_v16  ;;  %v978_v48 = vrot.slane %v803_v2, 3  ;;  %v1164_v50 = vmul.f32 0.21300554, %v6442_v31  ;;  %v979_v52 = vrot.slane %v805_v25, 3 }
 0x143   : > { %9780 = vst [vmem:[#allocation26_spill] sm:$0xff] %v6465_v56  ;;  %3101 = vrot.lane.b32.xlu1 %v6465_v56, %s5668_s20  ;;  %v551_v10 = vadd.f32 %v471_v35, %v351_v39  ;;  %v1166_v22 = vmul.f32 0.21300554, %v6448_v4  ;;  %v1525_v20 = vmul.f32 0.26601171, %v6442_v31  ;;  %v2102_v35 = vrot.slane %v803_v2, 7 }
 0x144   : > { %v2234_v37 = vadd.f32 %v2098_v18, %v2033_v11  ;;  %v1339_v51 = vrot.slane %v1164_v50, 4  ;;  %v1527_v26 = vmul.f32 0.26601171, %v6448_v4  ;;  %v1901_v34 = vrot.slane %v1164_v50, 6  ;;  %v6487_v2 = vld [vmem:[%s5712_s14 + $0x78] sm:$0xff] }
 0x145   : > { %v751_v14 = vadd.f32 %v671_v42, %v551_v10  ;;  %v980_v7 = vsel %vm938_vm0, %v978_v48, %v979_v52  ;;  %v1340_v36 = vrot.slane %v1166_v22, 4  ;;  %v1700_v16 = vrot.slane %v1525_v20, 5 }
 0x146   : > { %v2314_v60 = vadd.f32 %v2274_v3, %v2234_v37  ;;  %v1701_v56 = vrot.slane %v1527_v26, 5  ;;  %v1902_v39 = vrot.slane %v1166_v22, 6  ;;  %v2103_v30 = vrot.slane %v805_v25, 7 }
 0x147   : > { %v1112_v24 = vadd.f32 %v980_v7, %v751_v14  ;;  %v1341_v13 = vsel %vm1299_vm1, %v1339_v51, %v1340_v36  ;;  %v2356_v42 = vmul.f32 0.007598758, %v6448_v4  ;;  %v2276_v10 = vmul.f32 0.036000773, %v6448_v4 }
 0x148   : > { %v2514_v18 = vadd.f32 %v2434_v38, %v2314_v60  ;;  %v1702_v11 = vsel %vm1660_vm2, %v1700_v16, %v1701_v56  ;;  %v1903_v48 = vsel %vm1861_vm3, %v1901_v34, %v1902_v39  ;;  %v6484_v3 = vmul.f32 0.10936069, %v5895_v19 }
 0x149   : > { %v1473_v50 = vadd.f32 %v1341_v13, %v1112_v24  ;;  %v2104_v25 = vsel %vm2062_vm4, %v2102_v35, %v2103_v30  ;;  %v353_v38 = vmul.f32 0.0010283801, %v6477_v53  ;;  %v393_v56 = vmul.f32 0.007598758, %v6477_v53 }
 0x14a   : > { %9781 = vst [vmem:[#allocation27_spill] sm:$0xff] %v6484_v3  ;;  %v6489_v52 = vadd.f32 %v2634_v29, %v2514_v18  ;;  %v2556_v24 = vmul.f32 0.0010283801, %v6448_v4  ;;  %3107 = vrot.lane.b32.xlu0 %v6484_v3, %s5668_s20  ;;  %v593_v13 = vmul.f32 0.036000773, %v6477_v53  ;;  %v2436_v29 = vrot.slane %v2356_v42, 1 }
 0x14b   : > { %v1834_v22 = vadd.f32 %v1702_v11, %v1473_v50  ;;  %v807_v20 = vmul.f32 0.10936069, %v6477_v53  ;;  %v473_v51 = vrot.slane %v393_v56, 1  ;;  %v809_v30 = vmul.f32 0.10936069, %v6487_v2 }
 0x14c   : > { %9782 = vst [vmem:[#allocation28_spill] sm:$0xff] %v6489_v52  ;;  %v6500_v37 = vmul.f32 0.10936069, %v6489_v52  ;;  %v673_v34 = vrot.slane %v593_v13, 2  ;;  %v1168_v7 = vmul.f32 0.21300554, %v6477_v53 }
 0x14d   : > { %v2035_v26 = vadd.f32 %v1903_v48, %v1834_v22  ;;  %v984_v14 = vrot.slane %v807_v20, 3  ;;  %v553_v36 = vadd.f32 %v473_v51, %v353_v38  ;;  %v985_v16 = vrot.slane %v809_v30, 3 }
 0x14e   : > { %9783 = vst [vmem:[#allocation29_spill] sm:$0xff] %v6500_v37  ;;  %3105 = vrot.lane.b32.xlu1 %v6500_v37, %s5668_s20  ;;  %v1170_v60 = vmul.f32 0.21300554, %v6487_v2  ;;  %v1529_v39 = vmul.f32 0.26601171, %v6477_v53  ;;  %v2636_v18 = vrot.slane %v2556_v24, 2 }
 0x14f   : > { %v2236_v35 = vadd.f32 %v2104_v25, %v2035_v26  ;;  %v1345_v11 = vrot.slane %v1168_v7, 4  ;;  %v1531_v42 = vmul.f32 0.26601171, %v6487_v2  ;;  %v753_v50 = vadd.f32 %v673_v34, %v553_v36 }
 0x150   : > { %v986_v48 = vsel %vm938_vm0, %v984_v14, %v985_v16  ;;  %v1346_v56 = vrot.slane %v1170_v60, 4  ;;  %v1706_v22 = vrot.slane %v1529_v39, 5  ;;  %v1907_v52 = vrot.slane %v1168_v7, 6 }
 0x151   : > { %v2316_v13 = vadd.f32 %v2276_v10, %v2236_v35  ;;  %v1707_v3 = vrot.slane %v1531_v42, 5  ;;  %v1908_v37 = vrot.slane %v1170_v60, 6  ;;  %v1114_v38 = vadd.f32 %v986_v48, %v753_v50 }
 0x152   : > { %v1347_v51 = vsel %vm1299_vm1, %v1345_v11, %v1346_v56  ;;  %v2108_v19 = vrot.slane %v807_v20, 7  ;;  %v291_v25 = vmul.f32 %v5836_v59, %v5836_v59  ;;  %v2109_v28 = vrot.slane %v809_v30, 7 }
 0x153   : > { %v2516_v24 = vadd.f32 %v2436_v29, %v2316_v13  ;;  %v1708_v26 = vsel %vm1660_vm2, %v1706_v22, %v1707_v3  ;;  %v2358_v34 = vmul.f32 0.007598758, %v6487_v2  ;;  %v1475_v14 = vadd.f32 %v1347_v51, %v1114_v38 }
 0x154   : > { %v6516_v36 = vmul.f32 0.10936069, %v5923_v27  ;;  %v293_v10 = vmul.f32 %v5856_v15, %v5856_v15  ;;  %v1909_v20 = vsel %vm1861_vm3, %v1907_v52, %v1908_v37  ;;  %v2558_v16 = vmul.f32 0.0010283801, %v6487_v2 }
 0x155   : > { %v6520_v7 = vadd.f32 %v2636_v18, %v2516_v24  ;;  %v1836_v60 = vadd.f32 %v1708_v26, %v1475_v14  ;;  %v2278_v29 = vmul.f32 0.036000773, %v6487_v2  ;;  %v355_v3 = vmul.f32 0.0010283801, %v291_v25 }
 0x156   : > { %9784 = vst [vmem:[#allocation30_spill] sm:$0xff] %v6516_v36  ;;  %3111 = vrot.lane.b32.xlu0 %v6516_v36, %s5668_s20  ;;  %v395_v30 = vmul.f32 0.007598758, %v291_v25  ;;  %v2110_v35 = vsel %vm2062_vm4, %v2108_v19, %v2109_v28  ;;  %v2438_v11 = vrot.slane %v2358_v34, 1  ;;  %v595_v18 = vmul.f32 0.036000773, %v291_v25 }
 0x157   : > { %9785 = vst [vmem:[#allocation31_spill] sm:$0xff] %v6520_v7  ;;  %v6528_v39 = vmul.f32 0.10936069, %v6520_v7  ;;  %v2037_v42 = vadd.f32 %v1909_v20, %v1836_v60  ;;  %v811_v52 = vmul.f32 0.10936069, %v291_v25  ;;  %v2638_v48 = vrot.slane %v2558_v16, 2 }
 0x158   : > { %v475_v50 = vrot.slane %v395_v30, 1  ;;  %v813_v37 = vmul.f32 0.10936069, %v293_v10  ;;  %v675_v56 = vrot.slane %v595_v18, 2  ;;  %v1172_v22 = vmul.f32 0.21300554, %v291_v25 }
 0x159   : > { %9786 = vst [vmem:[#allocation32_spill] sm:$0xff] %v6528_v39  ;;  %3109 = vrot.lane.b32.xlu1 %v6528_v39, %s5668_s20  ;;  %v1174_v13 = vmul.f32 0.21300554, %v293_v10  ;;  %v2238_v38 = vadd.f32 %v2110_v35, %v2037_v42  ;;  %v990_v24 = vrot.slane %v811_v52, 3  ;;  %v1533_v28 = vmul.f32 0.26601171, %v291_v25 }
 0x15a   : > { %v555_v51 = vadd.f32 %v475_v50, %v355_v3  ;;  %v991_v26 = vrot.slane %v813_v37, 3  ;;  %v1351_v14 = vrot.slane %v1172_v22, 4  ;;  %v1535_v19 = vmul.f32 0.26601171, %v293_v10 }
 0x15b   : > { %v1352_v36 = vrot.slane %v1174_v13, 4  ;;  %v2318_v34 = vadd.f32 %v2278_v29, %v2238_v38  ;;  %v1913_v30 = vrot.slane %v1172_v22, 6  ;;  %v1712_v39 = vrot.slane %v1533_v28, 5 }
 0x15c   : > { %v755_v20 = vadd.f32 %v675_v56, %v555_v51  ;;  %v992_v60 = vsel %vm938_vm0, %v990_v24, %v991_v26  ;;  %v1713_v16 = vrot.slane %v1535_v19, 5  ;;  %v1914_v18 = vrot.slane %v1174_v13, 6 }
 0x15d   : > { %v1353_v7 = vsel %vm1299_vm1, %v1351_v14, %v1352_v36  ;;  %v2518_v27 = vadd.f32 %v2438_v11, %v2318_v34  ;;  %v2114_v35 = vrot.slane %v811_v52, 7  ;;  %v2115_v42 = vrot.slane %v813_v37, 7 }
 0x15e   : > { %v1116_v5 = vadd.f32 %v992_v60, %v755_v20  ;;  %v1714_v3 = vsel %vm1660_vm2, %v1712_v39, %v1713_v16  ;;  %v295_v25 = vmul.f32 %v5868_v57, %v5868_v57  ;;  %v2360_v56 = vmul.f32 0.007598758, %v293_v10 }
 0x15f   : > { %v6538_v50 = vadd.f32 %v2638_v48, %v2518_v27  ;;  %v297_v22 = vmul.f32 %v6186_v58, %v6186_v58  ;;  %v1915_v36 = vsel %vm1861_vm3, %v1913_v30, %v1914_v18  ;;  %v6544_v13 = vmul.f32 0.10936069, %v6161_v61 }
 0x160   : > { %v1477_v29 = vadd.f32 %v1353_v7, %v1116_v5  ;;  %v6548_v39 = vmul.f32 %v6232_v46, %v6232_v46  ;;  %v2280_v27 = vmul.f32 0.036000773, %v293_v10  ;;  %v2560_v37 = vmul.f32 0.0010283801, %v293_v10 }
 0x161   : > { %9787 = vst [vmem:[#allocation33_spill] sm:$0xff] %v6538_v50  ;;  %9788 = vst [vmem:[#allocation34_spill] sm:$0xff] %v6544_v13  ;;  %v6551_v11 = vmul.f32 0.10936069, %v6538_v50  ;;  %v2116_v5 = vsel %vm2062_vm4, %v2114_v35, %v2115_v42  ;;  %3115 = vrot.lane.b32.xlu0 %v6544_v13, %s5668_s20  ;;  %v357_v7 = vmul.f32 0.0010283801, %v295_v25 }
 0x162   : > { %v1838_v52 = vadd.f32 %v1714_v3, %v1477_v29  ;;  %v397_v48 = vmul.f32 0.007598758, %v295_v25  ;;  %v597_v38 = vmul.f32 0.036000773, %v295_v25  ;;  %v2440_v24 = vrot.slane %v2360_v56, 1 }
 0x163   : > { %9789 = vst [vmem:[#allocation35_spill] sm:$0xff] %v6551_v11  ;;  %3113 = vrot.lane.b32.xlu1 %v6551_v11, %s5668_s20  ;;  %v815_v26 = vmul.f32 0.10936069, %v295_v25  ;;  %v817_v14 = vmul.f32 0.10936069, %v297_v22  ;;  %v2640_v13 = vrot.slane %v2560_v37, 2  ;;  %v6566_v37 = vmul.f32 %v6264_v23, %v6264_v23 }
 0x164   : > { %v2039_v51 = vadd.f32 %v1915_v36, %v1838_v52  ;;  %v477_v28 = vrot.slane %v397_v48, 1  ;;  %v677_v19 = vrot.slane %v597_v38, 2  ;;  %v1176_v34 = vmul.f32 0.21300554, %v295_v25  ;;  %v6559_v38 = vpop.permute.xlu0 %2811 }
 0x165   : > { %v1178_v20 = vmul.f32 0.21300554, %v297_v22  ;;  %v996_v60 = vrot.slane %v815_v26, 3  ;;  %v997_v30 = vrot.slane %v817_v14, 3  ;;  %v1537_v16 = vmul.f32 0.26601171, %v295_v25 }
 0x166   : > { %v2240_v10 = vadd.f32 %v2116_v5, %v2039_v51  ;;  %v557_v18 = vadd.f32 %v477_v28, %v357_v7  ;;  %v1357_v3 = vrot.slane %v1176_v34, 4  ;;  %v1539_v42 = vmul.f32 0.26601171, %v297_v22  ;;  %9790 = vst [vmem:[#allocation36_spill] sm:$0xff] %v6559_v38 }
 0x167   : > { %v1358_v35 = vrot.slane %v1178_v20, 4  ;;  %v998_v11 = vsel %vm938_vm0, %v996_v60, %v997_v30  ;;  %v1718_v36 = vrot.slane %v1537_v16, 5  ;;  %v1919_v50 = vrot.slane %v1176_v34, 6 }
 0x168   : > { %v2320_v29 = vadd.f32 %v2280_v27, %v2240_v10  ;;  %v757_v56 = vadd.f32 %v677_v19, %v557_v18  ;;  %v1719_v52 = vrot.slane %v1539_v42, 5  ;;  %v1920_v48 = vrot.slane %v1178_v20, 6 }
 0x169   : > { %v1359_v5 = vsel %vm1299_vm1, %v1357_v3, %v1358_v35  ;;  %v2120_v51 = vrot.slane %v815_v26, 7  ;;  %v2121_v25 = vrot.slane %v817_v14, 7  ;;  %v2282_v28 = vmul.f32 0.036000773, %v297_v22  ;;  %v6587_v35 = vpop.permute.xlu0 %2815 }
 0x16a   : > { %v2520_v61 = vadd.f32 %v2440_v24, %v2320_v29  ;;  %v1118_v7 = vadd.f32 %v998_v11, %v757_v56  ;;  %v301_v27 = vmul.f32 %v6257_v33, %v6257_v33  ;;  %v1720_v34 = vsel %vm1660_vm2, %v1718_v36, %v1719_v52  ;;  %9794 = vst [vmem:[#allocation40_spill] sm:$0xff] %v6587_v35 }
 0x16b   : > { %v2362_v20 = vmul.f32 0.007598758, %v297_v22  ;;  %v6572_v24 = vmul.f32 0.10936069, %v6144_v63  ;;  %v1921_v26 = vsel %vm1861_vm3, %v1919_v50, %v1920_v48  ;;  %v359_v11 = vmul.f32 0.0010283801, %v6548_v39 }
 0x16c   : > { %v6568_v19 = vadd.f32 %v2640_v13, %v2520_v61  ;;  %v1479_v10 = vadd.f32 %v1359_v5, %v1118_v7  ;;  %v399_v14 = vmul.f32 0.007598758, %v6548_v39  ;;  %v2122_v30 = vsel %vm2062_vm4, %v2120_v51, %v2121_v25 }
 0x16d   : > { %9792 = vst [vmem:[#allocation38_spill] sm:$0xff] %v6572_v24  ;;  %v2562_v61 = vmul.f32 0.0010283801, %v297_v22  ;;  %3119 = vrot.lane.b32.xlu0 %v6572_v24, %s5668_s20  ;;  %v599_v13 = vmul.f32 0.036000773, %v6548_v39  ;;  %v2442_v42 = vrot.slane %v2362_v20, 1 }
 0x16e   : > { %9791 = vst [vmem:[#allocation37_spill] sm:$0xff] %v6568_v19  ;;  %v6578_v60 = vmul.f32 0.10936069, %v6568_v19  ;;  %v1840_v16 = vadd.f32 %v1720_v34, %v1479_v10  ;;  %v479_v18 = vrot.slane %v399_v14, 1  ;;  %v819_v3 = vmul.f32 0.10936069, %v6548_v39 }
 0x16f   : > { %v821_v50 = vmul.f32 0.10936069, %v301_v27  ;;  %v679_v29 = vrot.slane %v599_v13, 2  ;;  %v1180_v36 = vmul.f32 0.21300554, %v6548_v39 }
 0x170   : > { %9793 = vst [vmem:[#allocation39_spill] sm:$0xff] %v6578_v60  ;;  %3117 = vrot.lane.b32.xlu1 %v6578_v60, %s5668_s20  ;;  %v1182_v22 = vmul.f32 0.21300554, %v301_v27  ;;  %v2041_v56 = vadd.f32 %v1921_v26, %v1840_v16  ;;  %v559_v52 = vadd.f32 %v479_v18, %v359_v11  ;;  %v1002_v48 = vrot.slane %v819_v3, 3  ;;  %v6597_v18 = vpop.permute.xlu0 %2931 }
 0x171   : > { %v1003_v5 = vrot.slane %v821_v50, 3  ;;  %v1363_v51 = vrot.slane %v1180_v36, 4  ;;  %v1541_v7 = vmul.f32 0.26601171, %v6548_v39  ;;  %v1543_v34 = vmul.f32 0.26601171, %v301_v27 }
 0x172   : > { %v1364_v25 = vrot.slane %v1182_v22, 4  ;;  %v2242_v10 = vadd.f32 %v2122_v30, %v2041_v56  ;;  %v759_v14 = vadd.f32 %v679_v29, %v559_v52  ;;  %v1925_v60 = vrot.slane %v1180_v36, 6  ;;  %9795 = vst [vmem:[#allocation41_spill] sm:$0xff] %v6597_v18 }
 0x173   : > { %v1004_v38 = vsel %vm938_vm0, %v1002_v48, %v1003_v5  ;;  %v1724_v13 = vrot.slane %v1541_v7, 5  ;;  %v1725_v35 = vrot.slane %v1543_v34, 5  ;;  %v1926_v24 = vrot.slane %v1182_v22, 6  ;;  %v6618_v34 = vpop.permute.xlu1 %2813 }
 0x174   : > { %v1365_v20 = vsel %vm1299_vm1, %v1363_v51, %v1364_v25  ;;  %v2322_v19 = vadd.f32 %v2282_v28, %v2242_v10  ;;  %v2642_v26 = vrot.slane %v2562_v61, 2  ;;  %v1120_v11 = vadd.f32 %v1004_v38, %v759_v14  ;;  %9799 = vst [vmem:[#allocation45_spill] sm:$0xff] %v6618_v34  ;;  %v6620_v10 = vpop.permute.xlu0 %2935 }
 0x175   : > { %v6595_v16 = vmul.f32 %v6277_v17, %v6277_v17  ;;  %v1726_v39 = vsel %vm1660_vm2, %v1724_v13, %v1725_v35  ;;  %v2126_v30 = vrot.slane %v819_v3, 7  ;;  %v2127_v29 = vrot.slane %v821_v50, 7  ;;  %9800 = vst [vmem:[#allocation46_spill] sm:$0xff] %v6620_v10 }
 0x176   : > { %v2364_v56 = vmul.f32 0.007598758, %v301_v27  ;;  %v2522_v36 = vadd.f32 %v2442_v42, %v2322_v19  ;;  %v1481_v52 = vadd.f32 %v1365_v20, %v1120_v11  ;;  %v2284_v48 = vmul.f32 0.036000773, %v301_v27 }
 0x177   : > { %v1927_v5 = vsel %vm1861_vm3, %v1925_v60, %v1926_v24  ;;  %v2564_v28 = vmul.f32 0.0010283801, %v301_v27  ;;  %v6602_v38 = vmul.f32 0.10936069, %v6190_v47  ;;  %v361_v25 = vmul.f32 0.0010283801, %v6566_v37 }
 0x178   : > { %v2444_v22 = vrot.slane %v2364_v56, 1  ;;  %v6604_v61 = vadd.f32 %v2642_v26, %v2522_v36  ;;  %v1842_v51 = vadd.f32 %v1726_v39, %v1481_v52  ;;  %v401_v35 = vmul.f32 0.007598758, %v6566_v37 }
 0x179   : > { %9796 = vst [vmem:[#allocation42_spill] sm:$0xff] %v6602_v38  ;;  %v2128_v3 = vsel %vm2062_vm4, %v2126_v30, %v2127_v29  ;;  %3123 = vrot.lane.b32.xlu0 %v6602_v38, %s5668_s20  ;;  %v601_v19 = vmul.f32 0.036000773, %v6566_v37  ;;  %v823_v24 = vmul.f32 0.10936069, %v6566_v37 }
 0x17a   : > { %9797 = vst [vmem:[#allocation43_spill] sm:$0xff] %v6604_v61  ;;  %v825_v27 = vmul.f32 0.10936069, %v6595_v16  ;;  %v6615_v60 = vmul.f32 0.10936069, %v6604_v61  ;;  %v2043_v50 = vadd.f32 %v1927_v5, %v1842_v51  ;;  %v481_v42 = vrot.slane %v401_v35, 1 }
 0x17b   : > { %v1184_v7 = vmul.f32 0.21300554, %v6566_v37  ;;  %v681_v14 = vrot.slane %v601_v19, 2  ;;  %v1008_v20 = vrot.slane %v823_v24, 3  ;;  %v1186_v26 = vmul.f32 0.21300554, %v6595_v16 }
 0x17c   : > { %9798 = vst [vmem:[#allocation44_spill] sm:$0xff] %v6615_v60  ;;  %v1009_v13 = vrot.slane %v825_v27, 3  ;;  %3121 = vrot.lane.b32.xlu1 %v6615_v60, %s5668_s20  ;;  %v2244_v11 = vadd.f32 %v2128_v3, %v2043_v50  ;;  %v561_v39 = vadd.f32 %v481_v42, %v361_v25  ;;  %v1545_v29 = vmul.f32 0.26601171, %v6566_v37  ;;  %v6635_v50 = vpop.permute.xlu1 %2817 }
 0x17d   : > { %v1369_v30 = vrot.slane %v1184_v7, 4  ;;  %v1370_v36 = vrot.slane %v1186_v26, 4  ;;  %v1547_v52 = vmul.f32 0.26601171, %v6595_v16  ;;  %v2644_v51 = vrot.slane %v2564_v28, 2  ;;  %9801 = vst [vmem:[#allocation47_spill] sm:$0xff] %v6635_v50 }
 0x17e   : > { %v1010_v56 = vsel %vm938_vm0, %v1008_v20, %v1009_v13  ;;  %v2324_v5 = vadd.f32 %v2284_v48, %v2244_v11  ;;  %v761_v35 = vadd.f32 %v681_v14, %v561_v39  ;;  %v1730_v19 = vrot.slane %v1545_v29, 5  ;;  %v6639_v20 = vpop.permute.xlu0 %2827 }
 0x17f   : > { %v1371_v10 = vsel %vm1299_vm1, %v1369_v30, %v1370_v36  ;;  %v1731_v18 = vrot.slane %v1547_v52, 5  ;;  %v1931_v34 = vrot.slane %v1184_v7, 6  ;;  %v1932_v38 = vrot.slane %v1186_v26, 6  ;;  %9802 = vst [vmem:[#allocation48_spill] sm:$0xff] %v6639_v20 }
 0x180   : > { %v2524_v60 = vadd.f32 %v2444_v22, %v2324_v5  ;;  %v1122_v3 = vadd.f32 %v1010_v56, %v761_v35  ;;  %v307_v25 = vmul.f32 %v6368_v62, %v6368_v62  ;;  %v6633_v37 = vmul.f32 %v6379_v54, %v6379_v54  ;;  %v6659_v36 = vpop.permute.xlu1 %2933 }
 0x181   : > { %v1732_v48 = vsel %vm1660_vm2, %v1730_v19, %v1731_v18  ;;  %v2132_v28 = vrot.slane %v823_v24, 7  ;;  %v2133_v42 = vrot.slane %v825_v27, 7  ;;  %v2366_v14 = vmul.f32 0.007598758, %v6595_v16  ;;  %9806 = vst [vmem:[#allocation52_spill] sm:$0xff] %v6659_v36 }
 0x182   : > { %v6641_v7 = vadd.f32 %v2644_v51, %v2524_v60  ;;  %v1483_v22 = vadd.f32 %v1371_v10, %v1122_v3  ;;  %v6644_v13 = vmul.f32 0.10936069, %v6172_v44  ;;  %v1933_v62 = vsel %vm1861_vm3, %v1931_v34, %v1932_v38  ;;  %v6661_v19 = vpop.permute.xlu0 %2831 }
 0x183   : > { %v2286_v54 = vmul.f32 0.036000773, %v6595_v16  ;;  %v2446_v26 = vrot.slane %v2366_v14, 1  ;;  %v2566_v11 = vmul.f32 0.0010283801, %v6595_v16  ;;  %v2134_v10 = vsel %vm2062_vm4, %v2132_v28, %v2133_v42  ;;  %9807 = vst [vmem:[#allocation53_spill] sm:$0xff] %v6661_v19 }
 0x184   : > { %9803 = vst [vmem:[#allocation49_spill] sm:$0xff] %v6641_v7  ;;  %9804 = vst [vmem:[#allocation50_spill] sm:$0xff] %v6644_v13  ;;  %v6650_v18 = vmul.f32 0.10936069, %v6641_v7  ;;  %v1844_v24 = vadd.f32 %v1732_v48, %v1483_v22  ;;  %3127 = vrot.lane.b32.xlu0 %v6644_v13, %s5668_s20  ;;  %v363_v27 = vmul.f32 0.0010283801, %v307_v25 }
 0x185   : > { %v403_v60 = vmul.f32 0.007598758, %v307_v25  ;;  %v603_v39 = vmul.f32 0.036000773, %v307_v25  ;;  %v827_v30 = vmul.f32 0.10936069, %v307_v25 }
 0x186   : > { %9805 = vst [vmem:[#allocation51_spill] sm:$0xff] %v6650_v18  ;;  %v829_v38 = vmul.f32 0.10936069, %v6633_v37  ;;  %3125 = vrot.lane.b32.xlu1 %v6650_v18, %s5668_s20  ;;  %v2045_v34 = vadd.f32 %v1933_v62, %v1844_v24  ;;  %v1188_v29 = vmul.f32 0.21300554, %v307_v25 }
 0x187   : > { %v483_v16 = vrot.slane %v403_v60, 1  ;;  %v1190_v56 = vmul.f32 0.21300554, %v6633_v37  ;;  %v683_v52 = vrot.slane %v603_v39, 2  ;;  %v1014_v5 = vrot.slane %v827_v30, 3 }
 0x188   : > { %v1015_v51 = vrot.slane %v829_v38, 3  ;;  %v1549_v35 = vmul.f32 0.26601171, %v307_v25  ;;  %v2246_v3 = vadd.f32 %v2134_v10, %v2045_v34  ;;  %v1375_v28 = vrot.slane %v1188_v29, 4 }
 0x189   : > { %v563_v48 = vadd.f32 %v483_v16, %v363_v27  ;;  %v1376_v42 = vrot.slane %v1190_v56, 4  ;;  %v1551_v22 = vmul.f32 0.26601171, %v6633_v37  ;;  %v2646_v60 = vrot.slane %v2566_v11, 2 }
 0x18a   : > { %v1016_v14 = vsel %vm938_vm0, %v1014_v5, %v1015_v51  ;;  %v1736_v62 = vrot.slane %v1549_v35, 5  ;;  %v2326_v24 = vadd.f32 %v2286_v54, %v2246_v3  ;;  %v311_v39 = vmul.f32 %v6407_v6, %v6407_v6  ;;  %v6671_v5 = vpop.permute.xlu1 %2937  ;;  %v6677_v51 = vpop.permute.xlu0 %2947 }
 0x18b   : > { %v763_v20 = vadd.f32 %v683_v52, %v563_v48  ;;  %v1377_v36 = vsel %vm1299_vm1, %v1375_v28, %v1376_v42  ;;  %v1737_v25 = vrot.slane %v1551_v22, 5  ;;  %v1937_v50 = vrot.slane %v1188_v29, 6  ;;  %9808 = vst [vmem:[#allocation54_spill] sm:$0xff] %v6671_v5  ;;  %9810 = vst [vmem:[#allocation56_spill] sm:$0xff] %v6677_v51 }
 0x18c   : > { %v1938_v19 = vrot.slane %v1190_v56, 6  ;;  %v2526_v10 = vadd.f32 %v2446_v26, %v2326_v24  ;;  %v2368_v34 = vmul.f32 0.007598758, %v6633_v37  ;;  %v313_v16 = vmul.f32 %v6418_v9, %v6418_v9 }
 0x18d   : > { %v1124_v27 = vadd.f32 %v1016_v14, %v763_v20  ;;  %v1738_v54 = vsel %vm1660_vm2, %v1736_v62, %v1737_v25  ;;  %v2138_v11 = vrot.slane %v827_v30, 7  ;;  %v2139_v52 = vrot.slane %v829_v38, 7 }
 0x18e   : > { %v6675_v6 = vmul.f32 0.10936069, %v5956_v45  ;;  %v6679_v29 = vadd.f32 %v2646_v60, %v2526_v10  ;;  %v1939_v20 = vsel %vm1861_vm3, %v1937_v50, %v1938_v19  ;;  %v2288_v56 = vmul.f32 0.036000773, %v6633_v37  ;;  %v6690_v50 = vpop.permute.xlu0 %2803  ;;  %v6694_v24 = vpop.permute.xlu1 %2829 }
 0x18f   : > { %v1485_v26 = vadd.f32 %v1377_v36, %v1124_v27  ;;  %v2448_v35 = vrot.slane %v2368_v34, 1  ;;  %v2568_v9 = vmul.f32 0.0010283801, %v6633_v37  ;;  %v365_v3 = vmul.f32 0.0010283801, %v311_v39  ;;  %9813 = vst [vmem:[#allocation59_spill] sm:$0xff] %v6690_v50 }
 0x190   : > { %9809 = vst [vmem:[#allocation55_spill] sm:$0xff] %v6675_v6  ;;  %9811 = vst [vmem:[#allocation57_spill] sm:$0xff] %v6679_v29  ;;  %3131 = vrot.lane.b32.xlu0 %v6675_v6, %s5668_s20  ;;  %v6687_v30 = vmul.f32 0.10936069, %v6679_v29  ;;  %v405_v48 = vmul.f32 0.007598758, %v311_v39  ;;  %v2140_v28 = vsel %vm2062_vm4, %v2138_v11, %v2139_v52 }
 0x191   : > { %v1846_v38 = vadd.f32 %v1738_v54, %v1485_v26  ;;  %v605_v42 = vmul.f32 0.036000773, %v311_v39  ;;  %v831_v36 = vmul.f32 0.10936069, %v311_v39  ;;  %v833_v14 = vmul.f32 0.10936069, %v313_v16 }
 0x192   : > { %9812 = vst [vmem:[#allocation58_spill] sm:$0xff] %v6687_v30  ;;  %3129 = vrot.lane.b32.xlu1 %v6687_v30, %s5668_s20  ;;  %v485_v19 = vrot.slane %v405_v48, 1  ;;  %v1192_v22 = vmul.f32 0.21300554, %v311_v39  ;;  %v1194_v62 = vmul.f32 0.21300554, %v313_v16  ;;  %v6698_v13 = vpop.permute.xlu0 %2805 }
 0x193   : > { %v2047_v37 = vadd.f32 %v1939_v20, %v1846_v38  ;;  %9814 = vst [vmem:[#allocation60_spill] sm:$0xff] %v6694_v24  ;;  %v685_v60 = vrot.slane %v605_v42, 2  ;;  %v1020_v25 = vrot.slane %v831_v36, 3  ;;  %v1021_v10 = vrot.slane %v833_v14, 3  ;;  %9815 = vst [vmem:[#allocation61_spill] sm:$0xff] %v6698_v13 }
 0x194   : > { %v1553_v27 = vmul.f32 0.26601171, %v311_v39  ;;  %v565_v54 = vadd.f32 %v485_v19, %v365_v3  ;;  %v1381_v11 = vrot.slane %v1192_v22, 4  ;;  %v1382_v52 = vrot.slane %v1194_v62, 4 }
 0x195   : > { %v2248_v34 = vadd.f32 %v2140_v28, %v2047_v37  ;;  %v2648_v26 = vrot.slane %v2568_v9, 2  ;;  %v1022_v50 = vsel %vm938_vm0, %v1020_v25, %v1021_v10  ;;  %v1555_v51 = vmul.f32 0.26601171, %v313_v16  ;;  %v6700_v37 = vpop.permute.xlu1 %2833 }
 0x196   : > { %v1742_v5 = vrot.slane %v1553_v27, 5  ;;  %v765_v20 = vadd.f32 %v685_v60, %v565_v54  ;;  %v1943_v38 = vrot.slane %v1192_v22, 6  ;;  %v1944_v48 = vrot.slane %v1194_v62, 6  ;;  %9816 = vst [vmem:[#allocation62_spill] sm:$0xff] %v6700_v37  ;;  %v6724_v27 = vpop.permute.xlu0 %2923 }
 0x197   : > { %v2328_v30 = vadd.f32 %v2288_v56, %v2248_v34  ;;  %v1383_v18 = vsel %vm1299_vm1, %v1381_v11, %v1382_v52  ;;  %v1743_v24 = vrot.slane %v1555_v51, 5  ;;  %v2144_v42 = vrot.slane %v831_v36, 7  ;;  %9821 = vst [vmem:[#allocation67_spill] sm:$0xff] %v6724_v27 }
 0x198   : > { %v2145_v6 = vrot.slane %v833_v14, 7  ;;  %v1126_v3 = vadd.f32 %v1022_v50, %v765_v20  ;;  %v2370_v28 = vmul.f32 0.007598758, %v313_v16  ;;  %v2570_v19 = vmul.f32 0.0010283801, %v313_v16 }
 0x199   : > { %v2528_v39 = vadd.f32 %v2448_v35, %v2328_v30  ;;  %v1744_v9 = vsel %vm1660_vm2, %v1742_v5, %v1743_v24  ;;  %v6704_v56 = vmul.f32 0.10936069, %v5979_v41  ;;  %v1945_v51 = vsel %vm1861_vm3, %v1943_v38, %v1944_v48  ;;  %v6728_v11 = vpop.permute.xlu1 %2949 }
 0x19a   : > { %v1487_v62 = vadd.f32 %v1383_v18, %v1126_v3  ;;  %v2290_v36 = vmul.f32 0.036000773, %v313_v16  ;;  %v2146_v14 = vsel %vm2062_vm4, %v2144_v42, %v2145_v6  ;;  %v315_v35 = vmul.f32 %v6442_v31, %v6442_v31  ;;  %9822 = vst [vmem:[#allocation68_spill] sm:$0xff] %v6728_v11  ;;  %v6735_v13 = vpop.permute.xlu0 %2927 }
 0x19b   : > { %9817 = vst [vmem:[#allocation63_spill] sm:$0xff] %v6704_v56  ;;  %v6706_v22 = vadd.f32 %v2648_v26, %v2528_v39  ;;  %3135 = vrot.lane.b32.xlu0 %v6704_v56, %s5668_s20  ;;  %v317_v5 = vmul.f32 %v6448_v4, %v6448_v4  ;;  %v6717_v30 = vmul.f32 0.10936069, %v5998_v32  ;;  %v2450_v24 = vrot.slane %v2370_v28, 1  ;;  %9824 = vst [vmem:[#allocation70_spill] sm:$0xff] %v6735_v13 }
 0x19c   : > { %v1848_v18 = vadd.f32 %v1744_v9, %v1487_v62  ;;  %v2650_v16 = vrot.slane %v2570_v19, 2  ;;  %v367_v60 = vmul.f32 0.0010283801, %v315_v35  ;;  %v407_v6 = vmul.f32 0.007598758, %v315_v35 }
 0x19d   : > { %9818 = vst [vmem:[#allocation64_spill] sm:$0xff] %v6706_v22  ;;  %9819 = vst [vmem:[#allocation65_spill] sm:$0xff] %v6717_v30  ;;  %v6720_v50 = vmul.f32 0.10936069, %v6706_v22  ;;  %v607_v25 = vmul.f32 0.036000773, %v315_v35  ;;  %v319_v10 = vmul.f32 %v6477_v53, %v6477_v53 }
 0x19e   : > { %v2049_v31 = vadd.f32 %v1945_v51, %v1848_v18  ;;  %v835_v4 = vmul.f32 0.10936069, %v315_v35  ;;  %v837_v34 = vmul.f32 0.10936069, %v317_v5  ;;  %v1196_v54 = vmul.f32 0.21300554, %v315_v35 }
 0x19f   : > { %9820 = vst [vmem:[#allocation66_spill] sm:$0xff] %v6720_v50  ;;  %3133 = vrot.lane.b32.xlu1 %v6720_v50, %s5668_s20  ;;  %v487_v52 = vrot.slane %v407_v6, 1  ;;  %v687_v26 = vrot.slane %v607_v25, 2  ;;  %v1198_v20 = vmul.f32 0.21300554, %v317_v5  ;;  %3139 = vrot.lane.b32.xlu0 %v6717_v30, %s5668_s20 }
 0x1a0   : > { %v1557_v38 = vmul.f32 0.26601171, %v315_v35  ;;  %v2250_v48 = vadd.f32 %v2146_v14, %v2049_v31  ;;  %v1026_v53 = vrot.slane %v835_v4, 3  ;;  %v1027_v42 = vrot.slane %v837_v34, 3  ;;  %v6733_v35 = vpop.permute.xlu1 %2807 }
 0x1a1   : > { %v1387_v39 = vrot.slane %v1196_v54, 4  ;;  %v567_v3 = vadd.f32 %v487_v52, %v367_v60  ;;  %v1388_v28 = vrot.slane %v1198_v20, 4  ;;  %v1559_v9 = vmul.f32 0.26601171, %v317_v5  ;;  %9823 = vst [vmem:[#allocation69_spill] sm:$0xff] %v6733_v35 }
 0x1a2   : > { %v1748_v19 = vrot.slane %v1557_v38, 5  ;;  %v2330_v62 = vadd.f32 %v2290_v36, %v2250_v48  ;;  %v1028_v51 = vsel %vm938_vm0, %v1026_v53, %v1027_v42  ;;  %v1949_v18 = vrot.slane %v1196_v54, 6 }
 0x1a3   : > { %v1950_v27 = vrot.slane %v1198_v20, 6  ;;  %v767_v6 = vadd.f32 %v687_v26, %v567_v3  ;;  %v1749_v25 = vrot.slane %v1559_v9, 5  ;;  %v2150_v11 = vrot.slane %v835_v4, 7 }
 0x1a4   : > { %v2530_v14 = vadd.f32 %v2450_v24, %v2330_v62  ;;  %v1389_v31 = vsel %vm1299_vm1, %v1387_v39, %v1388_v28  ;;  %v2151_v37 = vrot.slane %v837_v34, 7  ;;  %v321_v60 = vmul.f32 %v6487_v2, %v6487_v2 }
 0x1a5   : > { %v1128_v52 = vadd.f32 %v1028_v51, %v767_v6  ;;  %v1951_v36 = vsel %vm1861_vm3, %v1949_v18, %v1950_v27  ;;  %v2292_v38 = vmul.f32 0.036000773, %v317_v5  ;;  %v2372_v54 = vmul.f32 0.007598758, %v317_v5  ;;  %v6748_v51 = vpop.permute.xlu1 %2809 }
 0x1a6   : > { %v6741_v20 = vadd.f32 %v2650_v16, %v2530_v14  ;;  %v1750_v4 = vsel %vm1660_vm2, %v1748_v19, %v1749_v25  ;;  %v369_v26 = vmul.f32 0.0010283801, %v319_v10  ;;  %v409_v48 = vmul.f32 0.007598758, %v319_v10  ;;  %9827 = vst [vmem:[#allocation73_spill] sm:$0xff] %v6748_v51  ;;  %v6750_v19 = vpop.permute.xlu0 %2819 }
 0x1a7   : > { %v1489_v53 = vadd.f32 %v1389_v31, %v1128_v52  ;;  %v2152_v24 = vsel %vm2062_vm4, %v2150_v11, %v2151_v37  ;;  %v2572_v42 = vmul.f32 0.0010283801, %v317_v5  ;;  %v609_v39 = vmul.f32 0.036000773, %v319_v10  ;;  %9828 = vst [vmem:[#allocation74_spill] sm:$0xff] %v6750_v19 }
 0x1a8   : > { %9825 = vst [vmem:[#allocation71_spill] sm:$0xff] %v6741_v20  ;;  %v6746_v34 = vmul.f32 0.10936069, %v6741_v20  ;;  %v2452_v2 = vrot.slane %v2372_v54, 1  ;;  %v489_v3 = vrot.slane %v409_v48, 1 }
 0x1a9   : > { %v839_v28 = vmul.f32 0.10936069, %v319_v10  ;;  %v1850_v27 = vadd.f32 %v1750_v4, %v1489_v53  ;;  %v689_v9 = vrot.slane %v609_v39, 2  ;;  %v841_v62 = vmul.f32 0.10936069, %v321_v60 }
 0x1aa   : > { %9826 = vst [vmem:[#allocation72_spill] sm:$0xff] %v6746_v34  ;;  %v1200_v16 = vmul.f32 0.21300554, %v319_v10  ;;  %3137 = vrot.lane.b32.xlu1 %v6746_v34, %s5668_s20  ;;  %v569_v37 = vadd.f32 %v489_v3, %v369_v26  ;;  %v1202_v11 = vmul.f32 0.21300554, %v321_v60  ;;  %v5650_v34 = vld [vmem:[%s5712_s14 + $0x8] sm:$0xff] }
 0x1ab   : > { %v1032_v5 = vrot.slane %v839_v28, 3  ;;  %v1561_v18 = vmul.f32 0.26601171, %v319_v10  ;;  %v2051_v6 = vadd.f32 %v1951_v36, %v1850_v27  ;;  %v1033_v25 = vrot.slane %v841_v62, 3 }
 0x1ac   : > { %v1393_v14 = vrot.slane %v1200_v16, 4  ;;  %v1563_v31 = vmul.f32 0.26601171, %v321_v60  ;;  %v769_v52 = vadd.f32 %v689_v9, %v569_v37  ;;  %v1394_v54 = vrot.slane %v1202_v11, 4  ;;  %v6759_v37 = vpop.permute.xlu1 %2925 }
 0x1ad   : > { %v1754_v4 = vrot.slane %v1561_v18, 5  ;;  %v1955_v48 = vrot.slane %v1200_v16, 6  ;;  %v2252_v53 = vadd.f32 %v2152_v24, %v2051_v6  ;;  %v1034_v39 = vsel %vm938_vm0, %v1032_v5, %v1033_v25  ;;  %9829 = vst [vmem:[#allocation75_spill] sm:$0xff] %v6759_v37  ;;  %v6761_v24 = vpop.permute.xlu0 %2823  ;;  %v5651_v5 = vld [vmem:[%s5712_s14 + $0x18] sm:$0xff] }
 0x1ae   : > { %v1755_v19 = vrot.slane %v1563_v31, 5  ;;  %v1956_v13 = vrot.slane %v1202_v11, 6  ;;  %v1130_v51 = vadd.f32 %v1034_v39, %v769_v52  ;;  %v1395_v26 = vsel %vm1299_vm1, %v1393_v14, %v1394_v54  ;;  %9830 = vst [vmem:[#allocation76_spill] sm:$0xff] %v6761_v24 }
 0x1af   : > { %v2156_v3 = vrot.slane %v839_v28, 7  ;;  %v2157_v10 = vrot.slane %v841_v62, 7  ;;  %v2332_v36 = vadd.f32 %v2292_v38, %v2252_v53  ;;  %v2652_v27 = vrot.slane %v2572_v42, 2 }
 0x1b0   : > { %v1756_v35 = vsel %vm1660_vm2, %v1754_v4, %v1755_v19  ;;  %v323_v9 = vmul.f32 %v5650_v34, %v5836_v59  ;;  %v1491_v16 = vadd.f32 %v1395_v26, %v1130_v51  ;;  %v325_v11 = vmul.f32 %v5651_v5, %v5856_v15  ;;  %v6777_v4 = vpop.permute.xlu1 %2929 }
 0x1b1   : > { %v2532_v18 = vadd.f32 %v2452_v2, %v2332_v36  ;;  %v1957_v6 = vsel %vm1861_vm3, %v1955_v48, %v1956_v13  ;;  %v2374_v28 = vmul.f32 0.007598758, %v321_v60  ;;  %v6767_v38 = vmul.f32 0.10936069, %v6026_v21  ;;  %9834 = vst [vmem:[#allocation80_spill] sm:$0xff] %v6777_v4  ;;  %v6779_v48 = vpop.permute.xlu0 %2835  ;;  %v5652_v4 = vld [vmem:[%s5712_s14 + $0x28] sm:$0xff] }
 0x1b2   : > { %v1852_v42 = vadd.f32 %v1756_v35, %v1491_v16  ;;  %v2158_v62 = vsel %vm2062_vm4, %v2156_v3, %v2157_v10  ;;  %v2294_v19 = vmul.f32 0.036000773, %v321_v60  ;;  %v2574_v34 = vmul.f32 0.0010283801, %v321_v60  ;;  %9835 = vst [vmem:[#allocation81_spill] sm:$0xff] %v6779_v48 }
 0x1b3   : > { %9831 = vst [vmem:[#allocation77_spill] sm:$0xff] %v6767_v38  ;;  %v6770_v59 = vadd.f32 %v2652_v27, %v2532_v18  ;;  %3143 = vrot.lane.b32.xlu0 %v6767_v38, %s5668_s20  ;;  %v371_v51 = vmul.f32 0.0010283801, %v323_v9  ;;  %v411_v25 = vmul.f32 0.007598758, %v323_v9  ;;  %v2454_v52 = vrot.slane %v2374_v28, 1 }
 0x1b4   : > { %v2053_v15 = vadd.f32 %v1957_v6, %v1852_v42  ;;  %v611_v2 = vmul.f32 0.036000773, %v323_v9  ;;  %v843_v14 = vmul.f32 0.10936069, %v323_v9  ;;  %v845_v13 = vmul.f32 0.10936069, %v325_v11 }
 0x1b5   : > { %9832 = vst [vmem:[#allocation78_spill] sm:$0xff] %v6770_v59  ;;  %v6775_v31 = vmul.f32 0.10936069, %v6770_v59  ;;  %v491_v35 = vrot.slane %v411_v25, 1  ;;  %v1204_v54 = vmul.f32 0.21300554, %v323_v9 }
 0x1b6   : > { %v2254_v60 = vadd.f32 %v2158_v62, %v2053_v15  ;;  %v691_v53 = vrot.slane %v611_v2, 2  ;;  %v1038_v39 = vrot.slane %v843_v14, 3  ;;  %v1039_v26 = vrot.slane %v845_v13, 3 }
 0x1b7   : > { %9833 = vst [vmem:[#allocation79_spill] sm:$0xff] %v6775_v31  ;;  %3141 = vrot.lane.b32.xlu1 %v6775_v31, %s5668_s20  ;;  %v571_v3 = vadd.f32 %v491_v35, %v371_v51  ;;  %v1206_v10 = vmul.f32 0.21300554, %v325_v11  ;;  %v1399_v36 = vrot.slane %v1204_v54, 4  ;;  %v1565_v27 = vmul.f32 0.26601171, %v323_v9 }
 0x1b8   : > { %v2334_v16 = vadd.f32 %v2294_v19, %v2254_v60  ;;  %v2654_v5 = vrot.slane %v2574_v34, 2  ;;  %v1040_v18 = vsel %vm938_vm0, %v1038_v39, %v1039_v26  ;;  %v1567_v6 = vmul.f32 0.26601171, %v325_v11  ;;  %v6787_v19 = vpop.permute.xlu1 %2821  ;;  %v6789_v34 = vpop.permute.xlu0 %2839 }
 0x1b9   : > { %v771_v28 = vadd.f32 %v691_v53, %v571_v3  ;;  %v1400_v42 = vrot.slane %v1206_v10, 4  ;;  %v1760_v25 = vrot.slane %v1565_v27, 5  ;;  %v1961_v2 = vrot.slane %v1204_v54, 6  ;;  %9836 = vst [vmem:[#allocation82_spill] sm:$0xff] %v6787_v19  ;;  %9837 = vst [vmem:[#allocation83_spill] sm:$0xff] %v6789_v34 }
 0x1ba   : > { %v2534_v62 = vadd.f32 %v2454_v52, %v2334_v16  ;;  %v1761_v15 = vrot.slane %v1567_v6, 5  ;;  %v1962_v48 = vrot.slane %v1206_v10, 6  ;;  %v2162_v35 = vrot.slane %v843_v14, 7 }
 0x1bb   : > { %v1132_v24 = vadd.f32 %v1040_v18, %v771_v28  ;;  %v1401_v51 = vsel %vm1299_vm1, %v1399_v36, %v1400_v42  ;;  %v327_v9 = vmul.f32 %v5652_v4, %v5868_v57  ;;  %v2163_v52 = vrot.slane %v845_v13, 7  ;;  %v5653_v4 = vld [vmem:[%s5712_s14 + $0x38] sm:$0xff] }
 0x1bc   : > { %v6791_v60 = vadd.f32 %v2654_v5, %v2534_v62  ;;  %v1762_v53 = vsel %vm1660_vm2, %v1760_v25, %v1761_v15  ;;  %v2376_v39 = vmul.f32 0.007598758, %v325_v11  ;;  %v6795_v26 = vmul.f32 0.10936069, %v6220_v49  ;;  %v6810_v62 = vpop.permute.xlu0 %2939 }
 0x1bd   : > { %v1493_v54 = vadd.f32 %v1401_v51, %v1132_v24  ;;  %v1963_v14 = vsel %vm1861_vm3, %v1961_v2, %v1962_v48  ;;  %v2296_v57 = vmul.f32 0.036000773, %v325_v11  ;;  %v329_v10 = vmul.f32 %v5653_v4, %v6186_v58  ;;  %v6808_v58 = vpop.permute.xlu1 %2825  ;;  %9842 = vst [vmem:[#allocation88_spill] sm:$0xff] %v6810_v62 }
 0x1be   : > { %9838 = vst [vmem:[#allocation84_spill] sm:$0xff] %v6791_v60  ;;  %9839 = vst [vmem:[#allocation85_spill] sm:$0xff] %v6795_v26  ;;  %v6798_v3 = vmul.f32 0.10936069, %v6791_v60  ;;  %v2456_v27 = vrot.slane %v2376_v39, 1  ;;  %3147 = vrot.lane.b32.xlu0 %v6795_v26, %s5668_s20  ;;  %v2164_v24 = vsel %vm2062_vm4, %v2162_v35, %v2163_v52 }
 0x1bf   : > { %v1854_v36 = vadd.f32 %v1762_v53, %v1493_v54  ;;  %v2576_v16 = vmul.f32 0.0010283801, %v325_v11  ;;  %v373_v13 = vmul.f32 0.0010283801, %v327_v9  ;;  %v413_v5 = vmul.f32 0.007598758, %v327_v9 }
 0x1c0   : > { %9840 = vst [vmem:[#allocation86_spill] sm:$0xff] %v6798_v3  ;;  %3145 = vrot.lane.b32.xlu1 %v6798_v3, %s5668_s20  ;;  %v613_v18 = vmul.f32 0.036000773, %v327_v9  ;;  %v847_v6 = vmul.f32 0.10936069, %v327_v9  ;;  %9841 = vst [vmem:[#allocation87_spill] sm:$0xff] %v6808_v58 }
 0x1c1   : > { %v2055_v48 = vadd.f32 %v1963_v14, %v1854_v36  ;;  %v849_v28 = vmul.f32 0.10936069, %v329_v10  ;;  %v1208_v42 = vmul.f32 0.21300554, %v327_v9  ;;  %v1210_v25 = vmul.f32 0.21300554, %v329_v10 }
 0x1c2   : > { %v493_v11 = vrot.slane %v413_v5, 1  ;;  %v693_v15 = vrot.slane %v613_v18, 2  ;;  %v1044_v2 = vrot.slane %v847_v6, 3  ;;  %v1569_v51 = vmul.f32 0.26601171, %v327_v9 }
 0x1c3   : > { %v2256_v53 = vadd.f32 %v2164_v24, %v2055_v48  ;;  %v1045_v39 = vrot.slane %v849_v28, 3  ;;  %v1405_v54 = vrot.slane %v1208_v42, 4  ;;  %v1406_v4 = vrot.slane %v1210_v25, 4  ;;  %v6814_v24 = vpop.permute.xlu1 %2837  ;;  %v6816_v48 = vpop.permute.xlu0 %2943 }
 0x1c4   : > { %v2656_v35 = vrot.slane %v2576_v16, 2  ;;  %v573_v52 = vadd.f32 %v493_v11, %v373_v13  ;;  %v1571_v34 = vmul.f32 0.26601171, %v329_v10  ;;  %v1766_v19 = vrot.slane %v1569_v51, 5  ;;  %9843 = vst [vmem:[#allocation89_spill] sm:$0xff] %v6814_v24  ;;  %9844 = vst [vmem:[#allocation90_spill] sm:$0xff] %v6816_v48 }
 0x1c5   : > { %v2336_v14 = vadd.f32 %v2296_v57, %v2256_v53  ;;  %v1046_v36 = vsel %vm938_vm0, %v1044_v2, %v1045_v39  ;;  %v1967_v37 = vrot.slane %v1208_v42, 6  ;;  %v1968_v3 = vrot.slane %v1210_v25, 6  ;;  %v5654_v51 = vld [vmem:[%s5712_s14 + $0x48] sm:$0xff] }
 0x1c6   : > { %v773_v58 = vadd.f32 %v693_v15, %v573_v52  ;;  %v1767_v31 = vrot.slane %v1571_v34, 5  ;;  %v1407_v18 = vsel %vm1299_vm1, %v1405_v54, %v1406_v4  ;;  %v2378_v9 = vmul.f32 0.007598758, %v329_v10 }
 0x1c7   : > { %v2536_v5 = vadd.f32 %v2456_v27, %v2336_v14  ;;  %v2168_v13 = vrot.slane %v847_v6, 7  ;;  %v2169_v11 = vrot.slane %v849_v28, 7  ;;  %v1969_v25 = vsel %vm1861_vm3, %v1967_v37, %v1968_v3  ;;  %v5655_v28 = vld [vmem:[%s5712_s14 + $0x58] sm:$0xff]  ;;  %v6840_v52 = vpop.permute.xlu1 %2841  ;;  %v6842_v14 = vpop.permute.xlu0 %2951 }
 0x1c8   : > { %v1134_v16 = vadd.f32 %v1046_v36, %v773_v58  ;;  %v1768_v42 = vsel %vm1660_vm2, %v1766_v19, %v1767_v31  ;;  %v6823_v34 = vmul.f32 0.10936069, %v6206_v55  ;;  %v2298_v15 = vmul.f32 0.036000773, %v329_v10  ;;  %9849 = vst [vmem:[#allocation95_spill] sm:$0xff] %v6840_v52  ;;  %9850 = vst [vmem:[#allocation96_spill] sm:$0xff] %v6842_v14 }
 0x1c9   : > { %v6818_v57 = vadd.f32 %v2656_v35, %v2536_v5  ;;  %v2578_v2 = vmul.f32 0.0010283801, %v329_v10  ;;  %v331_v53 = vmul.f32 %v5654_v51, %v6232_v46  ;;  %v2458_v6 = vrot.slane %v2378_v9, 1 }
 0x1ca   : > { %9846 = vst [vmem:[#allocation92_spill] sm:$0xff] %v6823_v34  ;;  %v1495_v27 = vadd.f32 %v1407_v18, %v1134_v16  ;;  %3151 = vrot.lane.b32.xlu0 %v6823_v34, %s5668_s20  ;;  %v333_v31 = vmul.f32 %v5655_v28, %v6257_v33  ;;  %v6835_v37 = vmul.f32 0.10936069, %v6272_v43  ;;  %v2170_v46 = vsel %vm2062_vm4, %v2168_v13, %v2169_v11  ;;  %v9892_v34 = vld [vmem:[#allocation33_spill] sm:$0xff] }
 0x1cb   : > { %9845 = vst [vmem:[#allocation91_spill] sm:$0xff] %v6818_v57  ;;  %v6828_v39 = vmul.f32 0.10936069, %v6818_v57  ;;  %v375_v3 = vmul.f32 0.0010283801, %v331_v53 }
 0x1cc   : > { %9848 = vst [vmem:[#allocation94_spill] sm:$0xff] %v6835_v37  ;;  %v1856_v19 = vadd.f32 %v1768_v42, %v1495_v27  ;;  %v415_v58 = vmul.f32 0.007598758, %v331_v53  ;;  %v615_v10 = vmul.f32 0.036000773, %v331_v53 }
 0x1cd   : > { %9847 = vst [vmem:[#allocation93_spill] sm:$0xff] %v6828_v39  ;;  %3149 = vrot.lane.b32.xlu1 %v6828_v39, %s5668_s20  ;;  %v851_v54 = vmul.f32 0.10936069, %v331_v53  ;;  %v853_v4 = vmul.f32 0.10936069, %v333_v31 }
 0x1ce   : > { %v1212_v35 = vmul.f32 0.21300554, %v331_v53  ;;  %v2057_v33 = vadd.f32 %v1969_v25, %v1856_v19  ;;  %v495_v36 = vrot.slane %v415_v58, 1  ;;  %v695_v5 = vrot.slane %v615_v10, 2  ;;  %3155 = vrot.lane.b32.xlu0 %v6835_v37, %s5668_s20  ;;  %v6848_v37 = vpop.permute.xlu1 %2941 }
 0x1cf   : > { %v1214_v18 = vmul.f32 0.21300554, %v333_v31  ;;  %v1050_v9 = vrot.slane %v851_v54, 3  ;;  %v1051_v16 = vrot.slane %v853_v4, 3  ;;  %v1573_v27 = vmul.f32 0.26601171, %v331_v53 }
 0x1d0   : > { %v1411_v42 = vrot.slane %v1212_v35, 4  ;;  %v2258_v51 = vadd.f32 %v2170_v46, %v2057_v33  ;;  %v575_v13 = vadd.f32 %v495_v36, %v375_v3  ;;  %v1575_v28 = vmul.f32 0.26601171, %v333_v31  ;;  %9851 = vst [vmem:[#allocation97_spill] sm:$0xff] %v6848_v37  ;;  %v6850_v3 = vpop.permute.xlu0 %2955 }
 0x1d1   : > { %v1412_v11 = vrot.slane %v1214_v18, 4  ;;  %v1052_v48 = vsel %vm938_vm0, %v1050_v9, %v1051_v16  ;;  %v1772_v62 = vrot.slane %v1573_v27, 5  ;;  %v1973_v52 = vrot.slane %v1212_v35, 6  ;;  %9852 = vst [vmem:[#allocation98_spill] sm:$0xff] %v6850_v3 }
 0x1d2   : > { %v1974_v25 = vrot.slane %v1214_v18, 6  ;;  %v2338_v19 = vadd.f32 %v2298_v15, %v2258_v51  ;;  %v2658_v58 = vrot.slane %v2578_v2, 2  ;;  %v775_v10 = vadd.f32 %v695_v5, %v575_v13  ;;  %v5656_v15 = vld [vmem:[%s5712_s14 + $0x68] sm:$0xff]  ;;  %v5657_v5 = vld [vmem:[%s5712_s14 + $0x78] sm:$0xff] }
 0x1d3   : > { %v1773_v14 = vrot.slane %v1575_v28, 5  ;;  %v1413_v53 = vsel %vm1299_vm1, %v1411_v42, %v1412_v11  ;;  %v2174_v24 = vrot.slane %v851_v54, 7  ;;  %v2175_v39 = vrot.slane %v853_v4, 7 }
 0x1d4   : > { %v2538_v46 = vadd.f32 %v2458_v6, %v2338_v19  ;;  %v1136_v33 = vadd.f32 %v1052_v48, %v775_v10  ;;  %v1975_v36 = vsel %vm1861_vm3, %v1973_v52, %v1974_v25  ;;  %v2380_v18 = vmul.f32 0.007598758, %v333_v31  ;;  %v6869_v25 = vpop.permute.xlu1 %2945  ;;  %v6871_v19 = vpop.permute.xlu0 %2959 }
 0x1d5   : > { %v1774_v35 = vsel %vm1660_vm2, %v1772_v62, %v1773_v14  ;;  %v335_v2 = vmul.f32 %v5656_v15, %v6264_v23  ;;  %v337_v9 = vmul.f32 %v5657_v5, %v6277_v17  ;;  %v2300_v4 = vmul.f32 0.036000773, %v333_v31  ;;  %9856 = vst [vmem:[#allocation102_spill] sm:$0xff] %v6869_v25  ;;  %9857 = vst [vmem:[#allocation103_spill] sm:$0xff] %v6871_v19 }
 0x1d6   : > { %v6858_v16 = vadd.f32 %v2658_v58, %v2538_v46  ;;  %v1497_v54 = vadd.f32 %v1413_v53, %v1136_v33  ;;  %v6861_v42 = vmul.f32 0.10936069, %v6229_v1  ;;  %v2176_v48 = vsel %vm2062_vm4, %v2174_v24, %v2175_v39 }
 0x1d7   : > { %v2580_v6 = vmul.f32 0.0010283801, %v333_v31  ;;  %v377_v52 = vmul.f32 0.0010283801, %v335_v2  ;;  %v417_v27 = vmul.f32 0.007598758, %v335_v2 }
 0x1d8   : > { %9853 = vst [vmem:[#allocation99_spill] sm:$0xff] %v6858_v16  ;;  %9854 = vst [vmem:[#allocation100_spill] sm:$0xff] %v6861_v42  ;;  %v6865_v62 = vmul.f32 0.10936069, %v6858_v16  ;;  %v1858_v14 = vadd.f32 %v1774_v35, %v1497_v54  ;;  %v617_v23 = vmul.f32 0.036000773, %v335_v2  ;;  %3159 = vrot.lane.b32.xlu0 %v6861_v42, %s5668_s20 }
 0x1d9   : > { %v855_v51 = vmul.f32 0.10936069, %v335_v2  ;;  %v2460_v17 = vrot.slane %v2380_v18, 1  ;;  %v497_v13 = vrot.slane %v417_v27, 1  ;;  %v857_v11 = vmul.f32 0.10936069, %v337_v9 }
 0x1da   : > { %9855 = vst [vmem:[#allocation101_spill] sm:$0xff] %v6865_v62  ;;  %v1216_v28 = vmul.f32 0.21300554, %v335_v2  ;;  %3153 = vrot.lane.b32.xlu1 %v6865_v62, %s5668_s20  ;;  %v2059_v24 = vadd.f32 %v1975_v36, %v1858_v14  ;;  %v697_v39 = vrot.slane %v617_v23, 2  ;;  %v1218_v58 = vmul.f32 0.21300554, %v337_v9  ;;  %v6877_v62 = vpop.permute.xlu1 %2953 }
 0x1db   : > { %v1056_v31 = vrot.slane %v855_v51, 3  ;;  %v577_v10 = vadd.f32 %v497_v13, %v377_v52  ;;  %v1057_v53 = vrot.slane %v857_v11, 3  ;;  %v1577_v33 = vmul.f32 0.26601171, %v335_v2  ;;  %9858 = vst [vmem:[#allocation104_spill] sm:$0xff] %v6877_v62  ;;  %v6879_v52 = vpop.permute.xlu0 %3083 }
 0x1dc   : > { %v1417_v46 = vrot.slane %v1216_v28, 4  ;;  %v2260_v35 = vadd.f32 %v2176_v48, %v2059_v24  ;;  %v2660_v18 = vrot.slane %v2580_v6, 2  ;;  %v1418_v15 = vrot.slane %v1218_v58, 4  ;;  %9859 = vst [vmem:[#allocation105_spill] sm:$0xff] %v6879_v52 }
 0x1dd   : > { %v1579_v5 = vmul.f32 0.26601171, %v337_v9  ;;  %v777_v54 = vadd.f32 %v697_v39, %v577_v10  ;;  %v1058_v27 = vsel %vm938_vm0, %v1056_v31, %v1057_v53  ;;  %v1778_v3 = vrot.slane %v1577_v33, 5 }
 0x1de   : > { %v1979_v19 = vrot.slane %v1216_v28, 6  ;;  %v2340_v25 = vadd.f32 %v2300_v4, %v2260_v35  ;;  %v1419_v37 = vsel %vm1299_vm1, %v1417_v46, %v1418_v15  ;;  %v1980_v14 = vrot.slane %v1218_v58, 6 }
 0x1df   : > { %v1779_v36 = vrot.slane %v1579_v5, 5  ;;  %v1138_v23 = vadd.f32 %v1058_v27, %v777_v54  ;;  %v2180_v6 = vrot.slane %v855_v51, 7  ;;  %v2181_v13 = vrot.slane %v857_v11, 7  ;;  %v6897_v51 = vpop.permute.xlu1 %2957  ;;  %v6899_v11 = vpop.permute.xlu0 %3087 }
 0x1e0   : > { %v2540_v2 = vadd.f32 %v2460_v17, %v2340_v25  ;;  %v1981_v28 = vsel %vm1861_vm3, %v1979_v19, %v1980_v14  ;;  %v2382_v31 = vmul.f32 0.007598758, %v337_v9  ;;  %v6886_v10 = vmul.f32 0.21300554, %v6069_v8  ;;  %9862 = vst [vmem:[#allocation108_spill] sm:$0xff] %v6897_v51  ;;  %9863 = vst [vmem:[#allocation109_spill] sm:$0xff] %v6899_v11 }
 0x1e1   : > { %v1780_v48 = vsel %vm1660_vm2, %v1778_v3, %v1779_v36  ;;  %v1499_v24 = vadd.f32 %v1419_v37, %v1138_v23  ;;  %v2182_v53 = vsel %vm2062_vm4, %v2180_v6, %v2181_v13  ;;  %v2302_v25 = vmul.f32 0.036000773, %v337_v9  ;;  %v9868_v14 = vld [vmem:[#allocation12_spill] sm:$0xff]  ;;  %v9883_v11 = vld [vmem:[#allocation10_spill] sm:$0xff] }
 0x1e2   : > { %v6882_v39 = vadd.f32 %v2660_v18, %v2540_v2  ;;  %v2582_v3 = vmul.f32 0.0010283801, %v337_v9  ;;  %3304 = vrot.lane.b32.xlu0 %v6886_v10, %s5669_s21  ;;  %v6895_v37 = vmul.f32 0.21300554, %v6119_v40  ;;  %v2462_v46 = vrot.slane %v2382_v31, 1  ;;  %v9869_v2 = vld [vmem:[#allocation2_spill] sm:$0xff] }
 0x1e3   : > { %v1860_v4 = vadd.f32 %v1780_v48, %v1499_v24  ;;  %v6906_v9 = vmul.f32 0.21300554, %v6051_v0  ;;  %v6908_v15 = vpop.permute.xlu1 %2961  ;;  %v6910_v5 = vpop.permute.xlu0 %3091  ;;  %v6917_v27 = vmul.f32 0.21300554, %v6097_v12  ;;  %v6925_v23 = vmul.f32 0.21300554, %v9868_v14 }
 0x1e4   : > { %9860 = vst [vmem:[#allocation106_spill] sm:$0xff] %v6882_v39  ;;  %v6889_v58 = vmul.f32 0.10936069, %v6882_v39  ;;  %v2662_v35 = vrot.slane %v2582_v3, 2  ;;  %9864 = vst [vmem:[#allocation110_spill] sm:$0xff] %v6908_v15  ;;  %v9872_v24 = vld [vmem:[#allocation15_spill] sm:$0xff] }
 0x1e5   : > { %v2061_v17 = vadd.f32 %v1981_v28, %v1860_v4  ;;  %9865 = vst [vmem:[#allocation111_spill] sm:$0xff] %v6910_v5  ;;  %v6930_v48 = vmul.f32 0.21300554, %v9869_v2  ;;  %v6939_v28 = vmul.f32 0.21300554, %v9872_v24  ;;  %v9873_v4 = vld [vmem:[#allocation3_spill] sm:$0xff] }
 0x1e6   : > { %9861 = vst [vmem:[#allocation107_spill] sm:$0xff] %v6889_v58  ;;  %3157 = vrot.lane.b32.xlu1 %v6889_v58, %s5668_s20  ;;  %3308 = vrot.lane.b32.xlu0 %v6895_v37, %s5669_s21  ;;  %v6944_v31 = vmul.f32 0.21300554, %v9873_v4  ;;  %v9882_v5 = vld [vmem:[#allocation25_spill] sm:$0xff]  ;;  %v6996_v62 = vmul.f32 0.21300554, %v6144_v63 }
 0x1e7   : > { %v2262_v19 = vadd.f32 %v2182_v53, %v2061_v17  ;;  %v6932_v6 = vpop.permute.xlu1 %3085  ;;  %v6934_v13 = vpop.permute.xlu0 %3095  ;;  %v6977_v51 = vmul.f32 0.21300554, %v9882_v5  ;;  %v7015_v26 = vmul.f32 0.21300554, %v9892_v34  ;;  %v7020_v50 = vmul.f32 0.21300554, %v6172_v44 }
 0x1e8   : > { %9870 = vst [vmem:[#allocation12_spill] sm:$0xff] %v6932_v6  ;;  %9871 = vst [vmem:[#allocation2_spill] sm:$0xff] %v6934_v13  ;;  %v7034_v56 = vmul.f32 0.21300554, %v5956_v45 }
 0x1e9   : > { %v2342_v33 = vadd.f32 %v2302_v25, %v2262_v19  ;;  %v9876_v25 = vld [vmem:[#allocation19_spill] sm:$0xff]  ;;  %v9877_v19 = vld [vmem:[#allocation4_spill] sm:$0xff]  ;;  %9893 = vst [vmem:[#allocation120_spill] sm:$0xff] %v7015_v26  ;;  %9894 = vst [vmem:[#allocation121_spill] sm:$0xff] %v7020_v50 }
 0x1ea   : > { %3312 = vrot.lane.b32.xlu0 %v6906_v9, %s5669_s21  ;;  %v6953_v3 = vmul.f32 0.21300554, %v9876_v25  ;;  %9899 = vst [vmem:[#allocation125_spill] sm:$0xff] %v7034_v56 }
 0x1eb   : > { %v2542_v18 = vadd.f32 %v2462_v46, %v2342_v33  ;;  %v6946_v53 = vpop.permute.xlu1 %3089  ;;  %v6948_v17 = vpop.permute.xlu0 %3099  ;;  %v6958_v46 = vmul.f32 0.21300554, %v9877_v19  ;;  %v9878_v33 = vld [vmem:[#allocation22_spill] sm:$0xff] }
 0x1ec   : > { %9874 = vst [vmem:[#allocation3_spill] sm:$0xff] %v6946_v53  ;;  %9875 = vst [vmem:[#allocation114_spill] sm:$0xff] %v6948_v17  ;;  %v6982_v53 = vmul.f32 0.21300554, %v9883_v11 }
 0x1ed   : > { %v6912_v54 = vadd.f32 %v2662_v35, %v2542_v18  ;;  %v6963_v35 = vmul.f32 0.21300554, %v9878_v33  ;;  %v9879_v18 = vld [vmem:[#allocation5_spill] sm:$0xff] }
 0x1ee   : > { %3316 = vrot.lane.b32.xlu0 %v6917_v27, %s5669_s21  ;;  %v6968_v17 = vmul.f32 0.21300554, %v9879_v18 }
 0x1ef   : > { %9866 = vst [vmem:[#allocation112_spill] sm:$0xff] %v6912_v54  ;;  %v6920_v36 = vmul.f32 0.10936069, %v6912_v54  ;;  %v6970_v15 = vpop.permute.xlu1 %3093  ;;  %v6972_v13 = vpop.permute.xlu0 %3103 }
 0x1f0   : > { %9880 = vst [vmem:[#allocation4_spill] sm:$0xff] %v6970_v15  ;;  %9881 = vst [vmem:[#allocation5_spill] sm:$0xff] %v6972_v13  ;;  %v9886_v13 = vld [vmem:[#allocation28_spill] sm:$0xff] }
 0x1f1   : > { %9867 = vst [vmem:[#allocation113_spill] sm:$0xff] %v6920_v36  ;;  %3161 = vrot.lane.b32.xlu1 %v6920_v36, %s5668_s20  ;;  %v6991_v15 = vmul.f32 0.21300554, %v9886_v13  ;;  %v9887_v36 = vld [vmem:[#allocation31_spill] sm:$0xff] }
 0x1f2   : > { %3320 = vrot.lane.b32.xlu0 %v6930_v48, %s5669_s21  ;;  %v7001_v58 = vmul.f32 0.21300554, %v9887_v36 }
 0x1f3   : > { %v6984_v52 = vpop.permute.xlu1 %3097  ;;  %v6986_v6 = vpop.permute.xlu0 %3107 }
 0x1f4   : > { %9884 = vst [vmem:[#allocation10_spill] sm:$0xff] %v6984_v52  ;;  %9885 = vst [vmem:[#allocation115_spill] sm:$0xff] %v6986_v6  ;;  %v7006_v6 = vmul.f32 0.21300554, %v6190_v47 }
 0x1f5   : > { %3306 = vrot.lane.b32.xlu1 %v6925_v23, %s5669_s21  ;;  %9888 = vst [vmem:[#allocation116_spill] sm:$0xff] %v7001_v58 }
 0x1f6   : > { %3324 = vrot.lane.b32.xlu0 %v6944_v31, %s5669_s21  ;;  %9889 = vst [vmem:[#allocation117_spill] sm:$0xff] %v7006_v6 }
 0x1f7   : > { %v7008_v52 = vpop.permute.xlu1 %3101  ;;  %v7010_v42 = vpop.permute.xlu0 %3111 }
 0x1f8   : > { %9890 = vst [vmem:[#allocation118_spill] sm:$0xff] %v7008_v52  ;;  %9891 = vst [vmem:[#allocation119_spill] sm:$0xff] %v7010_v42  ;;  %v9897_v42 = vld [vmem:[#allocation37_spill] sm:$0xff] }
 0x1f9   : > { %3310 = vrot.lane.b32.xlu1 %v6939_v28, %s5669_s21  ;;  %v7029_v52 = vmul.f32 0.21300554, %v9897_v42 }
 0x1fa   : > { %3328 = vrot.lane.b32.xlu0 %v6958_v46, %s5669_s21 }
 0x1fb   : > { %v7022_v38 = vpop.permute.xlu1 %3105  ;;  %v7024_v30 = vpop.permute.xlu0 %3115  ;;  %9898 = vst [vmem:[#allocation124_spill] sm:$0xff] %v7029_v52 }
 0x1fc   : > { %9895 = vst [vmem:[#allocation122_spill] sm:$0xff] %v7022_v38  ;;  %9896 = vst [vmem:[#allocation123_spill] sm:$0xff] %v7024_v30  ;;  %v7044_v30 = vmul.f32 0.21300554, %v5979_v41 }
 0x1fd   : > { %3314 = vrot.lane.b32.xlu1 %v6953_v3, %s5669_s21 }
 0x1fe   : > { %3332 = vrot.lane.b32.xlu0 %v6968_v17, %s5669_s21  ;;  %9901 = vst [vmem:[#allocation127_spill] sm:$0xff] %v7044_v30 }
 0x1ff   : > { %v7046_v38 = vpop.permute.xlu1 %3109 }
 0x200   : > { %9902 = vst [vmem:[#allocation128_spill] sm:$0xff] %v7046_v38  ;;  %v7072_v38 = vmul.f32 0.21300554, %v6026_v21 }
 0x201   : > { %3318 = vrot.lane.b32.xlu1 %v6963_v35, %s5669_s21 }
 0x202   : > { %3336 = vrot.lane.b32.xlu0 %v6982_v53, %s5669_s21  ;;  %9909 = vst [vmem:[#allocation135_spill] sm:$0xff] %v7072_v38 }
 0x205   : > { %3322 = vrot.lane.b32.xlu1 %v6977_v51, %s5669_s21 }
 0x206   : > { %3340 = vrot.lane.b32.xlu0 %v6996_v62, %s5669_s21 }
 0x209   : > { %3326 = vrot.lane.b32.xlu1 %v6991_v15, %s5669_s21 }
 0x20a   : > { %3344 = vrot.lane.b32.xlu0 %v7006_v6, %s5669_s21  ;;  %v7039_v6 = vmul.f32 0.21300554, %v6604_v61 }
 0x20c   : > { %9900 = vst [vmem:[#allocation126_spill] sm:$0xff] %v7039_v6 }
 0x20d   : > { %3330 = vrot.lane.b32.xlu1 %v7001_v58, %s5669_s21 }
 0x20e   : > { %3348 = vrot.lane.b32.xlu0 %v7020_v50, %s5669_s21  ;;  %v7053_v50 = vmul.f32 0.21300554, %v6641_v7 }
 0x210   : > { %9904 = vst [vmem:[#allocation130_spill] sm:$0xff] %v7053_v50 }
 0x211   : > { %3334 = vrot.lane.b32.xlu1 %v7015_v26, %s5669_s21  ;;  %v7048_v26 = vpop.permute.xlu0 %3119 }
 0x212   : > { %3352 = vrot.lane.b32.xlu0 %v7034_v56, %s5669_s21  ;;  %9903 = vst [vmem:[#allocation129_spill] sm:$0xff] %v7048_v26  ;;  %v7060_v56 = vpop.permute.xlu1 %3113  ;;  %v7067_v26 = vmul.f32 0.21300554, %v6679_v29 }
 0x213   : > { %9906 = vst [vmem:[#allocation132_spill] sm:$0xff] %v7060_v56 }
 0x214   : > { %9908 = vst [vmem:[#allocation134_spill] sm:$0xff] %v7067_v26 }
 0x215   : > { %3338 = vrot.lane.b32.xlu1 %v7029_v52, %s5669_s21  ;;  %v7058_v52 = vmul.f32 0.21300554, %v5998_v32  ;;  %v7062_v58 = vpop.permute.xlu0 %3123 }
 0x216   : > { %3356 = vrot.lane.b32.xlu0 %v7044_v30, %s5669_s21  ;;  %9907 = vst [vmem:[#allocation133_spill] sm:$0xff] %v7062_v58  ;;  %v7077_v30 = vmul.f32 0.21300554, %v6706_v22  ;;  %v7082_v58 = vmul.f32 0.21300554, %v6220_v49  ;;  %v7084_v56 = vpop.permute.xlu1 %3117 }
 0x217   : > { %9905 = vst [vmem:[#allocation131_spill] sm:$0xff] %v7058_v52  ;;  %9912 = vst [vmem:[#allocation138_spill] sm:$0xff] %v7084_v56  ;;  %v7110_v56 = vmul.f32 0.21300554, %v6272_v43 }
 0x218   : > { %9910 = vst [vmem:[#allocation136_spill] sm:$0xff] %v7077_v30  ;;  %9911 = vst [vmem:[#allocation137_spill] sm:$0xff] %v7082_v58 }
 0x219   : > { %3342 = vrot.lane.b32.xlu1 %v7039_v6, %s5669_s21  ;;  %9919 = vst [vmem:[#allocation145_spill] sm:$0xff] %v7110_v56 }
 0x21a   : > { %3360 = vrot.lane.b32.xlu0 %v7058_v52, %s5669_s21  ;;  %v7091_v52 = vmul.f32 0.21300554, %v6741_v20 }
 0x21c   : > { %9914 = vst [vmem:[#allocation140_spill] sm:$0xff] %v7091_v52 }
 0x21d   : > { %3346 = vrot.lane.b32.xlu1 %v7053_v50, %s5669_s21  ;;  %v7086_v50 = vpop.permute.xlu0 %3127 }
 0x21e   : > { %3364 = vrot.lane.b32.xlu0 %v7072_v38, %s5669_s21  ;;  %9913 = vst [vmem:[#allocation139_spill] sm:$0xff] %v7086_v50  ;;  %v7098_v38 = vpop.permute.xlu1 %3121  ;;  %v7105_v50 = vmul.f32 0.21300554, %v6770_v59 }
 0x21f   : > { %9916 = vst [vmem:[#allocation142_spill] sm:$0xff] %v7098_v38  ;;  %v7122_v38 = vmul.f32 0.21300554, %v6229_v1 }
 0x220   : > { %9918 = vst [vmem:[#allocation144_spill] sm:$0xff] %v7105_v50 }
 0x221   : > { %3350 = vrot.lane.b32.xlu1 %v7067_v26, %s5669_s21  ;;  %v7096_v26 = vmul.f32 0.21300554, %v6206_v55  ;;  %v7100_v6 = vpop.permute.xlu0 %3131  ;;  %9921 = vst [vmem:[#allocation147_spill] sm:$0xff] %v7122_v38 }
 0x222   : > { %3368 = vrot.lane.b32.xlu0 %v7082_v58, %s5669_s21  ;;  %9917 = vst [vmem:[#allocation143_spill] sm:$0xff] %v7100_v6  ;;  %v7115_v58 = vmul.f32 0.21300554, %v6791_v60  ;;  %v7119_v6 = vpop.permute.xlu1 %3125 }
 0x223   : > { %9915 = vst [vmem:[#allocation141_spill] sm:$0xff] %v7096_v26  ;;  %9920 = vst [vmem:[#allocation146_spill] sm:$0xff] %v7119_v6  ;;  %v3447_v6 = vmul.f32 0.26601171, %v6119_v40  ;;  %v3451_v40 = vmul.f32 0.26601171, %v6097_v12 }
 0x224   : > { %v3450_v12 = vmul.f32 0.26601171, %v9876_v25 }
 0x225   : > { %3354 = vrot.lane.b32.xlu1 %v7077_v30, %s5669_s21 }
 0x226   : > { %3372 = vrot.lane.b32.xlu0 %v7096_v26, %s5669_s21  ;;  %v7129_v26 = vmul.f32 0.21300554, %v6818_v57  ;;  %v7134_v30 = vpop.permute.xlu1 %3129 }
 0x227   : > { %9924 = vst [vmem:[#allocation150_spill] sm:$0xff] %v7134_v30 }
 0x228   : > { %9923 = vst [vmem:[#allocation149_spill] sm:$0xff] %v7129_v26 }
 0x229   : > { %3358 = vrot.lane.b32.xlu1 %v7091_v52, %s5669_s21  ;;  %v7124_v52 = vpop.permute.xlu0 %3135 }
 0x22a   : > { %3376 = vrot.lane.b32.xlu0 %v7110_v56, %s5669_s21  ;;  %9922 = vst [vmem:[#allocation148_spill] sm:$0xff] %v7124_v52  ;;  %v7141_v52 = vmul.f32 0.21300554, %v6858_v16  ;;  %v7150_v30 = vpop.permute.xlu1 %3133 }
 0x22b   : > { %9927 = vst [vmem:[#allocation153_spill] sm:$0xff] %v7150_v30  ;;  %v3448_v30 = vmul.f32 0.26601171, %v9872_v24 }
 0x22c   : > { %9926 = vst [vmem:[#allocation152_spill] sm:$0xff] %v7141_v52 }
 0x22d   : > { %3362 = vrot.lane.b32.xlu1 %v7105_v50, %s5669_s21  ;;  %v3445_v50 = vmul.f32 0.26601171, %v6069_v8  ;;  %v7136_v56 = vpop.permute.xlu0 %3139  ;;  %v7148_v8 = vmul.f32 0.21300554, %v6882_v39 }
 0x22e   : > { %3380 = vrot.lane.b32.xlu0 %v7122_v38, %s5669_s21  ;;  %9925 = vst [vmem:[#allocation151_spill] sm:$0xff] %v7136_v56  ;;  %v3449_v56 = vmul.f32 0.26601171, %v6051_v0 }
 0x231   : > { %3366 = vrot.lane.b32.xlu1 %v7115_v58, %s5669_s21 }
 0x232   : > { %3525 = vrot.lane.b32.xlu0 %v3445_v50, %s5670_s22  ;;  %v7159_v50 = vmul.f32 0.21300554, %v6912_v54 }
 0x235   : > { %3370 = vrot.lane.b32.xlu1 %v7129_v26, %s5669_s21  ;;  %v7154_v26 = vpop.permute.xlu0 %3143 }
 0x236   : > { %3529 = vrot.lane.b32.xlu0 %v3447_v6, %s5670_s22  ;;  %9928 = vst [vmem:[#allocation154_spill] sm:$0xff] %v7154_v26  ;;  %v3446_v6 = vmul.f32 0.26601171, %v9868_v14  ;;  %v3453_v26 = vmul.f32 0.26601171, %v9869_v2 }
 0x239   : > { %3374 = vrot.lane.b32.xlu1 %v7141_v52, %s5669_s21  ;;  %v7163_v52 = vpop.permute.xlu1 %3137  ;;  %v7165_v38 = vpop.permute.xlu0 %3147 }
 0x23a   : > { %3533 = vrot.lane.b32.xlu0 %v3449_v56, %s5670_s22  ;;  %9929 = vst [vmem:[#allocation155_spill] sm:$0xff] %v7163_v52  ;;  %9930 = vst [vmem:[#allocation156_spill] sm:$0xff] %v7165_v38  ;;  %v3455_v52 = vmul.f32 0.26601171, %v9873_v4 }
 0x23d   : > { %3378 = vrot.lane.b32.xlu1 %v7148_v8, %s5669_s21  ;;  %v7174_v56 = vpop.permute.xlu1 %3141  ;;  %v7178_v38 = vpop.permute.xlu0 %3151 }
 0x23e   : > { %3537 = vrot.lane.b32.xlu0 %v3451_v40, %s5670_s22  ;;  %9931 = vst [vmem:[#allocation157_spill] sm:$0xff] %v7174_v56  ;;  %9932 = vst [vmem:[#allocation158_spill] sm:$0xff] %v7178_v38  ;;  %v3457_v40 = vmul.f32 0.26601171, %v9877_v19  ;;  %v3459_v38 = vmul.f32 0.26601171, %v9879_v18 }
 0x241   : > { %3382 = vrot.lane.b32.xlu1 %v7159_v50, %s5669_s21  ;;  %v7184_v0 = vpop.permute.xlu1 %3145 }
 0x242   : > { %3541 = vrot.lane.b32.xlu0 %v3453_v26, %s5670_s22  ;;  %9933 = vst [vmem:[#allocation159_spill] sm:$0xff] %v7184_v0  ;;  %v3452_v26 = vmul.f32 0.26601171, %v9878_v33 }
 0x245   : > { %3527 = vrot.lane.b32.xlu1 %v3446_v6, %s5670_s22  ;;  %v7186_v6 = vpop.permute.xlu0 %3155  ;;  %v7194_v56 = vpop.permute.xlu1 %3149 }
 0x246   : > { %3545 = vrot.lane.b32.xlu0 %v3455_v52, %s5670_s22  ;;  %9934 = vst [vmem:[#allocation160_spill] sm:$0xff] %v7186_v6  ;;  %9935 = vst [vmem:[#allocation161_spill] sm:$0xff] %v7194_v56  ;;  %v3461_v6 = vmul.f32 0.26601171, %v9883_v11 }
 0x249   : > { %3531 = vrot.lane.b32.xlu1 %v3448_v30, %s5670_s22  ;;  %v3454_v30 = vmul.f32 0.26601171, %v9882_v5 }
 0x24a   : > { %3549 = vrot.lane.b32.xlu0 %v3457_v40, %s5670_s22  ;;  %v7197_v52 = vpop.permute.xlu0 %3159  ;;  %v3463_v40 = vmul.f32 0.26601171, %v6144_v63 }
 0x24b   : > { %9936 = vst [vmem:[#allocation162_spill] sm:$0xff] %v7197_v52  ;;  %v3465_v52 = vmul.f32 0.26601171, %v6190_v47 }
 0x24c   : > { %v7204_v0 = vpop.permute.xlu1 %3153 }
 0x24d   : > { %3535 = vrot.lane.b32.xlu1 %v3450_v12, %s5670_s22  ;;  %v3456_v12 = vmul.f32 0.26601171, %v9886_v13  ;;  %9937 = vst [vmem:[#allocation163_spill] sm:$0xff] %v7204_v0 }
 0x24e   : > { %3553 = vrot.lane.b32.xlu0 %v3459_v38, %s5670_s22  ;;  %v3458_v38 = vmul.f32 0.26601171, %v9887_v36 }
 0x251   : > { %3539 = vrot.lane.b32.xlu1 %v3452_v26, %s5670_s22 }
 0x252   : > { %3557 = vrot.lane.b32.xlu0 %v3461_v6, %s5670_s22  ;;  %v3460_v6 = vmul.f32 0.26601171, %v9892_v34 }
 0x254   : > { %v7206_v26 = vpop.permute.xlu0 %3304 }
 0x255   : > { %3543 = vrot.lane.b32.xlu1 %v3454_v30, %s5670_s22  ;;  %9938 = vst [vmem:[#allocation164_spill] sm:$0xff] %v7206_v26  ;;  %v3467_v26 = vmul.f32 0.26601171, %v6172_v44 }
 0x256   : > { %3561 = vrot.lane.b32.xlu0 %v3463_v40, %s5670_s22  ;;  %v3469_v40 = vmul.f32 0.26601171, %v5956_v45 }
 0x258   : > { %v7212_v56 = vpop.permute.xlu0 %3308  ;;  %v7215_v30 = vpop.permute.xlu1 %3157 }
 0x259   : > { %3547 = vrot.lane.b32.xlu1 %v3456_v12, %s5670_s22  ;;  %9939 = vst [vmem:[#allocation165_spill] sm:$0xff] %v7212_v56  ;;  %9940 = vst [vmem:[#allocation166_spill] sm:$0xff] %v7215_v30  ;;  %v3462_v12 = vmul.f32 0.26601171, %v9897_v42 }
 0x25a   : > { %3565 = vrot.lane.b32.xlu0 %v3465_v52, %s5670_s22  ;;  %v3464_v52 = vmul.f32 0.26601171, %v6604_v61 }
 0x25c   : > { %v7220_v0 = vpop.permute.xlu0 %3312 }
 0x25d   : > { %3551 = vrot.lane.b32.xlu1 %v3458_v38, %s5670_s22  ;;  %9941 = vst [vmem:[#allocation167_spill] sm:$0xff] %v7220_v0  ;;  %v3471_v0 = vmul.f32 0.26601171, %v5979_v41 }
 0x25e   : > { %3569 = vrot.lane.b32.xlu0 %v3467_v26, %s5670_s22  ;;  %v3466_v26 = vmul.f32 0.26601171, %v6641_v7 }
 0x260   : > { %v7228_v38 = vpop.permute.xlu0 %3316 }
 0x261   : > { %3555 = vrot.lane.b32.xlu1 %v3460_v6, %s5670_s22  ;;  %9943 = vst [vmem:[#allocation169_spill] sm:$0xff] %v7228_v38  ;;  %v3473_v38 = vmul.f32 0.26601171, %v5998_v32 }
 0x262   : > { %3573 = vrot.lane.b32.xlu0 %v3469_v40, %s5670_s22  ;;  %v3468_v40 = vmul.f32 0.26601171, %v6679_v29 }
 0x263   : > { %v7226_v56 = vpop.permute.xlu1 %3161 }
 0x264   : > { %9942 = vst [vmem:[#allocation168_spill] sm:$0xff] %v7226_v56  ;;  %v7236_v6 = vpop.permute.xlu0 %3320 }
 0x265   : > { %3559 = vrot.lane.b32.xlu1 %v3462_v12, %s5670_s22  ;;  %9945 = vst [vmem:[#allocation171_spill] sm:$0xff] %v7236_v6  ;;  %v3475_v6 = vmul.f32 0.26601171, %v6026_v21 }
 0x266   : > { %3577 = vrot.lane.b32.xlu0 %v3471_v0, %s5670_s22  ;;  %v3470_v0 = vmul.f32 0.26601171, %v6706_v22 }
 0x267   : > { %v7234_v30 = vpop.permute.xlu1 %3306 }
 0x268   : > { %9944 = vst [vmem:[#allocation170_spill] sm:$0xff] %v7234_v30  ;;  %v7244_v12 = vpop.permute.xlu0 %3324 }
 0x269   : > { %3563 = vrot.lane.b32.xlu1 %v3464_v52, %s5670_s22  ;;  %9947 = vst [vmem:[#allocation173_spill] sm:$0xff] %v7244_v12  ;;  %v3477_v12 = vmul.f32 0.26601171, %v6220_v49 }
 0x26a   : > { %3581 = vrot.lane.b32.xlu0 %v3473_v38, %s5670_s22  ;;  %v3472_v38 = vmul.f32 0.26601171, %v6741_v20 }
 0x26b   : > { %v7242_v56 = vpop.permute.xlu1 %3310 }
 0x26c   : > { %9946 = vst [vmem:[#allocation172_spill] sm:$0xff] %v7242_v56  ;;  %v7252_v52 = vpop.permute.xlu0 %3328 }
 0x26d   : > { %3567 = vrot.lane.b32.xlu1 %v3466_v26, %s5670_s22  ;;  %9949 = vst [vmem:[#allocation175_spill] sm:$0xff] %v7252_v52  ;;  %v3479_v52 = vmul.f32 0.26601171, %v6206_v55 }
 0x26e   : > { %3585 = vrot.lane.b32.xlu0 %v3475_v6, %s5670_s22  ;;  %v3474_v6 = vmul.f32 0.26601171, %v6770_v59 }
 0x26f   : > { %v7250_v30 = vpop.permute.xlu1 %3314 }
 0x270   : > { %9948 = vst [vmem:[#allocation174_spill] sm:$0xff] %v7250_v30  ;;  %v7260_v26 = vpop.permute.xlu0 %3332 }
 0x271   : > { %3571 = vrot.lane.b32.xlu1 %v3468_v40, %s5670_s22  ;;  %9951 = vst [vmem:[#allocation177_spill] sm:$0xff] %v7260_v26  ;;  %v3481_v26 = vmul.f32 0.26601171, %v6272_v43 }
 0x272   : > { %3589 = vrot.lane.b32.xlu0 %v3477_v12, %s5670_s22  ;;  %v3476_v12 = vmul.f32 0.26601171, %v6791_v60 }
 0x273   : > { %v7258_v56 = vpop.permute.xlu1 %3318 }
 0x274   : > { %9950 = vst [vmem:[#allocation176_spill] sm:$0xff] %v7258_v56  ;;  %v7268_v40 = vpop.permute.xlu0 %3336 }
 0x275   : > { %3575 = vrot.lane.b32.xlu1 %v3470_v0, %s5670_s22  ;;  %9953 = vst [vmem:[#allocation179_spill] sm:$0xff] %v7268_v40  ;;  %v3483_v40 = vmul.f32 0.26601171, %v6229_v1 }
 0x276   : > { %3593 = vrot.lane.b32.xlu0 %v3479_v52, %s5670_s22  ;;  %v3478_v52 = vmul.f32 0.26601171, %v6818_v57 }
 0x277   : > { %v7266_v30 = vpop.permute.xlu1 %3322 }
 0x278   : > { %9952 = vst [vmem:[#allocation178_spill] sm:$0xff] %v7266_v30  ;;  %v7276_v0 = vpop.permute.xlu0 %3340 }
 0x279   : > { %3579 = vrot.lane.b32.xlu1 %v3472_v38, %s5670_s22  ;;  %9955 = vst [vmem:[#allocation181_spill] sm:$0xff] %v7276_v0 }
 0x27a   : > { %3597 = vrot.lane.b32.xlu0 %v3481_v26, %s5670_s22  ;;  %v3480_v26 = vmul.f32 0.26601171, %v6858_v16 }
 0x27b   : > { %v7274_v56 = vpop.permute.xlu1 %3326 }
 0x27c   : > { %9954 = vst [vmem:[#allocation180_spill] sm:$0xff] %v7274_v56  ;;  %v7284_v38 = vpop.permute.xlu0 %3344 }
 0x27d   : > { %3583 = vrot.lane.b32.xlu1 %v3474_v6, %s5670_s22  ;;  %9956 = vst [vmem:[#allocation182_spill] sm:$0xff] %v7284_v38 }
 0x27e   : > { %3601 = vrot.lane.b32.xlu0 %v3483_v40, %s5670_s22  ;;  %v3482_v40 = vmul.f32 0.26601171, %v6882_v39 }
 0x27f   : > { %v7282_v30 = vpop.permute.xlu1 %3330 }
 0x280   : > { %v7291_v0 = vpop.permute.xlu0 %3348 }
 0x281   : > { %3587 = vrot.lane.b32.xlu1 %v3476_v12, %s5670_s22  ;;  %9957 = vst [vmem:[#allocation183_spill] sm:$0xff] %v7291_v0  ;;  %v3484_v0 = vmul.f32 0.26601171, %v6912_v54 }
 0x282   : > { %3666 = vrot.lane.b32.xlu0 %v6886_v10, %s5671_s23 }
 0x283   : > { %v7289_v56 = vpop.permute.xlu1 %3334 }
 0x284   : > { %v7299_v38 = vpop.permute.xlu0 %3352 }
 0x285   : > { %3591 = vrot.lane.b32.xlu1 %v3478_v52, %s5670_s22  ;;  %9958 = vst [vmem:[#allocation184_spill] sm:$0xff] %v7299_v38 }
 0x286   : > { %3670 = vrot.lane.b32.xlu0 %v6895_v37, %s5671_s23 }
 0x287   : > { %v7297_v6 = vpop.permute.xlu1 %3338 }
 0x288   : > { %v7307_v52 = vpop.permute.xlu0 %3356 }
 0x289   : > { %3595 = vrot.lane.b32.xlu1 %v3480_v26, %s5670_s22 }
 0x28a   : > { %3674 = vrot.lane.b32.xlu0 %v6906_v9, %s5671_s23 }
 0x28b   : > { %v7305_v12 = vpop.permute.xlu1 %3342 }
 0x28c   : > { %v7315_v38 = vpop.permute.xlu0 %3360 }
 0x28d   : > { %3599 = vrot.lane.b32.xlu1 %v3482_v40, %s5670_s22 }
 0x28e   : > { %3678 = vrot.lane.b32.xlu0 %v6917_v27, %s5671_s23 }
 0x28f   : > { %v7313_v10 = vpop.permute.xlu1 %3346 }
 0x290   : > { %v7322_v26 = vpop.permute.xlu0 %3364 }
 0x291   : > { %3603 = vrot.lane.b32.xlu1 %v3484_v0, %s5670_s22 }
 0x292   : > { %3682 = vrot.lane.b32.xlu0 %v6930_v48, %s5671_s23 }
 0x293   : > { %v7320_v37 = vpop.permute.xlu1 %3350 }
 0x294   : > { %v7330_v40 = vpop.permute.xlu0 %3368 }
 0x295   : > { %3668 = vrot.lane.b32.xlu1 %v6925_v23, %s5671_s23 }
 0x296   : > { %3686 = vrot.lane.b32.xlu0 %v6944_v31, %s5671_s23 }
 0x297   : > { %v7328_v9 = vpop.permute.xlu1 %3354 }
 0x298   : > { %v7338_v0 = vpop.permute.xlu0 %3372 }
 0x299   : > { %3672 = vrot.lane.b32.xlu1 %v6939_v28, %s5671_s23  ;;  %9959 = vst [vmem:[#allocation185_spill] sm:$0xff] %v7338_v0 }
 0x29a   : > { %3690 = vrot.lane.b32.xlu0 %v6958_v46, %s5671_s23 }
 0x29b   : > { %v7336_v27 = vpop.permute.xlu1 %3358 }
 0x29c   : > { %v7346_v48 = vpop.permute.xlu0 %3376 }
 0x29d   : > { %3676 = vrot.lane.b32.xlu1 %v6953_v3, %s5671_s23  ;;  %9960 = vst [vmem:[#allocation186_spill] sm:$0xff] %v7346_v48  ;;  %v9969_v48 = vld [vmem:[#allocation120_spill] sm:$0xff] }
 0x29e   : > { %3694 = vrot.lane.b32.xlu0 %v6968_v17, %s5671_s23 }
 0x29f   : > { %v7344_v23 = vpop.permute.xlu1 %3362 }
 0x2a0   : > { %v7354_v31 = vpop.permute.xlu0 %3380 }
 0x2a1   : > { %3680 = vrot.lane.b32.xlu1 %v6963_v35, %s5671_s23  ;;  %9961 = vst [vmem:[#allocation187_spill] sm:$0xff] %v7354_v31  ;;  %v9965_v31 = vld [vmem:[#allocation116_spill] sm:$0xff] }
 0x2a2   : > { %3698 = vrot.lane.b32.xlu0 %v6982_v53, %s5671_s23 }
 0x2a3   : > { %v7352_v28 = vpop.permute.xlu1 %3366 }
 0x2a4   : > { %v7362_v46 = vpop.permute.xlu0 %3525 }
 0x2a5   : > { %3684 = vrot.lane.b32.xlu1 %v6977_v51, %s5671_s23  ;;  %9962 = vst [vmem:[#allocation188_spill] sm:$0xff] %v7362_v46  ;;  %v9966_v51 = vld [vmem:[#allocation117_spill] sm:$0xff] }
 0x2a6   : > { %3702 = vrot.lane.b32.xlu0 %v6996_v62, %s5671_s23 }
 0x2a7   : > { %v7360_v3 = vpop.permute.xlu1 %3370 }
 0x2a8   : > { %v7370_v35 = vpop.permute.xlu0 %3529 }
 0x2a9   : > { %3688 = vrot.lane.b32.xlu1 %v6991_v15, %s5671_s23  ;;  %9964 = vst [vmem:[#allocation190_spill] sm:$0xff] %v7370_v35  ;;  %v9970_v15 = vld [vmem:[#allocation121_spill] sm:$0xff]  ;;  %v9973_v35 = vld [vmem:[#allocation124_spill] sm:$0xff] }
 0x2aa   : > { %3706 = vrot.lane.b32.xlu0 %v9966_v51, %s5671_s23 }
 0x2ab   : > { %v7368_v17 = vpop.permute.xlu1 %3374 }
 0x2ac   : > { %9963 = vst [vmem:[#allocation189_spill] sm:$0xff] %v7368_v17  ;;  %v7378_v0 = vpop.permute.xlu0 %3533 }
 0x2ad   : > { %3692 = vrot.lane.b32.xlu1 %v9965_v31, %s5671_s23  ;;  %9968 = vst [vmem:[#allocation117_spill] sm:$0xff] %v7378_v0  ;;  %v9974_v31 = vld [vmem:[#allocation125_spill] sm:$0xff]  ;;  %v9976_v0 = vld [vmem:[#allocation126_spill] sm:$0xff] }
 0x2ae   : > { %3710 = vrot.lane.b32.xlu0 %v9970_v15, %s5671_s23 }
 0x2af   : > { %v7376_v53 = vpop.permute.xlu1 %3378 }
 0x2b0   : > { %9967 = vst [vmem:[#allocation116_spill] sm:$0xff] %v7376_v53  ;;  %v7386_v17 = vpop.permute.xlu0 %3537 }
 0x2b1   : > { %3696 = vrot.lane.b32.xlu1 %v9969_v48, %s5671_s23  ;;  %9972 = vst [vmem:[#allocation121_spill] sm:$0xff] %v7386_v17  ;;  %v9977_v48 = vld [vmem:[#allocation127_spill] sm:$0xff]  ;;  %v9980_v17 = vld [vmem:[#allocation130_spill] sm:$0xff] }
 0x2b2   : > { %3714 = vrot.lane.b32.xlu0 %v9974_v31, %s5671_s23 }
 0x2b3   : > { %v7384_v62 = vpop.permute.xlu1 %3382 }
 0x2b4   : > { %9971 = vst [vmem:[#allocation120_spill] sm:$0xff] %v7384_v62  ;;  %v7394_v53 = vpop.permute.xlu0 %3541 }
 0x2b5   : > { %3700 = vrot.lane.b32.xlu1 %v9973_v35, %s5671_s23  ;;  %9975 = vst [vmem:[#allocation124_spill] sm:$0xff] %v7394_v53  ;;  %v9981_v35 = vld [vmem:[#allocation131_spill] sm:$0xff]  ;;  %v9984_v53 = vld [vmem:[#allocation134_spill] sm:$0xff] }
 0x2b6   : > { %3718 = vrot.lane.b32.xlu0 %v9977_v48, %s5671_s23 }
 0x2b7   : > { %v7392_v51 = vpop.permute.xlu1 %3527 }
 0x2b8   : > { %v7402_v62 = vpop.permute.xlu0 %3545 }
 0x2b9   : > { %3704 = vrot.lane.b32.xlu1 %v9976_v0, %s5671_s23  ;;  %9979 = vst [vmem:[#allocation126_spill] sm:$0xff] %v7402_v62  ;;  %v9985_v0 = vld [vmem:[#allocation135_spill] sm:$0xff]  ;;  %v9988_v62 = vld [vmem:[#allocation136_spill] sm:$0xff] }
 0x2ba   : > { %3722 = vrot.lane.b32.xlu0 %v9981_v35, %s5671_s23 }
 0x2bb   : > { %v7400_v15 = vpop.permute.xlu1 %3531 }
 0x2bc   : > { %9978 = vst [vmem:[#allocation125_spill] sm:$0xff] %v7400_v15  ;;  %v7410_v46 = vpop.permute.xlu0 %3549 }
 0x2bd   : > { %3708 = vrot.lane.b32.xlu1 %v9980_v17, %s5671_s23  ;;  %9983 = vst [vmem:[#allocation130_spill] sm:$0xff] %v7410_v46  ;;  %v9989_v17 = vld [vmem:[#allocation137_spill] sm:$0xff]  ;;  %v9992_v46 = vld [vmem:[#allocation140_spill] sm:$0xff] }
 0x2be   : > { %3726 = vrot.lane.b32.xlu0 %v9985_v0, %s5671_s23 }
 0x2bf   : > { %v7408_v31 = vpop.permute.xlu1 %3535 }
 0x2c0   : > { %9982 = vst [vmem:[#allocation127_spill] sm:$0xff] %v7408_v31  ;;  %v7418_v15 = vpop.permute.xlu0 %3553 }
 0x2c1   : > { %3712 = vrot.lane.b32.xlu1 %v9984_v53, %s5671_s23  ;;  %9987 = vst [vmem:[#allocation134_spill] sm:$0xff] %v7418_v15  ;;  %v9993_v53 = vld [vmem:[#allocation141_spill] sm:$0xff]  ;;  %v9996_v15 = vld [vmem:[#allocation144_spill] sm:$0xff] }
 0x2c2   : > { %3730 = vrot.lane.b32.xlu0 %v9989_v17, %s5671_s23 }
 0x2c3   : > { %v7416_v48 = vpop.permute.xlu1 %3539 }
 0x2c4   : > { %9986 = vst [vmem:[#allocation131_spill] sm:$0xff] %v7416_v48  ;;  %v7426_v31 = vpop.permute.xlu0 %3557 }
 0x2c5   : > { %3716 = vrot.lane.b32.xlu1 %v9988_v62, %s5671_s23  ;;  %9991 = vst [vmem:[#allocation136_spill] sm:$0xff] %v7426_v31  ;;  %v9997_v62 = vld [vmem:[#allocation145_spill] sm:$0xff] }
 0x2c6   : > { %3734 = vrot.lane.b32.xlu0 %v9993_v53, %s5671_s23 }
 0x2c7   : > { %v7424_v35 = vpop.permute.xlu1 %3543 }
 0x2c8   : > { %9990 = vst [vmem:[#allocation135_spill] sm:$0xff] %v7424_v35  ;;  %v7434_v48 = vpop.permute.xlu0 %3561 }
 0x2c9   : > { %3720 = vrot.lane.b32.xlu1 %v9992_v46, %s5671_s23  ;;  %9995 = vst [vmem:[#allocation140_spill] sm:$0xff] %v7434_v48  ;;  %v10000_v46 = vld [vmem:[#allocation147_spill] sm:$0xff]  ;;  %v10003_v48 = vld [vmem:[#allocation149_spill] sm:$0xff] }
 0x2ca   : > { %3738 = vrot.lane.b32.xlu0 %v9997_v62, %s5671_s23 }
 0x2cb   : > { %v7432_v0 = vpop.permute.xlu1 %3547 }
 0x2cc   : > { %9994 = vst [vmem:[#allocation137_spill] sm:$0xff] %v7432_v0  ;;  %v7442_v35 = vpop.permute.xlu0 %3565 }
 0x2cd   : > { %3724 = vrot.lane.b32.xlu1 %v9996_v15, %s5671_s23  ;;  %9999 = vst [vmem:[#allocation144_spill] sm:$0xff] %v7442_v35  ;;  %v10004_v15 = vld [vmem:[#allocation11_spill] sm:$0xff] }
 0x2ce   : > { %3742 = vrot.lane.b32.xlu0 %v10000_v46, %s5671_s23  ;;  %v10008_v46 = vld [vmem:[#allocation14_spill] sm:$0xff] }
 0x2cf   : > { %v7440_v17 = vpop.permute.xlu1 %3551 }
 0x2d0   : > { %9998 = vst [vmem:[#allocation141_spill] sm:$0xff] %v7440_v17  ;;  %v7450_v31 = vpop.permute.xlu0 %3569 }
 0x2d1   : > { %3728 = vrot.lane.b32.xlu1 %v7115_v58, %s5671_s23  ;;  %10002 = vst [vmem:[#allocation147_spill] sm:$0xff] %v7450_v31  ;;  %v10007_v58 = vld [vmem:[#allocation152_spill] sm:$0xff] }
 0x2d2   : > { %3807 = vrot.lane.b32.xlu0 %v10004_v15, %s5672_s24 }
 0x2d3   : > { %v7448_v53 = vpop.permute.xlu1 %3555 }
 0x2d4   : > { %10001 = vst [vmem:[#allocation145_spill] sm:$0xff] %v7448_v53  ;;  %v7458_v35 = vpop.permute.xlu0 %3573 }
 0x2d5   : > { %3732 = vrot.lane.b32.xlu1 %v10003_v48, %s5671_s23  ;;  %10006 = vst [vmem:[#allocation11_spill] sm:$0xff] %v7458_v35  ;;  %v10011_v48 = vld [vmem:[#allocation16_spill] sm:$0xff] }
 0x2d6   : > { %3811 = vrot.lane.b32.xlu0 %v10008_v46, %s5672_s24 }
 0x2d7   : > { %v7456_v62 = vpop.permute.xlu1 %3559 }
 0x2d8   : > { %10005 = vst [vmem:[#allocation149_spill] sm:$0xff] %v7456_v62  ;;  %v7466_v31 = vpop.permute.xlu0 %3577 }
 0x2d9   : > { %3736 = vrot.lane.b32.xlu1 %v10007_v58, %s5671_s23  ;;  %10010 = vst [vmem:[#allocation14_spill] sm:$0xff] %v7466_v31  ;;  %v10014_v58 = vld [vmem:[#allocation18_spill] sm:$0xff]  ;;  %v10017_v31 = vld [vmem:[#allocation13_spill] sm:$0xff] }
 0x2da   : > { %3815 = vrot.lane.b32.xlu0 %v10011_v48, %s5672_s24 }
 0x2db   : > { %v7464_v53 = vpop.permute.xlu1 %3563 }
 0x2dc   : > { %10009 = vst [vmem:[#allocation152_spill] sm:$0xff] %v7464_v53  ;;  %v7474_v62 = vpop.permute.xlu0 %3581  ;;  %v10044_v53 = vld [vmem:[#allocation35_spill] sm:$0xff] }
 0x2dd   : > { %3740 = vrot.lane.b32.xlu1 %v7148_v8, %s5671_s23  ;;  %10013 = vst [vmem:[#allocation191_spill] sm:$0xff] %v7474_v62  ;;  %v10018_v8 = vld [vmem:[#allocation21_spill] sm:$0xff] }
 0x2de   : > { %3819 = vrot.lane.b32.xlu0 %v10014_v58, %s5672_s24  ;;  %v10021_v62 = vld [vmem:[#allocation17_spill] sm:$0xff] }
 0x2df   : > { %v7472_v15 = vpop.permute.xlu1 %3567 }
 0x2e0   : > { %10012 = vst [vmem:[#allocation16_spill] sm:$0xff] %v7472_v15  ;;  %v7482_v35 = vpop.permute.xlu0 %3585 }
 0x2e1   : > { %3744 = vrot.lane.b32.xlu1 %v7159_v50, %s5671_s23  ;;  %10016 = vst [vmem:[#allocation192_spill] sm:$0xff] %v7482_v35  ;;  %v10022_v50 = vld [vmem:[#allocation24_spill] sm:$0xff] }
 0x2e2   : > { %3823 = vrot.lane.b32.xlu0 %v10018_v8, %s5672_s24  ;;  %v10025_v35 = vld [vmem:[#allocation20_spill] sm:$0xff] }
 0x2e3   : > { %v7480_v46 = vpop.permute.xlu1 %3571 }
 0x2e4   : > { %10015 = vst [vmem:[#allocation18_spill] sm:$0xff] %v7480_v46  ;;  %v7490_v15 = vpop.permute.xlu0 %3589 }
 0x2e5   : > { %3809 = vrot.lane.b32.xlu1 %v10017_v31, %s5672_s24  ;;  %10020 = vst [vmem:[#allocation21_spill] sm:$0xff] %v7490_v15  ;;  %v10026_v31 = vld [vmem:[#allocation27_spill] sm:$0xff] }
 0x2e6   : > { %3827 = vrot.lane.b32.xlu0 %v10022_v50, %s5672_s24  ;;  %v10029_v15 = vld [vmem:[#allocation23_spill] sm:$0xff] }
 0x2e7   : > { %v7488_v48 = vpop.permute.xlu1 %3575 }
 0x2e8   : > { %10019 = vst [vmem:[#allocation13_spill] sm:$0xff] %v7488_v48  ;;  %v7498_v46 = vpop.permute.xlu0 %3593 }
 0x2e9   : > { %3813 = vrot.lane.b32.xlu1 %v10021_v62, %s5672_s24  ;;  %10024 = vst [vmem:[#allocation24_spill] sm:$0xff] %v7498_v46  ;;  %v10030_v62 = vld [vmem:[#allocation30_spill] sm:$0xff] }
 0x2ea   : > { %3831 = vrot.lane.b32.xlu0 %v10026_v31, %s5672_s24  ;;  %v10033_v46 = vld [vmem:[#allocation26_spill] sm:$0xff] }
 0x2eb   : > { %v7496_v58 = vpop.permute.xlu1 %3579 }
 0x2ec   : > { %10023 = vst [vmem:[#allocation17_spill] sm:$0xff] %v7496_v58  ;;  %v7506_v48 = vpop.permute.xlu0 %3597 }
 0x2ed   : > { %3817 = vrot.lane.b32.xlu1 %v10025_v35, %s5672_s24  ;;  %10028 = vst [vmem:[#allocation27_spill] sm:$0xff] %v7506_v48  ;;  %v10034_v35 = vld [vmem:[#allocation34_spill] sm:$0xff]  ;;  %v10036_v48 = vld [vmem:[#allocation29_spill] sm:$0xff] }
 0x2ee   : > { %3835 = vrot.lane.b32.xlu0 %v10030_v62, %s5672_s24 }
 0x2ef   : > { %v7504_v8 = vpop.permute.xlu1 %3583 }
 0x2f0   : > { %10027 = vst [vmem:[#allocation20_spill] sm:$0xff] %v7504_v8  ;;  %v7514_v58 = vpop.permute.xlu0 %3601 }
 0x2f1   : > { %3821 = vrot.lane.b32.xlu1 %v10029_v15, %s5672_s24  ;;  %10032 = vst [vmem:[#allocation30_spill] sm:$0xff] %v7514_v58  ;;  %v10037_v15 = vld [vmem:[#allocation38_spill] sm:$0xff]  ;;  %v10040_v58 = vld [vmem:[#allocation32_spill] sm:$0xff] }
 0x2f2   : > { %3839 = vrot.lane.b32.xlu0 %v10034_v35, %s5672_s24 }
 0x2f3   : > { %v7512_v50 = vpop.permute.xlu1 %3587 }
 0x2f4   : > { %10031 = vst [vmem:[#allocation23_spill] sm:$0xff] %v7512_v50  ;;  %v7522_v8 = vpop.permute.xlu0 %3666 }
 0x2f5   : > { %3825 = vrot.lane.b32.xlu1 %v10033_v46, %s5672_s24  ;;  %v10041_v46 = vld [vmem:[#allocation42_spill] sm:$0xff] }
 0x2f6   : > { %3843 = vrot.lane.b32.xlu0 %v10037_v15, %s5672_s24 }
 0x2f7   : > { %v7520_v31 = vpop.permute.xlu1 %3591 }
 0x2f8   : > { %10035 = vst [vmem:[#allocation26_spill] sm:$0xff] %v7520_v31  ;;  %v7530_v50 = vpop.permute.xlu0 %3670 }
 0x2f9   : > { %3829 = vrot.lane.b32.xlu1 %v10036_v48, %s5672_s24  ;;  %10039 = vst [vmem:[#allocation29_spill] sm:$0xff] %v7530_v50  ;;  %v10045_v48 = vld [vmem:[#allocation50_spill] sm:$0xff]  ;;  %v10048_v50 = vld [vmem:[#allocation39_spill] sm:$0xff] }
 0x2fa   : > { %3847 = vrot.lane.b32.xlu0 %v10041_v46, %s5672_s24 }
 0x2fb   : > { %v7528_v62 = vpop.permute.xlu1 %3595 }
 0x2fc   : > { %10038 = vst [vmem:[#allocation34_spill] sm:$0xff] %v7528_v62  ;;  %v7538_v31 = vpop.permute.xlu0 %3674 }
 0x2fd   : > { %3833 = vrot.lane.b32.xlu1 %v10040_v58, %s5672_s24  ;;  %10043 = vst [vmem:[#allocation32_spill] sm:$0xff] %v7538_v31  ;;  %v10049_v58 = vld [vmem:[#allocation55_spill] sm:$0xff]  ;;  %v10051_v31 = vld [vmem:[#allocation44_spill] sm:$0xff] }
 0x2fe   : > { %3851 = vrot.lane.b32.xlu0 %v10045_v48, %s5672_s24 }
 0x2ff   : > { %v7536_v35 = vpop.permute.xlu1 %3599 }
 0x300   : > { %10042 = vst [vmem:[#allocation38_spill] sm:$0xff] %v7536_v35  ;;  %v7546_v62 = vpop.permute.xlu0 %3678 }
 0x301   : > { %3837 = vrot.lane.b32.xlu1 %v10044_v53, %s5672_s24  ;;  %10047 = vst [vmem:[#allocation35_spill] sm:$0xff] %v7546_v62  ;;  %v10052_v53 = vld [vmem:[#allocation63_spill] sm:$0xff] }
 0x302   : > { %3855 = vrot.lane.b32.xlu0 %v10049_v58, %s5672_s24  ;;  %v10055_v62 = vld [vmem:[#allocation51_spill] sm:$0xff] }
 0x303   : > { %v7544_v15 = vpop.permute.xlu1 %3603 }
 0x304   : > { %10046 = vst [vmem:[#allocation42_spill] sm:$0xff] %v7544_v15  ;;  %v7554_v35 = vpop.permute.xlu0 %3682 }
 0x305   : > { %3841 = vrot.lane.b32.xlu1 %v10048_v50, %s5672_s24  ;;  %10050 = vst [vmem:[#allocation50_spill] sm:$0xff] %v7554_v35  ;;  %v10056_v50 = vld [vmem:[#allocation65_spill] sm:$0xff]  ;;  %v10059_v35 = vld [vmem:[#allocation58_spill] sm:$0xff] }
 0x306   : > { %3859 = vrot.lane.b32.xlu0 %v10052_v53, %s5672_s24 }
 0x307   : > { %v7552_v46 = vpop.permute.xlu1 %3668 }
 0x308   : > { %v7562_v15 = vpop.permute.xlu0 %3686 }
 0x309   : > { %3845 = vrot.lane.b32.xlu1 %v10051_v31, %s5672_s24  ;;  %10054 = vst [vmem:[#allocation55_spill] sm:$0xff] %v7562_v15  ;;  %v10060_v31 = vld [vmem:[#allocation77_spill] sm:$0xff]  ;;  %v10063_v15 = vld [vmem:[#allocation66_spill] sm:$0xff] }
 0x30a   : > { %3863 = vrot.lane.b32.xlu0 %v10056_v50, %s5672_s24 }
 0x30b   : > { %v7560_v48 = vpop.permute.xlu1 %3672 }
 0x30c   : > { %10053 = vst [vmem:[#allocation39_spill] sm:$0xff] %v7560_v48  ;;  %v7570_v17 = vpop.permute.xlu0 %3690 }
 0x30d   : > { %3849 = vrot.lane.b32.xlu1 %v10055_v62, %s5672_s24  ;;  %10058 = vst [vmem:[#allocation63_spill] sm:$0xff] %v7570_v17  ;;  %v10064_v62 = vld [vmem:[#allocation85_spill] sm:$0xff]  ;;  %v10067_v17 = vld [vmem:[#allocation72_spill] sm:$0xff] }
 0x30e   : > { %3867 = vrot.lane.b32.xlu0 %v10060_v31, %s5672_s24 }
 0x30f   : > { %v7568_v58 = vpop.permute.xlu1 %3676 }
 0x310   : > { %10057 = vst [vmem:[#allocation44_spill] sm:$0xff] %v7568_v58  ;;  %v7578_v48 = vpop.permute.xlu0 %3694 }
 0x311   : > { %3853 = vrot.lane.b32.xlu1 %v10059_v35, %s5672_s24  ;;  %10062 = vst [vmem:[#allocation65_spill] sm:$0xff] %v7578_v48  ;;  %v10068_v35 = vld [vmem:[#allocation92_spill] sm:$0xff]  ;;  %v10071_v48 = vld [vmem:[#allocation79_spill] sm:$0xff] }
 0x312   : > { %3871 = vrot.lane.b32.xlu0 %v10064_v62, %s5672_s24 }
 0x313   : > { %v7576_v53 = vpop.permute.xlu1 %3680 }
 0x314   : > { %10061 = vst [vmem:[#allocation51_spill] sm:$0xff] %v7576_v53  ;;  %v7586_v58 = vpop.permute.xlu0 %3698 }
 0x315   : > { %3857 = vrot.lane.b32.xlu1 %v10063_v15, %s5672_s24  ;;  %10066 = vst [vmem:[#allocation77_spill] sm:$0xff] %v7586_v58  ;;  %v10072_v15 = vld [vmem:[#allocation94_spill] sm:$0xff] }
 0x316   : > { %3875 = vrot.lane.b32.xlu0 %v10068_v35, %s5672_s24  ;;  %v10075_v58 = vld [vmem:[#allocation86_spill] sm:$0xff]  ;;  %v3988_v35 = vmul.f32 0.007598758, %v9868_v14 }
 0x317   : > { %v7584_v50 = vpop.permute.xlu1 %3684 }
 0x318   : > { %10065 = vst [vmem:[#allocation58_spill] sm:$0xff] %v7584_v50  ;;  %v7594_v53 = vpop.permute.xlu0 %3702 }
 0x319   : > { %3861 = vrot.lane.b32.xlu1 %v10067_v17, %s5672_s24  ;;  %10070 = vst [vmem:[#allocation85_spill] sm:$0xff] %v7594_v53  ;;  %v10076_v17 = vld [vmem:[#allocation100_spill] sm:$0xff] }
 0x31a   : > { %3879 = vrot.lane.b32.xlu0 %v10072_v15, %s5672_s24  ;;  %v3990_v15 = vmul.f32 0.007598758, %v9876_v25 }
 0x31b   : > { %v7592_v31 = vpop.permute.xlu1 %3688 }
 0x31c   : > { %10069 = vst [vmem:[#allocation66_spill] sm:$0xff] %v7592_v31  ;;  %v7602_v50 = vpop.permute.xlu0 %3706 }
 0x31d   : > { %3865 = vrot.lane.b32.xlu1 %v10071_v48, %s5672_s24  ;;  %10074 = vst [vmem:[#allocation92_spill] sm:$0xff] %v7602_v50  ;;  %v10079_v48 = vld [vmem:[#allocation93_spill] sm:$0xff] }
 0x31e   : > { %3883 = vrot.lane.b32.xlu0 %v10076_v17, %s5672_s24  ;;  %v3992_v17 = vmul.f32 0.007598758, %v9882_v5 }
 0x31f   : > { %v7600_v62 = vpop.permute.xlu1 %3692 }
 0x320   : > { %10073 = vst [vmem:[#allocation72_spill] sm:$0xff] %v7600_v62  ;;  %v7611_v53 = vpop.permute.xlu0 %3710 }
 0x321   : > { %3869 = vrot.lane.b32.xlu1 %v10075_v58, %s5672_s24  ;;  %10078 = vst [vmem:[#allocation94_spill] sm:$0xff] %v7611_v53  ;;  %v10082_v58 = vld [vmem:[#allocation101_spill] sm:$0xff] }
 0x322   : > { %4028 = vrot.lane.b32.xlu0 %v3988_v35, %s5666_s18  ;;  %v3994_v35 = vmul.f32 0.007598758, %v9887_v36 }
 0x323   : > { %v7609_v31 = vpop.permute.xlu1 %3696 }
 0x324   : > { %10077 = vst [vmem:[#allocation79_spill] sm:$0xff] %v7609_v31  ;;  %v7619_v62 = vpop.permute.xlu0 %3714 }
 0x325   : > { %3873 = vrot.lane.b32.xlu1 %v10079_v48, %s5672_s24  ;;  %10081 = vst [vmem:[#allocation100_spill] sm:$0xff] %v7619_v62  ;;  %v10085_v48 = vld [vmem:[#allocation107_spill] sm:$0xff] }
 0x326   : > { %4032 = vrot.lane.b32.xlu0 %v3990_v15, %s5666_s18  ;;  %v3989_v15 = vmul.f32 0.007598758, %v9872_v24 }
 0x327   : > { %v7617_v50 = vpop.permute.xlu1 %3700 }
 0x328   : > { %10080 = vst [vmem:[#allocation86_spill] sm:$0xff] %v7617_v50  ;;  %v7627_v53 = vpop.permute.xlu0 %3718 }
 0x329   : > { %3877 = vrot.lane.b32.xlu1 %v10082_v58, %s5672_s24  ;;  %10084 = vst [vmem:[#allocation101_spill] sm:$0xff] %v7627_v53  ;;  %v10088_v58 = vld [vmem:[#allocation113_spill] sm:$0xff]  ;;  %v3996_v53 = vmul.f32 0.007598758, %v9897_v42 }
 0x32a   : > { %4036 = vrot.lane.b32.xlu0 %v3992_v17, %s5666_s18  ;;  %v3991_v17 = vmul.f32 0.007598758, %v9878_v33 }
 0x32b   : > { %v7625_v31 = vpop.permute.xlu1 %3704 }
 0x32c   : > { %10083 = vst [vmem:[#allocation93_spill] sm:$0xff] %v7625_v31  ;;  %v7635_v62 = vpop.permute.xlu0 %3722 }
 0x32d   : > { %3881 = vrot.lane.b32.xlu1 %v10085_v48, %s5672_s24  ;;  %10087 = vst [vmem:[#allocation193_spill] sm:$0xff] %v7635_v62  ;;  %v3998_v62 = vmul.f32 0.007598758, %v6641_v7 }
 0x32e   : > { %4040 = vrot.lane.b32.xlu0 %v3994_v35, %s5666_s18  ;;  %v3993_v35 = vmul.f32 0.007598758, %v9886_v13 }
 0x32f   : > { %v7633_v50 = vpop.permute.xlu1 %3708 }
 0x330   : > { %10086 = vst [vmem:[#allocation107_spill] sm:$0xff] %v7633_v50  ;;  %v7644_v48 = vpop.permute.xlu0 %3726 }
 0x331   : > { %3885 = vrot.lane.b32.xlu1 %v10088_v58, %s5672_s24  ;;  %10090 = vst [vmem:[#allocation194_spill] sm:$0xff] %v7644_v48  ;;  %v4000_v48 = vmul.f32 0.007598758, %v6706_v22 }
 0x332   : > { %4044 = vrot.lane.b32.xlu0 %v3996_v53, %s5666_s18  ;;  %v3995_v53 = vmul.f32 0.007598758, %v9892_v34 }
 0x333   : > { %v7642_v31 = vpop.permute.xlu1 %3712 }
 0x334   : > { %10089 = vst [vmem:[#allocation113_spill] sm:$0xff] %v7642_v31  ;;  %v7652_v58 = vpop.permute.xlu0 %3730 }
 0x335   : > { %4030 = vrot.lane.b32.xlu1 %v3989_v15, %s5666_s18  ;;  %10092 = vst [vmem:[#allocation196_spill] sm:$0xff] %v7652_v58  ;;  %v4002_v58 = vmul.f32 0.007598758, %v6770_v59 }
 0x336   : > { %4048 = vrot.lane.b32.xlu0 %v3998_v62, %s5666_s18  ;;  %v3997_v62 = vmul.f32 0.007598758, %v6604_v61 }
 0x337   : > { %v7650_v50 = vpop.permute.xlu1 %3716 }
 0x338   : > { %10091 = vst [vmem:[#allocation195_spill] sm:$0xff] %v7650_v50  ;;  %v7660_v15 = vpop.permute.xlu0 %3734 }
 0x339   : > { %4034 = vrot.lane.b32.xlu1 %v3991_v17, %s5666_s18  ;;  %10094 = vst [vmem:[#allocation198_spill] sm:$0xff] %v7660_v15  ;;  %v4004_v15 = vmul.f32 0.007598758, %v6818_v57 }
 0x33a   : > { %4052 = vrot.lane.b32.xlu0 %v4000_v48, %s5666_s18  ;;  %v3999_v48 = vmul.f32 0.007598758, %v6679_v29 }
 0x33b   : > { %v7658_v31 = vpop.permute.xlu1 %3720 }
 0x33c   : > { %10093 = vst [vmem:[#allocation197_spill] sm:$0xff] %v7658_v31  ;;  %v7668_v17 = vpop.permute.xlu0 %3738 }
 0x33d   : > { %4038 = vrot.lane.b32.xlu1 %v3993_v35, %s5666_s18  ;;  %10096 = vst [vmem:[#allocation200_spill] sm:$0xff] %v7668_v17  ;;  %v4006_v17 = vmul.f32 0.007598758, %v6882_v39 }
 0x33e   : > { %4056 = vrot.lane.b32.xlu0 %v4002_v58, %s5666_s18  ;;  %v4001_v58 = vmul.f32 0.007598758, %v6741_v20 }
 0x33f   : > { %v7666_v50 = vpop.permute.xlu1 %3724 }
 0x340   : > { %10095 = vst [vmem:[#allocation199_spill] sm:$0xff] %v7666_v50  ;;  %v7676_v35 = vpop.permute.xlu0 %3742 }
 0x341   : > { %4042 = vrot.lane.b32.xlu1 %v3995_v53, %s5666_s18  ;;  %10098 = vst [vmem:[#allocation202_spill] sm:$0xff] %v7676_v35  ;;  %v4108_v35 = vmul.f32 0.0010283801, %v9868_v14 }
 0x342   : > { %4060 = vrot.lane.b32.xlu0 %v4004_v15, %s5666_s18  ;;  %v4003_v15 = vmul.f32 0.007598758, %v6791_v60 }
 0x343   : > { %v7674_v31 = vpop.permute.xlu1 %3728 }
 0x344   : > { %10097 = vst [vmem:[#allocation201_spill] sm:$0xff] %v7674_v31  ;;  %v7684_v53 = vpop.permute.xlu0 %3807 }
 0x345   : > { %4046 = vrot.lane.b32.xlu1 %v3997_v62, %s5666_s18 }
 0x346   : > { %4064 = vrot.lane.b32.xlu0 %v4006_v17, %s5666_s18  ;;  %v4005_v17 = vmul.f32 0.007598758, %v6858_v16 }
 0x347   : > { %v7682_v50 = vpop.permute.xlu1 %3732 }
 0x348   : > { %10099 = vst [vmem:[#allocation203_spill] sm:$0xff] %v7682_v50  ;;  %v7692_v62 = vpop.permute.xlu0 %3811  ;;  %v4110_v50 = vmul.f32 0.0010283801, %v9876_v25 }
 0x349   : > { %4050 = vrot.lane.b32.xlu1 %v3999_v48, %s5666_s18  ;;  %10101 = vst [vmem:[#allocation205_spill] sm:$0xff] %v7692_v62 }
 0x34a   : > { %4148 = vrot.lane.b32.xlu0 %v4108_v35, %s5667_s19  ;;  %v4007_v35 = vmul.f32 0.007598758, %v6912_v54 }
 0x34b   : > { %v7690_v31 = vpop.permute.xlu1 %3736 }
 0x34c   : > { %10100 = vst [vmem:[#allocation204_spill] sm:$0xff] %v7690_v31  ;;  %v7700_v48 = vpop.permute.xlu0 %3815  ;;  %v4112_v31 = vmul.f32 0.0010283801, %v9882_v5 }
 0x34d   : > { %4054 = vrot.lane.b32.xlu1 %v4001_v58, %s5666_s18  ;;  %10103 = vst [vmem:[#allocation207_spill] sm:$0xff] %v7700_v48 }
 0x34e   : > { %4152 = vrot.lane.b32.xlu0 %v4110_v50, %s5667_s19  ;;  %v4109_v50 = vmul.f32 0.0010283801, %v9872_v24  ;;  %v10180_v24 = vld [vmem:[#allocation12_spill] sm:$0xff] }
 0x34f   : > { %v7698_v0 = vpop.permute.xlu1 %3740 }
 0x350   : > { %10102 = vst [vmem:[#allocation206_spill] sm:$0xff] %v7698_v0  ;;  %v7708_v58 = vpop.permute.xlu0 %3819  ;;  %v4114_v0 = vmul.f32 0.0010283801, %v9887_v36  ;;  %v4118_v36 = vmul.f32 0.0010283801, %v6641_v7 }
 0x351   : > { %4058 = vrot.lane.b32.xlu1 %v4003_v15, %s5666_s18  ;;  %10105 = vst [vmem:[#allocation209_spill] sm:$0xff] %v7708_v58  ;;  %v4122_v7 = vmul.f32 0.0010283801, %v6770_v59  ;;  %v4126_v59 = vmul.f32 0.0010283801, %v6882_v39 }
 0x352   : > { %4156 = vrot.lane.b32.xlu0 %v4112_v31, %s5667_s19  ;;  %v4111_v31 = vmul.f32 0.0010283801, %v9878_v33 }
 0x353   : > { %v7706_v62 = vpop.permute.xlu1 %3744 }
 0x354   : > { %10104 = vst [vmem:[#allocation208_spill] sm:$0xff] %v7706_v62  ;;  %v7716_v15 = vpop.permute.xlu0 %3823  ;;  %v4116_v62 = vmul.f32 0.0010283801, %v9897_v42 }
 0x355   : > { %4062 = vrot.lane.b32.xlu1 %v4005_v17, %s5666_s18  ;;  %10106 = vst [vmem:[#allocation210_spill] sm:$0xff] %v7716_v15  ;;  %v10178_v15 = vld [vmem:[#allocation83_spill] sm:$0xff] }
 0x356   : > { %4160 = vrot.lane.b32.xlu0 %v4114_v0, %s5667_s19  ;;  %v4113_v0 = vmul.f32 0.0010283801, %v9886_v13 }
 0x357   : > { %v7714_v25 = vpop.permute.xlu1 %3809 }
 0x358   : > { %v7724_v17 = vpop.permute.xlu0 %3827 }
 0x359   : > { %4066 = vrot.lane.b32.xlu1 %v4007_v35, %s5666_s18  ;;  %10108 = vst [vmem:[#allocation212_spill] sm:$0xff] %v7724_v17  ;;  %v4120_v17 = vmul.f32 0.0010283801, %v6706_v22 }
 0x35a   : > { %4164 = vrot.lane.b32.xlu0 %v4116_v62, %s5667_s19  ;;  %v4115_v62 = vmul.f32 0.0010283801, %v9892_v34 }
 0x35b   : > { %v7722_v58 = vpop.permute.xlu1 %3813 }
 0x35c   : > { %10107 = vst [vmem:[#allocation211_spill] sm:$0xff] %v7722_v58  ;;  %v7732_v35 = vpop.permute.xlu0 %3831 }
 0x35d   : > { %4150 = vrot.lane.b32.xlu1 %v4109_v50, %s5667_s19  ;;  %10110 = vst [vmem:[#allocation214_spill] sm:$0xff] %v7732_v35  ;;  %v10151_v35 = vld [vmem:[#allocation53_spill] sm:$0xff] }
 0x35e   : > { %4168 = vrot.lane.b32.xlu0 %v4118_v36, %s5667_s19  ;;  %v4117_v36 = vmul.f32 0.0010283801, %v6604_v61  ;;  %v10139_v61 = vld [vmem:[#allocation40_spill] sm:$0xff] }
 0x35f   : > { %v7730_v5 = vpop.permute.xlu1 %3817 }
 0x360   : > { %10109 = vst [vmem:[#allocation213_spill] sm:$0xff] %v7730_v5  ;;  %v7740_v50 = vpop.permute.xlu0 %3835  ;;  %v10203_v5 = vld [vmem:[#allocation138_spill] sm:$0xff] }
 0x361   : > { %4154 = vrot.lane.b32.xlu1 %v4111_v31, %s5667_s19  ;;  %10112 = vst [vmem:[#allocation216_spill] sm:$0xff] %v7740_v50  ;;  %v4124_v50 = vmul.f32 0.0010283801, %v6818_v57 }
 0x362   : > { %4172 = vrot.lane.b32.xlu0 %v4120_v17, %s5667_s19  ;;  %v4119_v17 = vmul.f32 0.0010283801, %v6679_v29 }
 0x363   : > { %v7738_v42 = vpop.permute.xlu1 %3821 }
 0x364   : > { %10111 = vst [vmem:[#allocation215_spill] sm:$0xff] %v7738_v42  ;;  %v7748_v31 = vpop.permute.xlu0 %3839 }
 0x365   : > { %4158 = vrot.lane.b32.xlu1 %v4113_v0, %s5667_s19  ;;  %10114 = vst [vmem:[#allocation218_spill] sm:$0xff] %v7748_v31  ;;  %v10140_v31 = vld [vmem:[#allocation7_spill] sm:$0xff] }
 0x366   : > { %4176 = vrot.lane.b32.xlu0 %v4122_v7, %s5667_s19  ;;  %v4121_v7 = vmul.f32 0.0010283801, %v6741_v20 }
 0x367   : > { %v7746_v58 = vpop.permute.xlu1 %3825 }
 0x368   : > { %10113 = vst [vmem:[#allocation217_spill] sm:$0xff] %v7746_v58  ;;  %v7756_v0 = vpop.permute.xlu0 %3843  ;;  %v10179_v58 = vld [vmem:[#allocation102_spill] sm:$0xff] }
 0x369   : > { %4162 = vrot.lane.b32.xlu1 %v4115_v62, %s5667_s19  ;;  %10116 = vst [vmem:[#allocation220_spill] sm:$0xff] %v7756_v0 }
 0x36a   : > { %4180 = vrot.lane.b32.xlu0 %v4124_v50, %s5667_s19  ;;  %v4123_v50 = vmul.f32 0.0010283801, %v6791_v60 }
 0x36b   : > { %v7754_v22 = vpop.permute.xlu1 %3829 }
 0x36c   : > { %10115 = vst [vmem:[#allocation219_spill] sm:$0xff] %v7754_v22  ;;  %v7764_v62 = vpop.permute.xlu0 %3847  ;;  %v10136_v22 = vld [vmem:[#allocation47_spill] sm:$0xff] }
 0x36d   : > { %4166 = vrot.lane.b32.xlu1 %v4117_v36, %s5667_s19  ;;  %10118 = vst [vmem:[#allocation222_spill] sm:$0xff] %v7764_v62  ;;  %v10137_v62 = vld [vmem:[#allocation36_spill] sm:$0xff] }
 0x36e   : > { %4184 = vrot.lane.b32.xlu0 %v4126_v59, %s5667_s19  ;;  %v4127_v59 = vmul.f32 0.0010283801, %v6912_v54  ;;  %v2750_v54 = vmul.f32 0.0010283801, %v9879_v18  ;;  %v2757_v18 = vmul.f32 0.0010283801, %v5998_v32 }
 0x36f   : > { %v7762_v42 = vpop.permute.xlu1 %3833  ;;  %v10146_v32 = vld [vmem:[#allocation8_spill] sm:$0xff] }
 0x370   : > { %10117 = vst [vmem:[#allocation221_spill] sm:$0xff] %v7762_v42  ;;  %v7771_v0 = vpop.permute.xlu0 %3851  ;;  %v10152_v42 = vld [vmem:[#allocation62_spill] sm:$0xff] }
 0x371   : > { %4170 = vrot.lane.b32.xlu1 %v4119_v17, %s5667_s19  ;;  %10120 = vst [vmem:[#allocation224_spill] sm:$0xff] %v7771_v0  ;;  %v4125_v17 = vmul.f32 0.0010283801, %v6858_v16 }
 0x373   : > { %v7769_v57 = vpop.permute.xlu1 %3837 }
 0x374   : > { %10119 = vst [vmem:[#allocation223_spill] sm:$0xff] %v7769_v57  ;;  %v7777_v39 = vpop.permute.xlu0 %3855 }
 0x375   : > { %4174 = vrot.lane.b32.xlu1 %v4121_v7, %s5667_s19  ;;  %10122 = vst [vmem:[#allocation226_spill] sm:$0xff] %v7777_v39 }
 0x377   : > { %v7775_v36 = vpop.permute.xlu1 %3841 }
 0x378   : > { %10121 = vst [vmem:[#allocation225_spill] sm:$0xff] %v7775_v36  ;;  %v7783_v20 = vpop.permute.xlu0 %3859  ;;  %v10141_v36 = vld [vmem:[#allocation9_spill] sm:$0xff] }
 0x379   : > { %4178 = vrot.lane.b32.xlu1 %v4123_v50, %s5667_s19  ;;  %10124 = vst [vmem:[#allocation228_spill] sm:$0xff] %v7783_v20 }
 0x37b   : > { %v7781_v29 = vpop.permute.xlu1 %3845 }
 0x37c   : > { %10123 = vst [vmem:[#allocation227_spill] sm:$0xff] %v7781_v29  ;;  %v7789_v7 = vpop.permute.xlu0 %3863 }
 0x37d   : > { %4182 = vrot.lane.b32.xlu1 %v4125_v17, %s5667_s19  ;;  %10126 = vst [vmem:[#allocation230_spill] sm:$0xff] %v7789_v7  ;;  %v2748_v17 = vmul.f32 0.0010283801, %v9873_v4  ;;  %v2747_v7 = vmul.f32 0.0010283801, %v9869_v2 }
 0x37e   : > { %v2758_v2 = vmul.f32 0.0010283801, %v6026_v21  ;;  %v10147_v21 = vld [vmem:[#allocation52_spill] sm:$0xff] }
 0x37f   : > { %v7787_v0 = vpop.permute.xlu1 %3849  ;;  %v2867_v4 = vadd.f32 %v10137_v62, %v2747_v7  ;;  %v2746_v7 = vmul.f32 0.0010283801, %v10146_v32  ;;  %v10155_v32 = vld [vmem:[#allocation59_spill] sm:$0xff] }
 0x380   : > { %10125 = vst [vmem:[#allocation229_spill] sm:$0xff] %v7787_v0  ;;  %v7794_v57 = vpop.permute.xlu0 %3867  ;;  %v10138_v0 = vld [vmem:[#allocation6_spill] sm:$0xff] }
 0x381   : > { %4186 = vrot.lane.b32.xlu1 %v4127_v59, %s5667_s19  ;;  %10128 = vst [vmem:[#allocation232_spill] sm:$0xff] %v7794_v57  ;;  %v2749_v59 = vmul.f32 0.0010283801, %v9877_v19  ;;  %v2755_v57 = vmul.f32 0.0010283801, %v5956_v45 }
 0x382   : > { %v2745_v19 = vmul.f32 0.0010283801, %v10138_v0  ;;  %v2744_v45 = vmul.f32 0.0010283801, %v10141_v36  ;;  %v10148_v0 = vld [vmem:[#allocation46_spill] sm:$0xff]  ;;  %v10150_v36 = vld [vmem:[#allocation60_spill] sm:$0xff] }
 0x383   : > { %v7792_v60 = vpop.permute.xlu1 %3853 }
 0x384   : > { %10127 = vst [vmem:[#allocation231_spill] sm:$0xff] %v7792_v60  ;;  %v7798_v16 = vpop.permute.xlu0 %3871 }
 0x385   : > { %10130 = vst [vmem:[#allocation234_spill] sm:$0xff] %v7798_v16 }
 0x387   : > { %v7796_v50 = vpop.permute.xlu1 %3857 }
 0x388   : > { %10129 = vst [vmem:[#allocation233_spill] sm:$0xff] %v7796_v50  ;;  %v7802_v20 = vpop.permute.xlu0 %3875  ;;  %v10135_v50 = vld [vmem:[#allocation45_spill] sm:$0xff] }
 0x389   : > { %10132 = vst [vmem:[#allocation236_spill] sm:$0xff] %v7802_v20  ;;  %v2868_v16 = vadd.f32 %v10135_v50, %v2748_v17  ;;  %v2756_v20 = vmul.f32 0.0010283801, %v5979_v41 }
 0x38b   : > { %v7800_v29 = vpop.permute.xlu1 %3861  ;;  %v7833_v17 = vadd.f32 %v10147_v21, %v2868_v16  ;;  %v10156_v21 = vld [vmem:[#allocation61_spill] sm:$0xff] }
 0x38c   : > { %10131 = vst [vmem:[#allocation235_spill] sm:$0xff] %v7800_v29  ;;  %v7810_v60 = vpop.permute.xlu0 %3879  ;;  %v2870_v29 = vadd.f32 %v10136_v22, %v2750_v54  ;;  %v10144_v22 = vld [vmem:[#allocation41_spill] sm:$0xff]  ;;  %v10145_v54 = vld [vmem:[#allocation48_spill] sm:$0xff]  ;;  %v2864_v33 = vadd.f32 %v10156_v21, %v2744_v45  ;;  %v10161_v45 = vld [vmem:[#allocation75_spill] sm:$0xff] }
 0x38d   : > { %10134 = vst [vmem:[#allocation238_spill] sm:$0xff] %v7810_v60  ;;  %v2743_v60 = vmul.f32 0.0010283801, %v10140_v31  ;;  %v7828_v41 = vadd.f32 %v10144_v22, %v2867_v4  ;;  %v2875_v62 = vadd.f32 %v10145_v54, %v2755_v57  ;;  %v10149_v31 = vld [vmem:[#allocation54_spill] sm:$0xff]  ;;  %v2878_v4 = vadd.f32 %v10152_v42, %v2758_v2  ;;  %v10153_v22 = vld [vmem:[#allocation56_spill] sm:$0xff]  ;;  %v10154_v57 = vld [vmem:[#allocation69_spill] sm:$0xff] }
 0x38e   : > { %v2865_v54 = vadd.f32 %v10154_v57, %v2745_v19  ;;  %v2754_v42 = vmul.f32 0.0010283801, %v6172_v44  ;;  %v2753_v2 = vmul.f32 0.0010283801, %v6190_v47  ;;  %v2760_v19 = vmul.f32 0.0010283801, %v6206_v55 }
 0x38f   : > { %v7808_v39 = vpop.permute.xlu1 %3865  ;;  %v7845_v13 = vadd.f32 %v10153_v22, %v2875_v62  ;;  %v2863_v16 = vadd.f32 %v10155_v32, %v2743_v60  ;;  %v10160_v62 = vld [vmem:[#allocation68_spill] sm:$0xff]  ;;  %v2761_v44 = vmul.f32 0.0010283801, %v6272_v43  ;;  %v10165_v47 = vld [vmem:[#allocation82_spill] sm:$0xff]  ;;  %v10174_v43 = vld [vmem:[#allocation81_spill] sm:$0xff] }
 0x390   : > { %10133 = vst [vmem:[#allocation237_spill] sm:$0xff] %v7808_v39  ;;  %v2869_v39 = vadd.f32 %v10139_v61, %v2749_v59  ;;  %v7825_v50 = vpop.permute.xlu0 %3883  ;;  %v7839_v59 = vadd.f32 %v10149_v31, %v2870_v29  ;;  %v2751_v29 = vmul.f32 0.0010283801, %v9883_v11  ;;  %v2984_v31 = vadd.f32 %v10161_v45, %v2864_v33  ;;  %v10163_v57 = vld [vmem:[#allocation80_spill] sm:$0xff]  ;;  %v10166_v55 = vld [vmem:[#allocation74_spill] sm:$0xff] }
 0x391   : > { %10143 = vst [vmem:[#allocation47_spill] sm:$0xff] %v7825_v50  ;;  %v2877_v50 = vadd.f32 %v10151_v35, %v2757_v18  ;;  %v10159_v35 = vld [vmem:[#allocation73_spill] sm:$0xff]  ;;  %v2762_v11 = vmul.f32 0.0010283801, %v6229_v1  ;;  %v10170_v1 = vld [vmem:[#allocation87_spill] sm:$0xff] }
 0x392   : > { %v7836_v61 = vadd.f32 %v10148_v0, %v2869_v39  ;;  %v2752_v39 = vmul.f32 0.0010283801, %v6144_v63  ;;  %v2866_v18 = vadd.f32 %v10159_v35, %v2746_v7  ;;  %v2759_v63 = vmul.f32 0.0010283801, %v6220_v49  ;;  %v10164_v7 = vld [vmem:[#allocation70_spill] sm:$0xff] }
 0x393   : > { %v7823_v34 = vpop.permute.xlu1 %3869  ;;  %v2985_v21 = vadd.f32 %v10164_v7, %v2865_v54  ;;  %v2874_v45 = vadd.f32 %v10170_v1, %v2754_v42  ;;  %v10173_v54 = vld [vmem:[#allocation96_spill] sm:$0xff]  ;;  %v10181_v42 = vld [vmem:[#allocation105_spill] sm:$0xff]  ;;  %v10182_v1 = vld [vmem:[#allocation3_spill] sm:$0xff] }
 0x394   : > { %10142 = vst [vmem:[#allocation45_spill] sm:$0xff] %v7823_v34  ;;  %v2876_v34 = vadd.f32 %v10150_v36, %v2756_v20  ;;  %v7854_v20 = vpop.permute.xlu0 %4028  ;;  %v10162_v36 = vld [vmem:[#allocation67_spill] sm:$0xff]  ;;  %v2986_v32 = vadd.f32 %v10163_v57, %v2866_v18  ;;  %v2872_v35 = vadd.f32 %v10165_v47, %v2752_v39  ;;  %v10172_v18 = vld [vmem:[#allocation89_spill] sm:$0xff]  ;;  %v2997_v7 = vadd.f32 %v10173_v54, %v2877_v50  ;;  %v10186_v54 = vld [vmem:[#allocation4_spill] sm:$0xff] }
 0x395   : > { %10158 = vst [vmem:[#allocation6_spill] sm:$0xff] %v7854_v20  ;;  %v2983_v22 = vadd.f32 %v10162_v36, %v2863_v16  ;;  %v10171_v16 = vld [vmem:[#allocation76_spill] sm:$0xff]  ;;  %v2880_v57 = vadd.f32 %v10172_v18, %v2760_v19  ;;  %v2879_v20 = vadd.f32 %v10174_v43, %v2759_v63  ;;  %v10175_v39 = vld [vmem:[#allocation95_spill] sm:$0xff]  ;;  %v10183_v19 = vld [vmem:[#allocation109_spill] sm:$0xff] }
 0x396   : > { %v7861_v60 = vadd.f32 %v10160_v62, %v2876_v34  ;;  %v10167_v34 = vld [vmem:[#allocation104_spill] sm:$0xff]  ;;  %v2873_v36 = vadd.f32 %v10171_v16, %v2753_v2  ;;  %v2882_v47 = vadd.f32 %v10175_v39, %v2762_v11  ;;  %v3164_v2 = vsel %vm3163_vm5, %v10181_v42, %v10180_v24  ;;  %v10184_v16 = vld [vmem:[#allocation90_spill] sm:$0xff] }
 0x397   : > { %v7852_v0 = vpop.permute.xlu1 %3873  ;;  %v2998_v62 = vadd.f32 %v10167_v34, %v2878_v4  ;;  %v10177_v4 = vld [vmem:[#allocation88_spill] sm:$0xff]  ;;  %v3165_v50 = vsel %vm3163_vm5, %v10183_v19, %v10182_v1  ;;  %v10188_v43 = vld [vmem:[#allocation10_spill] sm:$0xff]  ;;  %v10197_v19 = vld [vmem:[#allocation5_spill] sm:$0xff] }
 0x398   : > { %10157 = vst [vmem:[#allocation36_spill] sm:$0xff] %v7852_v0  ;;  %v2871_v0 = vadd.f32 %v10166_v55, %v2751_v29  ;;  %v7875_v49 = vpop.permute.xlu0 %4032  ;;  %v10176_v29 = vld [vmem:[#allocation97_spill] sm:$0xff]  ;;  %v2993_v63 = vadd.f32 %v10184_v16, %v2873_v36  ;;  %v10185_v18 = vld [vmem:[#allocation108_spill] sm:$0xff]  ;;  %v10192_v24 = vld [vmem:[#allocation98_spill] sm:$0xff] }
 0x399   : > { %10169 = vst [vmem:[#allocation7_spill] sm:$0xff] %v7875_v49  ;;  %v2992_v55 = vadd.f32 %v10176_v29, %v2872_v35  ;;  %v2994_v49 = vadd.f32 %v10179_v58, %v2874_v45  ;;  %v3000_v11 = vadd.f32 %v10185_v18, %v2880_v57  ;;  %v10187_v35 = vld [vmem:[#allocation111_spill] sm:$0xff]  ;;  %v2999_v39 = vadd.f32 %v10192_v24, %v2879_v20  ;;  %v10193_v29 = vld [vmem:[#allocation110_spill] sm:$0xff]  ;;  %v10201_v24 = vld [vmem:[#allocation132_spill] sm:$0xff] }
 0x39a   : > { %v2991_v34 = vadd.f32 %v10177_v4, %v2871_v0  ;;  %v3166_v0 = vsel %vm3163_vm5, %v10187_v35, %v10186_v54  ;;  %v3002_v4 = vadd.f32 %v10193_v29, %v2882_v47  ;;  %v10194_v42 = vld [vmem:[#allocation118_spill] sm:$0xff]  ;;  %v10198_v18 = vld [vmem:[#allocation103_spill] sm:$0xff]  ;;  %v3204_v35 = vadd.f32 %v3164_v2, %v2983_v22 }
 0x39b   : > { %v7873_v33 = vpop.permute.xlu1 %3877  ;;  %v10195_v36 = vld [vmem:[#allocation114_spill] sm:$0xff]  ;;  %v3206_v48 = vadd.f32 %v3166_v0, %v2985_v21  ;;  %v10202_v47 = vld [vmem:[#allocation119_spill] sm:$0xff] }
 0x39c   : > { %10168 = vst [vmem:[#allocation40_spill] sm:$0xff] %v7873_v33  ;;  %v2881_v33 = vadd.f32 %v10178_v15, %v2761_v44  ;;  %v10189_v15 = vld [vmem:[#allocation2_spill] sm:$0xff]  ;;  %v7903_v45 = vpop.permute.xlu0 %4036  ;;  %v3168_v57 = vsel %vm3163_vm5, %v10195_v36, %v10194_v42  ;;  %v3171_v29 = vsel %vm3163_vm5, %v10202_v47, %v10201_v24  ;;  %v10204_v42 = vld [vmem:[#allocation123_spill] sm:$0xff] }
 0x39d   : > { %v3167_v58 = vsel %vm3163_vm5, %v10189_v15, %v10188_v43  ;;  %10191 = vst [vmem:[#allocation41_spill] sm:$0xff] %v7903_v45  ;;  %v10196_v1 = vld [vmem:[#allocation122_spill] sm:$0xff]  ;;  %v3205_v43 = vadd.f32 %v3165_v50, %v2984_v31  ;;  %v10199_v15 = vld [vmem:[#allocation128_spill] sm:$0xff]  ;;  %v3172_v36 = vsel %vm3163_vm5, %v10204_v42, %v10203_v5  ;;  %v10206_v31 = vld [vmem:[#allocation129_spill] sm:$0xff]  ;;  %v3211_v47 = vadd.f32 %v3171_v29, %v7839_v59 }
 0x39e   : > { %v3169_v16 = vsel %vm3163_vm5, %v10197_v19, %v10196_v1  ;;  %v3001_v54 = vadd.f32 %v10198_v18, %v2881_v33  ;;  %v3207_v20 = vadd.f32 %v3167_v58, %v2986_v32  ;;  %v3208_v1 = vadd.f32 %v3168_v57, %v7828_v41  ;;  %v10205_v22 = vld [vmem:[#allocation142_spill] sm:$0xff]  ;;  %v10212_v5 = vld [vmem:[#allocation139_spill] sm:$0xff]  ;;  %v10213_v57 = vld [vmem:[#allocation153_spill] sm:$0xff] }
 0x39f   : > { %v7901_v44 = vpop.permute.xlu1 %3881  ;;  %v3209_v33 = vadd.f32 %v3169_v16, %v7833_v17  ;;  %v3173_v2 = vsel %vm3163_vm5, %v10206_v31, %v10205_v22  ;;  %v10207_v50 = vld [vmem:[#allocation146_spill] sm:$0xff]  ;;  %v10214_v17 = vld [vmem:[#allocation143_spill] sm:$0xff]  ;;  %v3212_v42 = vadd.f32 %v3172_v36, %v2991_v34  ;;  %v10217_v22 = vld [vmem:[#allocation157_spill] sm:$0xff] }
 0x3a0   : > { %10190 = vst [vmem:[#allocation9_spill] sm:$0xff] %v7901_v44  ;;  %v10200_v44 = vld [vmem:[#allocation115_spill] sm:$0xff]  ;;  %v7933_v0 = vpop.permute.xlu0 %4040  ;;  %v10211_v19 = vld [vmem:[#allocation150_spill] sm:$0xff]  ;;  %v3176_v16 = vsel %vm3163_vm5, %v10214_v17, %v10213_v57 }
 0x3a1   : > { %v3170_v45 = vsel %vm3163_vm5, %v10200_v44, %v10199_v15  ;;  %v10208_v44 = vld [vmem:[#allocation133_spill] sm:$0xff]  ;;  %10210 = vst [vmem:[#allocation8_spill] sm:$0xff] %v7933_v0  ;;  %v3175_v41 = vsel %vm3163_vm5, %v10212_v5, %v10211_v19  ;;  %v10215_v18 = vld [vmem:[#allocation155_spill] sm:$0xff]  ;;  %v10216_v15 = vld [vmem:[#allocation148_spill] sm:$0xff]  ;;  %v3213_v19 = vadd.f32 %v3173_v2, %v2992_v55 }
 0x3a2   : > { %v3174_v32 = vsel %vm3163_vm5, %v10208_v44, %v10207_v50  ;;  %v3210_v58 = vadd.f32 %v3170_v45, %v7836_v61  ;;  %v3177_v24 = vsel %vm3163_vm5, %v10216_v15, %v10215_v18  ;;  %v10218_v31 = vld [vmem:[#allocation151_spill] sm:$0xff]  ;;  %v10220_v45 = vld [vmem:[#allocation154_spill] sm:$0xff]  ;;  %v10222_v0 = vld [vmem:[#allocation156_spill] sm:$0xff]  ;;  %v3215_v17 = vadd.f32 %v3175_v41, %v2994_v49 }
 0x3a3   : > { %v7931_v21 = vpop.permute.xlu1 %3885  ;;  %v3178_v50 = vsel %vm3163_vm5, %v10218_v31, %v10217_v22  ;;  %v10219_v61 = vld [vmem:[#allocation159_spill] sm:$0xff]  ;;  %v3214_v5 = vadd.f32 %v3174_v32, %v2993_v63  ;;  %v3216_v18 = vadd.f32 %v3176_v16, %v7845_v13  ;;  %v3217_v59 = vadd.f32 %v3177_v24, %v7861_v60  ;;  %v10224_v29 = vld [vmem:[#allocation158_spill] sm:$0xff]  ;;  %v10226_v32 = vld [vmem:[#allocation160_spill] sm:$0xff] }
 0x3a4   : > { %10209 = vst [vmem:[#allocation48_spill] sm:$0xff] %v7931_v21  ;;  %v3179_v44 = vsel %vm3163_vm5, %v10220_v45, %v10219_v61  ;;  %v10221_v21 = vld [vmem:[#allocation161_spill] sm:$0xff]  ;;  %v10223_v34 = vld [vmem:[#allocation163_spill] sm:$0xff]  ;;  %v7962_v22 = vpop.permute.xlu0 %4044  ;;  %v3218_v55 = vadd.f32 %v3178_v50, %v2997_v7  ;;  %v10225_v2 = vld [vmem:[#allocation166_spill] sm:$0xff] }
 0x3a5   : > { %v3180_v57 = vsel %vm3163_vm5, %v10222_v0, %v10221_v21  ;;  %v3181_v36 = vsel %vm3163_vm5, %v10224_v29, %v10223_v34  ;;  %v3219_v63 = vadd.f32 %v3179_v44, %v2998_v62  ;;  %v3182_v21 = vsel %vm3163_vm5, %v10226_v32, %v10225_v2  ;;  %v10227_v0 = vld [vmem:[#allocation168_spill] sm:$0xff]  ;;  %v10228_v49 = vld [vmem:[#allocation162_spill] sm:$0xff]  ;;  %v10232_v61 = vld [vmem:[#allocation165_spill] sm:$0xff] }
 0x3a6   : > { %v3183_v13 = vsel %vm3163_vm5, %v10228_v49, %v10227_v0  ;;  %v3220_v41 = vadd.f32 %v3180_v57, %v2999_v39  ;;  %v10229_v60 = vld [vmem:[#allocation170_spill] sm:$0xff]  ;;  %v10230_v16 = vld [vmem:[#allocation164_spill] sm:$0xff]  ;;  %v7976_v7 = vadd.f32 %v3181_v36, %v3000_v11  ;;  %v10234_v50 = vld [vmem:[#allocation167_spill] sm:$0xff]  ;;  %v3222_v0 = vadd.f32 %v3182_v21, %v3001_v54 }
 0x3a7   : > { %v7960_v15 = vpop.permute.xlu1 %4030  ;;  %v3385_v24 = vsel %vm3384_vm6, %v10230_v16, %v10229_v60  ;;  %v10231_v31 = vld [vmem:[#allocation172_spill] sm:$0xff]  ;;  %v10233_v62 = vld [vmem:[#allocation174_spill] sm:$0xff]  ;;  %v10236_v29 = vld [vmem:[#allocation169_spill] sm:$0xff]  ;;  %v7987_v49 = vadd.f32 %v3183_v13, %v3002_v4 }
 0x3a8   : > { %v3386_v45 = vsel %vm3384_vm6, %v10232_v61, %v10231_v31  ;;  %v3387_v44 = vsel %vm3384_vm6, %v10234_v50, %v10233_v62  ;;  %v10235_v34 = vld [vmem:[#allocation176_spill] sm:$0xff]  ;;  %v10237_v39 = vld [vmem:[#allocation178_spill] sm:$0xff]  ;;  %v10238_v57 = vld [vmem:[#allocation171_spill] sm:$0xff]  ;;  %v7997_v62 = vpop.permute.xlu0 %4048  ;;  %v3425_v50 = vadd.f32 %v3385_v24, %v3204_v35 }
 0x3a9   : > { %v3388_v2 = vsel %vm3384_vm6, %v10236_v29, %v10235_v34  ;;  %v3389_v32 = vsel %vm3384_vm6, %v10238_v57, %v10237_v39  ;;  %v10239_v60 = vld [vmem:[#allocation180_spill] sm:$0xff]  ;;  %v10240_v16 = vld [vmem:[#allocation173_spill] sm:$0xff]  ;;  %v10241_v36 = vld [vmem:[#allocation175_spill] sm:$0xff]  ;;  %v3426_v34 = vadd.f32 %v3386_v45, %v3205_v43  ;;  %v3427_v13 = vadd.f32 %v3387_v44, %v3206_v48 }
 0x3aa   : > { %v3390_v11 = vsel %vm3384_vm6, %v10240_v16, %v10239_v60  ;;  %v3391_v31 = vsel %vm3384_vm6, %v10241_v36, %v7282_v30  ;;  %v10242_v29 = vld [vmem:[#allocation177_spill] sm:$0xff]  ;;  %v10243_v4 = vld [vmem:[#allocation179_spill] sm:$0xff]  ;;  %v3428_v39 = vadd.f32 %v3388_v2, %v3207_v20  ;;  %v3429_v57 = vadd.f32 %v3389_v32, %v3208_v1  ;;  %v10245_v35 = vld [vmem:[#allocation182_spill] sm:$0xff] }
 0x3ab   : > { %v7995_v61 = vpop.permute.xlu1 %4034  ;;  %v3392_v54 = vsel %vm3384_vm6, %v10242_v29, %v7289_v56  ;;  %v3393_v21 = vsel %vm3384_vm6, %v10243_v4, %v7297_v6  ;;  %v10244_v60 = vld [vmem:[#allocation181_spill] sm:$0xff]  ;;  %v3430_v16 = vadd.f32 %v3390_v11, %v3209_v33  ;;  %v3431_v36 = vadd.f32 %v3391_v31, %v3210_v58  ;;  %v10246_v24 = vld [vmem:[#allocation183_spill] sm:$0xff]  ;;  %v10247_v6 = vld [vmem:[#allocation184_spill] sm:$0xff] }
 0x3ac   : > { %v3394_v30 = vsel %vm3384_vm6, %v10244_v60, %v7305_v12  ;;  %v3395_v43 = vsel %vm3384_vm6, %v10245_v35, %v7313_v10  ;;  %v3396_v56 = vsel %vm3384_vm6, %v10246_v24, %v7320_v37  ;;  %v3432_v45 = vadd.f32 %v3392_v54, %v3211_v47  ;;  %v8019_v12 = vpop.permute.xlu0 %4052  ;;  %v10253_v11 = vld [vmem:[#allocation127_spill] sm:$0xff]  ;;  %v10254_v31 = vld [vmem:[#allocation117_spill] sm:$0xff]  ;;  %v10262_v24 = vld [vmem:[#allocation130_spill] sm:$0xff] }
 0x3ad   : > { %v3433_v29 = vadd.f32 %v3393_v21, %v3212_v42  ;;  %v3397_v48 = vsel %vm3384_vm6, %v10247_v6, %v7328_v9  ;;  %v3434_v1 = vadd.f32 %v3394_v30, %v3213_v19  ;;  %v3398_v10 = vsel %vm3384_vm6, %v7307_v52, %v7336_v27  ;;  %v10248_v42 = vld [vmem:[#allocation188_spill] sm:$0xff]  ;;  %v10250_v27 = vld [vmem:[#allocation186_spill] sm:$0xff] }
 0x3ae   : > { %v3399_v37 = vsel %vm3384_vm6, %v7315_v38, %v7344_v23  ;;  %v3400_v33 = vsel %vm3384_vm6, %v7322_v26, %v7352_v28  ;;  %v3435_v58 = vadd.f32 %v3395_v43, %v3214_v5  ;;  %v3436_v9 = vadd.f32 %v3396_v56, %v3215_v17  ;;  %v10249_v52 = vld [vmem:[#allocation116_spill] sm:$0xff]  ;;  %v10251_v38 = vld [vmem:[#allocation125_spill] sm:$0xff]  ;;  %v10252_v23 = vld [vmem:[#allocation190_spill] sm:$0xff] }
 0x3af   : > { %v8017_v20 = vpop.permute.xlu1 %4038  ;;  %v3401_v47 = vsel %vm3384_vm6, %v7330_v40, %v7360_v3  ;;  %v3606_v19 = vsel %vm3605_vm7, %v10248_v42, %v7392_v51  ;;  %v3437_v44 = vadd.f32 %v3397_v48, %v3216_v18  ;;  %v3403_v2 = vsel %vm3384_vm6, %v10250_v27, %v10249_v52  ;;  %v10260_v30 = vld [vmem:[#allocation126_spill] sm:$0xff]  ;;  %v10261_v43 = vld [vmem:[#allocation141_spill] sm:$0xff]  ;;  %v10268_v42 = vld [vmem:[#allocation32_spill] sm:$0xff] }
 0x3b0   : > { %v3607_v32 = vsel %vm3605_vm7, %v10252_v23, %v10251_v38  ;;  %v3438_v26 = vadd.f32 %v3398_v10, %v3217_v59  ;;  %v8042_v28 = vadd.f32 %v3399_v37, %v3218_v55  ;;  %v8044_v5 = vadd.f32 %v3400_v33, %v3219_v63  ;;  %v8051_v51 = vpop.permute.xlu0 %4056  ;;  %v10255_v59 = vld [vmem:[#allocation131_spill] sm:$0xff]  ;;  %v10256_v55 = vld [vmem:[#allocation121_spill] sm:$0xff]  ;;  %v10264_v6 = vld [vmem:[#allocation134_spill] sm:$0xff] }
 0x3b1   : > { %v3747_v40 = vsel %vm3746_vm8, %v7522_v8, %v7552_v46  ;;  %v8053_v17 = vadd.f32 %v3401_v47, %v3220_v41  ;;  %v3646_v18 = vadd.f32 %v3606_v19, %v3425_v50  ;;  %v3608_v54 = vsel %vm3605_vm7, %v10254_v31, %v10253_v11  ;;  %v10257_v8 = vld [vmem:[#allocation135_spill] sm:$0xff]  ;;  %v10258_v46 = vld [vmem:[#allocation124_spill] sm:$0xff]  ;;  %v10259_v50 = vld [vmem:[#allocation137_spill] sm:$0xff] }
 0x3b2   : > { %v3609_v63 = vsel %vm3605_vm7, %v10256_v55, %v10255_v59  ;;  %v8061_v4 = vadd.f32 %v3403_v2, %v3222_v0  ;;  %v8063_v21 = vadd.f32 %v3607_v32, %v3426_v34  ;;  %v3610_v60 = vsel %vm3605_vm7, %v10258_v46, %v10257_v8  ;;  %v10263_v0 = vld [vmem:[#allocation145_spill] sm:$0xff]  ;;  %v10266_v47 = vld [vmem:[#allocation136_spill] sm:$0xff]  ;;  %v10275_v46 = vld [vmem:[#allocation18_spill] sm:$0xff] }
 0x3b3   : > { %v8049_v3 = vpop.permute.xlu1 %4042  ;;  %v3888_v41 = vsel %vm3887_vm9, %v7684_v53, %v7714_v25  ;;  %v3611_v35 = vsel %vm3605_vm7, %v10260_v30, %v10259_v50  ;;  %v3612_v56 = vsel %vm3605_vm7, %v10262_v24, %v10261_v43  ;;  %v3613_v34 = vsel %vm3605_vm7, %v10264_v6, %v10263_v0  ;;  %v10265_v33 = vld [vmem:[#allocation149_spill] sm:$0xff]  ;;  %v10267_v53 = vld [vmem:[#allocation44_spill] sm:$0xff]  ;;  %v10279_v30 = vld [vmem:[#allocation58_spill] sm:$0xff] }
 0x3b4   : > { %v3787_v48 = vadd.f32 %v3747_v40, %v3646_v18  ;;  %v3648_v10 = vadd.f32 %v3608_v54, %v3427_v13  ;;  %v8080_v37 = vadd.f32 %v3609_v63, %v3428_v39  ;;  %v3614_v25 = vsel %vm3605_vm7, %v10266_v47, %v10265_v33  ;;  %v8090_v27 = vpop.permute.xlu0 %4060  ;;  %v10269_v38 = vld [vmem:[#allocation152_spill] sm:$0xff]  ;;  %v10271_v31 = vld [vmem:[#allocation213_spill] sm:$0xff]  ;;  %v10272_v54 = vld [vmem:[#allocation207_spill] sm:$0xff] }
 0x3b5   : > { %v3749_v19 = vsel %vm3746_vm8, %v10268_v42, %v10267_v53  ;;  %v3650_v2 = vadd.f32 %v3610_v60, %v3429_v57  ;;  %v10270_v23 = vld [vmem:[#allocation140_spill] sm:$0xff]  ;;  %v3948_v39 = vmul.f32 0.036000773, %v9868_v14  ;;  %v8096_v40 = vadd.f32 %v3611_v35, %v3430_v16  ;;  %v10276_v60 = vld [vmem:[#allocation147_spill] sm:$0xff]  ;;  %v10277_v16 = vld [vmem:[#allocation13_spill] sm:$0xff] }
 0x3b6   : > { %v3615_v32 = vsel %vm3605_vm7, %v10270_v23, %v10269_v38  ;;  %v3928_v13 = vadd.f32 %v3888_v41, %v3787_v48  ;;  %v3652_v18 = vadd.f32 %v3612_v56, %v3431_v36  ;;  %v8098_v11 = vadd.f32 %v3613_v34, %v3432_v45  ;;  %v10273_v63 = vld [vmem:[#allocation16_spill] sm:$0xff]  ;;  %v10278_v36 = vld [vmem:[#allocation11_spill] sm:$0xff]  ;;  %v10280_v35 = vld [vmem:[#allocation50_spill] sm:$0xff] }
 0x3b7   : > { %v8088_v52 = vpop.permute.xlu1 %4046  ;;  %v3890_v59 = vsel %vm3887_vm9, %v10272_v54, %v10271_v31  ;;  %v3654_v55 = vadd.f32 %v3614_v25, %v3433_v29  ;;  %v10274_v8 = vld [vmem:[#allocation144_spill] sm:$0xff]  ;;  %v3617_v41 = vsel %vm3605_vm7, %v10276_v60, %v10275_v46  ;;  %v3789_v50 = vadd.f32 %v3749_v19, %v3648_v10  ;;  %v10281_v29 = vld [vmem:[#allocation15_spill] sm:$0xff]  ;;  %v10282_v6 = vld [vmem:[#allocation17_spill] sm:$0xff] }
 0x3b8   : > { %v3616_v57 = vsel %vm3605_vm7, %v10274_v8, %v10273_v63  ;;  %v8109_v14 = vadd.f32 %v3615_v32, %v3434_v1  ;;  %v3618_v45 = vsel %vm3605_vm7, %v10278_v36, %v10277_v16  ;;  %v3751_v43 = vsel %vm3746_vm8, %v10280_v35, %v10279_v30  ;;  %v8122_v0 = vpop.permute.xlu0 %4064  ;;  %v10283_v34 = vld [vmem:[#allocation14_spill] sm:$0xff]  ;;  %v10284_v33 = vld [vmem:[#allocation19_spill] sm:$0xff]  ;;  %v10285_v42 = vld [vmem:[#allocation217_spill] sm:$0xff] }
 0x3b9   : > { %v8118_v24 = vmul.f32 0.036000773, %v10281_v29  ;;  %v3619_v1 = vsel %vm3605_vm7, %v10283_v34, %v10282_v6  ;;  %v3930_v48 = vadd.f32 %v3890_v59, %v3789_v50  ;;  %v3968_v10 = vadd.f32 %v3948_v39, %v3928_v13  ;;  %v10286_v19 = vld [vmem:[#allocation210_spill] sm:$0xff]  ;;  %v10288_v54 = vld [vmem:[#allocation20_spill] sm:$0xff]  ;;  %v10289_v63 = vld [vmem:[#allocation191_spill] sm:$0xff] }
 0x3ba   : > { %v3950_v47 = vmul.f32 0.036000773, %v10284_v33  ;;  %v3656_v25 = vadd.f32 %v3616_v57, %v3435_v58  ;;  %v8128_v53 = vadd.f32 %v3617_v41, %v3436_v9  ;;  %v3892_v38 = vsel %vm3887_vm9, %v10286_v19, %v10285_v42  ;;  %v10287_v23 = vld [vmem:[#allocation22_spill] sm:$0xff]  ;;  %v10291_v58 = vld [vmem:[#allocation72_spill] sm:$0xff]  ;;  %v10292_v9 = vld [vmem:[#allocation63_spill] sm:$0xff] }
 0x3bb   : > { %v8120_v56 = vpop.permute.xlu1 %4050  ;;  %v8134_v32 = vmul.f32 0.036000773, %v10287_v23  ;;  %v8136_v31 = vadd.f32 %v3618_v45, %v3437_v44  ;;  %v3620_v8 = vsel %vm3605_vm7, %v10289_v63, %v10288_v54  ;;  %v3791_v59 = vadd.f32 %v3751_v43, %v3650_v2  ;;  %v10290_v13 = vld [vmem:[#allocation6_spill] sm:$0xff]  ;;  %v10293_v60 = vld [vmem:[#allocation28_spill] sm:$0xff]  ;;  %v10294_v50 = vld [vmem:[#allocation25_spill] sm:$0xff] }
 0x3bc   : > { %v4088_v39 = vadd.f32 %v10290_v13, %v3968_v10  ;;  %v8142_v46 = vadd.f32 %v3619_v1, %v3438_v26  ;;  %v3753_v57 = vsel %vm3746_vm8, %v10292_v9, %v10291_v58  ;;  %v8148_v41 = vmul.f32 0.036000773, %v10293_v60  ;;  %v4149_v36 = vpop.permute.xlu0 %4148  ;;  %v10295_v45 = vld [vmem:[#allocation26_spill] sm:$0xff]  ;;  %v10296_v30 = vld [vmem:[#allocation21_spill] sm:$0xff]  ;;  %v10298_v6 = vld [vmem:[#allocation23_spill] sm:$0xff] }
 0x3bd   : > { %v3952_v16 = vmul.f32 0.036000773, %v10294_v50  ;;  %v3622_v2 = vsel %vm3605_vm7, %v10296_v30, %v10295_v45  ;;  %v3932_v35 = vadd.f32 %v3892_v38, %v3791_v59  ;;  %v3970_v43 = vadd.f32 %v3950_v47, %v3930_v48  ;;  %v10299_v34 = vld [vmem:[#allocation192_spill] sm:$0xff]  ;;  %v10300_v10 = vld [vmem:[#allocation221_spill] sm:$0xff]  ;;  %v10301_v33 = vld [vmem:[#allocation214_spill] sm:$0xff] }
 0x3be   : > { %v8156_v26 = vadd.f32 %v4149_v36, %v4088_v39  ;;  %v8159_v29 = vadd.f32 %v3620_v8, %v8042_v28  ;;  %v8164_v1 = vsel %vm3605_vm7, %v10299_v34, %v10298_v6  ;;  %v3894_v42 = vsel %vm3887_vm9, %v10301_v33, %v10300_v10  ;;  %v10302_v19 = vld [vmem:[#allocation31_spill] sm:$0xff]  ;;  %v10304_v63 = vld [vmem:[#allocation29_spill] sm:$0xff]  ;;  %v10307_v13 = vld [vmem:[#allocation38_spill] sm:$0xff] }
 0x3bf   : > { %v8151_v44 = vpop.permute.xlu1 %4054  ;;  %v3954_v23 = vmul.f32 0.036000773, %v10302_v19  ;;  %v10303_v54 = vld [vmem:[#allocation39_spill] sm:$0xff]  ;;  %v3793_v47 = vadd.f32 %v3753_v57, %v3652_v18  ;;  %v8178_v8 = vadd.f32 %v3622_v2, %v8053_v17  ;;  %v10309_v9 = vld [vmem:[#allocation86_spill] sm:$0xff]  ;;  %v10310_v60 = vld [vmem:[#allocation77_spill] sm:$0xff]  ;;  %v3972_v2 = vadd.f32 %v3952_v16, %v3932_v35 }
 0x3c0   : > { %10297 = vst [vmem:[#allocation52_spill] sm:$0xff] %v8156_v26  ;;  %v3748_v48 = vsel %vm3746_vm8, %v10304_v63, %v10303_v54  ;;  %v10305_v38 = vld [vmem:[#allocation7_spill] sm:$0xff]  ;;  %v8175_v28 = vmul.f32 0.007598758, %v8156_v26  ;;  %v3755_v50 = vsel %vm3746_vm8, %v10310_v60, %v10309_v9  ;;  %v10311_v36 = vld [vmem:[#allocation33_spill] sm:$0xff]  ;;  %v4153_v57 = vpop.permute.xlu0 %4152  ;;  %v10321_v35 = vld [vmem:[#allocation92_spill] sm:$0xff] }
 0x3c1   : > { %v4090_v59 = vadd.f32 %v10305_v38, %v3970_v43  ;;  %v10308_v39 = vld [vmem:[#allocation27_spill] sm:$0xff]  ;;  %v8187_v45 = vmul.f32 0.036000773, %v10311_v36  ;;  %v10313_v43 = vld [vmem:[#allocation205_spill] sm:$0xff]  ;;  %v3934_v17 = vadd.f32 %v3894_v42, %v3793_v47  ;;  %v3788_v10 = vadd.f32 %v3748_v48, %v8063_v21  ;;  %v10318_v38 = vld [vmem:[#allocation218_spill] sm:$0xff] }
 0x3c2   : > { %10306 = vst [vmem:[#allocation46_spill] sm:$0xff] %v8175_v28  ;;  %v3624_v58 = vsel %vm3605_vm7, %v10308_v39, %v10307_v13  ;;  %v10312_v30 = vld [vmem:[#allocation211_spill] sm:$0xff]  ;;  %4288 = vrot.lane.b32.xlu0 %v8175_v28, %s5673_s25  ;;  %v10317_v63 = vld [vmem:[#allocation225_spill] sm:$0xff]  ;;  %v3795_v42 = vadd.f32 %v3755_v50, %v3654_v55  ;;  %v10324_v48 = vld [vmem:[#allocation66_spill] sm:$0xff] }
 0x3c3   : > { %v8189_v18 = vpop.permute.xlu1 %4058  ;;  %v3889_v6 = vsel %vm3887_vm9, %v10313_v43, %v10312_v30  ;;  %v8194_v34 = vadd.f32 %v4153_v57, %v4090_v59  ;;  %v10315_v33 = vld [vmem:[#allocation51_spill] sm:$0xff]  ;;  %v3896_v13 = vsel %vm3887_vm9, %v10318_v38, %v10317_v63  ;;  %v10319_v39 = vld [vmem:[#allocation37_spill] sm:$0xff]  ;;  %v8214_v21 = vadd.f32 %v3624_v58, %v8061_v4  ;;  %v10334_v28 = vld [vmem:[#allocation100_spill] sm:$0xff] }
 0x3c4   : > { %v10316_v19 = vld [vmem:[#allocation35_spill] sm:$0xff]  ;;  %v3956_v9 = vmul.f32 0.036000773, %v10319_v39  ;;  %v10322_v59 = vld [vmem:[#allocation41_spill] sm:$0xff]  ;;  %v3929_v43 = vadd.f32 %v3889_v6, %v3788_v10  ;;  %v4157_v50 = vpop.permute.xlu0 %4156  ;;  %v3936_v39 = vadd.f32 %v3896_v13, %v3795_v42  ;;  %v10331_v10 = vld [vmem:[#allocation222_spill] sm:$0xff] }
 0x3c5   : > { %10314 = vst [vmem:[#allocation54_spill] sm:$0xff] %v8194_v34  ;;  %v3750_v54 = vsel %vm3746_vm8, %v10316_v19, %v10315_v33  ;;  %v10320_v16 = vld [vmem:[#allocation107_spill] sm:$0xff]  ;;  %v4092_v60 = vadd.f32 %v10322_v59, %v3972_v2  ;;  %v8211_v36 = vmul.f32 0.007598758, %v8194_v34  ;;  %v10328_v38 = vld [vmem:[#allocation209_spill] sm:$0xff]  ;;  %v10337_v42 = vld [vmem:[#allocation8_spill] sm:$0xff] }
 0x3c6   : > { %v3757_v47 = vsel %vm3746_vm8, %v10321_v35, %v10320_v16  ;;  %v10325_v57 = vld [vmem:[#allocation55_spill] sm:$0xff]  ;;  %v3974_v16 = vadd.f32 %v3954_v23, %v3934_v17  ;;  %v3790_v4 = vadd.f32 %v3750_v54, %v8080_v37  ;;  %v10330_v6 = vld [vmem:[#allocation229_spill] sm:$0xff]  ;;  %v10336_v23 = vld [vmem:[#allocation212_spill] sm:$0xff] }
 0x3c7   : > { %10323 = vst [vmem:[#allocation60_spill] sm:$0xff] %v8211_v36  ;;  %v3752_v30 = vsel %vm3746_vm8, %v10325_v57, %v10324_v48  ;;  %v10326_v33 = vld [vmem:[#allocation43_spill] sm:$0xff]  ;;  %v8222_v55 = vpop.permute.xlu1 %4062  ;;  %v8227_v35 = vadd.f32 %v4157_v50, %v4092_v60  ;;  %4292 = vrot.lane.b32.xlu0 %v8211_v36, %s5673_s25  ;;  %v3797_v58 = vadd.f32 %v3757_v47, %v3656_v25  ;;  %v10332_v48 = vld [vmem:[#allocation49_spill] sm:$0xff] }
 0x3c8   : > { %v8220_v19 = vmul.f32 0.036000773, %v10326_v33  ;;  %v10327_v63 = vld [vmem:[#allocation215_spill] sm:$0xff]  ;;  %v3898_v59 = vsel %vm3887_vm9, %v10331_v10, %v10330_v6  ;;  %v3958_v57 = vmul.f32 0.036000773, %v10332_v48  ;;  %v4094_v60 = vadd.f32 %v10337_v42, %v3974_v16  ;;  %v10339_v54 = vld [vmem:[#allocation65_spill] sm:$0xff] }
 0x3c9   : > { %v3891_v2 = vsel %vm3887_vm9, %v10328_v38, %v10327_v63  ;;  %10329 = vst [vmem:[#allocation53_spill] sm:$0xff] %v8227_v35  ;;  %v10333_v33 = vld [vmem:[#allocation195_spill] sm:$0xff]  ;;  %v8244_v50 = vmul.f32 0.007598758, %v8227_v35  ;;  %v3792_v37 = vadd.f32 %v3752_v30, %v8096_v40  ;;  %v3969_v6 = vadd.f32 %v8118_v24, %v3929_v43  ;;  %v10343_v24 = vld [vmem:[#allocation78_spill] sm:$0xff] }
 0x3ca   : > { %v3759_v63 = vsel %vm3746_vm8, %v10334_v28, %v10333_v33  ;;  %v10335_v13 = vld [vmem:[#allocation219_spill] sm:$0xff]  ;;  %v3931_v38 = vadd.f32 %v3891_v2, %v3790_v4  ;;  %v4161_v28 = vpop.permute.xlu0 %4160  ;;  %v3938_v48 = vadd.f32 %v3898_v59, %v3797_v58  ;;  %v10340_v33 = vld [vmem:[#allocation233_spill] sm:$0xff]  ;;  %v10342_v2 = vld [vmem:[#allocation64_spill] sm:$0xff]  ;;  %v3962_v43 = vmul.f32 0.036000773, %v10343_v24 }
 0x3cb   : > { %v3893_v17 = vsel %vm3887_vm9, %v10336_v23, %v10335_v13  ;;  %v10338_v25 = vld [vmem:[#allocation79_spill] sm:$0xff]  ;;  %v8251_v10 = vpop.permute.xlu1 %4066  ;;  %v10341_v13 = vld [vmem:[#allocation226_spill] sm:$0xff]  ;;  %v3976_v23 = vadd.f32 %v3956_v9, %v3936_v39  ;;  %v8256_v42 = vadd.f32 %v4161_v28, %v4094_v60  ;;  %4296 = vrot.lane.b32.xlu0 %v8244_v50, %s5673_s25  ;;  %v3799_v40 = vadd.f32 %v3759_v63, %v8136_v31  ;;  %v10348_v31 = vld [vmem:[#allocation216_spill] sm:$0xff] }
 0x3cc   : > { %v3754_v47 = vsel %vm3746_vm8, %v10339_v54, %v10338_v25  ;;  %v3900_v16 = vsel %vm3887_vm9, %v10341_v13, %v10340_v33  ;;  %v3933_v30 = vadd.f32 %v3893_v17, %v3792_v37  ;;  %v3960_v4 = vmul.f32 0.036000773, %v10342_v2  ;;  %v10344_v25 = vld [vmem:[#allocation199_spill] sm:$0xff]  ;;  %v10345_v54 = vld [vmem:[#allocation193_spill] sm:$0xff]  ;;  %v10350_v24 = vld [vmem:[#allocation230_spill] sm:$0xff] }
 0x3cd   : > { %v3761_v58 = vsel %vm3746_vm8, %v10345_v54, %v10344_v25  ;;  %v4089_v59 = vadd.f32 %v7960_v15, %v3969_v6  ;;  %v4096_v9 = vadd.f32 %v7962_v22, %v3976_v23  ;;  %v8269_v39 = vmul.f32 0.007598758, %v8256_v42  ;;  %v10347_v28 = vld [vmem:[#allocation223_spill] sm:$0xff]  ;;  %v10349_v2 = vld [vmem:[#allocation237_spill] sm:$0xff] }
 0x3ce   : > { %v3794_v60 = vadd.f32 %v3754_v47, %v8098_v11  ;;  %v3895_v63 = vsel %vm3887_vm9, %v10348_v31, %v10347_v28  ;;  %v3940_v17 = vadd.f32 %v3900_v16, %v3799_v40  ;;  %v3971_v37 = vadd.f32 %v8134_v32, %v3931_v38  ;;  %v4165_v13 = vpop.permute.xlu0 %4164  ;;  %v10352_v11 = vld [vmem:[#allocation93_spill] sm:$0xff]  ;;  %v10354_v38 = vld [vmem:[#allocation203_spill] sm:$0xff]  ;;  %v10355_v40 = vld [vmem:[#allocation196_spill] sm:$0xff] }
 0x3cf   : > { %10346 = vst [vmem:[#allocation62_spill] sm:$0xff] %v8269_v39  ;;  %v4151_v33 = vpop.permute.xlu1 %4150  ;;  %v3902_v15 = vsel %vm3887_vm9, %v10350_v24, %v10349_v2  ;;  %v3978_v6 = vadd.f32 %v3958_v57, %v3938_v48  ;;  %v8281_v23 = vadd.f32 %v4165_v13, %v4096_v9  ;;  %4300 = vrot.lane.b32.xlu0 %v8269_v39, %s5673_s25  ;;  %v10353_v47 = vld [vmem:[#allocation85_spill] sm:$0xff]  ;;  %v10357_v31 = vld [vmem:[#allocation227_spill] sm:$0xff] }
 0x3d0   : > { %v8279_v22 = vadd.f32 %v4151_v33, %v4089_v59  ;;  %v3756_v16 = vsel %vm3746_vm8, %v10353_v47, %v10352_v11  ;;  %v3801_v32 = vadd.f32 %v3761_v58, %v8159_v29  ;;  %v3763_v25 = vsel %vm3746_vm8, %v10355_v40, %v10354_v38  ;;  %v10358_v33 = vld [vmem:[#allocation220_spill] sm:$0xff]  ;;  %v10364_v47 = vld [vmem:[#allocation206_spill] sm:$0xff] }
 0x3d1   : > { %10351 = vst [vmem:[#allocation56_spill] sm:$0xff] %v8281_v23  ;;  %v3973_v54 = vadd.f32 %v8148_v41, %v3933_v30  ;;  %v4091_v57 = vadd.f32 %v7995_v61, %v3971_v37  ;;  %v4098_v48 = vadd.f32 %v7997_v62, %v3978_v6  ;;  %v8299_v9 = vmul.f32 0.007598758, %v8281_v23  ;;  %v10359_v41 = vld [vmem:[#allocation36_spill] sm:$0xff]  ;;  %v10360_v30 = vld [vmem:[#allocation234_spill] sm:$0xff]  ;;  %v10361_v62 = vld [vmem:[#allocation91_spill] sm:$0xff] }
 0x3d2   : > { %v8296_v59 = vmul.f32 0.007598758, %v8279_v22  ;;  %v3935_v28 = vadd.f32 %v3895_v63, %v3794_v60  ;;  %v3897_v29 = vsel %vm3887_vm9, %v10358_v33, %v10357_v31  ;;  %v3942_v58 = vadd.f32 %v3902_v15, %v3801_v32  ;;  %v4169_v24 = vpop.permute.xlu0 %4168  ;;  %v10362_v63 = vld [vmem:[#allocation113_spill] sm:$0xff]  ;;  %v10365_v32 = vld [vmem:[#allocation200_spill] sm:$0xff] }
 0x3d3   : > { %10356 = vst [vmem:[#allocation69_spill] sm:$0xff] %v8299_v9  ;;  %v3980_v13 = vadd.f32 %v3960_v4, %v3940_v17  ;;  %v4155_v2 = vpop.permute.xlu1 %4154  ;;  %v3904_v61 = vsel %vm3887_vm9, %v10360_v30, %v10359_v41  ;;  %v3964_v37 = vmul.f32 0.036000773, %v10361_v62  ;;  %v8312_v60 = vadd.f32 %v4169_v24, %v4098_v48  ;;  %4304 = vrot.lane.b32.xlu0 %v8299_v9, %s5673_s25  ;;  %v10363_v17 = vld [vmem:[#allocation94_spill] sm:$0xff]  ;;  %v10369_v33 = vld [vmem:[#allocation224_spill] sm:$0xff]  ;;  %v10370_v30 = vld [vmem:[#allocation57_spill] sm:$0xff] }
 0x3d4   : > { %v8308_v6 = vadd.f32 %v4155_v2, %v4091_v57  ;;  %4290 = vrot.lane.b32.xlu1 %v8296_v59, %s5673_s25  ;;  %v3796_v4 = vadd.f32 %v3756_v16, %v8109_v14  ;;  %v3758_v15 = vsel %vm3746_vm8, %v10363_v17, %v10362_v63  ;;  %v3803_v11 = vadd.f32 %v3763_v25, %v8178_v8  ;;  %v10368_v16 = vld [vmem:[#allocation231_spill] sm:$0xff]  ;;  %v10372_v62 = vld [vmem:[#allocation101_spill] sm:$0xff] }
 0x3d5   : > { %v3765_v38 = vsel %vm3746_vm8, %v10365_v32, %v10364_v47  ;;  %v4093_v40 = vadd.f32 %v8017_v20, %v3973_v54  ;;  %v4100_v57 = vadd.f32 %v8019_v12, %v3980_v13  ;;  %v8330_v31 = vmul.f32 0.007598758, %v8312_v60  ;;  %v10378_v32 = vld [vmem:[#allocation228_spill] sm:$0xff] }
 0x3d6   : > { %v8327_v48 = vmul.f32 0.007598758, %v8308_v6  ;;  %v3937_v14 = vadd.f32 %v3897_v29, %v3796_v4  ;;  %v3899_v2 = vsel %vm3887_vm9, %v10369_v33, %v10368_v16  ;;  %v3944_v8 = vadd.f32 %v3904_v61, %v3803_v11  ;;  %v4173_v41 = vpop.permute.xlu0 %4172  ;;  %v10371_v61 = vld [vmem:[#allocation197_spill] sm:$0xff] }
 0x3d7   : > { %10367 = vst [vmem:[#allocation61_spill] sm:$0xff] %v8330_v31  ;;  %v3975_v25 = vadd.f32 %v8187_v45, %v3935_v28  ;;  %v4159_v24 = vpop.permute.xlu1 %4158  ;;  %v3959_v20 = vmul.f32 0.036000773, %v10370_v30  ;;  %v3982_v54 = vadd.f32 %v3962_v43, %v3942_v58  ;;  %v8341_v13 = vadd.f32 %v4173_v41, %v4100_v57  ;;  %4308 = vrot.lane.b32.xlu0 %v8330_v31, %s5673_s25  ;;  %v10373_v4 = vld [vmem:[#allocation9_spill] sm:$0xff]  ;;  %v10374_v43 = vld [vmem:[#allocation238_spill] sm:$0xff] }
 0x3d8   : > { %10366 = vst [vmem:[#allocation59_spill] sm:$0xff] %v8327_v48  ;;  %v8337_v12 = vadd.f32 %v4159_v24, %v4093_v40  ;;  %4294 = vrot.lane.b32.xlu1 %v8327_v48, %s5673_s25  ;;  %v3798_v29 = vadd.f32 %v3758_v15, %v8128_v53  ;;  %v3760_v45 = vsel %vm3746_vm8, %v10372_v62, %v10371_v61  ;;  %v10377_v15 = vld [vmem:[#allocation235_spill] sm:$0xff]  ;;  %v10381_v41 = vld [vmem:[#allocation185_spill] sm:$0xff]  ;;  %v10383_v30 = vld [vmem:[#allocation194_spill] sm:$0xff]  ;;  %v8699_v48 = vmul.f32 0.21300554, %v8227_v35 }
 0x3d9   : > { %v3805_v28 = vadd.f32 %v3765_v38, %v8214_v21  ;;  %v3906_v58 = vsel %vm3887_vm9, %v10374_v43, %v10373_v4  ;;  %v4095_v63 = vadd.f32 %v8049_v3, %v3975_v25  ;;  %v4102_v17 = vadd.f32 %v8051_v51, %v3982_v54  ;;  %v10379_v3 = vld [vmem:[#allocation106_spill] sm:$0xff]  ;;  %v10387_v43 = vld [vmem:[#allocation24_spill] sm:$0xff] }
 0x3da   : > { %v8356_v11 = vmul.f32 0.007598758, %v8337_v12  ;;  %v8359_v47 = vmul.f32 0.007598758, %v8341_v13  ;;  %v3939_v53 = vadd.f32 %v3899_v2, %v3798_v29  ;;  %v3901_v40 = vsel %vm3887_vm9, %v10378_v32, %v10377_v15  ;;  %v4177_v16 = vpop.permute.xlu0 %4176  ;;  %v10380_v2 = vld [vmem:[#allocation189_spill] sm:$0xff]  ;;  %v10386_v4 = vld [vmem:[#allocation34_spill] sm:$0xff] }
 0x3db   : > { %v3977_v21 = vadd.f32 %v8220_v19, %v3937_v14  ;;  %v3984_v38 = vadd.f32 %v3964_v37, %v3944_v8  ;;  %v4163_v57 = vpop.permute.xlu1 %4162  ;;  %v3946_v33 = vadd.f32 %v3906_v58, %v3805_v28  ;;  %v3966_v25 = vmul.f32 0.036000773, %v10379_v3  ;;  %v10382_v8 = vld [vmem:[#allocation201_spill] sm:$0xff] }
 0x3dc   : > { %10375 = vst [vmem:[#allocation73_spill] sm:$0xff] %v8356_v11  ;;  %10376 = vst [vmem:[#allocation68_spill] sm:$0xff] %v8359_v47  ;;  %v8366_v51 = vadd.f32 %v4163_v57, %v4095_v63  ;;  %4298 = vrot.lane.b32.xlu1 %v8356_v11, %s5673_s25  ;;  %v8370_v24 = vadd.f32 %v4177_v16, %v4102_v17  ;;  %4312 = vrot.lane.b32.xlu0 %v8359_v47, %s5673_s25  ;;  %v10393_v57 = vld [vmem:[#allocation232_spill] sm:$0xff]  ;;  %v8750_v39 = vmul.f32 0.21300554, %v8337_v12 }
 0x3dd   : > { %v3402_v19 = vsel %vm3384_vm6, %v10381_v41, %v10380_v2  ;;  %v3661_v37 = vadd.f32 %v8164_v1, %v8044_v5  ;;  %v3800_v14 = vadd.f32 %v3760_v45, %v8142_v46  ;;  %v3762_v54 = vsel %vm3746_vm8, %v10383_v30, %v10382_v8  ;;  %v10388_v45 = vld [vmem:[#allocation71_spill] sm:$0xff]  ;;  %v10396_v41 = vld [vmem:[#allocation42_spill] sm:$0xff] }
 0x3de   : > { %v4097_v29 = vadd.f32 %v8088_v52, %v3977_v21  ;;  %v4104_v61 = vadd.f32 %v8090_v27, %v3984_v38  ;;  %v8386_v62 = vmul.f32 0.007598758, %v8366_v51  ;;  %v8389_v28 = vmul.f32 0.007598758, %v8370_v24  ;;  %v4181_v17 = vpop.permute.xlu0 %4180  ;;  %v10390_v21 = vld [vmem:[#allocation120_spill] sm:$0xff]  ;;  %v10392_v38 = vld [vmem:[#allocation45_spill] sm:$0xff] }
 0x3df   : > { %v3623_v5 = vsel %vm3605_vm7, %v10387_v43, %v10386_v4  ;;  %v3941_v1 = vadd.f32 %v3901_v40, %v3800_v14  ;;  %v3979_v46 = vadd.f32 %v3959_v20, %v3939_v53  ;;  %v3961_v58 = vmul.f32 0.036000773, %v10388_v45  ;;  %v4167_v63 = vpop.permute.xlu1 %4166  ;;  %v10391_v40 = vld [vmem:[#allocation187_spill] sm:$0xff]  ;;  %v10399_v8 = vld [vmem:[#allocation198_spill] sm:$0xff]  ;;  %v10402_v45 = vld [vmem:[#allocation40_spill] sm:$0xff] }
 0x3e0   : > { %10384 = vst [vmem:[#allocation75_spill] sm:$0xff] %v8386_v62  ;;  %10385 = vst [vmem:[#allocation67_spill] sm:$0xff] %v8389_v28  ;;  %v3986_v15 = vadd.f32 %v3966_v25, %v3946_v33  ;;  %v8395_v52 = vadd.f32 %v4167_v63, %v4097_v29  ;;  %4302 = vrot.lane.b32.xlu1 %v8386_v62, %s5673_s25  ;;  %v8399_v27 = vadd.f32 %v4181_v17, %v4104_v61  ;;  %v10403_v63 = vld [vmem:[#allocation236_spill] sm:$0xff] }
 0x3e1   : > { %4316 = vrot.lane.b32.xlu0 %v8389_v28, %s5673_s25  ;;  %v3442_v32 = vadd.f32 %v3402_v19, %v7976_v7  ;;  %v3404_v20 = vsel %vm3384_vm6, %v10391_v40, %v10390_v21  ;;  %v3802_v53 = vadd.f32 %v3762_v54, %v3661_v37  ;;  %v3903_v16 = vsel %vm3887_vm9, %v10393_v57, %v10392_v38  ;;  %v10397_v19 = vld [vmem:[#allocation30_spill] sm:$0xff]  ;;  %v10398_v37 = vld [vmem:[#allocation204_spill] sm:$0xff] }
 0x3e2   : > { %10389 = vst [vmem:[#allocation80_spill] sm:$0xff] %v8399_v27  ;;  %v4099_v33 = vadd.f32 %v8120_v56, %v3979_v46  ;;  %v4106_v3 = vadd.f32 %v8122_v0, %v3986_v15  ;;  %v8413_v25 = vmul.f32 0.007598758, %v8395_v52  ;;  %v8416_v2 = vmul.f32 0.007598758, %v8399_v27  ;;  %v4185_v56 = vpop.permute.xlu0 %4184  ;;  %v10400_v0 = vld [vmem:[#allocation84_spill] sm:$0xff] }
 0x3e3   : > { %v3663_v7 = vadd.f32 %v3623_v5, %v3442_v32  ;;  %v3625_v14 = vsel %vm3605_vm7, %v10397_v19, %v10396_v41  ;;  %v3764_v30 = vsel %vm3746_vm8, %v10399_v8, %v10398_v37  ;;  %v3981_v54 = vadd.f32 %v3961_v58, %v3941_v1  ;;  %v4171_v29 = vpop.permute.xlu1 %4170  ;;  %v10406_v40 = vld [vmem:[#allocation208_spill] sm:$0xff] }
 0x3e4   : > { %10394 = vst [vmem:[#allocation70_spill] sm:$0xff] %v8413_v25  ;;  %10395 = vst [vmem:[#allocation82_spill] sm:$0xff] %v8416_v2  ;;  %v3943_v61 = vadd.f32 %v3903_v16, %v3802_v53  ;;  %v3963_v4 = vmul.f32 0.036000773, %v10400_v0  ;;  %v8425_v43 = vadd.f32 %v4171_v29, %v4099_v33  ;;  %4306 = vrot.lane.b32.xlu1 %v8413_v25, %s5673_s25  ;;  %v10407_v53 = vld [vmem:[#allocation202_spill] sm:$0xff]  ;;  %v10408_v16 = vld [vmem:[#allocation99_spill] sm:$0xff] }
 0x3e5   : > { %v8429_v5 = vadd.f32 %v4185_v56, %v4106_v3  ;;  %4320 = vrot.lane.b32.xlu0 %v8416_v2, %s5673_s25  ;;  %v3444_v46 = vadd.f32 %v3404_v20, %v7987_v49  ;;  %v3905_v1 = vsel %vm3887_vm9, %v10403_v63, %v10402_v45  ;;  %v3804_v58 = vadd.f32 %v3764_v30, %v3663_v7  ;;  %v10410_v7 = vld [vmem:[#allocation47_spill] sm:$0xff]  ;;  %v10412_v56 = vld [vmem:[#allocation112_spill] sm:$0xff] }
 0x3e6   : > { %v4101_v17 = vadd.f32 %v8151_v44, %v3981_v54  ;;  %v8439_v15 = vmul.f32 0.007598758, %v8425_v43  ;;  %v3766_v38 = vsel %vm3746_vm8, %v10407_v53, %v10406_v40  ;;  %v3983_v20 = vadd.f32 %v3963_v4, %v3943_v61  ;;  %v10409_v44 = vld [vmem:[#allocation48_spill] sm:$0xff] }
 0x3e7   : > { %10401 = vst [vmem:[#allocation74_spill] sm:$0xff] %v8429_v5  ;;  %v8442_v32 = vmul.f32 0.007598758, %v8429_v5  ;;  %v3665_v21 = vadd.f32 %v3625_v14, %v3444_v46  ;;  %v4175_v57 = vpop.permute.xlu1 %4174  ;;  %v3945_v49 = vadd.f32 %v3905_v1, %v3804_v58  ;;  %v3965_v33 = vmul.f32 0.036000773, %v10408_v16 }
 0x3e8   : > { %10404 = vst [vmem:[#allocation104_spill] sm:$0xff] %v8439_v15  ;;  %v8448_v3 = vadd.f32 %v4175_v57, %v4101_v17  ;;  %4310 = vrot.lane.b32.xlu1 %v8439_v15, %s5673_s25  ;;  %v3907_v41 = vsel %vm3887_vm9, %v10410_v7, %v10409_v44  ;;  %v4103_v14 = vadd.f32 %v8189_v18, %v3983_v20  ;;  %v8462_v8 = vmul.f32 0.036000773, %v8156_v26 }
 0x3e9   : > { %10405 = vst [vmem:[#allocation87_spill] sm:$0xff] %v8442_v32  ;;  %4324 = vrot.lane.b32.xlu0 %v8442_v32, %s5673_s25  ;;  %v3806_v19 = vadd.f32 %v3766_v38, %v3665_v21  ;;  %v3985_v29 = vadd.f32 %v3965_v33, %v3945_v49  ;;  %v3967_v61 = vmul.f32 0.036000773, %v10412_v56  ;;  %v8476_v46 = vmul.f32 0.036000773, %v8194_v34 }
 0x3ea   : > { %v8459_v37 = vmul.f32 0.007598758, %v8448_v3  ;;  %v8489_v17 = vmul.f32 0.036000773, %v8227_v35  ;;  %v8508_v38 = vmul.f32 0.036000773, %v8279_v22 }
 0x3eb   : > { %v4179_v30 = vpop.permute.xlu1 %4178  ;;  %v3947_v54 = vadd.f32 %v3907_v41, %v3806_v19  ;;  %v4105_v18 = vadd.f32 %v8222_v55, %v3985_v29  ;;  %v8511_v57 = vmul.f32 0.036000773, %v8281_v23  ;;  %v8518_v49 = vmul.f32 0.036000773, %v8308_v6 }
 0x3ec   : > { %10411 = vst [vmem:[#allocation76_spill] sm:$0xff] %v8459_v37  ;;  %v8465_v0 = vadd.f32 %v4179_v30, %v4103_v14  ;;  %4314 = vrot.lane.b32.xlu1 %v8459_v37, %s5673_s25  ;;  %v8521_v20 = vmul.f32 0.036000773, %v8312_v60  ;;  %v8528_v16 = vmul.f32 0.036000773, %v8337_v12 }
 0x3ed   : > { %4408 = vrot.lane.b32.xlu0 %v8462_v8, %s5674_s26  ;;  %v3987_v63 = vadd.f32 %v3967_v61, %v3947_v54  ;;  %v8531_v33 = vmul.f32 0.036000773, %v8341_v13  ;;  %v8538_v44 = vmul.f32 0.036000773, %v8366_v51  ;;  %v8541_v7 = vmul.f32 0.036000773, %v8370_v24 }
 0x3ee   : > { %v8473_v4 = vmul.f32 0.007598758, %v8465_v0  ;;  %10418 = vst [vmem:[#allocation88_spill] sm:$0xff] %v8521_v20  ;;  %v8548_v41 = vmul.f32 0.036000773, %v8395_v52 }
 0x3ef   : > { %v4183_v45 = vpop.permute.xlu1 %4182  ;;  %v4107_v58 = vadd.f32 %v8251_v10, %v3987_v63  ;;  %v8501_v10 = vmul.f32 0.036000773, %v8256_v42  ;;  %10419 = vst [vmem:[#allocation83_spill] sm:$0xff] %v8538_v44  ;;  %10420 = vst [vmem:[#allocation102_spill] sm:$0xff] %v8541_v7  ;;  %v8551_v19 = vmul.f32 0.036000773, %v8399_v27 }
 0x3f0   : > { %10413 = vst [vmem:[#allocation89_spill] sm:$0xff] %v8473_v4  ;;  %v8478_v1 = vadd.f32 %v4183_v45, %v4105_v18  ;;  %4318 = vrot.lane.b32.xlu1 %v8473_v4, %s5673_s25  ;;  %v8558_v14 = vmul.f32 0.036000773, %v8425_v43  ;;  %v8561_v30 = vmul.f32 0.036000773, %v8429_v5 }
 0x3f1   : > { %4412 = vrot.lane.b32.xlu0 %v8476_v46, %s5674_s26  ;;  %10421 = vst [vmem:[#allocation12_spill] sm:$0xff] %v8551_v19  ;;  %v8568_v54 = vmul.f32 0.036000773, %v8448_v3  ;;  %v8571_v29 = vmul.f32 0.10936069, %v8156_v26 }
 0x3f2   : > { %10414 = vst [vmem:[#allocation96_spill] sm:$0xff] %v8478_v1  ;;  %v8486_v55 = vmul.f32 0.007598758, %v8478_v1  ;;  %10422 = vst [vmem:[#allocation105_spill] sm:$0xff] %v8558_v14  ;;  %v8578_v56 = vmul.f32 0.036000773, %v8465_v0 }
 0x3f3   : > { %v4187_v21 = vpop.permute.xlu1 %4186  ;;  %10423 = vst [vmem:[#allocation3_spill] sm:$0xff] %v8561_v30  ;;  %v8581_v61 = vmul.f32 0.10936069, %v8194_v34  ;;  %v8588_v18 = vmul.f32 0.036000773, %v8478_v1 }
 0x3f4   : > { %10415 = vst [vmem:[#allocation81_spill] sm:$0xff] %v8486_v55  ;;  %v8491_v40 = vadd.f32 %v4187_v21, %v4107_v58  ;;  %4322 = vrot.lane.b32.xlu1 %v8486_v55, %s5673_s25  ;;  %10424 = vst [vmem:[#allocation109_spill] sm:$0xff] %v8578_v56  ;;  %v8591_v45 = vmul.f32 0.10936069, %v8227_v35  ;;  %v8601_v58 = vmul.f32 0.10936069, %v8256_v42 }
 0x3f5   : > { %4416 = vrot.lane.b32.xlu0 %v8489_v17, %s5674_s26  ;;  %10425 = vst [vmem:[#allocation90_spill] sm:$0xff] %v8588_v18  ;;  %v8608_v21 = vmul.f32 0.10936069, %v8279_v22  ;;  %v8618_v2 = vmul.f32 0.10936069, %v8308_v6 }
 0x3f6   : > { %10416 = vst [vmem:[#allocation95_spill] sm:$0xff] %v8491_v40  ;;  %v8498_v53 = vmul.f32 0.007598758, %v8491_v40  ;;  %v8598_v63 = vmul.f32 0.036000773, %v8491_v40 }
 0x3f7   : > { %v8628_v32 = vmul.f32 0.10936069, %v8337_v12  ;;  %v8638_v55 = vmul.f32 0.10936069, %v8366_v51  ;;  %v8651_v4 = vmul.f32 0.10936069, %v8399_v27 }
 0x3f8   : > { %10417 = vst [vmem:[#allocation97_spill] sm:$0xff] %v8498_v53  ;;  %4326 = vrot.lane.b32.xlu1 %v8498_v53, %s5673_s25  ;;  %10426 = vst [vmem:[#allocation108_spill] sm:$0xff] %v8598_v63  ;;  %v8611_v53 = vmul.f32 0.10936069, %v8281_v23  ;;  %v8658_v15 = vmul.f32 0.10936069, %v8425_v43 }
 0x3f9   : > { %4420 = vrot.lane.b32.xlu0 %v8501_v10, %s5674_s26  ;;  %10427 = vst [vmem:[#allocation4_spill] sm:$0xff] %v8651_v4  ;;  %v8663_v62 = vmul.f32 0.10936069, %v8429_v5  ;;  %v8670_v27 = vmul.f32 0.10936069, %v8448_v3 }
 0x3fa   : > { %v8708_v37 = vmul.f32 0.10936069, %v8491_v40  ;;  %v8727_v40 = vmul.f32 0.21300554, %v8281_v23  ;;  %v8741_v25 = vmul.f32 0.21300554, %v8312_v60 }
 0x3fb   : > { %10429 = vst [vmem:[#allocation10_spill] sm:$0xff] %v8663_v62  ;;  %v8764_v47 = vmul.f32 0.21300554, %v8366_v51  ;;  %v8778_v9 = vmul.f32 0.21300554, %v8395_v52 }
 0x3fc   : > { %4410 = vrot.lane.b32.xlu1 %v8508_v38, %s5674_s26  ;;  %10436 = vst [vmem:[#allocation5_spill] sm:$0xff] %v8708_v37  ;;  %v8789_v36 = vmul.f32 0.21300554, %v8425_v43 }
 0x3fd   : > { %4424 = vrot.lane.b32.xlu0 %v8511_v57, %s5674_s26 }
 0x400   : > { %4414 = vrot.lane.b32.xlu1 %v8518_v49, %s5674_s26 }
 0x401   : > { %4428 = vrot.lane.b32.xlu0 %v8521_v20, %s5674_s26 }
 0x404   : > { %4418 = vrot.lane.b32.xlu1 %v8528_v16, %s5674_s26 }
 0x405   : > { %4432 = vrot.lane.b32.xlu0 %v8531_v33, %s5674_s26 }
 0x408   : > { %4422 = vrot.lane.b32.xlu1 %v8538_v44, %s5674_s26  ;;  %v8769_v44 = vmul.f32 0.21300554, %v8370_v24 }
 0x409   : > { %4436 = vrot.lane.b32.xlu0 %v8541_v7, %s5674_s26  ;;  %v8755_v7 = vmul.f32 0.21300554, %v8341_v13 }
 0x40c   : > { %4426 = vrot.lane.b32.xlu1 %v8548_v41, %s5674_s26 }
 0x40d   : > { %4440 = vrot.lane.b32.xlu0 %v8551_v19, %s5674_s26  ;;  %v8631_v19 = vmul.f32 0.10936069, %v8341_v13 }
 0x410   : > { %4430 = vrot.lane.b32.xlu1 %v8558_v14, %s5674_s26 }
 0x411   : > { %4444 = vrot.lane.b32.xlu0 %v8561_v30, %s5674_s26  ;;  %v8641_v30 = vmul.f32 0.10936069, %v8370_v24 }
 0x414   : > { %4434 = vrot.lane.b32.xlu1 %v8568_v54, %s5674_s26 }
 0x415   : > { %4528 = vrot.lane.b32.xlu0 %v8571_v29, %s5675_s27 }
 0x418   : > { %4438 = vrot.lane.b32.xlu1 %v8578_v56, %s5674_s26 }
 0x419   : > { %4532 = vrot.lane.b32.xlu0 %v8581_v61, %s5675_s27 }
 0x41c   : > { %4442 = vrot.lane.b32.xlu1 %v8588_v18, %s5674_s26  ;;  %v8648_v18 = vmul.f32 0.10936069, %v8395_v52 }
 0x41d   : > { %4536 = vrot.lane.b32.xlu0 %v8591_v45, %s5675_s27 }
 0x420   : > { %4446 = vrot.lane.b32.xlu1 %v8598_v63, %s5674_s26  ;;  %v8621_v63 = vmul.f32 0.10936069, %v8312_v60 }
 0x421   : > { %4540 = vrot.lane.b32.xlu0 %v8601_v58, %s5675_s27 }
 0x424   : > { %4530 = vrot.lane.b32.xlu1 %v8608_v21, %s5675_s27 }
 0x425   : > { %4544 = vrot.lane.b32.xlu0 %v8611_v53, %s5675_s27 }
 0x428   : > { %4534 = vrot.lane.b32.xlu1 %v8618_v2, %s5675_s27 }
 0x429   : > { %4548 = vrot.lane.b32.xlu0 %v8621_v63, %s5675_s27 }
 0x42c   : > { %4538 = vrot.lane.b32.xlu1 %v8628_v32, %s5675_s27 }
 0x42d   : > { %4552 = vrot.lane.b32.xlu0 %v8631_v19, %s5675_s27 }
 0x430   : > { %4542 = vrot.lane.b32.xlu1 %v8638_v55, %s5675_s27 }
 0x431   : > { %4556 = vrot.lane.b32.xlu0 %v8641_v30, %s5675_s27 }
 0x434   : > { %4546 = vrot.lane.b32.xlu1 %v8648_v18, %s5675_s27  ;;  %v8660_v28 = vpop.permute.xlu0 %4288 }
 0x435   : > { %4560 = vrot.lane.b32.xlu0 %v8651_v4, %s5675_s27  ;;  %10428 = vst [vmem:[#allocation111_spill] sm:$0xff] %v8660_v28  ;;  %v8675_v4 = vmul.f32 0.21300554, %v8156_v26  ;;  %v8682_v28 = vmul.f32 0.10936069, %v8465_v0 }
 0x437   : > { %10431 = vst [vmem:[#allocation98_spill] sm:$0xff] %v8682_v28 }
 0x438   : > { %4550 = vrot.lane.b32.xlu1 %v8658_v15, %s5675_s27 }
 0x439   : > { %4564 = vrot.lane.b32.xlu0 %v8663_v62, %s5675_s27  ;;  %v8672_v56 = vpop.permute.xlu0 %4292  ;;  %v8687_v62 = vmul.f32 0.21300554, %v8194_v34 }
 0x43a   : > { %10430 = vst [vmem:[#allocation2_spill] sm:$0xff] %v8672_v56  ;;  %v8694_v56 = vmul.f32 0.10936069, %v8478_v1  ;;  %v8713_v1 = vmul.f32 0.21300554, %v8256_v42 }
 0x43c   : > { %4554 = vrot.lane.b32.xlu1 %v8670_v27, %s5675_s27  ;;  %10433 = vst [vmem:[#allocation118_spill] sm:$0xff] %v8694_v56 }
 0x43d   : > { %4648 = vrot.lane.b32.xlu0 %v8675_v4, %s5676_s28  ;;  %v8684_v5 = vpop.permute.xlu0 %4296 }
 0x43e   : > { %10432 = vst [vmem:[#allocation110_spill] sm:$0xff] %v8684_v5 }
 0x440   : > { %4558 = vrot.lane.b32.xlu1 %v8682_v28, %s5675_s27  ;;  %v4728_v28 = vmul.f32 0.26601171, %v8156_v26  ;;  %v8800_v26 = vmul.f32 0.21300554, %v8448_v3 }
 0x441   : > { %4652 = vrot.lane.b32.xlu0 %v8687_v62, %s5676_s28  ;;  %v8696_v31 = vpop.permute.xlu0 %4300 }
 0x442   : > { %10434 = vst [vmem:[#allocation114_spill] sm:$0xff] %v8696_v31 }
 0x444   : > { %4562 = vrot.lane.b32.xlu1 %v8694_v56, %s5675_s27  ;;  %v8722_v56 = vmul.f32 0.21300554, %v8279_v22 }
 0x445   : > { %4656 = vrot.lane.b32.xlu0 %v8699_v48, %s5676_s28  ;;  %v8710_v14 = vpop.permute.xlu0 %4304 }
 0x446   : > { %v8705_v5 = vpop.permute.xlu1 %4290  ;;  %10437 = vst [vmem:[#allocation103_spill] sm:$0xff] %v8710_v14  ;;  %v8736_v14 = vmul.f32 0.21300554, %v8308_v6 }
 0x447   : > { %10435 = vst [vmem:[#allocation122_spill] sm:$0xff] %v8705_v5 }
 0x448   : > { %4566 = vrot.lane.b32.xlu1 %v8708_v37, %s5675_s27 }
 0x449   : > { %4660 = vrot.lane.b32.xlu0 %v8713_v1, %s5676_s28  ;;  %v8724_v5 = vpop.permute.xlu0 %4308 }
 0x44a   : > { %v8719_v31 = vpop.permute.xlu1 %4294  ;;  %10439 = vst [vmem:[#allocation115_spill] sm:$0xff] %v8724_v5 }
 0x44b   : > { %10438 = vst [vmem:[#allocation128_spill] sm:$0xff] %v8719_v31 }
 0x44c   : > { %4650 = vrot.lane.b32.xlu1 %v8722_v56, %s5676_s28 }
 0x44d   : > { %4664 = vrot.lane.b32.xlu0 %v8727_v40, %s5676_s28 }
 0x44e   : > { %v8733_v37 = vpop.permute.xlu1 %4298  ;;  %v8738_v31 = vpop.permute.xlu0 %4312 }
 0x44f   : > { %10440 = vst [vmem:[#allocation132_spill] sm:$0xff] %v8733_v37  ;;  %10441 = vst [vmem:[#allocation119_spill] sm:$0xff] %v8738_v31 }
 0x450   : > { %4654 = vrot.lane.b32.xlu1 %v8736_v14, %s5676_s28 }
 0x451   : > { %4668 = vrot.lane.b32.xlu0 %v8741_v25, %s5676_s28 }
 0x452   : > { %v8747_v5 = vpop.permute.xlu1 %4302 }
 0x453   : > { %10442 = vst [vmem:[#allocation138_spill] sm:$0xff] %v8747_v5  ;;  %v8752_v37 = vpop.permute.xlu0 %4316 }
 0x454   : > { %10443 = vst [vmem:[#allocation123_spill] sm:$0xff] %v8752_v37  ;;  %4658 = vrot.lane.b32.xlu1 %v8750_v39, %s5676_s28 }
 0x455   : > { %4672 = vrot.lane.b32.xlu0 %v8755_v7, %s5676_s28 }
 0x456   : > { %v8761_v31 = vpop.permute.xlu1 %4306 }
 0x457   : > { %10444 = vst [vmem:[#allocation142_spill] sm:$0xff] %v8761_v31  ;;  %v8766_v5 = vpop.permute.xlu0 %4320 }
 0x458   : > { %10445 = vst [vmem:[#allocation129_spill] sm:$0xff] %v8766_v5  ;;  %4662 = vrot.lane.b32.xlu1 %v8764_v47, %s5676_s28 }
 0x459   : > { %4676 = vrot.lane.b32.xlu0 %v8769_v44, %s5676_s28 }
 0x45a   : > { %v8775_v37 = vpop.permute.xlu1 %4310 }
 0x45b   : > { %10446 = vst [vmem:[#allocation146_spill] sm:$0xff] %v8775_v37  ;;  %v8780_v31 = vpop.permute.xlu0 %4324  ;;  %v4732_v37 = vmul.f32 0.26601171, %v8227_v35  ;;  %v8811_v35 = vmul.f32 0.21300554, %v8465_v0 }
 0x45c   : > { %10447 = vst [vmem:[#allocation133_spill] sm:$0xff] %v8780_v31  ;;  %4666 = vrot.lane.b32.xlu1 %v8778_v9, %s5676_s28 }
 0x45d   : > { %4768 = vrot.lane.b32.xlu0 %v4728_v28, %s5677_s29 }
 0x45e   : > { %v8786_v5 = vpop.permute.xlu1 %4314 }
 0x45f   : > { %10448 = vst [vmem:[#allocation150_spill] sm:$0xff] %v8786_v5  ;;  %v8791_v11 = vpop.permute.xlu0 %4408  ;;  %v4730_v5 = vmul.f32 0.26601171, %v8194_v34  ;;  %v4729_v34 = vmul.f32 0.26601171, %v8279_v22 }
 0x460   : > { %10449 = vst [vmem:[#allocation139_spill] sm:$0xff] %v8791_v11  ;;  %4670 = vrot.lane.b32.xlu1 %v8789_v36, %s5676_s28 }
 0x461   : > { %4776 = vrot.lane.b32.xlu0 %v4732_v37, %s5677_s29 }
 0x462   : > { %v8797_v31 = vpop.permute.xlu1 %4318 }
 0x463   : > { %10450 = vst [vmem:[#allocation153_spill] sm:$0xff] %v8797_v31  ;;  %v8802_v28 = vpop.permute.xlu0 %4412  ;;  %v4736_v31 = vmul.f32 0.26601171, %v8281_v23 }
 0x464   : > { %10451 = vst [vmem:[#allocation143_spill] sm:$0xff] %v8802_v28  ;;  %4674 = vrot.lane.b32.xlu1 %v8800_v26, %s5676_s28 }
 0x465   : > { %4772 = vrot.lane.b32.xlu0 %v4730_v5, %s5677_s29  ;;  %v4740_v5 = vmul.f32 0.26601171, %v8341_v13 }
 0x466   : > { %v8808_v11 = vpop.permute.xlu1 %4322 }
 0x467   : > { %10452 = vst [vmem:[#allocation155_spill] sm:$0xff] %v8808_v11  ;;  %v8813_v37 = vpop.permute.xlu0 %4416 }
 0x468   : > { %10453 = vst [vmem:[#allocation148_spill] sm:$0xff] %v8813_v37  ;;  %4678 = vrot.lane.b32.xlu1 %v8811_v35, %s5676_s28  ;;  %v4733_v37 = vmul.f32 0.26601171, %v8337_v12 }
 0x469   : > { %4784 = vrot.lane.b32.xlu0 %v4736_v31, %s5677_s29 }
 0x46a   : > { %v8819_v28 = vpop.permute.xlu1 %4326 }
 0x46b   : > { %10454 = vst [vmem:[#allocation157_spill] sm:$0xff] %v8819_v28  ;;  %v8822_v20 = vpop.permute.xlu0 %4420  ;;  %v4734_v28 = vmul.f32 0.26601171, %v8256_v42 }
 0x46c   : > { %10455 = vst [vmem:[#allocation151_spill] sm:$0xff] %v8822_v20  ;;  %4770 = vrot.lane.b32.xlu1 %v4729_v34, %s5677_s29 }
 0x46d   : > { %4792 = vrot.lane.b32.xlu0 %v4740_v5, %s5677_s29  ;;  %v4737_v5 = vmul.f32 0.26601171, %v8395_v52 }
 0x46e   : > { %v8827_v11 = vpop.permute.xlu1 %4410 }
 0x46f   : > { %10456 = vst [vmem:[#allocation159_spill] sm:$0xff] %v8827_v11  ;;  %v8830_v23 = vpop.permute.xlu0 %4424  ;;  %v4731_v11 = vmul.f32 0.26601171, %v8308_v6 }
 0x470   : > { %4778 = vrot.lane.b32.xlu1 %v4733_v37, %s5677_s29 }
 0x471   : > { %4848 = vrot.lane.b32.xlu0 %v8675_v4, %s5678_s30 }
 0x472   : > { %v8835_v31 = vpop.permute.xlu1 %4414 }
 0x473   : > { %10457 = vst [vmem:[#allocation154_spill] sm:$0xff] %v8835_v31  ;;  %v8838_v20 = vpop.permute.xlu0 %4428  ;;  %v4741_v31 = vmul.f32 0.26601171, %v8448_v3 }
 0x474   : > { %4780 = vrot.lane.b32.xlu1 %v4734_v28, %s5677_s29 }
 0x475   : > { %4856 = vrot.lane.b32.xlu0 %v8699_v48, %s5678_s30  ;;  %v4738_v48 = vmul.f32 0.26601171, %v8312_v60 }
 0x476   : > { %v8843_v34 = vpop.permute.xlu1 %4418 }
 0x477   : > { %10458 = vst [vmem:[#allocation161_spill] sm:$0xff] %v8843_v34  ;;  %v8846_v37 = vpop.permute.xlu0 %4432 }
 0x478   : > { %10459 = vst [vmem:[#allocation156_spill] sm:$0xff] %v8846_v37  ;;  %4786 = vrot.lane.b32.xlu1 %v4737_v5, %s5677_s29 }
 0x479   : > { %4774 = vrot.lane.b32.xlu0 %v4731_v11, %s5677_s29 }
 0x47a   : > { %v8851_v4 = vpop.permute.xlu1 %4422 }
 0x47b   : > { %v8854_v28 = vpop.permute.xlu0 %4436 }
 0x47c   : > { %4794 = vrot.lane.b32.xlu1 %v4741_v31, %s5677_s29 }
 0x47d   : > { %4788 = vrot.lane.b32.xlu0 %v4738_v48, %s5677_s29  ;;  %v4735_v48 = vmul.f32 0.26601171, %v8366_v51 }
 0x47e   : > { %v8859_v34 = vpop.permute.xlu1 %4426 }
 0x47f   : > { %10460 = vst [vmem:[#allocation163_spill] sm:$0xff] %v8859_v34  ;;  %v8861_v37 = vpop.permute.xlu0 %4440  ;;  %v9224_v34 = vmul.f32 0.0010283801, %v8465_v0 }
 0x480   : > { %10461 = vst [vmem:[#allocation158_spill] sm:$0xff] %v8861_v37  ;;  %4850 = vrot.lane.b32.xlu1 %v8722_v56, %s5678_s30  ;;  %v4742_v56 = vmul.f32 0.26601171, %v8370_v24 }
 0x481   : > { %4852 = vrot.lane.b32.xlu0 %v8687_v62, %s5678_s30  ;;  %10543 = vst [vmem:[#allocation58_spill] sm:$0xff] %v9224_v34 }
 0x482   : > { %v8867_v11 = vpop.permute.xlu1 %4430 }
 0x483   : > { %10462 = vst [vmem:[#allocation166_spill] sm:$0xff] %v8867_v11  ;;  %v8869_v5 = vpop.permute.xlu0 %4444 }
 0x484   : > { %10463 = vst [vmem:[#allocation160_spill] sm:$0xff] %v8869_v5  ;;  %4858 = vrot.lane.b32.xlu1 %v8750_v39, %s5678_s30 }
 0x485   : > { %4864 = vrot.lane.b32.xlu0 %v8727_v40, %s5678_s30 }
 0x486   : > { %v8875_v31 = vpop.permute.xlu1 %4434 }
 0x487   : > { %10464 = vst [vmem:[#allocation168_spill] sm:$0xff] %v8875_v31  ;;  %v8878_v37 = vpop.permute.xlu0 %4528 }
 0x488   : > { %4782 = vrot.lane.b32.xlu1 %v4735_v48, %s5677_s29 }
 0x489   : > { %4872 = vrot.lane.b32.xlu0 %v8755_v7, %s5678_s30 }
 0x48a   : > { %v8883_v62 = vpop.permute.xlu1 %4438 }
 0x48b   : > { %10465 = vst [vmem:[#allocation162_spill] sm:$0xff] %v8883_v62  ;;  %v8886_v5 = vpop.permute.xlu0 %4532  ;;  %v10502_v62 = vld [vmem:[#allocation83_spill] sm:$0xff] }
 0x48c   : > { %4796 = vrot.lane.b32.xlu1 %v4742_v56, %s5677_s29  ;;  %v4739_v56 = vmul.f32 0.26601171, %v8425_v43 }
 0x48d   : > { %4928 = vrot.lane.b32.xlu0 %v8571_v29, %s5679_s3 }
 0x48e   : > { %v8891_v39 = vpop.permute.xlu1 %4442 }
 0x48f   : > { %10466 = vst [vmem:[#allocation170_spill] sm:$0xff] %v8891_v39  ;;  %v8893_v40 = vpop.permute.xlu0 %4536 }
 0x490   : > { %4860 = vrot.lane.b32.xlu1 %v8713_v1, %s5678_s30 }
 0x491   : > { %4936 = vrot.lane.b32.xlu0 %v8591_v45, %s5679_s3 }
 0x492   : > { %v8899_v7 = vpop.permute.xlu1 %4446 }
 0x493   : > { %10467 = vst [vmem:[#allocation164_spill] sm:$0xff] %v8899_v7  ;;  %v8901_v48 = vpop.permute.xlu0 %4540 }
 0x494   : > { %10468 = vst [vmem:[#allocation172_spill] sm:$0xff] %v8901_v48  ;;  %4866 = vrot.lane.b32.xlu1 %v8778_v9, %s5678_s30 }
 0x495   : > { %4790 = vrot.lane.b32.xlu0 %v4739_v56, %s5677_s29 }
 0x496   : > { %v8907_v29 = vpop.permute.xlu1 %4530 }
 0x497   : > { %10469 = vst [vmem:[#allocation165_spill] sm:$0xff] %v8907_v29  ;;  %v8909_v39 = vpop.permute.xlu0 %4544 }
 0x498   : > { %4874 = vrot.lane.b32.xlu1 %v8800_v26, %s5678_s30 }
 0x499   : > { %4854 = vrot.lane.b32.xlu0 %v8736_v14, %s5678_s30  ;;  %v4743_v14 = vmul.f32 0.26601171, %v8465_v0 }
 0x49a   : > { %v8915_v1 = vpop.permute.xlu1 %4534 }
 0x49b   : > { %10470 = vst [vmem:[#allocation174_spill] sm:$0xff] %v8915_v1  ;;  %v8917_v45 = vpop.permute.xlu0 %4548 }
 0x49c   : > { %4930 = vrot.lane.b32.xlu1 %v8608_v21, %s5679_s3 }
 0x49d   : > { %4868 = vrot.lane.b32.xlu0 %v8741_v25, %s5678_s30 }
 0x49e   : > { %v8923_v9 = vpop.permute.xlu1 %4538 }
 0x49f   : > { %10471 = vst [vmem:[#allocation167_spill] sm:$0xff] %v8923_v9  ;;  %v8925_v56 = vpop.permute.xlu0 %4552  ;;  %v10512_v9 = vld [vmem:[#allocation70_spill] sm:$0xff] }
 0x4a0   : > { %4938 = vrot.lane.b32.xlu1 %v8628_v32, %s5679_s3 }
 0x4a1   : > { %4932 = vrot.lane.b32.xlu0 %v8581_v61, %s5679_s3 }
 0x4a2   : > { %v8931_v26 = vpop.permute.xlu1 %4542 }
 0x4a3   : > { %v8934_v7 = vpop.permute.xlu0 %4556 }
 0x4a4   : > { %4798 = vrot.lane.b32.xlu1 %v4743_v14, %s5677_s29 }
 0x4a5   : > { %4944 = vrot.lane.b32.xlu0 %v8611_v53, %s5679_s3 }
 0x4a6   : > { %v8939_v25 = vpop.permute.xlu1 %4546 }
 0x4a7   : > { %10472 = vst [vmem:[#allocation176_spill] sm:$0xff] %v8939_v25  ;;  %v8941_v21 = vpop.permute.xlu0 %4560 }
 0x4a8   : > { %10473 = vst [vmem:[#allocation169_spill] sm:$0xff] %v8941_v21  ;;  %4862 = vrot.lane.b32.xlu1 %v8764_v47, %s5678_s30 }
 0x4a9   : > { %4952 = vrot.lane.b32.xlu0 %v8631_v19, %s5679_s3 }
 0x4aa   : > { %v8947_v32 = vpop.permute.xlu1 %4550 }
 0x4ab   : > { %10474 = vst [vmem:[#allocation178_spill] sm:$0xff] %v8947_v32  ;;  %v8949_v61 = vpop.permute.xlu0 %4564 }
 0x4ac   : > { %10475 = vst [vmem:[#allocation171_spill] sm:$0xff] %v8949_v61  ;;  %4876 = vrot.lane.b32.xlu1 %v8769_v44, %s5678_s30  ;;  %v10494_v61 = vld [vmem:[#allocation73_spill] sm:$0xff] }
 0x4ad   : > { %5008 = vrot.lane.b32.xlu0 %v8462_v8, %s5680_s4 }
 0x4ae   : > { %v8955_v53 = vpop.permute.xlu1 %4554 }
 0x4af   : > { %10476 = vst [vmem:[#allocation180_spill] sm:$0xff] %v8955_v53  ;;  %v8957_v14 = vpop.permute.xlu0 %4648  ;;  %v10521_v53 = vld [vmem:[#allocation56_spill] sm:$0xff] }
 0x4b0   : > { %4940 = vrot.lane.b32.xlu1 %v8601_v58, %s5679_s3  ;;  %v9139_v1 = vmul.f32 0.0010283801, %v10521_v53  ;;  %v10527_v53 = vld [vmem:[#allocation75_spill] sm:$0xff] }
 0x4b1   : > { %5016 = vrot.lane.b32.xlu0 %v8489_v17, %s5680_s4 }
 0x4b2   : > { %v8963_v47 = vpop.permute.xlu1 %4558 }
 0x4b3   : > { %10477 = vst [vmem:[#allocation173_spill] sm:$0xff] %v8963_v47  ;;  %v8965_v19 = vpop.permute.xlu0 %4652 }
 0x4b4   : > { %4946 = vrot.lane.b32.xlu1 %v8648_v18, %s5679_s3 }
 0x4b5   : > { %4870 = vrot.lane.b32.xlu0 %v8789_v36, %s5678_s30 }
 0x4b6   : > { %v8971_v8 = vpop.permute.xlu1 %4562 }
 0x4b7   : > { %10478 = vst [vmem:[#allocation175_spill] sm:$0xff] %v8971_v8  ;;  %v8973_v44 = vpop.permute.xlu0 %4656 }
 0x4b8   : > { %10479 = vst [vmem:[#allocation177_spill] sm:$0xff] %v8973_v44  ;;  %4954 = vrot.lane.b32.xlu1 %v8670_v27, %s5679_s3 }
 0x4b9   : > { %4934 = vrot.lane.b32.xlu0 %v8618_v2, %s5679_s3 }
 0x4ba   : > { %v8979_v17 = vpop.permute.xlu1 %4566 }
 0x4bb   : > { %10480 = vst [vmem:[#allocation179_spill] sm:$0xff] %v8979_v17  ;;  %v8981_v58 = vpop.permute.xlu0 %4660 }
 0x4bc   : > { %10481 = vst [vmem:[#allocation181_spill] sm:$0xff] %v8981_v58  ;;  %5010 = vrot.lane.b32.xlu1 %v8508_v38, %s5680_s4  ;;  %v9221_v58 = vmul.f32 0.0010283801, %v8366_v51 }
 0x4bd   : > { %4948 = vrot.lane.b32.xlu0 %v8621_v63, %s5679_s3 }
 0x4be   : > { %v8987_v36 = vpop.permute.xlu1 %4650 }
 0x4bf   : > { %10482 = vst [vmem:[#allocation182_spill] sm:$0xff] %v8987_v36  ;;  %v8989_v18 = vpop.permute.xlu0 %4664 }
 0x4c0   : > { %5018 = vrot.lane.b32.xlu1 %v8528_v16, %s5680_s4 }
 0x4c1   : > { %5012 = vrot.lane.b32.xlu0 %v8476_v46, %s5680_s4 }
 0x4c2   : > { %v8995_v27 = vpop.permute.xlu1 %4654 }
 0x4c3   : > { %10483 = vst [vmem:[#allocation183_spill] sm:$0xff] %v8995_v27  ;;  %v8997_v2 = vpop.permute.xlu0 %4668  ;;  %v10515_v27 = vld [vmem:[#allocation76_spill] sm:$0xff] }
 0x4c4   : > { %4878 = vrot.lane.b32.xlu1 %v8811_v35, %s5678_s30  ;;  %v10486_v35 = vld [vmem:[#allocation46_spill] sm:$0xff] }
 0x4c5   : > { %5024 = vrot.lane.b32.xlu0 %v8511_v57, %s5680_s4 }
 0x4c6   : > { %v9003_v38 = vpop.permute.xlu1 %4658 }
 0x4c7   : > { %10484 = vst [vmem:[#allocation184_spill] sm:$0xff] %v9003_v38  ;;  %v9005_v63 = vpop.permute.xlu0 %4672 }
 0x4c8   : > { %4942 = vrot.lane.b32.xlu1 %v8638_v55, %s5679_s3 }
 0x4c9   : > { %5032 = vrot.lane.b32.xlu0 %v8531_v33, %s5680_s4 }
 0x4ca   : > { %v9011_v46 = vpop.permute.xlu1 %4662 }
 0x4cb   : > { %v9013_v16 = vpop.permute.xlu0 %4676 }
 0x4cc   : > { %10485 = vst [vmem:[#allocation188_spill] sm:$0xff] %v9013_v16  ;;  %4956 = vrot.lane.b32.xlu1 %v8641_v30, %s5679_s3 }
 0x4cd   : > { %5088 = vrot.lane.b32.xlu0 %v10486_v35, %s5681_s5 }
 0x4ce   : > { %v9019_v57 = vpop.permute.xlu1 %4666 }
 0x4cf   : > { %10487 = vst [vmem:[#allocation116_spill] sm:$0xff] %v9019_v57  ;;  %v9021_v17 = vpop.permute.xlu0 %4768  ;;  %v9150_v57 = vmul.f32 0.0010283801, %v8341_v13  ;;  %v9169_v13 = vmul.f32 0.0010283801, %v8256_v42 }
 0x4d0   : > { %5020 = vrot.lane.b32.xlu1 %v8501_v10, %s5680_s4 }
 0x4d1   : > { %5096 = vrot.lane.b32.xlu0 %v8244_v50, %s5681_s5 }
 0x4d2   : > { %v9027_v55 = vpop.permute.xlu1 %4670 }
 0x4d3   : > { %10488 = vst [vmem:[#allocation186_spill] sm:$0xff] %v9027_v55  ;;  %v9029_v33 = vpop.permute.xlu0 %4776 }
 0x4d4   : > { %10489 = vst [vmem:[#allocation125_spill] sm:$0xff] %v9029_v33  ;;  %5026 = vrot.lane.b32.xlu1 %v8548_v41, %s5680_s4  ;;  %v10492_v41 = vld [vmem:[#allocation88_spill] sm:$0xff]  ;;  %v10542_v33 = vld [vmem:[#allocation89_spill] sm:$0xff] }
 0x4d5   : > { %4950 = vrot.lane.b32.xlu0 %v8658_v15, %s5679_s3 }
 0x4d6   : > { %v9035_v30 = vpop.permute.xlu1 %4674 }
 0x4d7   : > { %10490 = vst [vmem:[#allocation190_spill] sm:$0xff] %v9035_v30  ;;  %v9037_v35 = vpop.permute.xlu0 %4772 }
 0x4d8   : > { %5034 = vrot.lane.b32.xlu1 %v8568_v54, %s5680_s4  ;;  %v10495_v54 = vld [vmem:[#allocation60_spill] sm:$0xff] }
 0x4d9   : > { %5014 = vrot.lane.b32.xlu0 %v8518_v49, %s5680_s4 }
 0x4da   : > { %v9043_v50 = vpop.permute.xlu1 %4678 }
 0x4db   : > { %10491 = vst [vmem:[#allocation127_spill] sm:$0xff] %v9043_v50  ;;  %v9045_v10 = vpop.permute.xlu0 %4784  ;;  %v10498_v50 = vld [vmem:[#allocation98_spill] sm:$0xff] }
 0x4dc   : > { %5090 = vrot.lane.b32.xlu1 %v8296_v59, %s5681_s5  ;;  %v10499_v59 = vld [vmem:[#allocation69_spill] sm:$0xff] }
 0x4dd   : > { %5028 = vrot.lane.b32.xlu0 %v10492_v41, %s5680_s4 }
 0x4de   : > { %v9051_v15 = vpop.permute.xlu1 %4770 }
 0x4df   : > { %10493 = vst [vmem:[#allocation117_spill] sm:$0xff] %v9051_v15  ;;  %v9053_v21 = vpop.permute.xlu0 %4792 }
 0x4e0   : > { %5098 = vrot.lane.b32.xlu1 %v10494_v61, %s5681_s5  ;;  %v10503_v61 = vld [vmem:[#allocation68_spill] sm:$0xff] }
 0x4e1   : > { %5092 = vrot.lane.b32.xlu0 %v10495_v54, %s5681_s5  ;;  %v10504_v54 = vld [vmem:[#allocation52_spill] sm:$0xff] }
 0x4e2   : > { %v9059_v49 = vpop.permute.xlu1 %4778 }
 0x4e3   : > { %10496 = vst [vmem:[#allocation131_spill] sm:$0xff] %v9059_v49  ;;  %v9061_v8 = vpop.permute.xlu0 %4848  ;;  %v9076_v49 = vmul.f32 0.0010283801, %v10504_v54  ;;  %v10510_v54 = vld [vmem:[#allocation62_spill] sm:$0xff] }
 0x4e4   : > { %10497 = vst [vmem:[#allocation121_spill] sm:$0xff] %v9061_v8  ;;  %4958 = vrot.lane.b32.xlu1 %v10498_v50, %s5679_s3  ;;  %v10507_v50 = vld [vmem:[#allocation102_spill] sm:$0xff] }
 0x4e5   : > { %5104 = vrot.lane.b32.xlu0 %v10499_v59, %s5681_s5  ;;  %v10508_v59 = vld [vmem:[#allocation53_spill] sm:$0xff]  ;;  %v10559_v8 = vld [vmem:[#allocation90_spill] sm:$0xff] }
 0x4e6   : > { %v9067_v41 = vpop.permute.xlu1 %4780  ;;  %v9087_v36 = vmul.f32 0.0010283801, %v10508_v59  ;;  %v10513_v59 = vld [vmem:[#allocation105_spill] sm:$0xff] }
 0x4e7   : > { %10500 = vst [vmem:[#allocation135_spill] sm:$0xff] %v9067_v41  ;;  %v9069_v47 = vpop.permute.xlu0 %4856 }
 0x4e8   : > { %10501 = vst [vmem:[#allocation124_spill] sm:$0xff] %v9069_v47  ;;  %5022 = vrot.lane.b32.xlu1 %v10502_v62, %s5680_s4  ;;  %v10531_v47 = vld [vmem:[#allocation67_spill] sm:$0xff] }
 0x4e9   : > { %5112 = vrot.lane.b32.xlu0 %v10503_v61, %s5681_s5 }
 0x4ea   : > { %v9078_v38 = vpop.permute.xlu1 %4786 }
 0x4eb   : > { %10505 = vst [vmem:[#allocation137_spill] sm:$0xff] %v9078_v38  ;;  %v9080_v15 = vpop.permute.xlu0 %4774 }
 0x4ec   : > { %10506 = vst [vmem:[#allocation126_spill] sm:$0xff] %v9080_v15  ;;  %5036 = vrot.lane.b32.xlu1 %v10507_v50, %s5680_s4 }
 0x4ed   : > { %5188 = vrot.lane.b32.xlu0 %v9076_v49, %s5682_s6 }
 0x4ee   : > { %v9089_v62 = vpop.permute.xlu1 %4794 }
 0x4ef   : > { %10509 = vst [vmem:[#allocation141_spill] sm:$0xff] %v9089_v62  ;;  %v9091_v61 = vpop.permute.xlu0 %4788 }
 0x4f0   : > { %5100 = vrot.lane.b32.xlu1 %v10510_v54, %s5681_s5  ;;  %v10516_v54 = vld [vmem:[#allocation59_spill] sm:$0xff] }
 0x4f1   : > { %5196 = vrot.lane.b32.xlu0 %v9087_v36, %s5682_s6 }
 0x4f2   : > { %v9097_v15 = vpop.permute.xlu1 %4850 }
 0x4f3   : > { %10511 = vst [vmem:[#allocation130_spill] sm:$0xff] %v9097_v15  ;;  %v9099_v50 = vpop.permute.xlu0 %4852  ;;  %v9114_v15 = vmul.f32 0.0010283801, %v8279_v22 }
 0x4f4   : > { %5106 = vrot.lane.b32.xlu1 %v10512_v9, %s5681_s5  ;;  %v10517_v9 = vld [vmem:[#allocation61_spill] sm:$0xff] }
 0x4f5   : > { %5030 = vrot.lane.b32.xlu0 %v10513_v59, %s5680_s4  ;;  %v10518_v59 = vld [vmem:[#allocation54_spill] sm:$0xff] }
 0x4f6   : > { %v9105_v30 = vpop.permute.xlu1 %4858 }
 0x4f7   : > { %10514 = vst [vmem:[#allocation145_spill] sm:$0xff] %v9105_v30  ;;  %v9107_v62 = vpop.permute.xlu0 %4864  ;;  %v9125_v30 = vmul.f32 0.0010283801, %v10518_v59 }
 0x4f8   : > { %5114 = vrot.lane.b32.xlu1 %v10515_v27, %s5681_s5  ;;  %v9128_v27 = vmul.f32 0.0010283801, %v8337_v12  ;;  %v10524_v12 = vld [vmem:[#allocation109_spill] sm:$0xff] }
 0x4f9   : > { %5094 = vrot.lane.b32.xlu0 %v10516_v54, %s5681_s5 }
 0x4fa   : > { %v9116_v38 = vpop.permute.xlu1 %4782 }
 0x4fb   : > { %v9118_v55 = vpop.permute.xlu0 %4872 }
 0x4fc   : > { %5190 = vrot.lane.b32.xlu1 %v9114_v15, %s5682_s6 }
 0x4fd   : > { %5108 = vrot.lane.b32.xlu0 %v10517_v9, %s5681_s5 }
 0x4fe   : > { %v9130_v54 = vpop.permute.xlu1 %4796 }
 0x4ff   : > { %10519 = vst [vmem:[#allocation134_spill] sm:$0xff] %v9130_v54  ;;  %v9132_v22 = vpop.permute.xlu0 %4928 }
 0x500   : > { %10520 = vst [vmem:[#allocation149_spill] sm:$0xff] %v9132_v22  ;;  %5198 = vrot.lane.b32.xlu1 %v9128_v27, %s5682_s6  ;;  %v10539_v22 = vld [vmem:[#allocation74_spill] sm:$0xff] }
 0x501   : > { %5192 = vrot.lane.b32.xlu0 %v9125_v30, %s5682_s6  ;;  %v4746_v0 = vmul.f32 0.26601171, %v10539_v22 }
 0x502   : > { %v9141_v9 = vpop.permute.xlu1 %4860 }
 0x503   : > { %10522 = vst [vmem:[#allocation136_spill] sm:$0xff] %v9141_v9  ;;  %v9143_v59 = vpop.permute.xlu0 %4936 }
 0x504   : > { %10523 = vst [vmem:[#allocation44_spill] sm:$0xff] %v9143_v59  ;;  %5038 = vrot.lane.b32.xlu1 %v10524_v12, %s5680_s4  ;;  %v10530_v12 = vld [vmem:[#allocation80_spill] sm:$0xff] }
 0x505   : > { %5204 = vrot.lane.b32.xlu0 %v9139_v1, %s5682_s6  ;;  %v4624_v31 = vmul.f32 0.21300554, %v10530_v12 }
 0x506   : > { %v9152_v32 = vpop.permute.xlu1 %4866 }
 0x507   : > { %10525 = vst [vmem:[#allocation32_spill] sm:$0xff] %v9152_v32  ;;  %v9154_v29 = vpop.permute.xlu0 %4790 }
 0x508   : > { %10526 = vst [vmem:[#allocation152_spill] sm:$0xff] %v9154_v29  ;;  %5102 = vrot.lane.b32.xlu1 %v10527_v53, %s5681_s5 }
 0x509   : > { %5212 = vrot.lane.b32.xlu0 %v9150_v57, %s5682_s6 }
 0x50a   : > { %v9160_v59 = vpop.permute.xlu1 %4874 }
 0x50b   : > { %10528 = vst [vmem:[#allocation140_spill] sm:$0xff] %v9160_v59  ;;  %v9162_v9 = vpop.permute.xlu0 %4854  ;;  %v10533_v59 = vld [vmem:[#allocation104_spill] sm:$0xff] }
 0x50c   : > { %10529 = vst [vmem:[#allocation213_spill] sm:$0xff] %v9162_v9  ;;  %5116 = vrot.lane.b32.xlu1 %v10531_v47, %s5681_s5  ;;  %v9180_v9 = vmul.f32 0.0010283801, %v8308_v6  ;;  %v9183_v47 = vmul.f32 0.0010283801, %v8395_v52 }
 0x50d   : > { %4680 = vrot.lane.b32.xlu0 %v4624_v31, %s5676_s28 }
 0x50e   : > { %v9171_v29 = vpop.permute.xlu1 %4930 }
 0x50f   : > { %10532 = vst [vmem:[#allocation207_spill] sm:$0xff] %v9171_v29  ;;  %v9173_v53 = vpop.permute.xlu0 %4868  ;;  %v4238_v29 = vmul.f32 0.0010283801, %v8312_v60  ;;  %v4626_v60 = vmul.f32 0.21300554, %v10539_v22 }
 0x510   : > { %5200 = vrot.lane.b32.xlu1 %v9169_v13, %s5682_s6 }
 0x511   : > { %5110 = vrot.lane.b32.xlu0 %v10533_v59, %s5681_s5  ;;  %v9195_v59 = vmul.f32 0.0010283801, %v8448_v3 }
 0x512   : > { %v9185_v32 = vpop.permute.xlu1 %4938 }
 0x513   : > { %10534 = vst [vmem:[#allocation16_spill] sm:$0xff] %v9185_v32  ;;  %v9187_v42 = vpop.permute.xlu0 %4932  ;;  %v10537_v32 = vld [vmem:[#allocation96_spill] sm:$0xff] }
 0x514   : > { %5206 = vrot.lane.b32.xlu1 %v9183_v47, %s5682_s6  ;;  %v4625_v25 = vmul.f32 0.21300554, %v10537_v32  ;;  %v4745_v54 = vmul.f32 0.26601171, %v10537_v32 }
 0x515   : > { %5194 = vrot.lane.b32.xlu0 %v9180_v9, %s5682_s6 }
 0x516   : > { %v9197_v6 = vpop.permute.xlu1 %4798 }
 0x517   : > { %10535 = vst [vmem:[#allocation144_spill] sm:$0xff] %v9197_v6  ;;  %v9199_v41 = vpop.permute.xlu0 %4944 }
 0x518   : > { %5214 = vrot.lane.b32.xlu1 %v9195_v59, %s5682_s6 }
 0x519   : > { %5208 = vrot.lane.b32.xlu0 %v4238_v29, %s5682_s6 }
 0x51a   : > { %v9204_v52 = vpop.permute.xlu1 %4862 }
 0x51b   : > { %10536 = vst [vmem:[#allocation18_spill] sm:$0xff] %v9204_v52  ;;  %v9207_v11 = vpop.permute.xlu0 %4952 }
 0x51c   : > { %10538 = vst [vmem:[#allocation147_spill] sm:$0xff] %v9207_v11  ;;  %4682 = vrot.lane.b32.xlu1 %v4625_v25, %s5676_s28 }
 0x51d   : > { %4684 = vrot.lane.b32.xlu0 %v4626_v60, %s5676_s28 }
 0x51e   : > { %v9212_v3 = vpop.permute.xlu1 %4876 }
 0x51f   : > { %10540 = vst [vmem:[#allocation13_spill] sm:$0xff] %v9212_v3  ;;  %v9214_v6 = vpop.permute.xlu0 %5008 }
 0x520   : > { %10541 = vst [vmem:[#allocation11_spill] sm:$0xff] %v9214_v6  ;;  %5118 = vrot.lane.b32.xlu1 %v10542_v33, %s5681_s5  ;;  %v9235_v33 = vmul.f32 0.0010283801, %v8370_v24  ;;  %v9253_v24 = vmul.f32 0.0010283801, %v8425_v43 }
 0x521   : > { %4802 = vrot.lane.b32.xlu0 %v4745_v54, %s5677_s29 }
 0x522   : > { %v9226_v11 = vpop.permute.xlu1 %4940 }
 0x523   : > { %10544 = vst [vmem:[#allocation50_spill] sm:$0xff] %v9226_v11  ;;  %v9228_v52 = vpop.permute.xlu0 %5016  ;;  %v4744_v11 = vmul.f32 0.26601171, %v10530_v12 }
 0x524   : > { %10545 = vst [vmem:[#allocation15_spill] sm:$0xff] %v9228_v52  ;;  %5202 = vrot.lane.b32.xlu1 %v9221_v58, %s5682_s6 }
 0x525   : > { %5218 = vrot.lane.b32.xlu0 %v9224_v34, %s5682_s6 }
 0x526   : > { %v9237_v54 = vpop.permute.xlu1 %4946 }
 0x527   : > { %10546 = vst [vmem:[#allocation17_spill] sm:$0xff] %v9237_v54  ;;  %v9239_v51 = vpop.permute.xlu0 %4870 }
 0x528   : > { %10547 = vst [vmem:[#allocation14_spill] sm:$0xff] %v9239_v51  ;;  %5216 = vrot.lane.b32.xlu1 %v9235_v33, %s5682_s6 }
 0x529   : > { %4804 = vrot.lane.b32.xlu0 %v4746_v0, %s5677_s29 }
 0x52a   : > { %v9245_v52 = vpop.permute.xlu1 %4954 }
 0x52b   : > { %10548 = vst [vmem:[#allocation19_spill] sm:$0xff] %v9245_v52  ;;  %v9248_v6 = vpop.permute.xlu0 %4934  ;;  %v10552_v52 = vld [vmem:[#allocation95_spill] sm:$0xff] }
 0x52c   : > { %10549 = vst [vmem:[#allocation217_spill] sm:$0xff] %v9248_v6  ;;  %4800 = vrot.lane.b32.xlu1 %v4744_v11, %s5677_s29  ;;  %v4627_v54 = vmul.f32 0.21300554, %v10552_v52  ;;  %v10553_v11 = vld [vmem:[#allocation118_spill] sm:$0xff] }
 0x52d   : > { %4882 = vrot.lane.b32.xlu0 %v4625_v25, %s5678_s30 }
 0x52e   : > { %v9255_v34 = vpop.permute.xlu1 %5010 }
 0x52f   : > { %10550 = vst [vmem:[#allocation210_spill] sm:$0xff] %v9255_v34  ;;  %v4949_v51 = vpop.permute.xlu0 %4948  ;;  %v10556_v34 = vld [vmem:[#allocation10_spill] sm:$0xff] }
 0x530   : > { %5210 = vrot.lane.b32.xlu1 %v9253_v24, %s5682_s6 }
 0x531   : > { %4884 = vrot.lane.b32.xlu0 %v4626_v60, %s5678_s30 }
 0x532   : > { %v9260_v0 = vpop.permute.xlu1 %5018 }
 0x533   : > { %10551 = vst [vmem:[#allocation22_spill] sm:$0xff] %v9260_v0  ;;  %v9263_v6 = vpop.permute.xlu0 %5012  ;;  %v4747_v0 = vmul.f32 0.26601171, %v10552_v52 }
 0x534   : > { %4686 = vrot.lane.b32.xlu1 %v4627_v54, %s5676_s28 }
 0x535   : > { %4962 = vrot.lane.b32.xlu0 %v10553_v11, %s5679_s3 }
 0x536   : > { %v9268_v43 = vpop.permute.xlu1 %4878 }
 0x537   : > { %10554 = vst [vmem:[#allocation20_spill] sm:$0xff] %v9268_v43  ;;  %v9270_v25 = vpop.permute.xlu0 %5024 }
 0x538   : > { %10555 = vst [vmem:[#allocation191_spill] sm:$0xff] %v9270_v25  ;;  %4880 = vrot.lane.b32.xlu1 %v4624_v31, %s5678_s30  ;;  %v10562_v31 = vld [vmem:[#allocation4_spill] sm:$0xff] }
 0x539   : > { %4964 = vrot.lane.b32.xlu0 %v10556_v34, %s5679_s3  ;;  %v10563_v34 = vld [vmem:[#allocation3_spill] sm:$0xff] }
 0x53a   : > { %v9275_v60 = vpop.permute.xlu1 %4942 }
 0x53b   : > { %10557 = vst [vmem:[#allocation6_spill] sm:$0xff] %v9275_v60  ;;  %v9278_v3 = vpop.permute.xlu0 %5032  ;;  %v10564_v60 = vld [vmem:[#allocation115_spill] sm:$0xff] }
 0x53c   : > { %10558 = vst [vmem:[#allocation72_spill] sm:$0xff] %v9278_v3  ;;  %4806 = vrot.lane.b32.xlu1 %v4747_v0, %s5677_s29  ;;  %v4358_v16 = vadd.f32 %v10564_v60, %v4238_v29  ;;  %v10566_v0 = vld [vmem:[#allocation2_spill] sm:$0xff]  ;;  %v10569_v60 = vld [vmem:[#allocation103_spill] sm:$0xff] }
 0x53d   : > { %5042 = vrot.lane.b32.xlu0 %v10559_v8, %s5680_s4  ;;  %v4350_v48 = vadd.f32 %v10566_v0, %v9125_v30 }
 0x53e   : > { %v9283_v11 = vpop.permute.xlu1 %4956  ;;  %v4478_v8 = vadd.f32 %v8838_v20, %v4358_v16  ;;  %v10570_v16 = vld [vmem:[#allocation12_spill] sm:$0xff] }
 0x53f   : > { %10560 = vst [vmem:[#allocation63_spill] sm:$0xff] %v9283_v11  ;;  %v9285_v43 = vpop.permute.xlu0 %5088 }
 0x540   : > { %10561 = vst [vmem:[#allocation28_spill] sm:$0xff] %v9285_v43  ;;  %4960 = vrot.lane.b32.xlu1 %v10562_v31, %s5679_s3  ;;  %v10567_v43 = vld [vmem:[#allocation81_spill] sm:$0xff]  ;;  %v10568_v31 = vld [vmem:[#allocation143_spill] sm:$0xff] }
 0x541   : > { %5044 = vrot.lane.b32.xlu0 %v10563_v34, %s5680_s4  ;;  %v4470_v11 = vadd.f32 %v10568_v31, %v4350_v48  ;;  %v4598_v34 = vadd.f32 %v8917_v45, %v4478_v8  ;;  %v9317_v48 = vmul.f32 0.0010283801, %v10530_v12  ;;  %v10574_v8 = vld [vmem:[#allocation114_spill] sm:$0xff] }
 0x542   : > { %v9292_v44 = vpop.permute.xlu1 %5020  ;;  %v4354_v31 = vadd.f32 %v10574_v8, %v9169_v13  ;;  %v10577_v13 = vld [vmem:[#allocation128_spill] sm:$0xff] }
 0x543   : > { %v9294_v3 = vpop.permute.xlu0 %5096  ;;  %v4590_v30 = vadd.f32 %v8886_v5, %v4470_v11  ;;  %v4718_v20 = vadd.f32 %v8997_v2, %v4598_v34  ;;  %v10573_v2 = vld [vmem:[#allocation110_spill] sm:$0xff]  ;;  %v9329_v34 = vmul.f32 0.0010283801, %v10537_v32  ;;  %v4351_v32 = vadd.f32 %v10577_v13, %v9180_v9  ;;  %v10581_v9 = vld [vmem:[#allocation132_spill] sm:$0xff] }
 0x544   : > { %10565 = vst [vmem:[#allocation25_spill] sm:$0xff] %v9294_v3  ;;  %4886 = vrot.lane.b32.xlu1 %v4627_v54, %s5678_s30  ;;  %v4356_v3 = vadd.f32 %v10569_v60, %v9139_v1  ;;  %v10571_v54 = vld [vmem:[#allocation87_spill] sm:$0xff]  ;;  %v4352_v11 = vadd.f32 %v10573_v2, %v9087_v36  ;;  %v10576_v36 = vld [vmem:[#allocation122_spill] sm:$0xff] }
 0x545   : > { %5122 = vrot.lane.b32.xlu0 %v10567_v43, %s5681_s5  ;;  %v4710_v43 = vadd.f32 %v8965_v19, %v4590_v30  ;;  %v4838_v0 = vadd.f32 %v9091_v61, %v4718_v20  ;;  %v10572_v1 = vld [vmem:[#allocation111_spill] sm:$0xff]  ;;  %v4349_v30 = vadd.f32 %v10576_v36, %v9114_v15  ;;  %v10578_v20 = vld [vmem:[#allocation138_spill] sm:$0xff]  ;;  %v10588_v36 = vld [vmem:[#allocation148_spill] sm:$0xff] }
 0x546   : > { %v9304_v25 = vpop.permute.xlu1 %5026  ;;  %v4476_v45 = vadd.f32 %v8830_v23, %v4356_v3  ;;  %v4348_v5 = vadd.f32 %v10572_v1, %v9076_v49  ;;  %v10575_v23 = vld [vmem:[#allocation119_spill] sm:$0xff]  ;;  %v4472_v13 = vadd.f32 %v10588_v36, %v4352_v11  ;;  %v10605_v36 = vld [vmem:[#allocation149_spill] sm:$0xff] }
 0x547   : > { %v9306_v29 = vpop.permute.xlu0 %4950  ;;  %v4360_v19 = vadd.f32 %v10575_v23, %v9150_v57  ;;  %v4830_v49 = vadd.f32 %v9037_v35, %v4710_v43  ;;  %v4918_v3 = vadd.f32 %v9173_v53, %v4838_v0  ;;  %v10579_v57 = vld [vmem:[#allocation5_spill] sm:$0xff]  ;;  %v4353_v43 = vadd.f32 %v10581_v9, %v9128_v27  ;;  %v10583_v0 = vld [vmem:[#allocation139_spill] sm:$0xff]  ;;  %v10584_v27 = vld [vmem:[#allocation142_spill] sm:$0xff] }
 0x548   : > { %5040 = vrot.lane.b32.xlu1 %v10570_v16, %s5680_s4  ;;  %v4596_v61 = vadd.f32 %v8909_v39, %v4476_v45  ;;  %v4355_v16 = vadd.f32 %v10578_v20, %v9221_v58  ;;  %v10580_v39 = vld [vmem:[#allocation156_spill] sm:$0xff]  ;;  %v10582_v58 = vld [vmem:[#allocation123_spill] sm:$0xff]  ;;  %v4468_v1 = vadd.f32 %v10583_v0, %v4348_v5  ;;  %v9374_v5 = vmul.f32 0.0010283801, %v10552_v52  ;;  %v10593_v9 = vld [vmem:[#allocation154_spill] sm:$0xff] }
 0x549   : > { %5124 = vrot.lane.b32.xlu0 %v10571_v54, %s5681_s5  ;;  %v9347_v54 = vmul.f32 0.0010283801, %v10539_v22  ;;  %v4480_v35 = vadd.f32 %v10580_v39, %v4360_v19  ;;  %v4910_v15 = vadd.f32 %v9099_v50, %v4830_v49  ;;  %v4998_v45 = vadd.f32 %v4949_v51, %v4918_v3  ;;  %v10586_v3 = vld [vmem:[#allocation82_spill] sm:$0xff] }
 0x54a   : > { %v9331_v12 = vpop.permute.xlu1 %5034  ;;  %v4716_v53 = vadd.f32 %v8989_v18, %v4596_v61  ;;  %v4362_v22 = vadd.f32 %v10582_v58, %v9235_v33  ;;  %v4475_v2 = vadd.f32 %v8851_v4, %v4355_v16  ;;  %v4357_v61 = vadd.f32 %v10584_v27, %v9183_v47  ;;  %v10585_v33 = vld [vmem:[#allocation146_spill] sm:$0xff]  ;;  %v10600_v27 = vld [vmem:[#allocation161_spill] sm:$0xff] }
 0x54b   : > { %v9333_v60 = vpop.permute.xlu0 %5014  ;;  %v4600_v19 = vadd.f32 %v8925_v56, %v4480_v35  ;;  %v4990_v50 = vadd.f32 %v9187_v42, %v4910_v15  ;;  %v4359_v49 = vadd.f32 %v10585_v33, %v9253_v24  ;;  %v4588_v4 = vadd.f32 %v8878_v37, %v4468_v1  ;;  %v10587_v24 = vld [vmem:[#allocation150_spill] sm:$0xff] }
 0x54c   : > { %4966 = vrot.lane.b32.xlu1 %v10579_v57, %s5679_s3  ;;  %v4836_v18 = vadd.f32 %v9045_v10, %v4716_v53  ;;  %v4595_v56 = vadd.f32 %v8931_v26, %v4475_v2  ;;  %v4361_v52 = vadd.f32 %v10587_v24, %v9195_v59  ;;  %v4482_v37 = vadd.f32 %v8854_v28, %v4362_v22  ;;  %v10590_v59 = vld [vmem:[#allocation151_spill] sm:$0xff] }
 0x54d   : > { %5222 = vrot.lane.b32.xlu0 %v9329_v34, %s5682_s6  ;;  %v4720_v10 = vadd.f32 %v9005_v63, %v4600_v19  ;;  %v5070_v42 = vadd.f32 %v9263_v6, %v4990_v50  ;;  %v4708_v20 = vadd.f32 %v8957_v14, %v4588_v4  ;;  %v10589_v6 = vld [vmem:[#allocation159_spill] sm:$0xff]  ;;  %v4474_v53 = vadd.f32 %v10590_v59, %v4354_v31  ;;  %v10591_v14 = vld [vmem:[#allocation108_spill] sm:$0xff]  ;;  %v10595_v31 = vld [vmem:[#allocation177_spill] sm:$0xff] }
 0x54e   : > { %v9362_v8 = vpop.permute.xlu1 %5090  ;;  %v4916_v47 = vadd.f32 %v9107_v62, %v4836_v18  ;;  %v4715_v26 = vadd.f32 %v9011_v46, %v4595_v56  ;;  %v4469_v35 = vadd.f32 %v10589_v6, %v4349_v30  ;;  %v4592_v11 = vadd.f32 %v8893_v40, %v4472_v13  ;;  %v10594_v30 = vld [vmem:[#allocation172_spill] sm:$0xff] }
 0x54f   : > { %v5029_v23 = vpop.permute.xlu0 %5028  ;;  %v4840_v63 = vadd.f32 %v9053_v21, %v4720_v10  ;;  %v4602_v28 = vadd.f32 %v8934_v7, %v4482_v37  ;;  %v4828_v15 = vadd.f32 %v9021_v17, %v4708_v20  ;;  %v4471_v58 = vadd.f32 %v10593_v9, %v4351_v32  ;;  %v10596_v40 = vld [vmem:[#allocation188_spill] sm:$0xff]  ;;  %v10598_v17 = vld [vmem:[#allocation18_spill] sm:$0xff]  ;;  %v10601_v32 = vld [vmem:[#allocation163_spill] sm:$0xff] }
 0x550   : > { %v9367_v51 = vadd.f32 %v5029_v23, %v4998_v45  ;;  %5120 = vrot.lane.b32.xlu1 %v10586_v3, %s5681_s5  ;;  %v4996_v62 = vadd.f32 %v9199_v41, %v4916_v47  ;;  %v4835_v46 = vadd.f32 %v9116_v38, %v4715_v26  ;;  %v10592_v41 = vld [vmem:[#allocation191_spill] sm:$0xff]  ;;  %v4594_v22 = vadd.f32 %v10594_v30, %v4474_v53  ;;  %v10597_v23 = vld [vmem:[#allocation121_spill] sm:$0xff]  ;;  %v10606_v37 = vld [vmem:[#allocation6_spill] sm:$0xff] }
 0x551   : > { %5224 = vrot.lane.b32.xlu0 %v9347_v54, %s5682_s6  ;;  %v4920_v21 = vadd.f32 %v9118_v55, %v4840_v63  ;;  %v4712_v0 = vadd.f32 %v10595_v31, %v4592_v11  ;;  %v4722_v1 = vadd.f32 %v10596_v40, %v4602_v28  ;;  %v4908_v19 = vadd.f32 %v10597_v23, %v4828_v15  ;;  %v10599_v38 = vld [vmem:[#allocation147_spill] sm:$0xff]  ;;  %v10602_v3 = vld [vmem:[#allocation181_spill] sm:$0xff]  ;;  %v10608_v63 = vld [vmem:[#allocation166_spill] sm:$0xff] }
 0x552   : > { %v9390_v16 = vpop.permute.xlu1 %5098  ;;  %v5076_v45 = vadd.f32 %v10592_v41, %v4996_v62  ;;  %v4915_v18 = vadd.f32 %v10598_v17, %v4835_v46  ;;  %v4473_v33 = vadd.f32 %v10600_v27, %v4353_v43  ;;  %v4477_v4 = vadd.f32 %v10601_v32, %v4357_v61  ;;  %v10603_v10 = vld [vmem:[#allocation125_spill] sm:$0xff]  ;;  %v10609_v43 = vld [vmem:[#allocation176_spill] sm:$0xff]  ;;  %v10610_v61 = vld [vmem:[#allocation135_spill] sm:$0xff] }
 0x553   : > { %v5093_v57 = vpop.permute.xlu0 %5092  ;;  %v5000_v50 = vadd.f32 %v10599_v38, %v4920_v21  ;;  %v4714_v56 = vadd.f32 %v10602_v3, %v4594_v22  ;;  %v4832_v47 = vadd.f32 %v10603_v10, %v4712_v0  ;;  %v4988_v13 = vadd.f32 %v10605_v36, %v4908_v19  ;;  %v10611_v53 = vld [vmem:[#allocation124_spill] sm:$0xff]  ;;  %v10612_v15 = vld [vmem:[#allocation13_spill] sm:$0xff]  ;;  %v10613_v21 = vld [vmem:[#allocation11_spill] sm:$0xff] }
 0x554   : > { %v9395_v39 = vadd.f32 %v5093_v57, %v5070_v42  ;;  %5046 = vrot.lane.b32.xlu1 %v10591_v14, %s5680_s4  ;;  %v10604_v42 = vld [vmem:[#allocation134_spill] sm:$0xff]  ;;  %v4995_v20 = vadd.f32 %v10606_v37, %v4915_v18  ;;  %v10607_v57 = vld [vmem:[#allocation72_spill] sm:$0xff]  ;;  %v4479_v62 = vadd.f32 %v10608_v63, %v4359_v49  ;;  %v4597_v6 = vadd.f32 %v10609_v43, %v4477_v4  ;;  %v10615_v31 = vld [vmem:[#allocation165_spill] sm:$0xff] }
 0x555   : > { %v4842_v24 = vadd.f32 %v10604_v42, %v4722_v1  ;;  %v5080_v26 = vadd.f32 %v10607_v57, %v5000_v50  ;;  %v4834_v59 = vadd.f32 %v10610_v61, %v4714_v56  ;;  %v4912_v11 = vadd.f32 %v10611_v53, %v4832_v47  ;;  %v10614_v30 = vld [vmem:[#allocation168_spill] sm:$0xff]  ;;  %v10616_v0 = vld [vmem:[#allocation178_spill] sm:$0xff]  ;;  %v10618_v23 = vld [vmem:[#allocation97_spill] sm:$0xff] }
 0x556   : > { %v9411_v7 = vpop.permute.xlu1 %4958  ;;  %v5068_v41 = vadd.f32 %v10613_v21, %v4988_v13  ;;  %v4481_v22 = vadd.f32 %v10614_v30, %v4361_v52  ;;  %v4589_v49 = vadd.f32 %v10615_v31, %v4469_v35  ;;  %v4599_v40 = vadd.f32 %v10616_v0, %v4479_v62  ;;  %v10617_v1 = vld [vmem:[#allocation116_spill] sm:$0xff]  ;;  %v10621_v50 = vld [vmem:[#allocation63_spill] sm:$0xff]  ;;  %v10623_v3 = vld [vmem:[#allocation174_spill] sm:$0xff] }
 0x557   : > { %v5105_v2 = vpop.permute.xlu0 %5104  ;;  %v4922_v46 = vadd.f32 %v10612_v15, %v4842_v24  ;;  %v10619_v19 = vld [vmem:[#allocation136_spill] sm:$0xff]  ;;  %v4591_v56 = vadd.f32 %v10623_v3, %v4471_v58  ;;  %v10625_v35 = vld [vmem:[#allocation186_spill] sm:$0xff]  ;;  %v10626_v42 = vld [vmem:[#allocation137_spill] sm:$0xff] }
 0x558   : > { %v9416_v55 = vadd.f32 %v5105_v2, %v5076_v45  ;;  %5220 = vrot.lane.b32.xlu1 %v9317_v48, %s5682_s6  ;;  %v4717_v2 = vadd.f32 %v10617_v1, %v4597_v6  ;;  %v4914_v17 = vadd.f32 %v10619_v19, %v4834_v59  ;;  %v10620_v18 = vld [vmem:[#allocation44_spill] sm:$0xff]  ;;  %v4719_v47 = vadd.f32 %v10625_v35, %v4599_v40  ;;  %v10627_v37 = vld [vmem:[#allocation50_spill] sm:$0xff]  ;;  %v10628_v57 = vld [vmem:[#allocation15_spill] sm:$0xff] }
 0x559   : > { %v4992_v38 = vadd.f32 %v10620_v18, %v4912_v11  ;;  %v5002_v27 = vadd.f32 %v10621_v50, %v4922_v46  ;;  %v10622_v32 = vld [vmem:[#allocation28_spill] sm:$0xff]  ;;  %v10629_v43 = vld [vmem:[#allocation183_spill] sm:$0xff]  ;;  %v10630_v61 = vld [vmem:[#allocation190_spill] sm:$0xff] }
 0x55a   : > { %v5023_v28 = vpop.permute.xlu1 %5022  ;;  %v5148_v4 = vadd.f32 %v10622_v32, %v5068_v41  ;;  %v10624_v52 = vld [vmem:[#allocation180_spill] sm:$0xff]  ;;  %v4837_v24 = vadd.f32 %v10626_v42, %v4717_v2  ;;  %v4711_v6 = vadd.f32 %v10629_v43, %v4591_v56  ;;  %v10634_v46 = vld [vmem:[#allocation182_spill] sm:$0xff]  ;;  %v10635_v30 = vld [vmem:[#allocation25_spill] sm:$0xff] }
 0x55b   : > { %v5113_v14 = vpop.permute.xlu0 %5112  ;;  %v9434_v45 = vadd.f32 %v5023_v28, %v4995_v20  ;;  %v4601_v10 = vadd.f32 %v10624_v52, %v4481_v22  ;;  %v4994_v20 = vadd.f32 %v10627_v37, %v4914_v17  ;;  %v10631_v58 = vld [vmem:[#allocation32_spill] sm:$0xff]  ;;  %v4709_v21 = vadd.f32 %v10634_v46, %v4589_v49  ;;  %v10636_v31 = vld [vmem:[#allocation141_spill] sm:$0xff]  ;;  %v10637_v40 = vld [vmem:[#allocation126_spill] sm:$0xff] }
 0x55c   : > { %v9436_v9 = vadd.f32 %v5113_v14, %v5080_v26  ;;  %5126 = vrot.lane.b32.xlu1 %v10618_v23, %s5681_s5  ;;  %v5072_v26 = vadd.f32 %v10628_v57, %v4992_v38  ;;  %v4917_v53 = vadd.f32 %v10631_v58, %v4837_v24  ;;  %v10632_v11 = vld [vmem:[#allocation152_spill] sm:$0xff]  ;;  %v10633_v14 = vld [vmem:[#allocation167_spill] sm:$0xff]  ;;  %v4831_v1 = vadd.f32 %v10637_v40, %v4711_v6  ;;  %v10638_v2 = vld [vmem:[#allocation17_spill] sm:$0xff] }
 0x55d   : > { %v4721_v59 = vadd.f32 %v10630_v61, %v4601_v10  ;;  %v4839_v28 = vadd.f32 %v10632_v11, %v4719_v47  ;;  %v4593_v15 = vadd.f32 %v10633_v14, %v4473_v33  ;;  %v5074_v41 = vadd.f32 %v9292_v44, %v4994_v20  ;;  %v10639_v19 = vld [vmem:[#allocation14_spill] sm:$0xff]  ;;  %v10640_v50 = vld [vmem:[#allocation117_spill] sm:$0xff]  ;;  %v10645_v57 = vld [vmem:[#allocation19_spill] sm:$0xff] }
 0x55e   : > { %v5037_v36 = vpop.permute.xlu1 %5036  ;;  %v5152_v22 = vadd.f32 %v10635_v30, %v5072_v26  ;;  %v4997_v23 = vadd.f32 %v10638_v2, %v4917_v53  ;;  %v10642_v3 = vld [vmem:[#allocation213_spill] sm:$0xff]  ;;  %v10644_v37 = vld [vmem:[#allocation130_spill] sm:$0xff]  ;;  %v10649_v14 = vld [vmem:[#allocation131_spill] sm:$0xff] }
 0x55f   : > { %v5189_v13 = vpop.permute.xlu0 %5188  ;;  %v9454_v63 = vadd.f32 %v5037_v36, %v5002_v27  ;;  %v4841_v0 = vadd.f32 %v10636_v31, %v4721_v59  ;;  %v4919_v17 = vadd.f32 %v10639_v19, %v4839_v28  ;;  %v4829_v27 = vadd.f32 %v10640_v50, %v4709_v21  ;;  %v10643_v36 = vld [vmem:[#allocation184_spill] sm:$0xff]  ;;  %v10646_v61 = vld [vmem:[#allocation217_spill] sm:$0xff]  ;;  %v10647_v53 = vld [vmem:[#allocation58_spill] sm:$0xff] }
 0x560   : > { %v5248_v62 = vadd.f32 %v5189_v13, %v5148_v4  ;;  %5226 = vrot.lane.b32.xlu1 %v9374_v5, %s5682_s6  ;;  %v10641_v4 = vld [vmem:[#allocation140_spill] sm:$0xff]  ;;  %v4911_v56 = vadd.f32 %v10642_v3, %v4831_v1  ;;  %v5077_v52 = vadd.f32 %v9304_v25, %v4997_v23  ;;  %v4713_v13 = vadd.f32 %v10643_v36, %v4593_v15  ;;  %v10648_v11 = vld [vmem:[#allocation153_spill] sm:$0xff]  ;;  %v10650_v46 = vld [vmem:[#allocation207_spill] sm:$0xff] }
 0x561   : > { %v4921_v44 = vadd.f32 %v10641_v4, %v4841_v0  ;;  %v4999_v10 = vadd.f32 %v9306_v29, %v4919_v17  ;;  %v4909_v20 = vadd.f32 %v10644_v37, %v4829_v27  ;;  %v4363_v28 = vadd.f32 %v10648_v11, %v10647_v53  ;;  %v10651_v30 = vld [vmem:[#allocation162_spill] sm:$0xff]  ;;  %v10652_v40 = vld [vmem:[#allocation145_spill] sm:$0xff]  ;;  %v10655_v50 = vld [vmem:[#allocation16_spill] sm:$0xff] }
 0x562   : > { %v5101_v18 = vpop.permute.xlu1 %5100  ;;  %v5292_v33 = vmul.f32 2.0, %v5248_v62  ;;  %v5268_v47 = vmul.f32 %v5248_v62, %v5248_v62  ;;  %v4991_v59 = vadd.f32 %v10646_v61, %v4911_v56  ;;  %v10653_v2 = vld [vmem:[#allocation210_spill] sm:$0xff] }
 0x563   : > { %v5197_v38 = vpop.permute.xlu0 %5196  ;;  %v9471_v32 = vadd.f32 %v5101_v18, %v5074_v41  ;;  %v5001_v26 = vadd.f32 %v10645_v57, %v4921_v44  ;;  %v4989_v21 = vadd.f32 %v10650_v46, %v4909_v20  ;;  %v10654_v18 = vld [vmem:[#allocation173_spill] sm:$0xff]  ;;  %v10657_v44 = vld [vmem:[#allocation22_spill] sm:$0xff]  ;;  %v10659_v57 = vld [vmem:[#allocation20_spill] sm:$0xff] }
 0x564   : > { %v5252_v49 = vadd.f32 %v5197_v38, %v5152_v22  ;;  %v5071_v41 = vadd.f32 %v9333_v60, %v4991_v59  ;;  %v4483_v22 = vadd.f32 %v10651_v30, %v4363_v28  ;;  %v10656_v60 = vld [vmem:[#allocation127_spill] sm:$0xff] }
 0x565   : > { %v5081_v15 = vadd.f32 %v9331_v12, %v5001_v26  ;;  %v5069_v23 = vadd.f32 %v10653_v2, %v4989_v21 }
 0x566   : > { %v9477_v35 = vmul.f32 %v5292_v33, %v5252_v49  ;;  %v5276_v42 = vmul.f32 %v5252_v49, %v5252_v49  ;;  %v9479_v24 = vmul.f32 %v5252_v49, %v5248_v62  ;;  %v5107_v43 = vpop.permute.xlu1 %5106  ;;  %v4833_v62 = vadd.f32 %v10649_v14, %v4713_v13 }
 0x567   : > { %v5031_v6 = vpop.permute.xlu0 %5030  ;;  %v9485_v58 = vadd.f32 %v5107_v43, %v5077_v52  ;;  %v4603_v38 = vadd.f32 %v10654_v18, %v4483_v22  ;;  %v5149_v33 = vadd.f32 %v9362_v8, %v5069_v23 }
 0x568   : > { %v5079_v25 = vadd.f32 %v5031_v6, %v4999_v10  ;;  %v5316_v29 = vadd.f32 %v5276_v42, %v5268_v47  ;;  %v4913_v1 = vadd.f32 %v10652_v40, %v4833_v62  ;;  %v10658_v10 = vld [vmem:[#allocation144_spill] sm:$0xff] }
 0x569   : > { %v4723_v4 = vadd.f32 %v10656_v60, %v4603_v38 }
 0x56a   : > { %v5115_v31 = vpop.permute.xlu1 %5114  ;;  %v4993_v27 = vadd.f32 %v10655_v50, %v4913_v1  ;;  %v5320_v2 = vadd.f32 0.0001, %v5316_v29 }
 0x56b   : > { %v5095_v0 = vpop.permute.xlu0 %5094  ;;  %v5161_v19 = vadd.f32 %v5115_v31, %v5081_v15  ;;  %v4843_v36 = vadd.f32 %v10658_v10, %v4723_v4 }
 0x56c   : > { %v9496_v17 = vadd.f32 %v5095_v0, %v5071_v41  ;;  %v5073_v3 = vadd.f32 %v10657_v44, %v4993_v27 }
 0x56d   : > { %v4923_v26 = vadd.f32 %v10659_v57, %v4843_v36 }
 0x56e   : > { %v5191_v12 = vpop.permute.xlu1 %5190  ;;  %v5153_v13 = vadd.f32 %v9390_v16, %v5073_v3 }
 0x56f   : > { %v5109_v49 = vpop.permute.xlu0 %5108  ;;  %v5249_v56 = vadd.f32 %v5191_v12, %v5149_v33  ;;  %v5003_v61 = vadd.f32 %v9411_v7, %v4923_v26 }
 0x570   : > { %v5158_v52 = vadd.f32 %v5109_v49, %v9367_v51 }
 0x571   : > { %v5293_v43 = vmul.f32 2.0, %v5249_v56  ;;  %v5269_v53 = vmul.f32 %v5249_v56, %v5249_v56 }
 0x572   : > { %v5199_v37 = vpop.permute.xlu1 %5198 }
 0x573   : > { %v5193_v20 = vpop.permute.xlu0 %5192  ;;  %v5253_v6 = vadd.f32 %v5199_v37, %v5153_v13 }
 0x574   : > { %v5250_v8 = vadd.f32 %v5193_v20, %v9395_v39 }
 0x575   : > { %v9509_v59 = vmul.f32 %v5293_v43, %v5253_v6  ;;  %v5277_v11 = vmul.f32 %v5253_v6, %v5253_v6  ;;  %v9511_v14 = vmul.f32 %v5253_v6, %v5249_v56 }
 0x576   : > { %v5039_v28 = vpop.permute.xlu1 %5038  ;;  %v5294_v1 = vmul.f32 2.0, %v5250_v8 }
 0x577   : > { %v5205_v51 = vpop.permute.xlu0 %5204  ;;  %v5083_v62 = vadd.f32 %v5039_v28, %v5003_v61  ;;  %v5317_v46 = vadd.f32 %v5277_v11, %v5269_v53 }
 0x578   : > { %v5256_v16 = vadd.f32 %v5205_v51, %v9416_v55 }
 0x579   : > { %v5321_v13 = vadd.f32 0.0001, %v5317_v46 }
 0x57a   : > { %v5272_v21 = vsub.f32 %v5256_v16, %v5268_v47  ;;  %v5103_v15 = vpop.permute.xlu1 %5102 }
 0x57b   : > { %v5213_v41 = vpop.permute.xlu0 %5212  ;;  %v5155_v30 = vadd.f32 %v5103_v15, %v9434_v45  ;;  %v5270_v45 = vmul.f32 %v5250_v8, %v5250_v8 }
 0x57c   : > { %v5260_v39 = vadd.f32 %v5213_v41, %v9436_v9 }
 0x57e   : > { %v5280_v7 = vsub.f32 %v5260_v39, %v5276_v42  ;;  %v5117_v22 = vpop.permute.xlu1 %5116 }
 0x57f   : > { %v9516_v31 = vpop.permute.xlu0 %4680  ;;  %v5162_v0 = vadd.f32 %v5117_v22, %v9454_v63 }
 0x580   : > { %v5324_v40 = vadd.f32 %v5280_v7, %v5272_v21 }
 0x582   : > { %v5328_v23 = vadd.f32 0.0009, %v5324_v40  ;;  %v5201_v18 = vpop.permute.xlu1 %5200 }
 0x583   : > { %v5111_v55 = vpop.permute.xlu0 %5110  ;;  %v5254_v47 = vadd.f32 %v5201_v18, %v9471_v32 }
 0x584   : > { %v9520_v38 = vmul.f32 %v5328_v23, %v5320_v2  ;;  %v5159_v50 = vadd.f32 %v5111_v55, %v5079_v25 }
 0x585   : > { %v9522_v27 = vmul.f32 %v5294_v1, %v5254_v47  ;;  %v5278_v9 = vmul.f32 %v5254_v47, %v5254_v47  ;;  %v9524_v42 = vmul.f32 %v5254_v47, %v5250_v8 }
 0x586   : > { %v5207_v33 = vpop.permute.xlu1 %5206 }
 0x587   : > { %v5195_v12 = vpop.permute.xlu0 %5194  ;;  %v5257_v63 = vadd.f32 %v5207_v33, %v9485_v58  ;;  %v5318_v49 = vadd.f32 %v5278_v9, %v5270_v45 }
 0x588   : > { %v5251_v20 = vadd.f32 %v5195_v12, %v9496_v17 }
 0x589   : > { %v5273_v29 = vsub.f32 %v5257_v63, %v5269_v53  ;;  %v5322_v22 = vadd.f32 0.0001, %v5318_v49 }
 0x58a   : > { %v5215_v60 = vpop.permute.xlu1 %5214  ;;  %v5295_v58 = vmul.f32 2.0, %v5251_v20  ;;  %v5271_v28 = vmul.f32 %v5251_v20, %v5251_v20 }
 0x58b   : > { %v5209_v4 = vpop.permute.xlu0 %5208  ;;  %v5261_v44 = vadd.f32 %v5215_v60, %v5161_v19 }
 0x58c   : > { %v5258_v3 = vadd.f32 %v5209_v4, %v5158_v52 }
 0x58d   : > { %v5281_v32 = vsub.f32 %v5261_v44, %v5277_v11  ;;  %v10661_v44 = vld [vmem:[#allocation170_spill] sm:$0xff] }
 0x58e   : > { %v5274_v56 = vsub.f32 %v5258_v3, %v5270_v45  ;;  %v4683_v10 = vpop.permute.xlu1 %4682 }
 0x58f   : > { %v4685_v25 = vpop.permute.xlu0 %4684  ;;  %v5325_v36 = vadd.f32 %v5281_v32, %v5273_v29  ;;  %v10662_v32 = vld [vmem:[#allocation133_spill] sm:$0xff] }
 0x591   : > { %v5329_v37 = vadd.f32 0.0009, %v5325_v36 }
 0x592   : > { %v5119_v57 = vpop.permute.xlu1 %5118 }
 0x593   : > { %v4803_v26 = vpop.permute.xlu0 %4802  ;;  %v5333_v43 = vmul.f32 %v5329_v37, %v5321_v13  ;;  %v5163_v6 = vadd.f32 %v5119_v57, %v5083_v62 }
 0x595   : > { %5634 = vrcp.f32 %v5333_v43 }
 0x596   : > { %v5203_v8 = vpop.permute.xlu1 %5202 }
 0x597   : > { %v5219_v61 = vpop.permute.xlu0 %5218  ;;  %v5255_v53 = vadd.f32 %v5203_v8, %v5155_v30 }
 0x598   : > { %v5263_v19 = vadd.f32 %v5219_v61, %v5163_v6 }
 0x599   : > { %v9528_v52 = vmul.f32 %v5295_v58, %v5255_v53  ;;  %v5279_v11 = vmul.f32 %v5255_v53, %v5255_v53  ;;  %v9530_v51 = vmul.f32 %v5255_v53, %v5251_v20  ;;  %v10664_v20 = vld [vmem:[#allocation160_spill] sm:$0xff]  ;;  %v10665_v58 = vld [vmem:[#allocation171_spill] sm:$0xff] }
 0x59a   : > { %v5217_v16 = vpop.permute.xlu1 %5216 }
 0x59b   : > { %v4805_v46 = vpop.permute.xlu0 %4804  ;;  %v5262_v21 = vadd.f32 %v5217_v16, %v5162_v0  ;;  %v5319_v15 = vadd.f32 %v5279_v11, %v5271_v28  ;;  %v5283_v17 = vsub.f32 %v5263_v19, %v5279_v11  ;;  %v10666_v11 = vld [vmem:[#allocation129_spill] sm:$0xff] }
 0x59c   : > { %v4364_v16 = vadd.f32 %v10666_v11, %v9317_v48 }
 0x59d   : > { %v5282_v41 = vsub.f32 %v5262_v21, %v5278_v9  ;;  %v5323_v33 = vadd.f32 0.0001, %v5319_v15  ;;  %v10660_v9 = vld [vmem:[#allocation155_spill] sm:$0xff] }
 0x59e   : > { %v4801_v39 = vpop.permute.xlu1 %4800  ;;  %v4365_v60 = vadd.f32 %v10660_v9, %v9329_v34 }
 0x59f   : > { %v4883_v7 = vpop.permute.xlu0 %4882  ;;  %v5326_v62 = vadd.f32 %v5282_v41, %v5274_v56  ;;  %v10663_v56 = vld [vmem:[#allocation175_spill] sm:$0xff]  ;;  %v10667_v41 = vld [vmem:[#allocation158_spill] sm:$0xff] }
 0x5a0   : > { %v4485_v3 = vadd.f32 %v10661_v44, %v4365_v60 }
 0x5a1   : > { %v5330_v40 = vadd.f32 0.0009, %v5326_v62  ;;  %v4484_v62 = vadd.f32 %v10667_v41, %v4364_v16  ;;  %v5300_v16 = vadd.f32 0.0001, %v9477_v35 }
 0x5a2   : > { %v5211_v1 = vpop.permute.xlu1 %5210  ;;  %v4605_v36 = vadd.f32 %v10663_v56, %v4485_v3 }
 0x5a3   : > { %v4885_v30 = vpop.permute.xlu0 %4884  ;;  %v5334_v2 = vmul.f32 %v5330_v40, %v5322_v22  ;;  %v5259_v23 = vadd.f32 %v5211_v1, %v5159_v50  ;;  %v4366_v50 = vadd.f32 %v10662_v32, %v9347_v54  ;;  %v10671_v32 = vld [vmem:[#allocation179_spill] sm:$0xff] }
 0x5a4   : > { %v4725_v6 = vadd.f32 %v4683_v10, %v4605_v36  ;;  %v10668_v10 = vld [vmem:[#allocation169_spill] sm:$0xff] }
 0x5a5   : > { %v5275_v18 = vsub.f32 %v5259_v23, %v5271_v28  ;;  %v4486_v57 = vadd.f32 %v10664_v20, %v4366_v50  ;;  %v4604_v1 = vadd.f32 %v10668_v10, %v4484_v62  ;;  %5636 = vrcp.f32 %v5334_v2 }
 0x5a6   : > { %v4687_v55 = vpop.permute.xlu1 %4686  ;;  %v4845_v61 = vadd.f32 %v4803_v26, %v4725_v6  ;;  %5638 = vrcp.f32 %v9520_v38 }
 0x5a7   : > { %v4963_v47 = vpop.permute.xlu0 %4962  ;;  %v5327_v45 = vadd.f32 %v5283_v17, %v5275_v18  ;;  %v4606_v8 = vadd.f32 %v10665_v58, %v4486_v57  ;;  %v5635_v57 = vpop.eup %5634 }
 0x5a8   : > { %v4925_v19 = vadd.f32 %v4883_v7, %v4845_v61 }
 0x5a9   : > { %v5331_v12 = vadd.f32 0.0009, %v5327_v45  ;;  %v4726_v34 = vadd.f32 %v4685_v25, %v4606_v8  ;;  %v4724_v25 = vadd.f32 %v9516_v31, %v4604_v1  ;;  %v5301_v31 = vadd.f32 0.0001, %v9509_v59 }
 0x5aa   : > { %v4881_v63 = vpop.permute.xlu1 %4880  ;;  %v5005_v15 = vadd.f32 %v4963_v47, %v4925_v19 }
 0x5ab   : > { %v4965_v0 = vpop.permute.xlu0 %4964  ;;  %v9532_v29 = vmul.f32 %v5331_v12, %v5323_v33  ;;  %v4846_v21 = vadd.f32 %v4805_v46, %v4726_v34  ;;  %v10669_v46 = vld [vmem:[#allocation157_spill] sm:$0xff]  ;;  %v4844_v33 = vadd.f32 %v4801_v39, %v4724_v25 }
 0x5ac   : > { %v4367_v47 = vadd.f32 %v10669_v46, %v9374_v5 }
 0x5ad   : > { %v4926_v22 = vadd.f32 %v4885_v30, %v4846_v21  ;;  %v10670_v30 = vld [vmem:[#allocation164_spill] sm:$0xff]  ;;  %5640 = vrcp.f32 %v9532_v29 }
 0x5ae   : > { %v4807_v4 = vpop.permute.xlu1 %4806  ;;  %v4487_v9 = vadd.f32 %v10670_v30, %v4367_v47 }
 0x5af   : > { %v5043_v49 = vpop.permute.xlu0 %5042  ;;  %v5006_v23 = vadd.f32 %v4965_v0, %v4926_v22  ;;  %v4924_v0 = vadd.f32 %v4881_v63, %v4844_v33  ;;  %v5302_v63 = vadd.f32 0.0001, %v9522_v27 }
 0x5b0   : > { %v5085_v40 = vadd.f32 %v5043_v49, %v5005_v15  ;;  %v4607_v50 = vadd.f32 %v10671_v32, %v4487_v9 }
 0x5b2   : > { %v4961_v13 = vpop.permute.xlu1 %4960  ;;  %v4727_v39 = vadd.f32 %v4687_v55, %v4607_v50  ;;  %v5637_v38 = vpop.eup %5636 }
 0x5b3   : > { %v5045_v37 = vpop.permute.xlu0 %5044  ;;  %v5004_v2 = vadd.f32 %v4961_v13, %v4924_v0 }
 0x5b4   : > { %v5086_v7 = vadd.f32 %v5045_v37, %v5006_v23  ;;  %v4847_v6 = vadd.f32 %v4807_v4, %v4727_v39 }
 0x5b6   : > { %v4887_v53 = vpop.permute.xlu1 %4886 }
 0x5b7   : > { %v5123_v28 = vpop.permute.xlu0 %5122  ;;  %v4927_v13 = vadd.f32 %v4887_v53, %v4847_v6 }
 0x5b8   : > { %v5165_v26 = vadd.f32 %v5123_v28, %v5085_v40 }
 0x5ba   : > { %v5041_v54 = vpop.permute.xlu1 %5040 }
 0x5bb   : > { %v5125_v17 = vpop.permute.xlu0 %5124 }
 0x5bc   : > { %v5166_v12 = vadd.f32 %v5125_v17, %v5086_v7 }
 0x5be   : > { %v4967_v18 = vpop.permute.xlu1 %4966 }
 0x5bf   : > { %v5223_v45 = vpop.permute.xlu0 %5222 }
 0x5c0   : > { %v5265_v48 = vadd.f32 %v5223_v45, %v5165_v26 }
 0x5c2   : > { %v5289_v43 = vsub.f32 %v5265_v48, %v9511_v14  ;;  %v5121_v60 = vpop.permute.xlu1 %5120  ;;  %v5084_v14 = vadd.f32 %v5041_v54, %v5004_v2  ;;  %v5639_v54 = vpop.eup %5638 }
 0x5c3   : > { %v5225_v49 = vpop.permute.xlu0 %5224  ;;  %v5641_v35 = vpop.eup %5640 }
 0x5c4   : > { %v5305_v44 = vmul.f32 2.0, %v5289_v43  ;;  %v5266_v3 = vadd.f32 %v5225_v49, %v5166_v12  ;;  %v5164_v58 = vadd.f32 %v5121_v60, %v5084_v14 }
 0x5c6   : > { %v5309_v56 = vadd.f32 0.0009, %v5305_v44  ;;  %v5290_v36 = vsub.f32 %v5266_v3, %v9524_v42  ;;  %v5047_v5 = vpop.permute.xlu1 %5046  ;;  %v5007_v42 = vadd.f32 %v4967_v18, %v4927_v13 }
 0x5c8   : > { %v5313_v37 = vmul.f32 %v5309_v56, %v5301_v31  ;;  %v5306_v20 = vmul.f32 2.0, %v5290_v36  ;;  %v5087_v27 = vadd.f32 %v5047_v5, %v5007_v42 }
 0x5ca   : > { %v9556_v8 = vmul.f32 %v5635_v57, %v5313_v37  ;;  %v5310_v61 = vadd.f32 0.0009, %v5306_v20  ;;  %v5221_v59 = vpop.permute.xlu1 %5220 }
 0x5cb   : > { %v5264_v28 = vadd.f32 %v5221_v59, %v5164_v58 }
 0x5cc   : > { %v5314_v34 = vmul.f32 %v5310_v61, %v5302_v63  ;;  %5350 = vrot.lane.b32.xlu1 %v9556_v8, %s5666_s18 }
 0x5cd   : > { %v5288_v55 = vsub.f32 %v5264_v28, %v9479_v24  ;;  %v5303_v24 = vadd.f32 0.0001, %v9528_v52 }
 0x5ce   : > { %v5341_v19 = vmul.f32 %v5637_v38, %v5314_v34  ;;  %v5127_v11 = vpop.permute.xlu1 %5126 }
 0x5cf   : > { %v5304_v4 = vmul.f32 2.0, %v5288_v55  ;;  %v5167_v15 = vadd.f32 %v5127_v11, %v5087_v27 }
 0x5d1   : > { %v5308_v21 = vadd.f32 0.0009, %v5304_v4 }
 0x5d2   : > { %v5227_v53 = vpop.permute.xlu1 %5226 }
 0x5d3   : > { %v5312_v17 = vmul.f32 %v5308_v21, %v5300_v16  ;;  %v5267_v41 = vadd.f32 %v5227_v53, %v5167_v15 }
 0x5d5   : > { %v5337_v62 = vmul.f32 %v5639_v54, %v5312_v17  ;;  %v5291_v22 = vsub.f32 %v5267_v41, %v9530_v51 }
 0x5d7   : > { %v5307_v40 = vmul.f32 2.0, %v5291_v22  ;;  %5348 = vrot.lane.b32.xlu0 %v5337_v62, %s5666_s18  ;;  %5364 = vrot.lane.b32.xlu1 %v5337_v62, %s5667_s19 }
 0x5d9   : > { %v5311_v29 = vadd.f32 0.0009, %v5307_v40 }
 0x5db   : > { %v5315_v10 = vmul.f32 %v5311_v29, %v5303_v24  ;;  %5352 = vrot.lane.b32.xlu0 %v5341_v19, %s5666_s18 }
 0x5dd   : > { %v5343_v1 = vmul.f32 %v5641_v35, %v5315_v10 }
 0x5df   : > { %5354 = vrot.lane.b32.xlu1 %v5343_v1, %s5666_s18  ;;  %5366 = vrot.lane.b32.xlu0 %v9556_v8, %s5667_s19 }
 0x5e3   : > { %5380 = vrot.lane.b32.xlu1 %v5337_v62, %s5668_s20  ;;  %5368 = vrot.lane.b32.xlu0 %v5341_v19, %s5667_s19 }
 0x5e7   : > { %5370 = vrot.lane.b32.xlu1 %v5343_v1, %s5667_s19  ;;  %5382 = vrot.lane.b32.xlu0 %v9556_v8, %s5668_s20 }
 0x5eb   : > { %5396 = vrot.lane.b32.xlu1 %v5337_v62, %s5669_s21  ;;  %5384 = vrot.lane.b32.xlu0 %v5341_v19, %s5668_s20 }
 0x5ef   : > { %5386 = vrot.lane.b32.xlu1 %v5343_v1, %s5668_s20  ;;  %5398 = vrot.lane.b32.xlu0 %v9556_v8, %s5669_s21 }
 0x5f3   : > { %5412 = vrot.lane.b32.xlu1 %v5337_v62, %s5670_s22  ;;  %5400 = vrot.lane.b32.xlu0 %v5341_v19, %s5669_s21 }
 0x5f7   : > { %5402 = vrot.lane.b32.xlu1 %v5343_v1, %s5669_s21  ;;  %5414 = vrot.lane.b32.xlu0 %v9556_v8, %s5670_s22 }
 0x5fb   : > { %5418 = vrot.lane.b32.xlu1 %v5343_v1, %s5670_s22  ;;  %5416 = vrot.lane.b32.xlu0 %v5341_v19, %s5670_s22 }
 0x63e   : > { %v5351_v52 = vpop.permute.xlu1 %5350 }
 0x63f   : > { %v5361_v9 = vadd.f32 %v5351_v52, %v9556_v8 }
 0x649   : > { %v5349_v51 = vpop.permute.xlu0 %5348  ;;  %v5365_v23 = vpop.permute.xlu1 %5364 }
 0x64a   : > { %v5360_v30 = vadd.f32 %v5349_v51, %v5337_v62 }
 0x64c   : > { %v5376_v60 = vadd.f32 %v5365_v23, %v5360_v30 }
 0x64d   : > { %v5353_v26 = vpop.permute.xlu0 %5352 }
 0x64e   : > { %v5362_v3 = vadd.f32 %v5353_v26, %v5341_v19 }
 0x651   : > { %v5355_v18 = vpop.permute.xlu1 %5354  ;;  %v5367_v45 = vpop.permute.xlu0 %5366 }
 0x652   : > { %v5377_v49 = vadd.f32 %v5367_v45, %v5361_v9  ;;  %v5363_v32 = vadd.f32 %v5355_v18, %v5343_v1 }
 0x655   : > { %v5381_v25 = vpop.permute.xlu1 %5380  ;;  %v5369_v7 = vpop.permute.xlu0 %5368 }
 0x656   : > { %v5392_v50 = vadd.f32 %v5381_v25, %v5376_v60  ;;  %v5378_v2 = vadd.f32 %v5369_v7, %v5362_v3 }
 0x659   : > { %v5371_v48 = vpop.permute.xlu1 %5370  ;;  %v5383_v46 = vpop.permute.xlu0 %5382 }
 0x65a   : > { %v5393_v31 = vadd.f32 %v5383_v46, %v5377_v49  ;;  %v5379_v56 = vadd.f32 %v5371_v48, %v5363_v32 }
 0x65d   : > { %v5397_v47 = vpop.permute.xlu1 %5396  ;;  %v5385_v33 = vpop.permute.xlu0 %5384 }
 0x65e   : > { %v5408_v36 = vadd.f32 %v5397_v47, %v5392_v50  ;;  %v5394_v37 = vadd.f32 %v5385_v33, %v5378_v2 }
 0x661   : > { %v5387_v12 = vpop.permute.xlu1 %5386  ;;  %v5399_v43 = vpop.permute.xlu0 %5398 }
 0x662   : > { %v5409_v5 = vadd.f32 %v5399_v43, %v5393_v31  ;;  %v5395_v20 = vadd.f32 %v5387_v12, %v5379_v56 }
 0x665   : > { %v5413_v0 = vpop.permute.xlu1 %5412  ;;  %v5401_v44 = vpop.permute.xlu0 %5400 }
 0x666   : > { %v5424_v57 = vadd.f32 %v5413_v0, %v5408_v36  ;;  %v5410_v6 = vadd.f32 %v5401_v44, %v5394_v37 }
 0x668   : > { %v5429_v13 = vsel %vm5428_vm10, %v5424_v57, 0.0 }
 0x669   : > { %v5403_v39 = vpop.permute.xlu1 %5402  ;;  %v5415_v14 = vpop.permute.xlu0 %5414 }
 0x66a   : > { %v5425_v63 = vadd.f32 %v5415_v14, %v5409_v5  ;;  %v5411_v58 = vadd.f32 %v5403_v39, %v5395_v20 }
 0x66c   : > { %v5430_v8 = vsel %vm5428_vm10, %v5425_v63, 0.0 }
 0x66d   : > { %v5419_v61 = vpop.permute.xlu1 %5418  ;;  %v5417_v59 = vpop.permute.xlu0 %5416  ;;  %v5431_v38 = vadd.f32 %v5430_v8, %v5429_v13 }
 0x66e   : > { %v5427_v28 = vadd.f32 %v5419_v61, %v5411_v58  ;;  %v5426_v34 = vadd.f32 %v5417_v59, %v5410_v6 }
 0x670   : > { %v5432_v42 = vsel %vm5428_vm10, %v5426_v34, 0.0  ;;  %v5434_v19 = vsel %vm5428_vm10, %v5427_v28, 0.0 }
 0x671   : > { %v5433_v55 = vadd.f32 %v5432_v42, %v5431_v38 }
 0x673   : > { %v5435_v11 = vadd.f32 %v5434_v19, %v5433_v55 }
 0x675   : > { %v5436_v27 = vsel %vm5428_vm10, %v5435_v11, 0.0 }
 0x676   : > { %5437 = vadd.xlane.f32.xlu0 %v5436_v27 }
 0x6ff   : > { %v5438_v4 = vpop.xlane.xlu0 %5437 }
 0x700   : > { %v5439_v16 = vrot.slane %v5438_v4, 4 }
 0x702   : > { %v5440_v21 = vadd.f32 %v5439_v16, %v5438_v4 }
 0x704   : > { %v5441_v15 = vrot.slane %v5440_v21, 2 }
 0x706   : > { %v5442_v53 = vadd.f32 %v5441_v15, %v5440_v21 }
 0x708   : > { %v5443_v54 = vrot.slane %v5442_v53, 1 }
 0x70a   : > { %v5444_v17 = vadd.f32 %v5443_v54, %v5442_v53 }
 0x70c   : > { %5543 = vpush %v5444_v17 }
 0x73d   : > { %s5544_s13 = spop %5543 }
 0x73e   : > { %v5446_v41 = vstv %s5544_s13 }
 0x73f   : > { %5447 = vst [vmem:[%s161_s12] sm:$0xff] %v5446_v41 }
 0x740 PF: > { %s12_s9 = sadd.s32 1, %s5664_s9  }
 0x741   : > { %p9_p4 = scmp.ge.s32.totalorder %s12_s9, 4  }
 0x743   :  { %11 = sbr.rel (!%p9_p4) target bundleno = 1 (0x1), region = 61 }

</bundles_post_ra>
